<compile_context>
chip_gen: v7x
topology: tpu7x:2x2x1
jax: 0.10.0
libtpu: 0.0.40
codegen_flags: <defaults>
</compile_context>

<pallas_src>
import functools
import math

import jax
import jax.numpy as jnp
from jax.experimental import pallas as pl
from jax.experimental.pallas import tpu as pltpu


_VMEM_LIMIT = 32 * 1024 * 1024  # explicit scoped-VMEM limit, safe on v5e/v6e/v7x


def _round_up(x, m):
    return (x + m - 1) // m * m


# ----------------------------------------------------------------------------
# Fused 3x3 conv kernel (no im2col materialization)
# ----------------------------------------------------------------------------
def _conv3x3_kernel(x_ref, w_ref, b_ref, o_ref, *, taps, kc, hout, wout,
                    activation):
    """One batch image: accumulate shifted-window taps as MXU matmuls.

    x_ref: (1, Hk, Wk, kc)         padded (and s2d'd for stride 2) input, bf16
    w_ref: (len(taps)*kc, Cout)    tap-major weights, bf16
    b_ref: (1, Cout)               f32
    o_ref: (1, hout*wout, Cout)    token-layout output
    """
    acc = None
    for t, (ro, co) in enumerate(taps):
        patch = x_ref[0, pl.ds(ro, hout), pl.ds(co, wout), :]
        patch = patch.reshape(hout * wout, kc).astype(jnp.bfloat16)
        wk = w_ref[pl.ds(t * kc, kc), :].astype(jnp.bfloat16)
        d = jnp.dot(patch, wk, preferred_element_type=jnp.float32)
        acc = d if acc is None else acc + d
    acc = acc + b_ref[...]                        # f32 elementwise (v5e-safe)
    if activation == "relu":
        acc = jnp.maximum(acc, 0.0)
    o_ref[0] = acc.astype(o_ref.dtype)


def _regroup_stride2_weight(w, cin):
    """(9*Cin, Cout) tap-major (dy*3+dx) -> (16*Cin, Cout) grouped for the
    space-to-depth formulation: 4 spatial taps x (2x2 parity x Cin) rows."""
    cout = w.shape[1]
    w9 = w.reshape(3, 3, cin, cout)
    zero = jnp.zeros((cin, cout), w.dtype)
    blocks = []
    for ro in range(2):
        for co in range(2):
            for py in range(2):
                for px in range(2):
                    dy, dx = 2 * ro + py, 2 * co + px
                    blocks.append(w9[dy, dx] if (dy < 3 and dx < 3) else zero)
    return jnp.concatenate(blocks, axis=0)


def conv3x3(x, w, b, *, stride, activation=None, out_dtype=jnp.bfloat16):
    """3x3 conv, padding=1.  x: (B,H,W,Cin) -> (B, H//stride, W//stride, Cout).

    The 3x3 patch gather is fused into the GEMM kernel: every tap is a
    contiguous VMEM read + MXU matmul accumulated in f32 (stride 2 uses a
    space-to-depth layout built once in the wrapper - ~1x input bytes instead
    of the 9x im2col materialization).
    """
    B, H, W, cin = x.shape
    cout = w.shape[1]
    hout, wout = H // stride, W // stride
    xp = jnp.pad(x, ((0, 0), (1, 1), (1, 1), (0, 0)))
    if stride == 2:
        assert H % 2 == 0 and W % 2 == 0
        hp, wp = H + 2, W + 2
        xp = xp.reshape(B, hp // 2, 2, wp // 2, 2, cin)
        xp = xp.transpose(0, 1, 3, 2, 4, 5).reshape(B, hp // 2, wp // 2, 4 * cin)
        w = _regroup_stride2_weight(w, cin)
        taps = ((0, 0), (0, 1), (1, 0), (1, 1))
        kc = 4 * cin
    elif stride == 1:
        taps = tuple((dy, dx) for dy in range(3) for dx in range(3))
        kc = cin
    else:
        raise ValueError(f"unsupported stride {stride}")

    kernel = functools.partial(_conv3x3_kernel, taps=taps, kc=kc,
                               hout=hout, wout=wout, activation=activation)
    out = pl.pallas_call(
        kernel,
        out_shape=jax.ShapeDtypeStruct((B, hout * wout, cout), out_dtype),
        grid=(B,),
        in_specs=[
            pl.BlockSpec((1,) + xp.shape[1:], lambda i: (i, 0, 0, 0)),
            pl.BlockSpec(w.shape, lambda i: (0, 0)),
            pl.BlockSpec((1, cout), lambda i: (0, 0)),
        ],
        out_specs=pl.BlockSpec((1, hout * wout, cout), lambda i: (i, 0, 0)),
        compiler_params=pltpu.CompilerParams(
            dimension_semantics=("parallel",),
            vmem_limit_bytes=_VMEM_LIMIT),
    )(xp, w, b.reshape(1, cout))
    # free row-major reshape back to spatial layout
    return out.reshape(B, hout, wout, cout)


# ----------------------------------------------------------------------------
# Generic GEMM + bias (+ ReLU) kernel
# ----------------------------------------------------------------------------
def _matmul_bias_kernel(a_ref, w_ref, b_ref, o_ref, *, activation):
    acc = jnp.dot(a_ref[...].astype(jnp.bfloat16),
                  w_ref[...].astype(jnp.bfloat16),
                  preferred_element_type=jnp.float32)
    acc = acc + b_ref[...]
    if activation == "relu":
        acc = jnp.maximum(acc, 0.0)
    o_ref[...] = acc.astype(o_ref.dtype)


def matmul_bias(a, w, b, activation=None, out_dtype=jnp.bfloat16):
    """(M,K) @ (K,N) + bias[N], optional ReLU.  bf16 MXU operands / f32 acc.

    cdiv grid over M with a VMEM-budget-derived row tile (no tm=M fallback);
    lane-dense N (padded to a 128 multiple and sliced back only if needed).
    """
    M, K = a.shape
    N = w.shape[1]
    n_pad = (-N) % 128
    if n_pad:
        w = jnp.pad(w, ((0, 0), (0, n_pad)))
        b = jnp.pad(b, (0, n_pad))
    Np = N + n_pad

    budget = 8 * 1024 * 1024  # conservative; double-buffered blocks + weights
    tm = 512
    def _bytes(t):
        return 2 * (t * K * 2 + t * Np * 4) + K * Np * 2
    while tm > 8 and _bytes(tm) > budget:
        tm //= 2
    tm = min(tm, _round_up(M, 8))
    Mp = _round_up(M, tm)
    if Mp != M:
        a = jnp.pad(a, ((0, Mp - M), (0, 0)))

    kernel = functools.partial(_matmul_bias_kernel, activation=activation)
    out = pl.pallas_call(
        kernel,
        out_shape=jax.ShapeDtypeStruct((Mp, Np), out_dtype),
        grid=(Mp // tm,),
        in_specs=[
            pl.BlockSpec((tm, K), lambda i: (i, 0)),
            pl.BlockSpec((K, Np), lambda i: (0, 0)),
            pl.BlockSpec((1, Np), lambda i: (0, 0)),
        ],
        out_specs=pl.BlockSpec((tm, Np), lambda i: (i, 0)),
        compiler_params=pltpu.CompilerParams(
            dimension_semantics=("parallel",),
            vmem_limit_bytes=_VMEM_LIMIT),
    )(a, w, b.reshape(1, Np))
    if Mp != M or n_pad:
        out = out[:M, :N]
    return out


# ----------------------------------------------------------------------------
# Fused residual MHSA block: whole batch in ONE launch
# ----------------------------------------------------------------------------
def _mhsa_kernel(t_ref, wqkv_ref, bqkv_ref, wo_ref, bo_ref, o_ref, *, heads):
    xb = t_ref[...].astype(jnp.bfloat16)          # (B, T, C)
    B, T, C = xb.shape
    D = C // heads
    scale = 1.0 / math.sqrt(D)

    # QKV projection: one (B*T, C) @ (C, 3C) GEMM (batch folded into rows).
    x2 = xb.reshape(B * T, C)
    qkv = jnp.dot(x2, wqkv_ref[...].astype(jnp.bfloat16),
                  preferred_element_type=jnp.float32) + bqkv_ref[...]
    qkv = qkv.reshape(B, T, 3 * C)
    q, k, v = qkv[..., :C], qkv[..., C:2 * C], qkv[..., 2 * C:]

    outs = []
    for h in range(heads):                        # static unroll, in-kernel
        sl = slice(h * D, (h + 1) * D)
        qh = q[..., sl].astype(jnp.bfloat16)      # (B, T, D)
        kh = k[..., sl].astype(jnp.bfloat16)
        vh = v[..., sl].astype(jnp.bfloat16)
        s = jnp.einsum('bqd,bkd->bqk', qh, kh,
                       preferred_element_type=jnp.float32) * scale
        m = jnp.max(s, axis=-1, keepdims=True)
        p = jnp.exp(s - m)                        # f32 elementwise (v5e-safe)
        p = p * pl.reciprocal(jnp.sum(p, axis=-1, keepdims=True), approx=True)
        outs.append(jnp.einsum('bqk,bkd->bqd', p.astype(jnp.bfloat16), vh,
                               preferred_element_type=jnp.float32))
    attn = jnp.concatenate(outs, axis=-1)         # (B, T, C) f32

    y = jnp.dot(attn.reshape(B * T, C).astype(jnp.bfloat16),
                wo_ref[...].astype(jnp.bfloat16),
                preferred_element_type=jnp.float32) + bo_ref[...]
    y = y.reshape(B, T, C) + xb.astype(jnp.float32)   # residual in f32
    o_ref[...] = y.astype(o_ref.dtype)


def mhsa(tokens, p, heads):
    """tokens: (B, T, C) bf16 -> (B, T, C) bf16; whole batch, one kernel."""
    B, T, C = tokens.shape
    return pl.pallas_call(
        functools.partial(_mhsa_kernel, heads=heads),
        out_shape=jax.ShapeDtypeStruct((B, T, C), jnp.bfloat16),
        grid=(1,),
        in_specs=[
            pl.BlockSpec((B, T, C), lambda i: (0, 0, 0)),
            pl.BlockSpec((C, 3 * C), lambda i: (0, 0)),
            pl.BlockSpec((1, 3 * C), lambda i: (0, 0)),
            pl.BlockSpec((C, C), lambda i: (0, 0)),
            pl.BlockSpec((1, C), lambda i: (0, 0)),
        ],
        out_specs=pl.BlockSpec((B, T, C), lambda i: (0, 0, 0)),
        compiler_params=pltpu.CompilerParams(
            dimension_semantics=("arbitrary",),
            vmem_limit_bytes=_VMEM_LIMIT),
    )(tokens, p["wqkv"], p["bqkv"].reshape(1, -1),
      p["wo"], p["bo"].reshape(1, -1))


# ----------------------------------------------------------------------------
# Fused mu/logvar projection + reparametrization
# ----------------------------------------------------------------------------
def _vae_head_kernel(flat_ref, w_ref, b_ref, eps_ref, o_ref, *, latent):
    """Output lanes (128, lane-dense single store):
    [0:L)=mu, [L:2L)=logvar, [2L:3L)=z, [3L:4L)=0."""
    x = flat_ref[...].astype(jnp.bfloat16)
    h = jnp.dot(x, w_ref[...].astype(jnp.bfloat16),
                preferred_element_type=jnp.float32) + b_ref[...]      # (B, 2L)
    mu = h[:, :latent]
    logvar = h[:, latent:]
    z = mu + eps_ref[...] * jnp.exp(0.5 * logvar)                     # f32
    o_ref[...] = jnp.concatenate([mu, logvar, z, jnp.zeros_like(mu)], axis=-1)


def vae_head(flat, w, b, eps, latent):
    B, F = flat.shape
    out = pl.pallas_call(
        functools.partial(_vae_head_kernel, latent=latent),
        out_shape=jax.ShapeDtypeStruct((B, 4 * latent), jnp.float32),
        grid=(1,),
        in_specs=[
            pl.BlockSpec((B, F), lambda i: (0, 0)),
            pl.BlockSpec((F, 2 * latent), lambda i: (0, 0)),
            pl.BlockSpec((1, 2 * latent), lambda i: (0, 0)),
            pl.BlockSpec((B, latent), lambda i: (0, 0)),
        ],
        out_specs=pl.BlockSpec((B, 4 * latent), lambda i: (0, 0)),
        compiler_params=pltpu.CompilerParams(
            dimension_semantics=("arbitrary",),
            vmem_limit_bytes=_VMEM_LIMIT),
    )(flat, w, b.reshape(1, -1), eps)
    return out[:, :latent], out[:, latent:2 * latent], out[:, 2 * latent:3 * latent]


# ----------------------------------------------------------------------------
# Glue (pure layout / data movement; all matmul compute stays in Pallas)
# ----------------------------------------------------------------------------
def upsample2x(x):
    # nearest-neighbor 2x upsample (pure data movement)
    # TODO(synk): fold into the following conv kernel's input DMA/index math.
    return jnp.repeat(jnp.repeat(x, 2, axis=1), 2, axis=2)


# ----------------------------------------------------------------------------
# Model
# ----------------------------------------------------------------------------
def init_params(key, in_ch, ch1, ch2, latent, spatial_out):
    keys = jax.random.split(key, 16)
    ki = iter(keys)

    def w(shape, scale=0.05):
        return (scale * jax.random.normal(next(ki), shape, jnp.float32)).astype(
            jnp.bfloat16)

    def zeros(n):
        return jnp.zeros((n,), jnp.float32)

    def attn_params(C):
        return {"wqkv": w((C, 3 * C)), "bqkv": zeros(3 * C),
                "wo": w((C, C)), "bo": zeros(C)}

    flat_dim = spatial_out * spatial_out * ch2
    return {
        # encoder (conv weights are tap-major (dy*3+dx)*Cin + c rows)
        "enc_w1": w((9 * in_ch, ch1)), "enc_b1": zeros(ch1),
        "enc_w2": w((9 * ch1, ch2)), "enc_b2": zeros(ch2),
        "enc_attn": attn_params(ch2),
        "enc_whead": w((flat_dim, 2 * latent)), "enc_bhead": zeros(2 * latent),
        # decoder
        "dec_wfc": w((latent, flat_dim)), "dec_bfc": zeros(flat_dim),
        "dec_attn": attn_params(ch2),
        "dec_w1": w((9 * ch2, ch1)), "dec_b1": zeros(ch1),
        "dec_w2": w((9 * ch1, in_ch)), "dec_b2": zeros(in_ch),
    }


def encoder_forward(p, x_nhwc, heads, latent, eps):
    h = conv3x3(x_nhwc, p["enc_w1"], p["enc_b1"], stride=2, activation="relu")
    h = conv3x3(h, p["enc_w2"], p["enc_b2"], stride=2, activation="relu")
    B, Hs, Ws, C = h.shape
    tokens = mhsa(h.reshape(B, Hs * Ws, C), p["enc_attn"], heads)
    flat = tokens.reshape(B, Hs * Ws * C)          # free row-major reshape
    mu, logvar, z = vae_head(flat, p["enc_whead"], p["enc_bhead"], eps, latent)
    return mu, logvar, z


def decoder_forward(p, z, heads, spatial, ch):
    B = z.shape[0]
    h = matmul_bias(z, p["dec_wfc"], p["dec_bfc"], activation="relu",
                    out_dtype=jnp.bfloat16)
    tokens = mhsa(h.reshape(B, spatial * spatial, ch), p["dec_attn"], heads)
    g = tokens.reshape(B, spatial, spatial, ch)
    g = upsample2x(g)
    g = conv3x3(g, p["dec_w1"], p["dec_b1"], stride=1, activation="relu")
    g = upsample2x(g)
    g = conv3x3(g, p["dec_w2"], p["dec_b2"], stride=1, activation=None,
                out_dtype=jnp.float32)
    return g


def vae_forward(params, x_nchw, eps_key, *, heads, latent_dim,
                bottleneck_spatial, ch2):
    # interface is NCHW (PyTorch convention); compute in NHWC (channels->lanes),
    # bf16 activations (MXU-native), f32 accumulation / statistics.
    x = jnp.transpose(x_nchw, (0, 2, 3, 1)).astype(jnp.bfloat16)
    B = x.shape[0]
    eps = jax.random.normal(eps_key, (B, latent_dim), dtype=jnp.float32)
    mu, logvar, z = encoder_forward(params, x, heads, latent_dim, eps)
    x_rec = decoder_forward(params, z, heads, bottleneck_spatial, ch2)
    return jnp.transpose(x_rec, (0, 3, 1, 2)), mu, logvar


# ----------------------------------------------------------------------------
if __name__ == "__main__":
    latent_dim = 32
    downsample_factor = 4        # -> int(log2(4)) = 2 stride-2 convs
    num_heads = 4
    in_ch, ch1, ch2 = 3, 16, 32
    B, H, W = 2, 16, 16
    bottleneck_spatial = H // downsample_factor   # 4

    key = jax.random.PRNGKey(0)
    pkey, xkey, ekey = jax.random.split(key, 3)

    params = init_params(pkey, in_ch, ch1, ch2, latent_dim, bottleneck_spatial)
    x = jax.random.normal(xkey, (B, in_ch, H, W), dtype=jnp.float32)  # NCHW

    fwd = jax.jit(functools.partial(
        vae_forward, heads=num_heads, latent_dim=latent_dim,
        bottleneck_spatial=bottleneck_spatial, ch2=ch2))
    x_rec, mu, logvar = fwd(params, x, ekey)
    jax.block_until_ready((x_rec, mu, logvar))

    assert x_rec.shape == x.shape, x_rec.shape
    assert mu.shape == (B, latent_dim) and logvar.shape == (B, latent_dim)
    assert bool(jnp.all(jnp.isfinite(x_rec)))
    assert bool(jnp.all(jnp.isfinite(mu))) and bool(jnp.all(jnp.isfinite(logvar)))
    print("KERNEL_OK")
</pallas_src>

<mosaic_0001>
module attributes {stable_mosaic.version = 11 : i64} {
  func.func @_conv3x3_kernel(%arg0: i32, %arg1: memref<1x9x9x12xbf16, #tpu.memory_space<vmem>>, %arg2: memref<48x16xbf16, #tpu.memory_space<vmem>>, %arg3: memref<1x16xf32, #tpu.memory_space<vmem>>, %arg4: memref<1x64x16xbf16, #tpu.memory_space<vmem>>) attributes {dimension_semantics = [#tpu.dimension_semantics<parallel>], iteration_bounds = array<i64: 2>, scalar_prefetch = 0 : i64, scratch_operands = 0 : i64, tpu.core_type = #tpu.core_type<tc>, window_params = [{transform_indices = @transform_0, window_bounds = array<i64: 1, 9, 9, 12>}, {pipeline_mode = #tpu.pipeline_mode<synchronous>, transform_indices = @transform_1, window_bounds = array<i64: 48, 16>}, {pipeline_mode = #tpu.pipeline_mode<synchronous>, transform_indices = @transform_2, window_bounds = array<i64: 1, 16>}, {transform_indices = @transform_3, window_bounds = array<i64: 1, 64, 16>}]} {
    %c0 = arith.constant 0 : index
    %c0_0 = arith.constant 0 : index
    %c0_1 = arith.constant 0 : index
    %c0_2 = arith.constant 0 : index
    %0 = vector.load %arg1[%c0, %c0_0, %c0_1, %c0_2] : memref<1x9x9x12xbf16, #tpu.memory_space<vmem>>, vector<1x8x8x12xbf16>
    %1 = vector.shape_cast %0 : vector<1x8x8x12xbf16> to vector<8x8x12xbf16>
    %2 = vector.shape_cast %1 : vector<8x8x12xbf16> to vector<64x12xbf16>
    %c0_3 = arith.constant 0 : index
    %c0_4 = arith.constant 0 : index
    %3 = vector.load %arg2[%c0_3, %c0_4] : memref<48x16xbf16, #tpu.memory_space<vmem>>, vector<12x16xbf16>
    %cst = arith.constant dense<0.000000e+00> : vector<64x16xf32>
    %4 = tpu.matmul %2, %3, %cst {dimension_numbers = #tpu.dot_dimension_numbers<[1], [0], [0], [1], [0, 0, 1, 1], [], []>} : vector<64x12xbf16>, vector<12x16xbf16>, vector<64x16xf32> -> vector<64x16xf32>
    %c0_5 = arith.constant 0 : index
    %c0_6 = arith.constant 0 : index
    %c1 = arith.constant 1 : index
    %c0_7 = arith.constant 0 : index
    %5 = vector.load %arg1[%c0_5, %c0_6, %c1, %c0_7] : memref<1x9x9x12xbf16, #tpu.memory_space<vmem>>, vector<1x8x8x12xbf16>
    %6 = vector.shape_cast %5 : vector<1x8x8x12xbf16> to vector<8x8x12xbf16>
    %7 = vector.shape_cast %6 : vector<8x8x12xbf16> to vector<64x12xbf16>
    %c12 = arith.constant 12 : index
    %c0_8 = arith.constant 0 : index
    %8 = vector.load %arg2[%c12, %c0_8] : memref<48x16xbf16, #tpu.memory_space<vmem>>, vector<12x16xbf16>
    %cst_9 = arith.constant dense<0.000000e+00> : vector<64x16xf32>
    %9 = tpu.matmul %7, %8, %cst_9 {dimension_numbers = #tpu.dot_dimension_numbers<[1], [0], [0], [1], [0, 0, 1, 1], [], []>} : vector<64x12xbf16>, vector<12x16xbf16>, vector<64x16xf32> -> vector<64x16xf32>
    %10 = arith.addf %4, %9 : vector<64x16xf32>
    %c0_10 = arith.constant 0 : index
    %c1_11 = arith.constant 1 : index
    %c0_12 = arith.constant 0 : index
    %c0_13 = arith.constant 0 : index
    %11 = vector.load %arg1[%c0_10, %c1_11, %c0_12, %c0_13] : memref<1x9x9x12xbf16, #tpu.memory_space<vmem>>, vector<1x8x8x12xbf16>
    %12 = vector.shape_cast %11 : vector<1x8x8x12xbf16> to vector<8x8x12xbf16>
    %13 = vector.shape_cast %12 : vector<8x8x12xbf16> to vector<64x12xbf16>
    %c24 = arith.constant 24 : index
    %c0_14 = arith.constant 0 : index
    %14 = vector.load %arg2[%c24, %c0_14] : memref<48x16xbf16, #tpu.memory_space<vmem>>, vector<12x16xbf16>
    %cst_15 = arith.constant dense<0.000000e+00> : vector<64x16xf32>
    %15 = tpu.matmul %13, %14, %cst_15 {dimension_numbers = #tpu.dot_dimension_numbers<[1], [0], [0], [1], [0, 0, 1, 1], [], []>} : vector<64x12xbf16>, vector<12x16xbf16>, vector<64x16xf32> -> vector<64x16xf32>
    %16 = arith.addf %10, %15 : vector<64x16xf32>
    %c0_16 = arith.constant 0 : index
    %c1_17 = arith.constant 1 : index
    %c1_18 = arith.constant 1 : index
    %c0_19 = arith.constant 0 : index
    %17 = vector.load %arg1[%c0_16, %c1_17, %c1_18, %c0_19] : memref<1x9x9x12xbf16, #tpu.memory_space<vmem>>, vector<1x8x8x12xbf16>
    %18 = vector.shape_cast %17 : vector<1x8x8x12xbf16> to vector<8x8x12xbf16>
    %19 = vector.shape_cast %18 : vector<8x8x12xbf16> to vector<64x12xbf16>
    %c36 = arith.constant 36 : index
    %c0_20 = arith.constant 0 : index
    %20 = vector.load %arg2[%c36, %c0_20] : memref<48x16xbf16, #tpu.memory_space<vmem>>, vector<12x16xbf16>
    %cst_21 = arith.constant dense<0.000000e+00> : vector<64x16xf32>
    %21 = tpu.matmul %19, %20, %cst_21 {dimension_numbers = #tpu.dot_dimension_numbers<[1], [0], [0], [1], [0, 0, 1, 1], [], []>} : vector<64x12xbf16>, vector<12x16xbf16>, vector<64x16xf32> -> vector<64x16xf32>
    %22 = arith.addf %16, %21 : vector<64x16xf32>
    %c0_22 = arith.constant 0 : index
    %c0_23 = arith.constant 0 : index
    %23 = vector.load %arg3[%c0_22, %c0_23] : memref<1x16xf32, #tpu.memory_space<vmem>>, vector<1x16xf32>
    %24 = vector.broadcast %23 : vector<1x16xf32> to vector<64x16xf32>
    %25 = arith.addf %22, %24 : vector<64x16xf32>
    %cst_24 = arith.constant 0.000000e+00 : f32
    %26 = vector.broadcast %cst_24 : f32 to vector<64x16xf32>
    %27 = arith.maximumf %25, %26 : vector<64x16xf32>
    %28 = arith.truncf %27 : vector<64x16xf32> to vector<64x16xbf16>
    %c0_25 = arith.constant 0 : index
    %c0_26 = arith.constant 0 : index
    %c0_27 = arith.constant 0 : index
    %29 = vector.load %arg4[%c0_25, %c0_26, %c0_27] : memref<1x64x16xbf16, #tpu.memory_space<vmem>>, vector<1x64x16xbf16>
    %30 = vector.shape_cast %29 : vector<1x64x16xbf16> to vector<64x16xbf16>
    %31 = vector.shape_cast %28 : vector<64x16xbf16> to vector<1x64x16xbf16>
    tpu.vector_store %arg4[%c0_25, %c0_26, %c0_27], %31 {strides = array<i32>} : memref<1x64x16xbf16, #tpu.memory_space<vmem>>, vector<1x64x16xbf16>,
    return
  }
  func.func @transform_0(%arg0: i32) -> (i32, i32, i32, i32) {
    %c0_i32 = arith.constant 0 : i32
    %c0_i32_0 = arith.constant 0 : i32
    %c0_i32_1 = arith.constant 0 : i32
    %c0_i32_2 = arith.constant 0 : i32
    return %arg0, %c0_i32, %c0_i32_0, %c0_i32_1 : i32, i32, i32, i32
  }
  func.func @transform_1(%arg0: i32) -> (i32, i32) {
    %c0_i32 = arith.constant 0 : i32
    %c0_i32_0 = arith.constant 0 : i32
    %c0_i32_1 = arith.constant 0 : i32
    return %c0_i32, %c0_i32_0 : i32, i32
  }
  func.func @transform_2(%arg0: i32) -> (i32, i32) {
    %c0_i32 = arith.constant 0 : i32
    %c0_i32_0 = arith.constant 0 : i32
    %c0_i32_1 = arith.constant 0 : i32
    return %c0_i32, %c0_i32_0 : i32, i32
  }
  func.func @transform_3(%arg0: i32) -> (i32, i32, i32) {
    %c0_i32 = arith.constant 0 : i32
    %c0_i32_0 = arith.constant 0 : i32
    %c0_i32_1 = arith.constant 0 : i32
    return %arg0, %c0_i32, %c0_i32_0 : i32, i32, i32
  }
}

module attributes {stable_mosaic.version = 11 : i64} {
  func.func @_conv3x3_kernel(%arg0: i32, %arg1: memref<1x5x5x64xbf16, #tpu.memory_space<vmem>>, %arg2: memref<256x32xbf16, #tpu.memory_space<vmem>>, %arg3: memref<1x32xf32, #tpu.memory_space<vmem>>, %arg4: memref<1x16x32xbf16, #tpu.memory_space<vmem>>) attributes {dimension_semantics = [#tpu.dimension_semantics<parallel>], iteration_bounds = array<i64: 2>, scalar_prefetch = 0 : i64, scratch_operands = 0 : i64, tpu.core_type = #tpu.core_type<tc>, window_params = [{transform_indices = @transform_0, window_bounds = array<i64: 1, 5, 5, 64>}, {pipeline_mode = #tpu.pipeline_mode<synchronous>, transform_indices = @transform_1, window_bounds = array<i64: 256, 32>}, {pipeline_mode = #tpu.pipeline_mode<synchronous>, transform_indices = @transform_2, window_bounds = array<i64: 1, 32>}, {transform_indices = @transform_3, window_bounds = array<i64: 1, 16, 32>}]} {
    %c0 = arith.constant 0 : index
    %c0_0 = arith.constant 0 : index
    %c0_1 = arith.constant 0 : index
    %c0_2 = arith.constant 0 : index
    %0 = vector.load %arg1[%c0, %c0_0, %c0_1, %c0_2] : memref<1x5x5x64xbf16, #tpu.memory_space<vmem>>, vector<1x4x4x64xbf16>
    %1 = vector.shape_cast %0 : vector<1x4x4x64xbf16> to vector<4x4x64xbf16>
    %2 = vector.shape_cast %1 : vector<4x4x64xbf16> to vector<16x64xbf16>
    %c0_3 = arith.constant 0 : index
    %c0_4 = arith.constant 0 : index
    %3 = vector.load %arg2[%c0_3, %c0_4] : memref<256x32xbf16, #tpu.memory_space<vmem>>, vector<64x32xbf16>
    %cst = arith.constant dense<0.000000e+00> : vector<16x32xf32>
    %4 = tpu.matmul %2, %3, %cst {dimension_numbers = #tpu.dot_dimension_numbers<[1], [0], [0], [1], [0, 0, 1, 1], [], []>} : vector<16x64xbf16>, vector<64x32xbf16>, vector<16x32xf32> -> vector<16x32xf32>
    %c0_5 = arith.constant 0 : index
    %c0_6 = arith.constant 0 : index
    %c1 = arith.constant 1 : index
    %c0_7 = arith.constant 0 : index
    %5 = vector.load %arg1[%c0_5, %c0_6, %c1, %c0_7] : memref<1x5x5x64xbf16, #tpu.memory_space<vmem>>, vector<1x4x4x64xbf16>
    %6 = vector.shape_cast %5 : vector<1x4x4x64xbf16> to vector<4x4x64xbf16>
    %7 = vector.shape_cast %6 : vector<4x4x64xbf16> to vector<16x64xbf16>
    %c64 = arith.constant 64 : index
    %c0_8 = arith.constant 0 : index
    %8 = vector.load %arg2[%c64, %c0_8] : memref<256x32xbf16, #tpu.memory_space<vmem>>, vector<64x32xbf16>
    %cst_9 = arith.constant dense<0.000000e+00> : vector<16x32xf32>
    %9 = tpu.matmul %7, %8, %cst_9 {dimension_numbers = #tpu.dot_dimension_numbers<[1], [0], [0], [1], [0, 0, 1, 1], [], []>} : vector<16x64xbf16>, vector<64x32xbf16>, vector<16x32xf32> -> vector<16x32xf32>
    %10 = arith.addf %4, %9 : vector<16x32xf32>
    %c0_10 = arith.constant 0 : index
    %c1_11 = arith.constant 1 : index
    %c0_12 = arith.constant 0 : index
    %c0_13 = arith.constant 0 : index
    %11 = vector.load %arg1[%c0_10, %c1_11, %c0_12, %c0_13] : memref<1x5x5x64xbf16, #tpu.memory_space<vmem>>, vector<1x4x4x64xbf16>
    %12 = vector.shape_cast %11 : vector<1x4x4x64xbf16> to vector<4x4x64xbf16>
    %13 = vector.shape_cast %12 : vector<4x4x64xbf16> to vector<16x64xbf16>
    %c128 = arith.constant 128 : index
    %c0_14 = arith.constant 0 : index
    %14 = vector.load %arg2[%c128, %c0_14] : memref<256x32xbf16, #tpu.memory_space<vmem>>, vector<64x32xbf16>
    %cst_15 = arith.constant dense<0.000000e+00> : vector<16x32xf32>
    %15 = tpu.matmul %13, %14, %cst_15 {dimension_numbers = #tpu.dot_dimension_numbers<[1], [0], [0], [1], [0, 0, 1, 1], [], []>} : vector<16x64xbf16>, vector<64x32xbf16>, vector<16x32xf32> -> vector<16x32xf32>
    %16 = arith.addf %10, %15 : vector<16x32xf32>
    %c0_16 = arith.constant 0 : index
    %c1_17 = arith.constant 1 : index
    %c1_18 = arith.constant 1 : index
    %c0_19 = arith.constant 0 : index
    %17 = vector.load %arg1[%c0_16, %c1_17, %c1_18, %c0_19] : memref<1x5x5x64xbf16, #tpu.memory_space<vmem>>, vector<1x4x4x64xbf16>
    %18 = vector.shape_cast %17 : vector<1x4x4x64xbf16> to vector<4x4x64xbf16>
    %19 = vector.shape_cast %18 : vector<4x4x64xbf16> to vector<16x64xbf16>
    %c192 = arith.constant 192 : index
    %c0_20 = arith.constant 0 : index
    %20 = vector.load %arg2[%c192, %c0_20] : memref<256x32xbf16, #tpu.memory_space<vmem>>, vector<64x32xbf16>
    %cst_21 = arith.constant dense<0.000000e+00> : vector<16x32xf32>
    %21 = tpu.matmul %19, %20, %cst_21 {dimension_numbers = #tpu.dot_dimension_numbers<[1], [0], [0], [1], [0, 0, 1, 1], [], []>} : vector<16x64xbf16>, vector<64x32xbf16>, vector<16x32xf32> -> vector<16x32xf32>
    %22 = arith.addf %16, %21 : vector<16x32xf32>
    %c0_22 = arith.constant 0 : index
    %c0_23 = arith.constant 0 : index
    %23 = vector.load %arg3[%c0_22, %c0_23] : memref<1x32xf32, #tpu.memory_space<vmem>>, vector<1x32xf32>
    %24 = vector.broadcast %23 : vector<1x32xf32> to vector<16x32xf32>
    %25 = arith.addf %22, %24 : vector<16x32xf32>
    %cst_24 = arith.constant 0.000000e+00 : f32
    %26 = vector.broadcast %cst_24 : f32 to vector<16x32xf32>
    %27 = arith.maximumf %25, %26 : vector<16x32xf32>
    %28 = arith.truncf %27 : vector<16x32xf32> to vector<16x32xbf16>
    %c0_25 = arith.constant 0 : index
    %c0_26 = arith.constant 0 : index
    %c0_27 = arith.constant 0 : index
    %29 = vector.load %arg4[%c0_25, %c0_26, %c0_27] : memref<1x16x32xbf16, #tpu.memory_space<vmem>>, vector<1x16x32xbf16>
    %30 = vector.shape_cast %29 : vector<1x16x32xbf16> to vector<16x32xbf16>
    %31 = vector.shape_cast %28 : vector<16x32xbf16> to vector<1x16x32xbf16>
    tpu.vector_store %arg4[%c0_25, %c0_26, %c0_27], %31 {strides = array<i32>} : memref<1x16x32xbf16, #tpu.memory_space<vmem>>, vector<1x16x32xbf16>,
    return
  }
  func.func @transform_0(%arg0: i32) -> (i32, i32, i32, i32) {
    %c0_i32 = arith.constant 0 : i32
    %c0_i32_0 = arith.constant 0 : i32
    %c0_i32_1 = arith.constant 0 : i32
    %c0_i32_2 = arith.constant 0 : i32
    return %arg0, %c0_i32, %c0_i32_0, %c0_i32_1 : i32, i32, i32, i32
  }
  func.func @transform_1(%arg0: i32) -> (i32, i32) {
    %c0_i32 = arith.constant 0 : i32
    %c0_i32_0 = arith.constant 0 : i32
    %c0_i32_1 = arith.constant 0 : i32
    return %c0_i32, %c0_i32_0 : i32, i32
  }
  func.func @transform_2(%arg0: i32) -> (i32, i32) {
    %c0_i32 = arith.constant 0 : i32
    %c0_i32_0 = arith.constant 0 : i32
    %c0_i32_1 = arith.constant 0 : i32
    return %c0_i32, %c0_i32_0 : i32, i32
  }
  func.func @transform_3(%arg0: i32) -> (i32, i32, i32) {
    %c0_i32 = arith.constant 0 : i32
    %c0_i32_0 = arith.constant 0 : i32
    %c0_i32_1 = arith.constant 0 : i32
    return %arg0, %c0_i32, %c0_i32_0 : i32, i32, i32
  }
}

module attributes {stable_mosaic.version = 11 : i64} {
  func.func @_mhsa_kernel(%arg0: i32, %arg1: memref<2x16x32xbf16, #tpu.memory_space<vmem>>, %arg2: memref<32x96xbf16, #tpu.memory_space<vmem>>, %arg3: memref<1x96xf32, #tpu.memory_space<vmem>>, %arg4: memref<32x32xbf16, #tpu.memory_space<vmem>>, %arg5: memref<1x32xf32, #tpu.memory_space<vmem>>, %arg6: memref<2x16x32xbf16, #tpu.memory_space<vmem>>) attributes {dimension_semantics = [#tpu.dimension_semantics<arbitrary>], iteration_bounds = array<i64: 1>, scalar_prefetch = 0 : i64, scratch_operands = 0 : i64, tpu.core_type = #tpu.core_type<tc>, window_params = [{pipeline_mode = #tpu.pipeline_mode<synchronous>, transform_indices = @transform_0, window_bounds = array<i64: 2, 16, 32>}, {pipeline_mode = #tpu.pipeline_mode<synchronous>, transform_indices = @transform_1, window_bounds = array<i64: 32, 96>}, {pipeline_mode = #tpu.pipeline_mode<synchronous>, transform_indices = @transform_2, window_bounds = array<i64: 1, 96>}, {pipeline_mode = #tpu.pipeline_mode<synchronous>, transform_indices = @transform_3, window_bounds = array<i64: 32, 32>}, {pipeline_mode = #tpu.pipeline_mode<synchronous>, transform_indices = @transform_4, window_bounds = array<i64: 1, 32>}, {pipeline_mode = #tpu.pipeline_mode<synchronous>, transform_indices = @transform_5, window_bounds = array<i64: 2, 16, 32>}]} {
    %c0 = arith.constant 0 : index
    %c0_0 = arith.constant 0 : index
    %c0_1 = arith.constant 0 : index
    %0 = vector.load %arg1[%c0, %c0_0, %c0_1] : memref<2x16x32xbf16, #tpu.memory_space<vmem>>, vector<2x16x32xbf16>
    %1 = vector.shape_cast %0 : vector<2x16x32xbf16> to vector<32x32xbf16>
    %c0_2 = arith.constant 0 : index
    %c0_3 = arith.constant 0 : index
    %2 = vector.load %arg2[%c0_2, %c0_3] : memref<32x96xbf16, #tpu.memory_space<vmem>>, vector<32x96xbf16>
    %cst = arith.constant dense<0.000000e+00> : vector<32x96xf32>
    %3 = tpu.matmul %1, %2, %cst {dimension_numbers = #tpu.dot_dimension_numbers<[1], [0], [0], [1], [0, 0, 1, 1], [], []>} : vector<32x32xbf16>, vector<32x96xbf16>, vector<32x96xf32> -> vector<32x96xf32>
    %c0_4 = arith.constant 0 : index
    %c0_5 = arith.constant 0 : index
    %4 = vector.load %arg3[%c0_4, %c0_5] : memref<1x96xf32, #tpu.memory_space<vmem>>, vector<1x96xf32>
    %5 = vector.broadcast %4 : vector<1x96xf32> to vector<32x96xf32>
    %6 = arith.addf %3, %5 : vector<32x96xf32>
    %7 = vector.shape_cast %6 : vector<32x96xf32> to vector<2x16x96xf32>
    %8 = vector.extract_strided_slice %7 {offsets = [0, 0, 0], sizes = [2, 16, 32], strides = [1, 1, 1]} : vector<2x16x96xf32> to vector<2x16x32xf32>
    %9 = vector.extract_strided_slice %7 {offsets = [0, 0, 32], sizes = [2, 16, 32], strides = [1, 1, 1]} : vector<2x16x96xf32> to vector<2x16x32xf32>
    %10 = vector.extract_strided_slice %7 {offsets = [0, 0, 64], sizes = [2, 16, 32], strides = [1, 1, 1]} : vector<2x16x96xf32> to vector<2x16x32xf32>
    %11 = vector.extract_strided_slice %8 {offsets = [0, 0, 0], sizes = [2, 16, 8], strides = [1, 1, 1]} : vector<2x16x32xf32> to vector<2x16x8xf32>
    %12 = arith.truncf %11 : vector<2x16x8xf32> to vector<2x16x8xbf16>
    %13 = vector.extract_strided_slice %9 {offsets = [0, 0, 0], sizes = [2, 16, 8], strides = [1, 1, 1]} : vector<2x16x32xf32> to vector<2x16x8xf32>
    %14 = arith.truncf %13 : vector<2x16x8xf32> to vector<2x16x8xbf16>
    %15 = vector.extract_strided_slice %10 {offsets = [0, 0, 0], sizes = [2, 16, 8], strides = [1, 1, 1]} : vector<2x16x32xf32> to vector<2x16x8xf32>
    %16 = arith.truncf %15 : vector<2x16x8xf32> to vector<2x16x8xbf16>
    "tpu.trace_start"() <{level = 10 : i32, message = "bqd,bkd->bqk"}> : () -> ()
    %cst_6 = arith.constant dense<0.000000e+00> : vector<2x16x16xf32>
    %17 = tpu.matmul %12, %14, %cst_6 {dimension_numbers = #tpu.dot_dimension_numbers<[2], [2], [1], [1], [0, 0, 0, 1, 1, 1], [0], [0]>} : vector<2x16x8xbf16>, vector<2x16x8xbf16>, vector<2x16x16xf32> -> vector<2x16x16xf32>
    "tpu.trace_stop"() : () -> ()
    %cst_7 = arith.constant 0.353553385 : f32
    %18 = vector.broadcast %cst_7 : f32 to vector<2x16x16xf32>
    %19 = arith.mulf %17, %18 : vector<2x16x16xf32>
    %cst_8 = arith.constant dense<0xFF800000> : vector<2x16xf32>
    %20 = vector.multi_reduction <maximumf>, %19, %cst_8 [2] : vector<2x16x16xf32> to vector<2x16xf32>
    %21 = vector.shape_cast %20 : vector<2x16xf32> to vector<2x16x1xf32>
    %22 = vector.broadcast %21 : vector<2x16x1xf32> to vector<2x16x16xf32>
    %23 = arith.subf %19, %22 : vector<2x16x16xf32>
    %24 = math.exp %23 : vector<2x16x16xf32>
    %cst_9 = arith.constant dense<0.000000e+00> : vector<2x16xf32>
    %25 = vector.multi_reduction <add>, %24, %cst_9 [2] : vector<2x16x16xf32> to vector<2x16xf32>
    %26 = vector.shape_cast %25 : vector<2x16xf32> to vector<2x16x1xf32>
    %27 = tpu.reciprocal %26 {approx = true} : vector<2x16x1xf32> -> vector<2x16x1xf32>
    %28 = vector.broadcast %27 : vector<2x16x1xf32> to vector<2x16x16xf32>
    %29 = arith.mulf %24, %28 : vector<2x16x16xf32>
    %30 = arith.truncf %29 : vector<2x16x16xf32> to vector<2x16x16xbf16>
    "tpu.trace_start"() <{level = 10 : i32, message = "bqk,bkd->bqd"}> : () -> ()
    %cst_10 = arith.constant dense<0.000000e+00> : vector<2x16x8xf32>
    %31 = tpu.matmul %30, %16, %cst_10 {dimension_numbers = #tpu.dot_dimension_numbers<[2], [1], [1], [2], [0, 0, 0, 1, 1, 2], [0], [0]>} : vector<2x16x16xbf16>, vector<2x16x8xbf16>, vector<2x16x8xf32> -> vector<2x16x8xf32>
    "tpu.trace_stop"() : () -> ()
    %32 = vector.extract_strided_slice %8 {offsets = [0, 0, 8], sizes = [2, 16, 8], strides = [1, 1, 1]} : vector<2x16x32xf32> to vector<2x16x8xf32>
    %33 = arith.truncf %32 : vector<2x16x8xf32> to vector<2x16x8xbf16>
    %34 = vector.extract_strided_slice %9 {offsets = [0, 0, 8], sizes = [2, 16, 8], strides = [1, 1, 1]} : vector<2x16x32xf32> to vector<2x16x8xf32>
    %35 = arith.truncf %34 : vector<2x16x8xf32> to vector<2x16x8xbf16>
    %36 = vector.extract_strided_slice %10 {offsets = [0, 0, 8], sizes = [2, 16, 8], strides = [1, 1, 1]} : vector<2x16x32xf32> to vector<2x16x8xf32>
    %37 = arith.truncf %36 : vector<2x16x8xf32> to vector<2x16x8xbf16>
    "tpu.trace_start"() <{level = 10 : i32, message = "bqd,bkd->bqk"}> : () -> ()
    %cst_11 = arith.constant dense<0.000000e+00> : vector<2x16x16xf32>
    %38 = tpu.matmul %33, %35, %cst_11 {dimension_numbers = #tpu.dot_dimension_numbers<[2], [2], [1], [1], [0, 0, 0, 1, 1, 1], [0], [0]>} : vector<2x16x8xbf16>, vector<2x16x8xbf16>, vector<2x16x16xf32> -> vector<2x16x16xf32>
    "tpu.trace_stop"() : () -> ()
    %cst_12 = arith.constant 0.353553385 : f32
    %39 = vector.broadcast %cst_12 : f32 to vector<2x16x16xf32>
    %40 = arith.mulf %38, %39 : vector<2x16x16xf32>
    %cst_13 = arith.constant dense<0xFF800000> : vector<2x16xf32>
    %41 = vector.multi_reduction <maximumf>, %40, %cst_13 [2] : vector<2x16x16xf32> to vector<2x16xf32>
    %42 = vector.shape_cast %41 : vector<2x16xf32> to vector<2x16x1xf32>
    %43 = vector.broadcast %42 : vector<2x16x1xf32> to vector<2x16x16xf32>
    %44 = arith.subf %40, %43 : vector<2x16x16xf32>
    %45 = math.exp %44 : vector<2x16x16xf32>
    %cst_14 = arith.constant dense<0.000000e+00> : vector<2x16xf32>
    %46 = vector.multi_reduction <add>, %45, %cst_14 [2] : vector<2x16x16xf32> to vector<2x16xf32>
    %47 = vector.shape_cast %46 : vector<2x16xf32> to vector<2x16x1xf32>
    %48 = tpu.reciprocal %47 {approx = true} : vector<2x16x1xf32> -> vector<2x16x1xf32>
    %49 = vector.broadcast %48 : vector<2x16x1xf32> to vector<2x16x16xf32>
    %50 = arith.mulf %45, %49 : vector<2x16x16xf32>
    %51 = arith.truncf %50 : vector<2x16x16xf32> to vector<2x16x16xbf16>
    "tpu.trace_start"() <{level = 10 : i32, message = "bqk,bkd->bqd"}> : () -> ()
    %cst_15 = arith.constant dense<0.000000e+00> : vector<2x16x8xf32>
    %52 = tpu.matmul %51, %37, %cst_15 {dimension_numbers = #tpu.dot_dimension_numbers<[2], [1], [1], [2], [0, 0, 0, 1, 1, 2], [0], [0]>} : vector<2x16x16xbf16>, vector<2x16x8xbf16>, vector<2x16x8xf32> -> vector<2x16x8xf32>
    "tpu.trace_stop"() : () -> ()
    %53 = vector.extract_strided_slice %8 {offsets = [0, 0, 16], sizes = [2, 16, 8], strides = [1, 1, 1]} : vector<2x16x32xf32> to vector<2x16x8xf32>
    %54 = arith.truncf %53 : vector<2x16x8xf32> to vector<2x16x8xbf16>
    %55 = vector.extract_strided_slice %9 {offsets = [0, 0, 16], sizes = [2, 16, 8], strides = [1, 1, 1]} : vector<2x16x32xf32> to vector<2x16x8xf32>
    %56 = arith.truncf %55 : vector<2x16x8xf32> to vector<2x16x8xbf16>
    %57 = vector.extract_strided_slice %10 {offsets = [0, 0, 16], sizes = [2, 16, 8], strides = [1, 1, 1]} : vector<2x16x32xf32> to vector<2x16x8xf32>
    %58 = arith.truncf %57 : vector<2x16x8xf32> to vector<2x16x8xbf16>
    "tpu.trace_start"() <{level = 10 : i32, message = "bqd,bkd->bqk"}> : () -> ()
    %cst_16 = arith.constant dense<0.000000e+00> : vector<2x16x16xf32>
    %59 = tpu.matmul %54, %56, %cst_16 {dimension_numbers = #tpu.dot_dimension_numbers<[2], [2], [1], [1], [0, 0, 0, 1, 1, 1], [0], [0]>} : vector<2x16x8xbf16>, vector<2x16x8xbf16>, vector<2x16x16xf32> -> vector<2x16x16xf32>
    "tpu.trace_stop"() : () -> ()
    %cst_17 = arith.constant 0.353553385 : f32
    %60 = vector.broadcast %cst_17 : f32 to vector<2x16x16xf32>
    %61 = arith.mulf %59, %60 : vector<2x16x16xf32>
    %cst_18 = arith.constant dense<0xFF800000> : vector<2x16xf32>
    %62 = vector.multi_reduction <maximumf>, %61, %cst_18 [2] : vector<2x16x16xf32> to vector<2x16xf32>
    %63 = vector.shape_cast %62 : vector<2x16xf32> to vector<2x16x1xf32>
    %64 = vector.broadcast %63 : vector<2x16x1xf32> to vector<2x16x16xf32>
    %65 = arith.subf %61, %64 : vector<2x16x16xf32>
    %66 = math.exp %65 : vector<2x16x16xf32>
    %cst_19 = arith.constant dense<0.000000e+00> : vector<2x16xf32>
    %67 = vector.multi_reduction <add>, %66, %cst_19 [2] : vector<2x16x16xf32> to vector<2x16xf32>
    %68 = vector.shape_cast %67 : vector<2x16xf32> to vector<2x16x1xf32>
    %69 = tpu.reciprocal %68 {approx = true} : vector<2x16x1xf32> -> vector<2x16x1xf32>
    %70 = vector.broadcast %69 : vector<2x16x1xf32> to vector<2x16x16xf32>
    %71 = arith.mulf %66, %70 : vector<2x16x16xf32>
    %72 = arith.truncf %71 : vector<2x16x16xf32> to vector<2x16x16xbf16>
    "tpu.trace_start"() <{level = 10 : i32, message = "bqk,bkd->bqd"}> : () -> ()
    %cst_20 = arith.constant dense<0.000000e+00> : vector<2x16x8xf32>
    %73 = tpu.matmul %72, %58, %cst_20 {dimension_numbers = #tpu.dot_dimension_numbers<[2], [1], [1], [2], [0, 0, 0, 1, 1, 2], [0], [0]>} : vector<2x16x16xbf16>, vector<2x16x8xbf16>, vector<2x16x8xf32> -> vector<2x16x8xf32>
    "tpu.trace_stop"() : () -> ()
    %74 = vector.extract_strided_slice %8 {offsets = [0, 0, 24], sizes = [2, 16, 8], strides = [1, 1, 1]} : vector<2x16x32xf32> to vector<2x16x8xf32>
    %75 = arith.truncf %74 : vector<2x16x8xf32> to vector<2x16x8xbf16>
    %76 = vector.extract_strided_slice %9 {offsets = [0, 0, 24], sizes = [2, 16, 8], strides = [1, 1, 1]} : vector<2x16x32xf32> to vector<2x16x8xf32>
    %77 = arith.truncf %76 : vector<2x16x8xf32> to vector<2x16x8xbf16>
    %78 = vector.extract_strided_slice %10 {offsets = [0, 0, 24], sizes = [2, 16, 8], strides = [1, 1, 1]} : vector<2x16x32xf32> to vector<2x16x8xf32>
    %79 = arith.truncf %78 : vector<2x16x8xf32> to vector<2x16x8xbf16>
    "tpu.trace_start"() <{level = 10 : i32, message = "bqd,bkd->bqk"}> : () -> ()
    %cst_21 = arith.constant dense<0.000000e+00> : vector<2x16x16xf32>
    %80 = tpu.matmul %75, %77, %cst_21 {dimension_numbers = #tpu.dot_dimension_numbers<[2], [2], [1], [1], [0, 0, 0, 1, 1, 1], [0], [0]>} : vector<2x16x8xbf16>, vector<2x16x8xbf16>, vector<2x16x16xf32> -> vector<2x16x16xf32>
    "tpu.trace_stop"() : () -> ()
    %cst_22 = arith.constant 0.353553385 : f32
    %81 = vector.broadcast %cst_22 : f32 to vector<2x16x16xf32>
    %82 = arith.mulf %80, %81 : vector<2x16x16xf32>
    %cst_23 = arith.constant dense<0xFF800000> : vector<2x16xf32>
    %83 = vector.multi_reduction <maximumf>, %82, %cst_23 [2] : vector<2x16x16xf32> to vector<2x16xf32>
    %84 = vector.shape_cast %83 : vector<2x16xf32> to vector<2x16x1xf32>
    %85 = vector.broadcast %84 : vector<2x16x1xf32> to vector<2x16x16xf32>
    %86 = arith.subf %82, %85 : vector<2x16x16xf32>
    %87 = math.exp %86 : vector<2x16x16xf32>
    %cst_24 = arith.constant dense<0.000000e+00> : vector<2x16xf32>
    %88 = vector.multi_reduction <add>, %87, %cst_24 [2] : vector<2x16x16xf32> to vector<2x16xf32>
    %89 = vector.shape_cast %88 : vector<2x16xf32> to vector<2x16x1xf32>
    %90 = tpu.reciprocal %89 {approx = true} : vector<2x16x1xf32> -> vector<2x16x1xf32>
    %91 = vector.broadcast %90 : vector<2x16x1xf32> to vector<2x16x16xf32>
    %92 = arith.mulf %87, %91 : vector<2x16x16xf32>
    %93 = arith.truncf %92 : vector<2x16x16xf32> to vector<2x16x16xbf16>
    "tpu.trace_start"() <{level = 10 : i32, message = "bqk,bkd->bqd"}> : () -> ()
    %cst_25 = arith.constant dense<0.000000e+00> : vector<2x16x8xf32>
    %94 = tpu.matmul %93, %79, %cst_25 {dimension_numbers = #tpu.dot_dimension_numbers<[2], [1], [1], [2], [0, 0, 0, 1, 1, 2], [0], [0]>} : vector<2x16x16xbf16>, vector<2x16x8xbf16>, vector<2x16x8xf32> -> vector<2x16x8xf32>
    "tpu.trace_stop"() : () -> ()
    %95 = tpu.concatenate %31, %52, %73, %94 in 2 : vector<2x16x8xf32>, vector<2x16x8xf32>, vector<2x16x8xf32>, vector<2x16x8xf32> -> vector<2x16x32xf32>
    %96 = vector.shape_cast %95 : vector<2x16x32xf32> to vector<32x32xf32>
    %97 = arith.truncf %96 : vector<32x32xf32> to vector<32x32xbf16>
    %c0_26 = arith.constant 0 : index
    %c0_27 = arith.constant 0 : index
    %98 = vector.load %arg4[%c0_26, %c0_27] : memref<32x32xbf16, #tpu.memory_space<vmem>>, vector<32x32xbf16>
    %cst_28 = arith.constant dense<0.000000e+00> : vector<32x32xf32>
    %99 = tpu.matmul %97, %98, %cst_28 {dimension_numbers = #tpu.dot_dimension_numbers<[1], [0], [0], [1], [0, 0, 1, 1], [], []>} : vector<32x32xbf16>, vector<32x32xbf16>, vector<32x32xf32> -> vector<32x32xf32>
    %c0_29 = arith.constant 0 : index
    %c0_30 = arith.constant 0 : index
    %100 = vector.load %arg5[%c0_29, %c0_30] : memref<1x32xf32, #tpu.memory_space<vmem>>, vector<1x32xf32>
    %101 = vector.broadcast %100 : vector<1x32xf32> to vector<32x32xf32>
    %102 = arith.addf %99, %101 : vector<32x32xf32>
    %103 = vector.shape_cast %102 : vector<32x32xf32> to vector<2x16x32xf32>
    %104 = arith.extf %0 : vector<2x16x32xbf16> to vector<2x16x32xf32>
    %105 = arith.addf %103, %104 : vector<2x16x32xf32>
    %106 = arith.truncf %105 : vector<2x16x32xf32> to vector<2x16x32xbf16>
    %c0_31 = arith.constant 0 : index
    %c0_32 = arith.constant 0 : index
    %c0_33 = arith.constant 0 : index
    %107 = vector.load %arg6[%c0_31, %c0_32, %c0_33] : memref<2x16x32xbf16, #tpu.memory_space<vmem>>, vector<2x16x32xbf16>
    tpu.vector_store %arg6[%c0_31, %c0_32, %c0_33], %106 {strides = array<i32>} : memref<2x16x32xbf16, #tpu.memory_space<vmem>>, vector<2x16x32xbf16>,
    return
  }
  func.func @transform_0(%arg0: i32) -> (i32, i32, i32) {
    %c0_i32 = arith.constant 0 : i32
    %c0_i32_0 = arith.constant 0 : i32
    %c0_i32_1 = arith.constant 0 : i32
    %c0_i32_2 = arith.constant 0 : i32
    return %c0_i32, %c0_i32_0, %c0_i32_1 : i32, i32, i32
  }
  func.func @transform_1(%arg0: i32) -> (i32, i32) {
    %c0_i32 = arith.constant 0 : i32
    %c0_i32_0 = arith.constant 0 : i32
    %c0_i32_1 = arith.constant 0 : i32
    return %c0_i32, %c0_i32_0 : i32, i32
  }
  func.func @transform_2(%arg0: i32) -> (i32, i32) {
    %c0_i32 = arith.constant 0 : i32
    %c0_i32_0 = arith.constant 0 : i32
    %c0_i32_1 = arith.constant 0 : i32
    return %c0_i32, %c0_i32_0 : i32, i32
  }
  func.func @transform_3(%arg0: i32) -> (i32, i32) {
    %c0_i32 = arith.constant 0 : i32
    %c0_i32_0 = arith.constant 0 : i32
    %c0_i32_1 = arith.constant 0 : i32
    return %c0_i32, %c0_i32_0 : i32, i32
  }
  func.func @transform_4(%arg0: i32) -> (i32, i32) {
    %c0_i32 = arith.constant 0 : i32
    %c0_i32_0 = arith.constant 0 : i32
    %c0_i32_1 = arith.constant 0 : i32
    return %c0_i32, %c0_i32_0 : i32, i32
  }
  func.func @transform_5(%arg0: i32) -> (i32, i32, i32) {
    %c0_i32 = arith.constant 0 : i32
    %c0_i32_0 = arith.constant 0 : i32
    %c0_i32_1 = arith.constant 0 : i32
    %c0_i32_2 = arith.constant 0 : i32
    return %c0_i32, %c0_i32_0, %c0_i32_1 : i32, i32, i32
  }
}

module attributes {stable_mosaic.version = 11 : i64} {
  func.func @_matmul_bias_kernel(%arg0: i32, %arg1: memref<8x32xf32, #tpu.memory_space<vmem>>, %arg2: memref<32x512xbf16, #tpu.memory_space<vmem>>, %arg3: memref<1x512xf32, #tpu.memory_space<vmem>>, %arg4: memref<8x512xbf16, #tpu.memory_space<vmem>>) attributes {dimension_semantics = [#tpu.dimension_semantics<parallel>], iteration_bounds = array<i64: 1>, scalar_prefetch = 0 : i64, scratch_operands = 0 : i64, tpu.core_type = #tpu.core_type<tc>, window_params = [{transform_indices = @transform_0, window_bounds = array<i64: 8, 32>}, {pipeline_mode = #tpu.pipeline_mode<synchronous>, transform_indices = @transform_1, window_bounds = array<i64: 32, 512>}, {pipeline_mode = #tpu.pipeline_mode<synchronous>, transform_indices = @transform_2, window_bounds = array<i64: 1, 512>}, {transform_indices = @transform_3, window_bounds = array<i64: 8, 512>}]} {
    %c0 = arith.constant 0 : index
    %c0_0 = arith.constant 0 : index
    %0 = vector.load %arg1[%c0, %c0_0] : memref<8x32xf32, #tpu.memory_space<vmem>>, vector<8x32xf32>
    %1 = arith.truncf %0 : vector<8x32xf32> to vector<8x32xbf16>
    %c0_1 = arith.constant 0 : index
    %c0_2 = arith.constant 0 : index
    %2 = vector.load %arg2[%c0_1, %c0_2] : memref<32x512xbf16, #tpu.memory_space<vmem>>, vector<32x512xbf16>
    %cst = arith.constant dense<0.000000e+00> : vector<8x512xf32>
    %3 = tpu.matmul %1, %2, %cst {dimension_numbers = #tpu.dot_dimension_numbers<[1], [0], [0], [1], [0, 0, 1, 1], [], []>} : vector<8x32xbf16>, vector<32x512xbf16>, vector<8x512xf32> -> vector<8x512xf32>
    %c0_3 = arith.constant 0 : index
    %c0_4 = arith.constant 0 : index
    %4 = vector.load %arg3[%c0_3, %c0_4] : memref<1x512xf32, #tpu.memory_space<vmem>>, vector<1x512xf32>
    %5 = vector.broadcast %4 : vector<1x512xf32> to vector<8x512xf32>
    %6 = arith.addf %3, %5 : vector<8x512xf32>
    %cst_5 = arith.constant 0.000000e+00 : f32
    %7 = vector.broadcast %cst_5 : f32 to vector<8x512xf32>
    %8 = arith.maximumf %6, %7 : vector<8x512xf32>
    %9 = arith.truncf %8 : vector<8x512xf32> to vector<8x512xbf16>
    %c0_6 = arith.constant 0 : index
    %c0_7 = arith.constant 0 : index
    %10 = vector.load %arg4[%c0_6, %c0_7] : memref<8x512xbf16, #tpu.memory_space<vmem>>, vector<8x512xbf16>
    tpu.vector_store %arg4[%c0_6, %c0_7], %9 {strides = array<i32>} : memref<8x512xbf16, #tpu.memory_space<vmem>>, vector<8x512xbf16>,
    return
  }
  func.func @transform_0(%arg0: i32) -> (i32, i32) {
    %c0_i32 = arith.constant 0 : i32
    %c0_i32_0 = arith.constant 0 : i32
    return %arg0, %c0_i32 : i32, i32
  }
  func.func @transform_1(%arg0: i32) -> (i32, i32) {
    %c0_i32 = arith.constant 0 : i32
    %c0_i32_0 = arith.constant 0 : i32
    %c0_i32_1 = arith.constant 0 : i32
    return %c0_i32, %c0_i32_0 : i32, i32
  }
  func.func @transform_2(%arg0: i32) -> (i32, i32) {
    %c0_i32 = arith.constant 0 : i32
    %c0_i32_0 = arith.constant 0 : i32
    %c0_i32_1 = arith.constant 0 : i32
    return %c0_i32, %c0_i32_0 : i32, i32
  }
  func.func @transform_3(%arg0: i32) -> (i32, i32) {
    %c0_i32 = arith.constant 0 : i32
    %c0_i32_0 = arith.constant 0 : i32
    return %arg0, %c0_i32 : i32, i32
  }
}

module attributes {stable_mosaic.version = 11 : i64} {
  func.func @_vae_head_kernel(%arg0: i32, %arg1: memref<2x512xbf16, #tpu.memory_space<vmem>>, %arg2: memref<512x64xbf16, #tpu.memory_space<vmem>>, %arg3: memref<1x64xf32, #tpu.memory_space<vmem>>, %arg4: memref<2x32xf32, #tpu.memory_space<vmem>>, %arg5: memref<2x128xf32, #tpu.memory_space<vmem>>) attributes {dimension_semantics = [#tpu.dimension_semantics<arbitrary>], iteration_bounds = array<i64: 1>, scalar_prefetch = 0 : i64, scratch_operands = 0 : i64, tpu.core_type = #tpu.core_type<tc>, window_params = [{pipeline_mode = #tpu.pipeline_mode<synchronous>, transform_indices = @transform_0, window_bounds = array<i64: 2, 512>}, {pipeline_mode = #tpu.pipeline_mode<synchronous>, transform_indices = @transform_1, window_bounds = array<i64: 512, 64>}, {pipeline_mode = #tpu.pipeline_mode<synchronous>, transform_indices = @transform_2, window_bounds = array<i64: 1, 64>}, {pipeline_mode = #tpu.pipeline_mode<synchronous>, transform_indices = @transform_3, window_bounds = array<i64: 2, 32>}, {pipeline_mode = #tpu.pipeline_mode<synchronous>, transform_indices = @transform_4, window_bounds = array<i64: 2, 128>}]} {
    %c0 = arith.constant 0 : index
    %c0_0 = arith.constant 0 : index
    %0 = vector.load %arg1[%c0, %c0_0] : memref<2x512xbf16, #tpu.memory_space<vmem>>, vector<2x512xbf16>
    %c0_1 = arith.constant 0 : index
    %c0_2 = arith.constant 0 : index
    %1 = vector.load %arg2[%c0_1, %c0_2] : memref<512x64xbf16, #tpu.memory_space<vmem>>, vector<512x64xbf16>
    %cst = arith.constant dense<0.000000e+00> : vector<2x64xf32>
    %2 = tpu.matmul %0, %1, %cst {dimension_numbers = #tpu.dot_dimension_numbers<[1], [0], [0], [1], [0, 0, 1, 1], [], []>} : vector<2x512xbf16>, vector<512x64xbf16>, vector<2x64xf32> -> vector<2x64xf32>
    %c0_3 = arith.constant 0 : index
    %c0_4 = arith.constant 0 : index
    %3 = vector.load %arg3[%c0_3, %c0_4] : memref<1x64xf32, #tpu.memory_space<vmem>>, vector<1x64xf32>
    %4 = vector.broadcast %3 : vector<1x64xf32> to vector<2x64xf32>
    %5 = arith.addf %2, %4 : vector<2x64xf32>
    %6 = vector.extract_strided_slice %5 {offsets = [0, 0], sizes = [2, 32], strides = [1, 1]} : vector<2x64xf32> to vector<2x32xf32>
    %7 = vector.extract_strided_slice %5 {offsets = [0, 32], sizes = [2, 32], strides = [1, 1]} : vector<2x64xf32> to vector<2x32xf32>
    %c0_5 = arith.constant 0 : index
    %c0_6 = arith.constant 0 : index
    %8 = vector.load %arg4[%c0_5, %c0_6] : memref<2x32xf32, #tpu.memory_space<vmem>>, vector<2x32xf32>
    %cst_7 = arith.constant 5.000000e-01 : f32
    %9 = vector.broadcast %cst_7 : f32 to vector<2x32xf32>
    %10 = arith.mulf %9, %7 : vector<2x32xf32>
    %11 = math.exp %10 : vector<2x32xf32>
    %12 = arith.mulf %8, %11 : vector<2x32xf32>
    %13 = arith.addf %6, %12 : vector<2x32xf32>
    %cst_8 = arith.constant 0.000000e+00 : f32
    %14 = vector.broadcast %cst_8 : f32 to vector<2x32xf32>
    %15 = tpu.concatenate %6, %7, %13, %14 in 1 : vector<2x32xf32>, vector<2x32xf32>, vector<2x32xf32>, vector<2x32xf32> -> vector<2x128xf32>
    %c0_9 = arith.constant 0 : index
    %c0_10 = arith.constant 0 : index
    %16 = vector.load %arg5[%c0_9, %c0_10] : memref<2x128xf32, #tpu.memory_space<vmem>>, vector<2x128xf32>
    tpu.vector_store %arg5[%c0_9, %c0_10], %15 {strides = array<i32>} : memref<2x128xf32, #tpu.memory_space<vmem>>, vector<2x128xf32>,
    return
  }
  func.func @transform_0(%arg0: i32) -> (i32, i32) {
    %c0_i32 = arith.constant 0 : i32
    %c0_i32_0 = arith.constant 0 : i32
    %c0_i32_1 = arith.constant 0 : i32
    return %c0_i32, %c0_i32_0 : i32, i32
  }
  func.func @transform_1(%arg0: i32) -> (i32, i32) {
    %c0_i32 = arith.constant 0 : i32
    %c0_i32_0 = arith.constant 0 : i32
    %c0_i32_1 = arith.constant 0 : i32
    return %c0_i32, %c0_i32_0 : i32, i32
  }
  func.func @transform_2(%arg0: i32) -> (i32, i32) {
    %c0_i32 = arith.constant 0 : i32
    %c0_i32_0 = arith.constant 0 : i32
    %c0_i32_1 = arith.constant 0 : i32
    return %c0_i32, %c0_i32_0 : i32, i32
  }
  func.func @transform_3(%arg0: i32) -> (i32, i32) {
    %c0_i32 = arith.constant 0 : i32
    %c0_i32_0 = arith.constant 0 : i32
    %c0_i32_1 = arith.constant 0 : i32
    return %c0_i32, %c0_i32_0 : i32, i32
  }
  func.func @transform_4(%arg0: i32) -> (i32, i32) {
    %c0_i32 = arith.constant 0 : i32
    %c0_i32_0 = arith.constant 0 : i32
    %c0_i32_1 = arith.constant 0 : i32
    return %c0_i32, %c0_i32_0 : i32, i32
  }
}

module attributes {stable_mosaic.version = 11 : i64} {
  func.func @_conv3x3_kernel(%arg0: i32, %arg1: memref<1x10x10x32xbf16, #tpu.memory_space<vmem>>, %arg2: memref<288x16xbf16, #tpu.memory_space<vmem>>, %arg3: memref<1x16xf32, #tpu.memory_space<vmem>>, %arg4: memref<1x64x16xbf16, #tpu.memory_space<vmem>>) attributes {dimension_semantics = [#tpu.dimension_semantics<parallel>], iteration_bounds = array<i64: 2>, scalar_prefetch = 0 : i64, scratch_operands = 0 : i64, tpu.core_type = #tpu.core_type<tc>, window_params = [{transform_indices = @transform_0, window_bounds = array<i64: 1, 10, 10, 32>}, {pipeline_mode = #tpu.pipeline_mode<synchronous>, transform_indices = @transform_1, window_bounds = array<i64: 288, 16>}, {pipeline_mode = #tpu.pipeline_mode<synchronous>, transform_indices = @transform_2, window_bounds = array<i64: 1, 16>}, {transform_indices = @transform_3, window_bounds = array<i64: 1, 64, 16>}]} {
    %c0 = arith.constant 0 : index
    %c0_0 = arith.constant 0 : index
    %c0_1 = arith.constant 0 : index
    %c0_2 = arith.constant 0 : index
    %0 = vector.load %arg1[%c0, %c0_0, %c0_1, %c0_2] : memref<1x10x10x32xbf16, #tpu.memory_space<vmem>>, vector<1x8x8x32xbf16>
    %1 = vector.shape_cast %0 : vector<1x8x8x32xbf16> to vector<8x8x32xbf16>
    %2 = vector.shape_cast %1 : vector<8x8x32xbf16> to vector<64x32xbf16>
    %c0_3 = arith.constant 0 : index
    %c0_4 = arith.constant 0 : index
    %3 = vector.load %arg2[%c0_3, %c0_4] : memref<288x16xbf16, #tpu.memory_space<vmem>>, vector<32x16xbf16>
    %cst = arith.constant dense<0.000000e+00> : vector<64x16xf32>
    %4 = tpu.matmul %2, %3, %cst {dimension_numbers = #tpu.dot_dimension_numbers<[1], [0], [0], [1], [0, 0, 1, 1], [], []>} : vector<64x32xbf16>, vector<32x16xbf16>, vector<64x16xf32> -> vector<64x16xf32>
    %c0_5 = arith.constant 0 : index
    %c0_6 = arith.constant 0 : index
    %c1 = arith.constant 1 : index
    %c0_7 = arith.constant 0 : index
    %5 = vector.load %arg1[%c0_5, %c0_6, %c1, %c0_7] : memref<1x10x10x32xbf16, #tpu.memory_space<vmem>>, vector<1x8x8x32xbf16>
    %6 = vector.shape_cast %5 : vector<1x8x8x32xbf16> to vector<8x8x32xbf16>
    %7 = vector.shape_cast %6 : vector<8x8x32xbf16> to vector<64x32xbf16>
    %c32 = arith.constant 32 : index
    %c0_8 = arith.constant 0 : index
    %8 = vector.load %arg2[%c32, %c0_8] : memref<288x16xbf16, #tpu.memory_space<vmem>>, vector<32x16xbf16>
    %cst_9 = arith.constant dense<0.000000e+00> : vector<64x16xf32>
    %9 = tpu.matmul %7, %8, %cst_9 {dimension_numbers = #tpu.dot_dimension_numbers<[1], [0], [0], [1], [0, 0, 1, 1], [], []>} : vector<64x32xbf16>, vector<32x16xbf16>, vector<64x16xf32> -> vector<64x16xf32>
    %10 = arith.addf %4, %9 : vector<64x16xf32>
    %c0_10 = arith.constant 0 : index
    %c0_11 = arith.constant 0 : index
    %c2 = arith.constant 2 : index
    %c0_12 = arith.constant 0 : index
    %11 = vector.load %arg1[%c0_10, %c0_11, %c2, %c0_12] : memref<1x10x10x32xbf16, #tpu.memory_space<vmem>>, vector<1x8x8x32xbf16>
    %12 = vector.shape_cast %11 : vector<1x8x8x32xbf16> to vector<8x8x32xbf16>
    %13 = vector.shape_cast %12 : vector<8x8x32xbf16> to vector<64x32xbf16>
    %c64 = arith.constant 64 : index
    %c0_13 = arith.constant 0 : index
    %14 = vector.load %arg2[%c64, %c0_13] : memref<288x16xbf16, #tpu.memory_space<vmem>>, vector<32x16xbf16>
    %cst_14 = arith.constant dense<0.000000e+00> : vector<64x16xf32>
    %15 = tpu.matmul %13, %14, %cst_14 {dimension_numbers = #tpu.dot_dimension_numbers<[1], [0], [0], [1], [0, 0, 1, 1], [], []>} : vector<64x32xbf16>, vector<32x16xbf16>, vector<64x16xf32> -> vector<64x16xf32>
    %16 = arith.addf %10, %15 : vector<64x16xf32>
    %c0_15 = arith.constant 0 : index
    %c1_16 = arith.constant 1 : index
    %c0_17 = arith.constant 0 : index
    %c0_18 = arith.constant 0 : index
    %17 = vector.load %arg1[%c0_15, %c1_16, %c0_17, %c0_18] : memref<1x10x10x32xbf16, #tpu.memory_space<vmem>>, vector<1x8x8x32xbf16>
    %18 = vector.shape_cast %17 : vector<1x8x8x32xbf16> to vector<8x8x32xbf16>
    %19 = vector.shape_cast %18 : vector<8x8x32xbf16> to vector<64x32xbf16>
    %c96 = arith.constant 96 : index
    %c0_19 = arith.constant 0 : index
    %20 = vector.load %arg2[%c96, %c0_19] : memref<288x16xbf16, #tpu.memory_space<vmem>>, vector<32x16xbf16>
    %cst_20 = arith.constant dense<0.000000e+00> : vector<64x16xf32>
    %21 = tpu.matmul %19, %20, %cst_20 {dimension_numbers = #tpu.dot_dimension_numbers<[1], [0], [0], [1], [0, 0, 1, 1], [], []>} : vector<64x32xbf16>, vector<32x16xbf16>, vector<64x16xf32> -> vector<64x16xf32>
    %22 = arith.addf %16, %21 : vector<64x16xf32>
    %c0_21 = arith.constant 0 : index
    %c1_22 = arith.constant 1 : index
    %c1_23 = arith.constant 1 : index
    %c0_24 = arith.constant 0 : index
    %23 = vector.load %arg1[%c0_21, %c1_22, %c1_23, %c0_24] : memref<1x10x10x32xbf16, #tpu.memory_space<vmem>>, vector<1x8x8x32xbf16>
    %24 = vector.shape_cast %23 : vector<1x8x8x32xbf16> to vector<8x8x32xbf16>
    %25 = vector.shape_cast %24 : vector<8x8x32xbf16> to vector<64x32xbf16>
    %c128 = arith.constant 128 : index
    %c0_25 = arith.constant 0 : index
    %26 = vector.load %arg2[%c128, %c0_25] : memref<288x16xbf16, #tpu.memory_space<vmem>>, vector<32x16xbf16>
    %cst_26 = arith.constant dense<0.000000e+00> : vector<64x16xf32>
    %27 = tpu.matmul %25, %26, %cst_26 {dimension_numbers = #tpu.dot_dimension_numbers<[1], [0], [0], [1], [0, 0, 1, 1], [], []>} : vector<64x32xbf16>, vector<32x16xbf16>, vector<64x16xf32> -> vector<64x16xf32>
    %28 = arith.addf %22, %27 : vector<64x16xf32>
    %c0_27 = arith.constant 0 : index
    %c1_28 = arith.constant 1 : index
    %c2_29 = arith.constant 2 : index
    %c0_30 = arith.constant 0 : index
    %29 = vector.load %arg1[%c0_27, %c1_28, %c2_29, %c0_30] : memref<1x10x10x32xbf16, #tpu.memory_space<vmem>>, vector<1x8x8x32xbf16>
    %30 = vector.shape_cast %29 : vector<1x8x8x32xbf16> to vector<8x8x32xbf16>
    %31 = vector.shape_cast %30 : vector<8x8x32xbf16> to vector<64x32xbf16>
    %c160 = arith.constant 160 : index
    %c0_31 = arith.constant 0 : index
    %32 = vector.load %arg2[%c160, %c0_31] : memref<288x16xbf16, #tpu.memory_space<vmem>>, vector<32x16xbf16>
    %cst_32 = arith.constant dense<0.000000e+00> : vector<64x16xf32>
    %33 = tpu.matmul %31, %32, %cst_32 {dimension_numbers = #tpu.dot_dimension_numbers<[1], [0], [0], [1], [0, 0, 1, 1], [], []>} : vector<64x32xbf16>, vector<32x16xbf16>, vector<64x16xf32> -> vector<64x16xf32>
    %34 = arith.addf %28, %33 : vector<64x16xf32>
    %c0_33 = arith.constant 0 : index
    %c2_34 = arith.constant 2 : index
    %c0_35 = arith.constant 0 : index
    %c0_36 = arith.constant 0 : index
    %35 = vector.load %arg1[%c0_33, %c2_34, %c0_35, %c0_36] : memref<1x10x10x32xbf16, #tpu.memory_space<vmem>>, vector<1x8x8x32xbf16>
    %36 = vector.shape_cast %35 : vector<1x8x8x32xbf16> to vector<8x8x32xbf16>
    %37 = vector.shape_cast %36 : vector<8x8x32xbf16> to vector<64x32xbf16>
    %c192 = arith.constant 192 : index
    %c0_37 = arith.constant 0 : index
    %38 = vector.load %arg2[%c192, %c0_37] : memref<288x16xbf16, #tpu.memory_space<vmem>>, vector<32x16xbf16>
    %cst_38 = arith.constant dense<0.000000e+00> : vector<64x16xf32>
    %39 = tpu.matmul %37, %38, %cst_38 {dimension_numbers = #tpu.dot_dimension_numbers<[1], [0], [0], [1], [0, 0, 1, 1], [], []>} : vector<64x32xbf16>, vector<32x16xbf16>, vector<64x16xf32> -> vector<64x16xf32>
    %40 = arith.addf %34, %39 : vector<64x16xf32>
    %c0_39 = arith.constant 0 : index
    %c2_40 = arith.constant 2 : index
    %c1_41 = arith.constant 1 : index
    %c0_42 = arith.constant 0 : index
    %41 = vector.load %arg1[%c0_39, %c2_40, %c1_41, %c0_42] : memref<1x10x10x32xbf16, #tpu.memory_space<vmem>>, vector<1x8x8x32xbf16>
    %42 = vector.shape_cast %41 : vector<1x8x8x32xbf16> to vector<8x8x32xbf16>
    %43 = vector.shape_cast %42 : vector<8x8x32xbf16> to vector<64x32xbf16>
    %c224 = arith.constant 224 : index
    %c0_43 = arith.constant 0 : index
    %44 = vector.load %arg2[%c224, %c0_43] : memref<288x16xbf16, #tpu.memory_space<vmem>>, vector<32x16xbf16>
    %cst_44 = arith.constant dense<0.000000e+00> : vector<64x16xf32>
    %45 = tpu.matmul %43, %44, %cst_44 {dimension_numbers = #tpu.dot_dimension_numbers<[1], [0], [0], [1], [0, 0, 1, 1], [], []>} : vector<64x32xbf16>, vector<32x16xbf16>, vector<64x16xf32> -> vector<64x16xf32>
    %46 = arith.addf %40, %45 : vector<64x16xf32>
    %c0_45 = arith.constant 0 : index
    %c2_46 = arith.constant 2 : index
    %c2_47 = arith.constant 2 : index
    %c0_48 = arith.constant 0 : index
    %47 = vector.load %arg1[%c0_45, %c2_46, %c2_47, %c0_48] : memref<1x10x10x32xbf16, #tpu.memory_space<vmem>>, vector<1x8x8x32xbf16>
    %48 = vector.shape_cast %47 : vector<1x8x8x32xbf16> to vector<8x8x32xbf16>
    %49 = vector.shape_cast %48 : vector<8x8x32xbf16> to vector<64x32xbf16>
    %c256 = arith.constant 256 : index
    %c0_49 = arith.constant 0 : index
    %50 = vector.load %arg2[%c256, %c0_49] : memref<288x16xbf16, #tpu.memory_space<vmem>>, vector<32x16xbf16>
    %cst_50 = arith.constant dense<0.000000e+00> : vector<64x16xf32>
    %51 = tpu.matmul %49, %50, %cst_50 {dimension_numbers = #tpu.dot_dimension_numbers<[1], [0], [0], [1], [0, 0, 1, 1], [], []>} : vector<64x32xbf16>, vector<32x16xbf16>, vector<64x16xf32> -> vector<64x16xf32>
    %52 = arith.addf %46, %51 : vector<64x16xf32>
    %c0_51 = arith.constant 0 : index
    %c0_52 = arith.constant 0 : index
    %53 = vector.load %arg3[%c0_51, %c0_52] : memref<1x16xf32, #tpu.memory_space<vmem>>, vector<1x16xf32>
    %54 = vector.broadcast %53 : vector<1x16xf32> to vector<64x16xf32>
    %55 = arith.addf %52, %54 : vector<64x16xf32>
    %cst_53 = arith.constant 0.000000e+00 : f32
    %56 = vector.broadcast %cst_53 : f32 to vector<64x16xf32>
    %57 = arith.maximumf %55, %56 : vector<64x16xf32>
    %58 = arith.truncf %57 : vector<64x16xf32> to vector<64x16xbf16>
    %c0_54 = arith.constant 0 : index
    %c0_55 = arith.constant 0 : index
    %c0_56 = arith.constant 0 : index
    %59 = vector.load %arg4[%c0_54, %c0_55, %c0_56] : memref<1x64x16xbf16, #tpu.memory_space<vmem>>, vector<1x64x16xbf16>
    %60 = vector.shape_cast %59 : vector<1x64x16xbf16> to vector<64x16xbf16>
    %61 = vector.shape_cast %58 : vector<64x16xbf16> to vector<1x64x16xbf16>
    tpu.vector_store %arg4[%c0_54, %c0_55, %c0_56], %61 {strides = array<i32>} : memref<1x64x16xbf16, #tpu.memory_space<vmem>>, vector<1x64x16xbf16>,
    return
  }
  func.func @transform_0(%arg0: i32) -> (i32, i32, i32, i32) {
    %c0_i32 = arith.constant 0 : i32
    %c0_i32_0 = arith.constant 0 : i32
    %c0_i32_1 = arith.constant 0 : i32
    %c0_i32_2 = arith.constant 0 : i32
    return %arg0, %c0_i32, %c0_i32_0, %c0_i32_1 : i32, i32, i32, i32
  }
  func.func @transform_1(%arg0: i32) -> (i32, i32) {
    %c0_i32 = arith.constant 0 : i32
    %c0_i32_0 = arith.constant 0 : i32
    %c0_i32_1 = arith.constant 0 : i32
    return %c0_i32, %c0_i32_0 : i32, i32
  }
  func.func @transform_2(%arg0: i32) -> (i32, i32) {
    %c0_i32 = arith.constant 0 : i32
    %c0_i32_0 = arith.constant 0 : i32
    %c0_i32_1 = arith.constant 0 : i32
    return %c0_i32, %c0_i32_0 : i32, i32
  }
  func.func @transform_3(%arg0: i32) -> (i32, i32, i32) {
    %c0_i32 = arith.constant 0 : i32
    %c0_i32_0 = arith.constant 0 : i32
    %c0_i32_1 = arith.constant 0 : i32
    return %arg0, %c0_i32, %c0_i32_0 : i32, i32, i32
  }
}

module attributes {stable_mosaic.version = 11 : i64} {
  func.func @_conv3x3_kernel(%arg0: i32, %arg1: memref<1x18x18x16xbf16, #tpu.memory_space<vmem>>, %arg2: memref<144x3xbf16, #tpu.memory_space<vmem>>, %arg3: memref<1x3xf32, #tpu.memory_space<vmem>>, %arg4: memref<1x256x3xf32, #tpu.memory_space<vmem>>) attributes {dimension_semantics = [#tpu.dimension_semantics<parallel>], iteration_bounds = array<i64: 2>, scalar_prefetch = 0 : i64, scratch_operands = 0 : i64, tpu.core_type = #tpu.core_type<tc>, window_params = [{transform_indices = @transform_0, window_bounds = array<i64: 1, 18, 18, 16>}, {pipeline_mode = #tpu.pipeline_mode<synchronous>, transform_indices = @transform_1, window_bounds = array<i64: 144, 3>}, {pipeline_mode = #tpu.pipeline_mode<synchronous>, transform_indices = @transform_2, window_bounds = array<i64: 1, 3>}, {transform_indices = @transform_3, window_bounds = array<i64: 1, 256, 3>}]} {
    %c0 = arith.constant 0 : index
    %c0_0 = arith.constant 0 : index
    %c0_1 = arith.constant 0 : index
    %c0_2 = arith.constant 0 : index
    %0 = vector.load %arg1[%c0, %c0_0, %c0_1, %c0_2] : memref<1x18x18x16xbf16, #tpu.memory_space<vmem>>, vector<1x16x16x16xbf16>
    %1 = vector.shape_cast %0 : vector<1x16x16x16xbf16> to vector<16x16x16xbf16>
    %2 = vector.shape_cast %1 : vector<16x16x16xbf16> to vector<256x16xbf16>
    %c0_3 = arith.constant 0 : index
    %c0_4 = arith.constant 0 : index
    %3 = vector.load %arg2[%c0_3, %c0_4] : memref<144x3xbf16, #tpu.memory_space<vmem>>, vector<16x3xbf16>
    %cst = arith.constant dense<0.000000e+00> : vector<256x3xf32>
    %4 = tpu.matmul %2, %3, %cst {dimension_numbers = #tpu.dot_dimension_numbers<[1], [0], [0], [1], [0, 0, 1, 1], [], []>} : vector<256x16xbf16>, vector<16x3xbf16>, vector<256x3xf32> -> vector<256x3xf32>
    %c0_5 = arith.constant 0 : index
    %c0_6 = arith.constant 0 : index
    %c1 = arith.constant 1 : index
    %c0_7 = arith.constant 0 : index
    %5 = vector.load %arg1[%c0_5, %c0_6, %c1, %c0_7] : memref<1x18x18x16xbf16, #tpu.memory_space<vmem>>, vector<1x16x16x16xbf16>
    %6 = vector.shape_cast %5 : vector<1x16x16x16xbf16> to vector<16x16x16xbf16>
    %7 = vector.shape_cast %6 : vector<16x16x16xbf16> to vector<256x16xbf16>
    %c16 = arith.constant 16 : index
    %c0_8 = arith.constant 0 : index
    %8 = vector.load %arg2[%c16, %c0_8] : memref<144x3xbf16, #tpu.memory_space<vmem>>, vector<16x3xbf16>
    %cst_9 = arith.constant dense<0.000000e+00> : vector<256x3xf32>
    %9 = tpu.matmul %7, %8, %cst_9 {dimension_numbers = #tpu.dot_dimension_numbers<[1], [0], [0], [1], [0, 0, 1, 1], [], []>} : vector<256x16xbf16>, vector<16x3xbf16>, vector<256x3xf32> -> vector<256x3xf32>
    %10 = arith.addf %4, %9 : vector<256x3xf32>
    %c0_10 = arith.constant 0 : index
    %c0_11 = arith.constant 0 : index
    %c2 = arith.constant 2 : index
    %c0_12 = arith.constant 0 : index
    %11 = vector.load %arg1[%c0_10, %c0_11, %c2, %c0_12] : memref<1x18x18x16xbf16, #tpu.memory_space<vmem>>, vector<1x16x16x16xbf16>
    %12 = vector.shape_cast %11 : vector<1x16x16x16xbf16> to vector<16x16x16xbf16>
    %13 = vector.shape_cast %12 : vector<16x16x16xbf16> to vector<256x16xbf16>
    %c32 = arith.constant 32 : index
    %c0_13 = arith.constant 0 : index
    %14 = vector.load %arg2[%c32, %c0_13] : memref<144x3xbf16, #tpu.memory_space<vmem>>, vector<16x3xbf16>
    %cst_14 = arith.constant dense<0.000000e+00> : vector<256x3xf32>
    %15 = tpu.matmul %13, %14, %cst_14 {dimension_numbers = #tpu.dot_dimension_numbers<[1], [0], [0], [1], [0, 0, 1, 1], [], []>} : vector<256x16xbf16>, vector<16x3xbf16>, vector<256x3xf32> -> vector<256x3xf32>
    %16 = arith.addf %10, %15 : vector<256x3xf32>
    %c0_15 = arith.constant 0 : index
    %c1_16 = arith.constant 1 : index
    %c0_17 = arith.constant 0 : index
    %c0_18 = arith.constant 0 : index
    %17 = vector.load %arg1[%c0_15, %c1_16, %c0_17, %c0_18] : memref<1x18x18x16xbf16, #tpu.memory_space<vmem>>, vector<1x16x16x16xbf16>
    %18 = vector.shape_cast %17 : vector<1x16x16x16xbf16> to vector<16x16x16xbf16>
    %19 = vector.shape_cast %18 : vector<16x16x16xbf16> to vector<256x16xbf16>
    %c48 = arith.constant 48 : index
    %c0_19 = arith.constant 0 : index
    %20 = vector.load %arg2[%c48, %c0_19] : memref<144x3xbf16, #tpu.memory_space<vmem>>, vector<16x3xbf16>
    %cst_20 = arith.constant dense<0.000000e+00> : vector<256x3xf32>
    %21 = tpu.matmul %19, %20, %cst_20 {dimension_numbers = #tpu.dot_dimension_numbers<[1], [0], [0], [1], [0, 0, 1, 1], [], []>} : vector<256x16xbf16>, vector<16x3xbf16>, vector<256x3xf32> -> vector<256x3xf32>
    %22 = arith.addf %16, %21 : vector<256x3xf32>
    %c0_21 = arith.constant 0 : index
    %c1_22 = arith.constant 1 : index
    %c1_23 = arith.constant 1 : index
    %c0_24 = arith.constant 0 : index
    %23 = vector.load %arg1[%c0_21, %c1_22, %c1_23, %c0_24] : memref<1x18x18x16xbf16, #tpu.memory_space<vmem>>, vector<1x16x16x16xbf16>
    %24 = vector.shape_cast %23 : vector<1x16x16x16xbf16> to vector<16x16x16xbf16>
    %25 = vector.shape_cast %24 : vector<16x16x16xbf16> to vector<256x16xbf16>
    %c64 = arith.constant 64 : index
    %c0_25 = arith.constant 0 : index
    %26 = vector.load %arg2[%c64, %c0_25] : memref<144x3xbf16, #tpu.memory_space<vmem>>, vector<16x3xbf16>
    %cst_26 = arith.constant dense<0.000000e+00> : vector<256x3xf32>
    %27 = tpu.matmul %25, %26, %cst_26 {dimension_numbers = #tpu.dot_dimension_numbers<[1], [0], [0], [1], [0, 0, 1, 1], [], []>} : vector<256x16xbf16>, vector<16x3xbf16>, vector<256x3xf32> -> vector<256x3xf32>
    %28 = arith.addf %22, %27 : vector<256x3xf32>
    %c0_27 = arith.constant 0 : index
    %c1_28 = arith.constant 1 : index
    %c2_29 = arith.constant 2 : index
    %c0_30 = arith.constant 0 : index
    %29 = vector.load %arg1[%c0_27, %c1_28, %c2_29, %c0_30] : memref<1x18x18x16xbf16, #tpu.memory_space<vmem>>, vector<1x16x16x16xbf16>
    %30 = vector.shape_cast %29 : vector<1x16x16x16xbf16> to vector<16x16x16xbf16>
    %31 = vector.shape_cast %30 : vector<16x16x16xbf16> to vector<256x16xbf16>
    %c80 = arith.constant 80 : index
    %c0_31 = arith.constant 0 : index
    %32 = vector.load %arg2[%c80, %c0_31] : memref<144x3xbf16, #tpu.memory_space<vmem>>, vector<16x3xbf16>
    %cst_32 = arith.constant dense<0.000000e+00> : vector<256x3xf32>
    %33 = tpu.matmul %31, %32, %cst_32 {dimension_numbers = #tpu.dot_dimension_numbers<[1], [0], [0], [1], [0, 0, 1, 1], [], []>} : vector<256x16xbf16>, vector<16x3xbf16>, vector<256x3xf32> -> vector<256x3xf32>
    %34 = arith.addf %28, %33 : vector<256x3xf32>
    %c0_33 = arith.constant 0 : index
    %c2_34 = arith.constant 2 : index
    %c0_35 = arith.constant 0 : index
    %c0_36 = arith.constant 0 : index
    %35 = vector.load %arg1[%c0_33, %c2_34, %c0_35, %c0_36] : memref<1x18x18x16xbf16, #tpu.memory_space<vmem>>, vector<1x16x16x16xbf16>
    %36 = vector.shape_cast %35 : vector<1x16x16x16xbf16> to vector<16x16x16xbf16>
    %37 = vector.shape_cast %36 : vector<16x16x16xbf16> to vector<256x16xbf16>
    %c96 = arith.constant 96 : index
    %c0_37 = arith.constant 0 : index
    %38 = vector.load %arg2[%c96, %c0_37] : memref<144x3xbf16, #tpu.memory_space<vmem>>, vector<16x3xbf16>
    %cst_38 = arith.constant dense<0.000000e+00> : vector<256x3xf32>
    %39 = tpu.matmul %37, %38, %cst_38 {dimension_numbers = #tpu.dot_dimension_numbers<[1], [0], [0], [1], [0, 0, 1, 1], [], []>} : vector<256x16xbf16>, vector<16x3xbf16>, vector<256x3xf32> -> vector<256x3xf32>
    %40 = arith.addf %34, %39 : vector<256x3xf32>
    %c0_39 = arith.constant 0 : index
    %c2_40 = arith.constant 2 : index
    %c1_41 = arith.constant 1 : index
    %c0_42 = arith.constant 0 : index
    %41 = vector.load %arg1[%c0_39, %c2_40, %c1_41, %c0_42] : memref<1x18x18x16xbf16, #tpu.memory_space<vmem>>, vector<1x16x16x16xbf16>
    %42 = vector.shape_cast %41 : vector<1x16x16x16xbf16> to vector<16x16x16xbf16>
    %43 = vector.shape_cast %42 : vector<16x16x16xbf16> to vector<256x16xbf16>
    %c112 = arith.constant 112 : index
    %c0_43 = arith.constant 0 : index
    %44 = vector.load %arg2[%c112, %c0_43] : memref<144x3xbf16, #tpu.memory_space<vmem>>, vector<16x3xbf16>
    %cst_44 = arith.constant dense<0.000000e+00> : vector<256x3xf32>
    %45 = tpu.matmul %43, %44, %cst_44 {dimension_numbers = #tpu.dot_dimension_numbers<[1], [0], [0], [1], [0, 0, 1, 1], [], []>} : vector<256x16xbf16>, vector<16x3xbf16>, vector<256x3xf32> -> vector<256x3xf32>
    %46 = arith.addf %40, %45 : vector<256x3xf32>
    %c0_45 = arith.constant 0 : index
    %c2_46 = arith.constant 2 : index
    %c2_47 = arith.constant 2 : index
    %c0_48 = arith.constant 0 : index
    %47 = vector.load %arg1[%c0_45, %c2_46, %c2_47, %c0_48] : memref<1x18x18x16xbf16, #tpu.memory_space<vmem>>, vector<1x16x16x16xbf16>
    %48 = vector.shape_cast %47 : vector<1x16x16x16xbf16> to vector<16x16x16xbf16>
    %49 = vector.shape_cast %48 : vector<16x16x16xbf16> to vector<256x16xbf16>
    %c128 = arith.constant 128 : index
    %c0_49 = arith.constant 0 : index
    %50 = vector.load %arg2[%c128, %c0_49] : memref<144x3xbf16, #tpu.memory_space<vmem>>, vector<16x3xbf16>
    %cst_50 = arith.constant dense<0.000000e+00> : vector<256x3xf32>
    %51 = tpu.matmul %49, %50, %cst_50 {dimension_numbers = #tpu.dot_dimension_numbers<[1], [0], [0], [1], [0, 0, 1, 1], [], []>} : vector<256x16xbf16>, vector<16x3xbf16>, vector<256x3xf32> -> vector<256x3xf32>
    %52 = arith.addf %46, %51 : vector<256x3xf32>
    %c0_51 = arith.constant 0 : index
    %c0_52 = arith.constant 0 : index
    %53 = vector.load %arg3[%c0_51, %c0_52] : memref<1x3xf32, #tpu.memory_space<vmem>>, vector<1x3xf32>
    %54 = vector.broadcast %53 : vector<1x3xf32> to vector<256x3xf32>
    %55 = arith.addf %52, %54 : vector<256x3xf32>
    %c0_53 = arith.constant 0 : index
    %c0_54 = arith.constant 0 : index
    %c0_55 = arith.constant 0 : index
    %56 = vector.load %arg4[%c0_53, %c0_54, %c0_55] : memref<1x256x3xf32, #tpu.memory_space<vmem>>, vector<1x256x3xf32>
    %57 = vector.shape_cast %56 : vector<1x256x3xf32> to vector<256x3xf32>
    %58 = vector.shape_cast %55 : vector<256x3xf32> to vector<1x256x3xf32>
    tpu.vector_store %arg4[%c0_53, %c0_54, %c0_55], %58 {strides = array<i32>} : memref<1x256x3xf32, #tpu.memory_space<vmem>>, vector<1x256x3xf32>,
    return
  }
  func.func @transform_0(%arg0: i32) -> (i32, i32, i32, i32) {
    %c0_i32 = arith.constant 0 : i32
    %c0_i32_0 = arith.constant 0 : i32
    %c0_i32_1 = arith.constant 0 : i32
    %c0_i32_2 = arith.constant 0 : i32
    return %arg0, %c0_i32, %c0_i32_0, %c0_i32_1 : i32, i32, i32, i32
  }
  func.func @transform_1(%arg0: i32) -> (i32, i32) {
    %c0_i32 = arith.constant 0 : i32
    %c0_i32_0 = arith.constant 0 : i32
    %c0_i32_1 = arith.constant 0 : i32
    return %c0_i32, %c0_i32_0 : i32, i32
  }
  func.func @transform_2(%arg0: i32) -> (i32, i32) {
    %c0_i32 = arith.constant 0 : i32
    %c0_i32_0 = arith.constant 0 : i32
    %c0_i32_1 = arith.constant 0 : i32
    return %c0_i32, %c0_i32_0 : i32, i32
  }
  func.func @transform_3(%arg0: i32) -> (i32, i32, i32) {
    %c0_i32 = arith.constant 0 : i32
    %c0_i32_0 = arith.constant 0 : i32
    %c0_i32_1 = arith.constant 0 : i32
    return %arg0, %c0_i32, %c0_i32_0 : i32, i32, i32
  }
}

</mosaic_0001>

<bundles_post_ra>
// kernel: vae_forward.9
= control target key start
LH: loop header
LB: loop body
LE: loop exit
PB: predicated region body
PF: predicated region fallthrough
CT: control target
= control target key end

     0   :  { %s1029_s12 = smov 0   ;;  %s1168_s0 = inlined_call_operand.vmem [shape: bf16[2,5,5,64], index: 0, kind: input, shape index: {}]   ;;  %s1169_s1 = inlined_call_operand.vmem [shape: bf16[256,32], index: 1, kind: input, shape index: {}]   ;;  %s1170_s2 = inlined_call_operand.vmem [shape: f32[1,32], index: 2, kind: input, shape index: {}]   ;;  %s1171_s3 = inlined_call_operand.vmem [shape: bf16[2,16,32], index: 3, kind: output, shape index: {}]  }
   0x1 LB: > { %s842_s13 = sadd.s32 4294967295, %s1004_s12   ;;  %p846_p0 = scmp.ge.s32.totalorder %s1004_s12, 1  ;;  %s1004_s12 = sphi %s1029_s12, %s13_s12  }
   0x2   : > { %p137_p1 = scmp.lt.s32.totalorder %s1004_s12, 3 }
   0x4   : > { %p138_p2 = pnand %p846_p0, %p137_p1 }
   0x5   : > { %v974_v0 = vld [vmem:[%s1169_s1] sm:$0xff] (!%p138_p2)   ;;  %v1006_v1 = vmov (!%p138_p2), 0.0   ;;  %v976_v3 = vld [vmem:[%s1169_s1 + $0x8] sm:$0xff] (!%p138_p2)   ;;  %vm1007_vm0 = vmmov (!%p138_p2), 0   ;;  %p161_p3 = scmp.lt.s32.totalorder (!%p138_p2), %s842_s13, 1  ;;  %v300_v5 = vlaneseq (!%p138_p2)  ;;  %v978_v6 = vld [vmem:[%s1169_s1 + $0x10] sm:$0xff] (!%p138_p2)  }
   0x6   : > { %141 = sbr.rel (%p138_p2) target bundleno = 282 (0x11a), region = 32  ;;  %926 = vmatprep.subr.bf16.mxu1 (!%p138_p2), %v1006_v1  ;;  %914 = vmatprep.subr.bf16.mxu0 (!%p138_p2), %v1006_v1  ;;  %v975_v2 = vld [vmem:[%s1169_s1 + $0x20] sm:$0xff] (!%p138_p2)   ;;  %v977_v4 = vld [vmem:[%s1169_s1 + $0x28] sm:$0xff] (!%p138_p2)   ;;  %v979_v7 = vld [vmem:[%s1169_s1 + $0x30] sm:$0xff] (!%p138_p2)   ;;  %v1008_v10 = vmov (!%p138_p2), 1983009808  }
   0x7   : > { %927 = vmatpush3.bf16.msra.mxu1 (!%p138_p2), %v974_v0  ;;  %934 = vmatprep.mubr.msk.bf16.mxu1 (!%p138_p2), %vm1007_vm0, %v1006_v1  ;;  %v301_v8 = vshrl.u32 (!%p138_p2), %v300_v5, 7  ;;  %v980_v9 = vld [vmem:[%s1169_s1 + $0x18] sm:$0xff] (!%p138_p2)   ;;  %v298_v11 = vunpack.c.l.s4 (!%p138_p2), %v1008_v10  ;;  %vm336_vm1 = vcmask (!%p138_p2), 523264   ;;  %vm224_vm2 = vsmask.f32 (!%p138_p2), 1280  ;;  %v984_v22 = vld [vmem:[%s1169_s1 + $0x60] sm:$0xff] (!%p138_p2)  }
   0x8   : > { %915 = vmatpush3.bf16.msra.mxu0 (!%p138_p2), %v975_v2  ;;  %928 = vmatprep.subr.bf16.mxu1 (!%p138_p2), %v1006_v1  ;;  %v981_v12 = vld [vmem:[%s1169_s1 + $0x38] sm:$0xff] (!%p138_p2)   ;;  %vm225_vm3 = vsmask.f32 (!%p138_p2), 3336  ;;  %vm227_vm4 = vsmask.f32 (!%p138_p2), 5392  ;;  %v986_v46 = vld [vmem:[%s1169_s1 + $0x68] sm:$0xff] (!%p138_p2)  }
   0x9   : > { %916 = vmatprep.subr.bf16.mxu0 (!%p138_p2), %v1006_v1  ;;  %922 = vmatprep.mubr.msk.bf16.mxu0 (!%p138_p2), %vm1007_vm0, %v1006_v1  ;;  %v299_v14 = vunpack.c.0.s8 (!%p138_p2), %v298_v11  ;;  %vm226_vm5 = vmor (!%p138_p2), %vm224_vm2, %vm225_vm3  ;;  %vm229_vm6 = vsmask.f32 (!%p138_p2), 7448  ;;  %v988_v61 = vld [vmem:[%s1169_s1 + $0x70] sm:$0xff] (!%p138_p2)   ;;  %v990_v10 = vld [vmem:[%s1169_s1 + $0x78] sm:$0xff] (!%p138_p2)   ;;  %vm784_vm9 = vcmask (!%p138_p2), 257024  }
   0xa   : > { %vm1095_vm7 = vmor (!%p138_p2), %vm226_vm5, %vm227_vm4 }
   0xb   : > { %929 = vmatpush3.bf16.msra.mxu1 (!%p138_p2), %v976_v3  ;;  %v1085_v19 = vsub.s32 (!%p138_p2), %v299_v14, %v301_v8  ;;  %vm1108_vm8 = vmor (!%p138_p2), %vm1095_vm7, %vm229_vm6 }
   0xc   : > { %917 = vmatpush3.bf16.msra.mxu0 (!%p138_p2), %v977_v4  ;;  %930 = vmatprep.subr.bf16.mxu1 (!%p138_p2), %v1006_v1 }
   0xd   : > { %s1177_s13 = smov (!%p161_p3, %s842_s13), 1  ;;  %918 = vmatprep.subr.bf16.mxu0 %v1006_v1 }
   0xe   : > { %s962_s24 = smul.u32 20, %s1177_s13  ;;  %s891_s27 = sshll.u32 %s1177_s13, 3 }
   0xf   : > { %931 = vmatpush3.bf16.msra.mxu1 %v978_v6  ;;  %s170_s30 = scalar_lea.vmem %s1171_s3, %s891_s27 }
  0x10   : > { %s1074_s4 = scalar_lea.vmem %s1168_s0, %s962_s24  ;;  %919 = vmatpush3.bf16.msra.mxu0 %v979_v7  ;;  %932 = vmatprep.subr.bf16.mxu1 %v1006_v1 }
  0x11   : > { %v994_v13 = vld.sshfl [vmem:[%s1074_s4] sm:$0xf pattern:$0x76325410]  ;;  %920 = vmatprep.subr.bf16.mxu0 %v1006_v1 }
  0x12   : > { %v995_v15 = vld.sshfl [vmem:[%s1074_s4 + $0x8] sm:$0xf pattern:$0x76325410] }
  0x13   : > { %v850_v16 = vld.sshfl [vmem:[%s1074_s4] sm:$0x13 pattern:$0x76325410]  ;;  %933 = vmatpush3.bf16.msra.mxu1 %v980_v9  ;;  %v401_v30 = vcombine.low %v994_v13, %v995_v15 }
  0x14   : > { %v851_v17 = vld.sshfl [vmem:[%s1074_s4 + $0x4] sm:$0x13 pattern:$0x76325410]  ;;  %v199_v18 = vcombine.high %v850_v16, %v850_v16  ;;  %921 = vmatpush3.bf16.msra.mxu0 %v981_v12  ;;  %950 = vmatprep.subr.bf16.mxu1 %v1006_v1  ;;  %v232_v26 = vshrl.u32 %v850_v16, 16  ;;  %v235_v27 = vshll.u32 %v850_v16, 16 }
  0x15   : > { %v852_v20 = vld.sshfl [vmem:[%s1074_s4 + $0x8] sm:$0x13 pattern:$0x76325410]  ;;  %v207_v21 = vcombine.high %v851_v17, %v851_v17  ;;  %938 = vmatprep.subr.bf16.mxu0 %v1006_v1  ;;  %v246_v29 = vshrl.u32 %v851_v17, 16  ;;  %v249_v31 = vshll.u32 %v851_v17, 16 }
  0x16   : > { %v853_v23 = vld.sshfl [vmem:[%s1074_s4 + $0xc] sm:$0x13 pattern:$0x76325410]  ;;  %v215_v24 = vcombine.high %v852_v20, %v852_v20  ;;  %v241_v28 = vshll.u32 %v199_v18, 16  ;;  %v260_v33 = vshrl.u32 %v852_v20, 16  ;;  %935 = vmatmul.mubr.msk.bf16.vlgmr.msra.gmra.mrb[0].mxu1 %vm336_vm1, %v401_v30 }
  0x17   : > { %v223_v25 = vcombine.high %v853_v23, %v853_v23  ;;  %v255_v32 = vshll.u32 %v207_v21, 16  ;;  %v234_v35 = vrot.slane %v232_v26, 6  ;;  %v237_v36 = vrot.slane %v235_v27, 7  ;;  %951 = vmatpush3.bf16.msra.mxu1 %v984_v22  ;;  %958 = vmatprep.mubr.msk.bf16.mxu1 %vm1007_vm0, %v1006_v1  ;;  %v985_v18 = vld [vmem:[%s1169_s1 + $0x40] sm:$0xff]   ;;  %v989_v30 = vld [vmem:[%s1169_s1 + $0x50] sm:$0xff]  }
  0x18   : > { %v248_v37 = vrot.slane %v246_v29, 6  ;;  %v243_v38 = vrot.slane %v241_v28, 7  ;;  %v251_v39 = vrot.slane %v249_v31, 7  ;;  %v262_v40 = vrot.slane %v260_v33, 6  ;;  %952 = vmatprep.subr.bf16.mxu1 %v1006_v1 }
  0x19   : > { %v263_v41 = vshll.u32 %v852_v20, 16  ;;  %v238_v42 = vor.u32 %v237_v36, %v234_v35  ;;  %v269_v43 = vshll.u32 %v215_v24, 16  ;;  %v274_v44 = vshrl.u32 %v853_v23, 16  ;;  %v987_v24 = vld [vmem:[%s1169_s1 + $0x48] sm:$0xff]  }
  0x1a   : > { %v277_v45 = vshll.u32 %v853_v23, 16  ;;  %v252_v48 = vor.u32 %v251_v39, %v248_v37  ;;  %v257_v49 = vrot.slane %v255_v32, 7  ;;  %v283_v51 = vshll.u32 %v223_v25, 16  ;;  %v991_v32 = vld [vmem:[%s1169_s1 + $0x58] sm:$0xff]  }
  0x1b   : > { %v265_v50 = vrot.slane %v263_v41, 7  ;;  %v239_v52 = vrot.slane %v238_v42, 2  ;;  %v276_v53 = vrot.slane %v274_v44, 6  ;;  %v271_v57 = vrot.slane %v269_v43, 7  ;;  %953 = vmatpush3.bf16.msra.mxu1 %v986_v46 }
  0x1c   : > { %v279_v54 = vrot.slane %v277_v45, 7  ;;  %v253_v55 = vrot.slane %v252_v48, 2  ;;  %v285_v60 = vrot.slane %v283_v51, 7  ;;  %954 = vmatprep.subr.bf16.mxu1 %v1006_v1 }
  0x1d   : > { %v266_v56 = vor.u32 %v265_v50, %v262_v40  ;;  %v244_v58 = vsel %vm1108_vm8, %v239_v52, %v243_v38  ;;  %v880_v3 = vld.sshfl [vmem:[%s1074_s4 + $0x10] sm:$0x13 pattern:$0x76325410] }
  0x1e   : > { %v280_v59 = vor.u32 %v279_v54, %v276_v53  ;;  %v258_v62 = vsel %vm1108_vm8, %v253_v55, %v257_v49  ;;  %v613_v5 = vcombine.high %v880_v3, %v880_v3  ;;  %v657_v6 = vshrl.u32 %v880_v3, 16  ;;  %v996_v28 = vld.sshfl [vmem:[%s1074_s4 + $0x4] sm:$0xf pattern:$0x76325410] }
  0x1f   : > { %v267_v63 = vrot.slane %v266_v56, 2  ;;  %v295_v2 = vcombine.low %v244_v58, %v258_v62  ;;  %v660_v7 = vshll.u32 %v880_v3, 16  ;;  %955 = vmatpush3.bf16.msra.mxu1 %v988_v61  ;;  %v997_v29 = vld.sshfl [vmem:[%s1074_s4 + $0xc] sm:$0xf pattern:$0x76325410] }
  0x20   : > { %v281_v0 = vrot.slane %v280_v59, 2  ;;  %956 = vmatprep.subr.bf16.mxu1 %v1006_v1  ;;  %v659_v12 = vrot.slane %v657_v6, 6  ;;  %v666_v14 = vshll.u32 %v613_v5, 16  ;;  %v886_v49 = vld [vmem:[%s1170_s2] ss:$0 sm:$0xff] }
  0x21   : > { %v272_v4 = vsel %vm1108_vm8, %v267_v63, %v271_v57  ;;  %v303_v9 = vrot.slane %v295_v2, %v1085_v19  ;;  %v662_v13 = vrot.slane %v660_v7, 7 }
  0x22   : > { %v286_v8 = vsel %vm1108_vm8, %v281_v0, %v285_v60  ;;  %v668_v17 = vrot.slane %v666_v14, 7  ;;  %v678_v20 = vcombine.low %v258_v62, %v272_v4 }
  0x23   : > { %v296_v11 = vcombine.low %v272_v4, %v286_v8  ;;  %v663_v16 = vor.u32 %v662_v13, %v659_v12  ;;  %957 = vmatpush3.bf16.msra.mxu1 %v990_v10 }
  0x24   : > { %v686_v26 = vrot.slane %v678_v20, %v1085_v19 }
  0x25   : > { %v310_v15 = vrot.slane %v296_v11, %v1085_v19  ;;  %v664_v22 = vrot.slane %v663_v16, 2 }
  0x27   : > { %v311_v21 = vcombine.low %v303_v9, %v310_v15  ;;  %v669_v23 = vsel %vm1108_vm8, %v664_v22, %v668_v17 }
  0x28   : > { %v679_v25 = vcombine.low %v286_v8, %v669_v23 }
  0x29   : > { %923 = vmatmul.mubr.msk.bf16.vlgmr.msra.gmra.mrb[0].mxu0 %vm336_vm1, %v311_v21 }
  0x2a   : > { %939 = vmatpush3.bf16.msra.mxu0 %v985_v18  ;;  %946 = vmatprep.mubr.msk.bf16.mxu0 %vm1007_vm0, %v1006_v1  ;;  %v693_v27 = vrot.slane %v679_v25, %v1085_v19  ;;  %v503_v19 = vcombine.low %v996_v28, %v997_v29 }
  0x2b   : > { %940 = vmatprep.subr.bf16.mxu0 %v1006_v1 }
  0x2c   : > { %v694_v31 = vcombine.low %v686_v26, %v693_v27 }
  0x2e   : > { %941 = vmatpush3.bf16.msra.mxu0 %v987_v24  ;;  %959 = vmatmul.mubr.msk.bf16.vlgmr.msra.gmra.mrb[4].mxu1 %vm336_vm1, %v694_v31 }
  0x2f   : > { %942 = vmatprep.subr.bf16.mxu0 %v1006_v1 }
  0x32   : > { %943 = vmatpush3.bf16.msra.mxu0 %v989_v30 }
  0x33   : > { %944 = vmatprep.subr.bf16.mxu0 %v1006_v1 }
  0x36   : > { %945 = vmatpush3.bf16.msra.mxu0 %v991_v32 }
  0x39   : > { %947 = vmatmul.mubr.msk.bf16.vlgmr.msra.gmra.mrb[4].mxu0 %vm336_vm1, %v503_v19 }
  0xe9   : > { %v463_v33 = vpop.f32.mrb[0].mxu1 }
  0xea   : > { %v936_v34 = vpop.f32.mrb[1].mxu1 }
  0xeb   : > { %v466_v35 = vpop.f32.mrb[2].mxu1 }
  0xec   : > { %v937_v36 = vpop.f32.mrb[3].mxu1 }
  0xfc   : > { %v374_v37 = vpop.f32.mrb[0].mxu0 }
  0xfd   : > { %v464_v38 = vadd.f32 %v463_v33, %v374_v37  ;;  %v924_v39 = vpop.f32.mrb[1].mxu0 }
  0xfe   : > { %v377_v40 = vpop.f32.mrb[2].mxu0 }
  0xff   : > { %v467_v41 = vadd.f32 %v466_v35, %v377_v40  ;;  %v925_v42 = vpop.f32.mrb[3].mxu0 }
 0x101   : > { %v756_v43 = vpop.f32.mrb[4].mxu1 }
 0x102   : > { %v960_v44 = vpop.f32.mrb[5].mxu1 }
 0x103   : > { %v759_v45 = vpop.f32.mrb[6].mxu1 }
 0x104   : > { %v961_v46 = vpop.f32.mrb[7].mxu1 }
 0x10c   : > { %v565_v1 = vpop.f32.mrb[4].mxu0 }
 0x10d   : > { %v572_v47 = vadd.f32 %v565_v1, %v464_v38  ;;  %v948_v48 = vpop.f32.mrb[5].mxu0 }
 0x10e   : > { %v568_v50 = vpop.f32.mrb[6].mxu0 }
 0x10f   : > { %v763_v51 = vadd.f32 %v756_v43, %v572_v47  ;;  %v573_v52 = vadd.f32 %v568_v50, %v467_v41  ;;  %v949_v53 = vpop.f32.mrb[7].mxu0 }
 0x111   : > { %v772_v54 = vadd.f32 %v886_v49, %v763_v51  ;;  %v764_v55 = vadd.f32 %v759_v45, %v573_v52 }
 0x113   : > { %v774_v56 = vmax.f32 %v772_v54, 0.0  ;;  %v773_v57 = vadd.f32 %v886_v49, %v764_v55 }
 0x115   : > { %v892_v58 = vpack.c.bf16 %v774_v56, %v774_v56  ;;  %v775_v59 = vmax.f32 %v773_v57, 0.0 }
 0x117   : > { %785 = vst.msk [vmem:[%s170_s30] sm:$0xf] %vm784_vm9, %v892_v58  ;;  %v893_v60 = vpack.c.bf16 %v775_v59, %v775_v59 }
 0x119   : > { %786 = vst.msk [vmem:[%s170_s30 + $0x4] sm:$0xf] %vm784_vm9, %v893_v60 }
 0x11a PF: > { %s13_s12 = sadd.s32 1, %s1004_s12  }
 0x11b   : > { %p10_p4 = scmp.ge.s32.totalorder %s13_s12, 4  }
 0x11d   :  { %12 = sbr.rel (!%p10_p4) target bundleno = 1 (0x1), region = 63 }

// kernel: vae_forward.8
= control target key start
LH: loop header
LB: loop body
LE: loop exit
PB: predicated region body
PF: predicated region fallthrough
CT: control target
= control target key end

     0   :  { %s1216_s12 = smov 0   ;;  %s1413_s0 = inlined_call_operand.vmem [shape: bf16[2,9,9,12], index: 0, kind: input, shape index: {}]   ;;  %s1414_s1 = inlined_call_operand.vmem [shape: bf16[48,16], index: 1, kind: input, shape index: {}]   ;;  %s1415_s2 = inlined_call_operand.vmem [shape: f32[1,16], index: 2, kind: input, shape index: {}]   ;;  %s1416_s3 = inlined_call_operand.vmem [shape: bf16[2,64,16], index: 3, kind: output, shape index: {}]  }
   0x1 LB: > { %s991_s13 = sadd.s32 4294967295, %s1194_s12   ;;  %p995_p0 = scmp.ge.s32.totalorder %s1194_s12, 1  ;;  %s1194_s12 = sphi %s1216_s12, %s13_s12  }
   0x2   : > { %p137_p1 = scmp.lt.s32.totalorder %s1194_s12, 3 }
   0x4   : > { %p138_p2 = pnand %p995_p0, %p137_p1 }
   0x5   : > { %vm338_vm0 = vcmask (!%p138_p2), 1045504   ;;  %p161_p3 = scmp.lt.s32.totalorder (!%p138_p2), %s991_s13, 1  ;;  %v1176_v0 = vld [vmem:[%s1414_s1 + $0xc] sm:$0x3f] (!%p138_p2)   ;;  %v1179_v1 = vld [vmem:[%s1414_s1 + $0x4] sm:$0xfc] (!%p138_p2)  }
   0x6   : > { %141 = sbr.rel (%p138_p2) target bundleno = 295 (0x127), region = 32  ;;  %1165 = vmatprep.subr.msk.bf16.mxu0 (!%p138_p2), %vm338_vm0, %v1176_v0  ;;  %v561_v2 = vsel (!%p138_p2), %vm338_vm0, %v1176_v0, 0  ;;  %v324_v3 = vrot.slane (!%p138_p2), %v1179_v1, 2  ;;  %v1181_v4 = vld [vmem:[%s1414_s1] sm:$0x3f] (!%p138_p2)   ;;  %vm325_vm1 = vcmask (!%p138_p2), 97280  }
   0x7   : > { %1120 = vmatpush3.bf16.msra.mxu0 (!%p138_p2), %v561_v2  ;;  %vm190_vm2 = vsmask.f32 (!%p138_p2), 3328  ;;  %vm191_vm3 = vsmask.f32 (!%p138_p2), 7440  ;;  %v1183_v8 = vld [vmem:[%s1414_s1 + $0x10] sm:$0xfc] (!%p138_p2)  }
   0x8   : > { %1163 = vmatprep.subr.msk.bf16.mxu1 (!%p138_p2), %vm338_vm0, %v324_v3  ;;  %v340_v5 = vsel (!%p138_p2), %vm338_vm0, %v324_v3, 0  ;;  %v783_v27 = vrot.slane (!%p138_p2), %v1183_v8, 2  ;;  %v1272_v29 = vsel (!%p138_p2), %vm338_vm0, %v1181_v4, 0  ;;  %vm1281_vm4 = vmor (!%p138_p2), %vm190_vm2, %vm191_vm3  ;;  %v1059_v34 = vld [vmem:[%s1415_s2] ss:$0 sm:$0xff] (!%p138_p2)  ;;  %vm927_vm5 = vcmask (!%p138_p2), 125952  }
   0x9   : > { %1100 = vmatpush3.bf16.msra.mxu1 (!%p138_p2), %v340_v5 }
   0xa   : > { %1164 = vmatprep.subr.msk.bf16.mxu1 (!%p138_p2), %vm338_vm0, %v1181_v4  ;;  %1166 = vmatprep.subr.msk.bf16.mxu0 (!%p138_p2), %vm338_vm0, %v783_v27  ;;  %v797_v56 = vsel (!%p138_p2), %vm338_vm0, %v783_v27, 0 }
   0xd   : > { %s1420_s13 = smov (!%p161_p3, %s991_s13), 1 }
   0xe   : > { %s1167_s18 = smul.u32 72, %s1420_s13  ;;  %s1070_s28 = sshll.u32 %s1420_s13, 5 }
   0xf   : > { %s1392_s4 = scalar_lea.vmem %s1416_s3, %s1070_s28 }
  0x10   : > { %s1241_s23 = scalar_lea.vmem %s1413_s0, %s1167_s18 }
  0x11   : > { %v1177_v6 = vld [vmem:[%s1241_s23 + $0x8] ss:$8 sps:$4 sm:$0xff]   ;;  %v1178_v7 = vld [vmem:[%s1241_s23 + $0x18] ss:$8 sps:$4 sm:$0xff]   ;;  %v182_v12 = vld [vmem:[%s1241_s23 + $0x4] sm:$0x1] }
  0x12   : > { %1121 = vmatprep.mubr.msk.bf16.mxu0 %vm325_vm1, %v1177_v6  ;;  %v1180_v9 = vld [vmem:[%s1241_s23 + $0x28] ss:$8 sps:$4 sm:$0xff]   ;;  %v1255_v10 = vld [vmem:[%s1241_s23] sm:$0xf]  ;;  %v183_v13 = vld [vmem:[%s1241_s23 + $0xc] sm:$0x1] }
  0x13   : > { %1122 = vmatmul.mubr.msk.bf16.vlgmr.msra.gmra.mrb[0].mxu0 %vm325_vm1, %v1178_v7  ;;  %v1258_v11 = vld [vmem:[%s1241_s23 + $0x8] sm:$0xf]  ;;  %v194_v14 = vshrl.u32 %v1255_v10, 16  ;;  %v197_v15 = vshll.u32 %v1255_v10, 16  ;;  %v203_v16 = vshll.u32 %v182_v12, 16  ;;  %v217_v19 = vshll.u32 %v183_v13, 16 }
  0x14   : > { %1125 = vmatprep.mubr.msk.bf16.mxu0 %vm325_vm1, %v1180_v9  ;;  %v208_v17 = vshrl.u32 %v1258_v11, 16  ;;  %v211_v18 = vshll.u32 %v1258_v11, 16  ;;  %v1182_v24 = vld [vmem:[%s1241_s23 + $0x38] ss:$8 sps:$4 sm:$0xff]   ;;  %v1269_v28 = vld [vmem:[%s1241_s23 + $0x10] sm:$0xf]  ;;  %1130 = vmatpush3.bf16.msra.mxu0 %v797_v56 }
  0x15   : > { %v196_v20 = vrot.slane %v194_v14, 4  ;;  %v199_v21 = vrot.slane %v197_v15, 5  ;;  %v205_v22 = vrot.slane %v203_v16, 5  ;;  %v219_v26 = vrot.slane %v217_v19, 5  ;;  %v1275_v31 = vld [vmem:[%s1241_s23 + $0x18] sm:$0xf] }
  0x16   : > { %v210_v23 = vrot.slane %v208_v17, 4  ;;  %v213_v25 = vrot.slane %v211_v18, 5  ;;  %v184_v32 = vld [vmem:[%s1241_s23 + $0x14] sm:$0x1]  ;;  %v185_v33 = vld [vmem:[%s1241_s23 + $0x1c] sm:$0x1] }
  0x17   : > { %v200_v30 = vor.u32 %v199_v21, %v196_v20  ;;  %v222_v36 = vshrl.u32 %v1269_v28, 16  ;;  %v225_v37 = vshll.u32 %v1269_v28, 16  ;;  %v231_v38 = vshll.u32 %v184_v32, 16  ;;  %v1034_v43 = vld [vmem:[%s1241_s23 + $0x8] sm:$0xf] }
  0x18   : > { %v214_v35 = vor.u32 %v213_v25, %v210_v23  ;;  %v236_v40 = vshrl.u32 %v1275_v31, 16  ;;  %v239_v41 = vshll.u32 %v1275_v31, 16  ;;  %v245_v42 = vshll.u32 %v185_v33, 16  ;;  %v1035_v48 = vld [vmem:[%s1241_s23 + $0xc] sm:$0x1] }
  0x19   : > { %v201_v39 = vrot.slane %v200_v30, 4  ;;  %v224_v45 = vrot.slane %v222_v36, 4  ;;  %v227_v46 = vrot.slane %v225_v37, 5  ;;  %v233_v47 = vrot.slane %v231_v38, 5  ;;  %v1036_v53 = vld [vmem:[%s1241_s23 + $0x10] sm:$0xf] }
  0x1a   : > { %v215_v44 = vrot.slane %v214_v35, 4  ;;  %v238_v50 = vrot.slane %v236_v40, 4  ;;  %v241_v51 = vrot.slane %v239_v41, 5  ;;  %v247_v52 = vrot.slane %v245_v42, 5  ;;  %v1037_v57 = vld [vmem:[%s1241_s23 + $0x14] sm:$0x1] }
  0x1b   : > { %1126 = vmatmul.mubr.msk.bf16.gmra.mrb[4].mxu0 %vm325_vm1, %v1182_v24  ;;  %v206_v49 = vsel %vm1281_vm4, %v201_v39, %v205_v22  ;;  %v228_v55 = vor.u32 %v227_v46, %v224_v45  ;;  %v653_v58 = vshrl.u32 %v1034_v43, 16  ;;  %v656_v61 = vshll.u32 %v1034_v43, 16  ;;  %v1301_v63 = vld [vmem:[%s1241_s23 + $0x20] sm:$0xf]  ;;  %v186_v8 = vld [vmem:[%s1241_s23 + $0x24] sm:$0x1] }
  0x1c   : > { %v220_v54 = vsel %vm1281_vm4, %v215_v44, %v219_v26  ;;  %v242_v60 = vor.u32 %v241_v51, %v238_v50  ;;  %v662_v62 = vshll.u32 %v1035_v48, 16  ;;  %v667_v2 = vshrl.u32 %v1036_v53, 16  ;;  %v1308_v14 = vld [vmem:[%s1241_s23 + $0x28] sm:$0xf]  ;;  %v187_v19 = vld [vmem:[%s1241_s23 + $0x2c] sm:$0x1] }
  0x1d   : > { %v999_v59 = vcombine.low %v206_v49, %v220_v54  ;;  %v229_v0 = vrot.slane %v228_v55, 4  ;;  %v655_v1 = vrot.slane %v653_v58, 4  ;;  %v670_v3 = vshll.u32 %v1036_v53, 16  ;;  %v1038_v21 = vld [vmem:[%s1241_s23 + $0x18] sm:$0xf] }
  0x1e   : > { %v243_v4 = vrot.slane %v242_v60, 4  ;;  %v658_v5 = vrot.slane %v656_v61, 5  ;;  %v664_v6 = vrot.slane %v662_v62, 5  ;;  %v676_v7 = vshll.u32 %v1037_v57, 16  ;;  %v1039_v37 = vld [vmem:[%s1241_s23 + $0x1c] sm:$0x1] }
  0x1f   : > { %1101 = vmatprep.mubr.msk.bf16.mxu1 %vm325_vm1, %v999_v59  ;;  %v234_v9 = vsel %vm1281_vm4, %v229_v0, %v233_v47  ;;  %v669_v12 = vrot.slane %v667_v2, 4  ;;  %v672_v13 = vrot.slane %v670_v3, 5  ;;  %v250_v15 = vshrl.u32 %v1301_v63, 16  ;;  %v1040_v43 = vld [vmem:[%s1241_s23 + $0x20] sm:$0xf] }
  0x20   : > { %v248_v16 = vsel %vm1281_vm4, %v243_v4, %v247_v52  ;;  %v659_v17 = vor.u32 %v658_v5, %v655_v1  ;;  %v678_v18 = vrot.slane %v676_v7, 5  ;;  %v253_v20 = vshll.u32 %v1301_v63, 16  ;;  %v1041_v44 = vld [vmem:[%s1241_s23 + $0x24] sm:$0x1]  ;;  %v1328_v49 = vld [vmem:[%s1241_s23 + $0x30] sm:$0xf] }
  0x21   : > { %v1000_v22 = vcombine.low %v234_v9, %v248_v16  ;;  %v673_v23 = vor.u32 %v672_v13, %v669_v12  ;;  %v252_v24 = vrot.slane %v250_v15, 4  ;;  %v259_v25 = vshll.u32 %v186_v8, 16  ;;  %v188_v57 = vld [vmem:[%s1241_s23 + $0x34] sm:$0x1]  ;;  %v1335_v61 = vld [vmem:[%s1241_s23 + $0x38] sm:$0xf] }
  0x22   : > { %v660_v26 = vrot.slane %v659_v17, 4  ;;  %v255_v27 = vrot.slane %v253_v20, 5  ;;  %v264_v30 = vshrl.u32 %v1308_v14, 16  ;;  %v267_v32 = vshll.u32 %v1308_v14, 16  ;;  %v189_v4 = vld [vmem:[%s1241_s23 + $0x3c] sm:$0x1] }
  0x23   : > { %1102 = vmatmul.mubr.msk.bf16.vlgmr.msra.gmra.mrb[0].mxu1 %vm325_vm1, %v1000_v22  ;;  %v674_v33 = vrot.slane %v673_v23, 4  ;;  %v261_v35 = vrot.slane %v259_v25, 5  ;;  %v273_v36 = vshll.u32 %v187_v19, 16  ;;  %v681_v38 = vshrl.u32 %v1038_v21, 16  ;;  %v1042_v9 = vld [vmem:[%s1241_s23 + $0x28] sm:$0xf] }
  0x24   : > { %1110 = vmatpush3.bf16.msra.mxu1 %v1272_v29  ;;  %v665_v39 = vsel %vm1281_vm4, %v660_v26, %v664_v6  ;;  %v256_v40 = vor.u32 %v255_v27, %v252_v24  ;;  %v266_v41 = vrot.slane %v264_v30, 4  ;;  %v269_v42 = vrot.slane %v267_v32, 5  ;;  %v1043_v17 = vld [vmem:[%s1241_s23 + $0x2c] sm:$0x1]  ;;  %v1044_v22 = vld [vmem:[%s1241_s23 + $0x30] sm:$0xf] }
  0x25   : > { %v679_v45 = vsel %vm1281_vm4, %v674_v33, %v678_v18  ;;  %v275_v46 = vrot.slane %v273_v36, 5  ;;  %v683_v47 = vrot.slane %v681_v38, 4  ;;  %v684_v48 = vshll.u32 %v1038_v21, 16  ;;  %v1045_v33 = vld [vmem:[%s1241_s23 + $0x34] sm:$0x1] }
  0x26   : > { %v1050_v50 = vcombine.low %v665_v39, %v679_v45  ;;  %v257_v29 = vrot.slane %v256_v40, 4  ;;  %v270_v51 = vor.u32 %v269_v42, %v266_v41  ;;  %v690_v52 = vshll.u32 %v1039_v37, 16  ;;  %v1046_v40 = vld [vmem:[%s1241_s23 + $0x38] sm:$0xf]  ;;  %v1047_v45 = vld [vmem:[%s1241_s23 + $0x3c] sm:$0x1] }
  0x27   : > { %v686_v53 = vrot.slane %v684_v48, 5  ;;  %v695_v54 = vshrl.u32 %v1040_v43, 16  ;;  %v698_v55 = vshll.u32 %v1040_v43, 16  ;;  %v704_v56 = vshll.u32 %v1041_v44, 16 }
  0x28   : > { %1131 = vmatprep.mubr.msk.bf16.mxu0 %vm325_vm1, %v1050_v50  ;;  %v262_v58 = vsel %vm1281_vm4, %v257_v29, %v261_v35  ;;  %v271_v59 = vrot.slane %v270_v51, 4  ;;  %v692_v60 = vrot.slane %v690_v52, 5  ;;  %v278_v62 = vshrl.u32 %v1328_v49, 16  ;;  %v1048_v29 = vld [vmem:[%s1241_s23 + $0x40] sm:$0xf] }
  0x29   : > { %v687_v0 = vor.u32 %v686_v53, %v683_v47  ;;  %v697_v1 = vrot.slane %v695_v54, 4  ;;  %v700_v2 = vrot.slane %v698_v55, 5  ;;  %v706_v3 = vrot.slane %v704_v56, 5 }
  0x2a   : > { %v276_v5 = vsel %vm1281_vm4, %v271_v59, %v275_v46  ;;  %v280_v6 = vrot.slane %v278_v62, 4  ;;  %v281_v7 = vshll.u32 %v1328_v49, 16  ;;  %v287_v8 = vshll.u32 %v188_v57, 16  ;;  %v1049_v57 = vld [vmem:[%s1241_s23 + $0x44] sm:$0x1] }
  0x2b   : > { %v1001_v12 = vcombine.low %v262_v58, %v276_v5  ;;  %v688_v13 = vrot.slane %v687_v0, 4  ;;  %v701_v15 = vor.u32 %v700_v2, %v697_v1  ;;  %v292_v16 = vshrl.u32 %v1335_v61, 16 }
  0x2c   : > { %v283_v18 = vrot.slane %v281_v7, 5  ;;  %v289_v19 = vrot.slane %v287_v8, 5  ;;  %v295_v20 = vshll.u32 %v1335_v61, 16  ;;  %v301_v21 = vshll.u32 %v189_v4, 16 }
  0x2d   : > { %1105 = vmatprep.mubr.msk.bf16.mxu1 %vm325_vm1, %v1001_v12  ;;  %v693_v23 = vsel %vm1281_vm4, %v688_v13, %v692_v60  ;;  %v702_v24 = vrot.slane %v701_v15, 4  ;;  %v294_v25 = vrot.slane %v292_v16, 4  ;;  %v709_v26 = vshrl.u32 %v1042_v9, 16 }
  0x2e   : > { %v284_v27 = vor.u32 %v283_v18, %v280_v6  ;;  %v297_v30 = vrot.slane %v295_v20, 5  ;;  %v303_v32 = vrot.slane %v301_v21, 5  ;;  %v712_v35 = vshll.u32 %v1042_v9, 16 }
  0x2f   : > { %v707_v36 = vsel %vm1281_vm4, %v702_v24, %v706_v3  ;;  %v711_v37 = vrot.slane %v709_v26, 4  ;;  %v718_v38 = vshll.u32 %v1043_v17, 16  ;;  %v723_v39 = vshrl.u32 %v1044_v22, 16 }
  0x30   : > { %v1051_v41 = vcombine.low %v693_v23, %v707_v36  ;;  %v285_v42 = vrot.slane %v284_v27, 4  ;;  %v298_v43 = vor.u32 %v297_v30, %v294_v25  ;;  %v714_v44 = vrot.slane %v712_v35, 5 }
  0x31   : > { %v725_v46 = vrot.slane %v723_v39, 4  ;;  %v726_v47 = vshll.u32 %v1044_v22, 16  ;;  %v732_v48 = vshll.u32 %v1045_v33, 16  ;;  %v1008_v50 = vcombine.low %v1255_v10, %v1258_v11 }
  0x32   : > { %1132 = vmatmul.mubr.msk.bf16.vlgmr.msra.gmra.mrb[0].mxu0 %vm325_vm1, %v1051_v41  ;;  %v290_v51 = vsel %vm1281_vm4, %v285_v42, %v289_v19  ;;  %v299_v52 = vrot.slane %v298_v43, 4  ;;  %v715_v53 = vor.u32 %v714_v44, %v711_v37  ;;  %v737_v54 = vshrl.u32 %v1046_v40, 16 }
  0x33   : > { %v720_v55 = vrot.slane %v718_v38, 5  ;;  %v728_v56 = vrot.slane %v726_v47, 5  ;;  %v740_v58 = vshll.u32 %v1046_v40, 16  ;;  %v746_v59 = vshll.u32 %v1047_v45, 16 }
  0x34   : > { %v304_v60 = vsel %vm1281_vm4, %v299_v52, %v303_v32  ;;  %v716_v62 = vrot.slane %v715_v53, 4  ;;  %v739_v0 = vrot.slane %v737_v54, 4  ;;  %v751_v10 = vshrl.u32 %v1048_v29, 16 }
  0x35   : > { %v1002_v11 = vcombine.low %v290_v51, %v304_v60  ;;  %v729_v1 = vor.u32 %v728_v56, %v725_v46  ;;  %v734_v2 = vrot.slane %v732_v48, 5  ;;  %v742_v3 = vrot.slane %v740_v58, 5 }
  0x36   : > { %v753_v4 = vrot.slane %v751_v10, 4  ;;  %v754_v5 = vshll.u32 %v1048_v29, 16  ;;  %v760_v6 = vshll.u32 %v1049_v57, 16  ;;  %v721_v7 = vsel %vm1281_vm4, %v716_v62, %v720_v55 }
  0x37   : > { %1106 = vmatmul.mubr.msk.bf16.gmra.mrb[4].mxu1 %vm325_vm1, %v1002_v11  ;;  %v730_v8 = vrot.slane %v729_v1, 4  ;;  %v743_v9 = vor.u32 %v742_v3, %v739_v0  ;;  %v748_v12 = vrot.slane %v746_v59, 5  ;;  %v1009_v20 = vcombine.low %v1269_v28, %v1275_v31 }
  0x38   : > { %1111 = vmatprep.mubr.msk.bf16.mxu1 %vm325_vm1, %v1008_v50  ;;  %v756_v13 = vrot.slane %v754_v5, 5  ;;  %v762_v19 = vrot.slane %v760_v6, 5  ;;  %v1010_v23 = vcombine.low %v1301_v63, %v1308_v14  ;;  %v1011_v28 = vcombine.low %v1328_v49, %v1335_v61 }
  0x39   : > { %v735_v15 = vsel %vm1281_vm4, %v730_v8, %v734_v2  ;;  %v744_v16 = vrot.slane %v743_v9, 4 }
  0x3a   : > { %v1052_v17 = vcombine.low %v721_v7, %v735_v15  ;;  %v757_v18 = vor.u32 %v756_v13, %v753_v4 }
  0x3b   : > { %v749_v21 = vsel %vm1281_vm4, %v744_v16, %v748_v12 }
  0x3c   : > { %1135 = vmatprep.mubr.msk.bf16.mxu0 %vm325_vm1, %v1052_v17  ;;  %v758_v22 = vrot.slane %v757_v18, 4 }
  0x3e   : > { %v763_v24 = vsel %vm1281_vm4, %v758_v22, %v762_v19 }
  0x3f   : > { %v1053_v25 = vcombine.low %v749_v21, %v763_v24  ;;  %1112 = vmatmul.mubr.msk.bf16.vlgmr.msra.gmra.mrb[0].mxu1 %vm325_vm1, %v1009_v20 }
  0x40   : > { %1115 = vmatprep.mubr.msk.bf16.mxu1 %vm325_vm1, %v1010_v23 }
  0x41   : > { %1136 = vmatmul.mubr.msk.bf16.gmra.mrb[4].mxu0 %vm325_vm1, %v1053_v25 }
  0x47   : > { %1116 = vmatmul.mubr.msk.bf16.gmra.mrb[4].mxu1 %vm325_vm1, %v1011_v28 }
 0x105   : > { %v1133_v31 = vpop.f32.mrb[0].mxu0 }
 0x106   : > { %v833_v26 = vpop.f32.mrb[1].mxu0 }
 0x107   : > { %v1134_v27 = vpop.f32.mrb[2].mxu0 }
 0x108   : > { %v836_v63 = vpop.f32.mrb[3].mxu0 }
 0x112   : > { %v1113_v14 = vpop.f32.mrb[0].mxu1 }
 0x113   : > { %v1139_v30 = vadd.f32 %v1133_v31, %v1113_v14  ;;  %v481_v32 = vpop.f32.mrb[1].mxu1 }
 0x114   : > { %v1137_v33 = vpop.f32.mrb[4].mxu0  ;;  %v1140_v35 = vadd.f32 %v833_v26, %v481_v32  ;;  %v1114_v36 = vpop.f32.mrb[2].mxu1 }
 0x115   : > { %v881_v37 = vadd.f32 %v1139_v30, %v1059_v34  ;;  %v849_v38 = vpop.f32.mrb[5].mxu0  ;;  %v1141_v49 = vadd.f32 %v1134_v27, %v1114_v36  ;;  %v484_v61 = vpop.f32.mrb[3].mxu1 }
 0x116   : > { %v879_v39 = vadd.f32 %v1140_v35, %v1059_v34  ;;  %v1138_v40 = vpop.f32.mrb[6].mxu0  ;;  %v1142_v41 = vadd.f32 %v836_v63, %v484_v61 }
 0x117   : > { %v889_v42 = vmax.f32 %v881_v37, 0.0  ;;  %v882_v43 = vadd.f32 %v1141_v49, %v1059_v34  ;;  %v852_v44 = vpop.f32.mrb[7].mxu0 }
 0x118   : > { %v887_v45 = vmax.f32 %v879_v39, 0.0  ;;  %v880_v46 = vadd.f32 %v1142_v41, %v1059_v34 }
 0x119   : > { %v1073_v47 = vpack.c.bf16 %v889_v42, %v889_v42  ;;  %v890_v48 = vmax.f32 %v882_v43, 0.0 }
 0x11a   : > { %v1071_v50 = vpack.c.bf16 %v887_v45, %v887_v45  ;;  %v888_v29 = vmax.f32 %v880_v46, 0.0  ;;  %v1117_v51 = vpop.f32.mrb[4].mxu1 }
 0x11b   : > { %930 = vst.msk [vmem:[%s1392_s4 + $0x8] sm:$0xf] %vm927_vm5, %v1073_v47  ;;  %v1074_v52 = vpack.c.bf16 %v890_v48, %v890_v48  ;;  %v1143_v53 = vadd.f32 %v1137_v33, %v1117_v51  ;;  %v497_v54 = vpop.f32.mrb[5].mxu1 }
 0x11c   : > { %928 = vst.msk [vmem:[%s1392_s4] sm:$0xf] %vm927_vm5, %v1071_v50  ;;  %v1072_v55 = vpack.c.bf16 %v888_v29, %v888_v29  ;;  %v1144_v56 = vadd.f32 %v849_v38, %v497_v54  ;;  %v1118_v57 = vpop.f32.mrb[6].mxu1 }
 0x11d   : > { %931 = vst.msk [vmem:[%s1392_s4 + $0xc] sm:$0xf] %vm927_vm5, %v1074_v52  ;;  %v885_v58 = vadd.f32 %v1143_v53, %v1059_v34  ;;  %v1145_v59 = vadd.f32 %v1138_v40, %v1118_v57  ;;  %v500_v60 = vpop.f32.mrb[7].mxu1 }
 0x11e   : > { %929 = vst.msk [vmem:[%s1392_s4 + $0x4] sm:$0xf] %vm927_vm5, %v1072_v55  ;;  %v883_v62 = vadd.f32 %v1144_v56, %v1059_v34  ;;  %v1146_v0 = vadd.f32 %v852_v44, %v500_v60 }
 0x11f   : > { %v893_v10 = vmax.f32 %v885_v58, 0.0  ;;  %v886_v11 = vadd.f32 %v1145_v59, %v1059_v34 }
 0x120   : > { %v891_v1 = vmax.f32 %v883_v62, 0.0  ;;  %v884_v2 = vadd.f32 %v1146_v0, %v1059_v34 }
 0x121   : > { %v1077_v3 = vpack.c.bf16 %v893_v10, %v893_v10  ;;  %v894_v4 = vmax.f32 %v886_v11, 0.0 }
 0x122   : > { %v1075_v5 = vpack.c.bf16 %v891_v1, %v891_v1  ;;  %v892_v6 = vmax.f32 %v884_v2, 0.0 }
 0x123   : > { %934 = vst.msk [vmem:[%s1392_s4 + $0x18] sm:$0xf] %vm927_vm5, %v1077_v3  ;;  %v1078_v7 = vpack.c.bf16 %v894_v4, %v894_v4 }
 0x124   : > { %932 = vst.msk [vmem:[%s1392_s4 + $0x10] sm:$0xf] %vm927_vm5, %v1075_v5  ;;  %v1076_v8 = vpack.c.bf16 %v892_v6, %v892_v6 }
 0x125   : > { %935 = vst.msk [vmem:[%s1392_s4 + $0x1c] sm:$0xf] %vm927_vm5, %v1078_v7 }
 0x126   : > { %933 = vst.msk [vmem:[%s1392_s4 + $0x14] sm:$0xf] %vm927_vm5, %v1076_v8 }
 0x127 PF: > { %s13_s12 = sadd.s32 1, %s1194_s12  }
 0x128   : > { %p10_p4 = scmp.ge.s32.totalorder %s13_s12, 4  }
 0x12a   :  { %12 = sbr.rel (!%p10_p4) target bundleno = 1 (0x1), region = 63 }

// kernel: vae_forward.10
= control target key start
LH: loop header
LB: loop body
LE: loop exit
PB: predicated region body
PF: predicated region fallthrough
CT: control target
= control target key end

     0   :  { %vm58_vm0 = vcmask 261120   ;;  %v1582_v4 = vmov 0.0   ;;  %vm1583_vm1 = vmmov 0   ;;  %s1584_s27 = smov 96   ;;  %vm119_vm2 = vcmask 64512   ;;  %s1586_s28 = smov 88   ;;  %s1862_s1 = inlined_call_operand.vmem [shape: bf16[32,96], index: 1, kind: input, shape index: {}]   ;;  %s1863_s0 = inlined_call_operand.vmem [shape: bf16[2,16,32], index: 0, kind: input, shape index: {}]   ;;  %s1864_s2 = inlined_call_operand.vmem [shape: f32[1,96], index: 2, kind: input, shape index: {}]   ;;  %s1865_s3 = inlined_call_operand.vmem [shape: bf16[32,32], index: 3, kind: input, shape index: {}]   ;;  %s1866_s4 = inlined_call_operand.vmem [shape: f32[1,32], index: 4, kind: input, shape index: {}]   ;;  %s1867_s5 = inlined_call_operand.vmem [shape: bf16[2,16,32], index: 5, kind: output, shape index: {}]  }
   0x1   :  { %v1508_v0 = vld [vmem:[%s1862_s1] sm:$0xff]   ;;  %v1509_v1 = vld [vmem:[%s1862_s1 + $0x8] sm:$0xff]   ;;  %1358 = vmatprep.subr.bf16.mxu1 %v1582_v4  ;;  %1360 = vmatprep.mubr.msk.bf16.mxu1 %vm1583_vm1, %v1582_v4  ;;  %vm221_vm3 = vcmask 130048   ;;  %s1587_s29 = smov 120   ;;  %s1588_s30 = smov 56   ;;  %vm1156_vm4 = vcmask 195584  }
   0x2   :  { %1350 = vmatprep.subr.bf16.mxu0 %v1508_v0  ;;  %v21_v2 = vld [vmem:[%s1863_s0] sm:$0xff]   ;;  %v1640_v3 = vld [vmem:[%s1863_s0 + $0x8] sm:$0xff]   ;;  %s1589_s6 = smov 80   ;;  %s1590_s7 = smov 112   ;;  %vm1265_vm5 = vcmask 257024  }
   0x3   :  { %1351 = vmatpush3.bf16.msra.mxu0 %v1508_v0  ;;  %1354 = vmatprep.mubr.msk.bf16.mxu0 %vm58_vm0, %v21_v2  ;;  %v1274_v6 = vld [vmem:[%s1864_s2] ss:$0 sm:$0xff]  ;;  %s1585_s2 = smov 64   ;;  %s1591_s8 = smov 48  }
   0x4   :  { %1352 = vmatprep.subr.bf16.mxu0 %v1509_v1  ;;  %s1592_s9 = smov 72   ;;  %s1593_s10 = smov 104  }
   0x5   :  { %s1594_s11 = smov 40   ;;  %s1595_s12 = smov 8  }
   0x6   :  { %s1596_s13 = smov 16   ;;  %s1597_s18 = smov 24  }
   0x7   :  { %1353 = vmatpush3.bf16.msra.mxu0 %v1509_v1 }
   0x8   :  { %1364 = vmatprep.subr.bf16.mxu0 %v1582_v4 }
   0xa   :  { %1355 = vmatmul.mubr.msk.bf16.vlgmr.msra.gmra.mrb[0].mxu0 %vm58_vm0, %v1640_v3 }
   0xb   :  { %1366 = vmatprep.mubr.msk.bf16.mxu0 %vm1583_vm1, %v1582_v4 }
  0xdd   :  { %v1356_v5 = vpop.f32.mrb[0].mxu0 }
  0xde   :  { %v99_v7 = vpop.f32.mrb[1].mxu0  ;;  %v108_v9 = vadd.f32 %v1356_v5, %v1274_v6 }
  0xdf   :  { %v1357_v8 = vpop.f32.mrb[2].mxu0  ;;  %v100_v12 = vadd.f32 %v1274_v6, %v99_v7 }
  0xe0   :  { %v111_v10 = vadd.f32 %v1357_v8, %v1274_v6  ;;  %v102_v11 = vpop.f32.mrb[3].mxu0 }
  0xe1   :  { %v103_v13 = vadd.f32 %v1274_v6, %v102_v11 }
  0xe2   :  { %v1654_v14 = vpack.c.bf16 %v111_v10, %v108_v9 }
  0xe3   :  { %v1656_v15 = vpack.c.bf16 %v103_v13, %v100_v12 }
  0xe5   :  { %117 = vrot.lane.b32.xlu0 %v1656_v15, %s1584_s27 }
  0xe9   :  { %168 = vrot.lane.b32.xlu0 %v1654_v14, %s1584_s27 }
 0x157   :  { %v118_v16 = vpop.permute.xlu0 %117 }
 0x158   :  { %v124_v17 = vsel %vm119_vm2, %v118_v16, 0 }
 0x159   :  { %1359 = vmatpush3.bf16.xpose.msra.mxu1 %v124_v17 }
 0x15a   :  { %1370 = vmatprep.subr.bf16.mxu1 %v1582_v4 }
 0x15b   :  { %v169_v18 = vpop.permute.xlu0 %168 }
 0x15c   :  { %v174_v19 = vsel %vm119_vm2, %v169_v18, 0 }
 0x15d   :  { %1365 = vmatpush3.bf16.xpose.msra.mxu0 %v174_v19 }
 0x15e   :  { %1376 = vmatprep.subr.bf16.mxu0 %v1582_v4 }
 0x160   :  { %1361 = vmatmul.mubr.msk.bf16.vlgmr.msra.gmra.mrb[0].mxu1 %vm119_vm2, %v1656_v15 }
 0x161   :  { %1372 = vmatprep.mubr.msk.bf16.mxu1 %vm1583_vm1, %v1582_v4 }
 0x164   :  { %1367 = vmatmul.mubr.msk.bf16.vlgmr.msra.gmra.mrb[4].mxu0 %vm119_vm2, %v1654_v14 }
 0x165   :  { %1378 = vmatprep.mubr.msk.bf16.mxu0 %vm1583_vm1, %v1582_v4 }
 0x233   :  { %v160_v20 = vpop.f32.mrb[0].mxu1 }
 0x234   :  { %v217_v21 = vmul.f32 0.35355338, %v160_v20  ;;  %v1362_v22 = vpop.f32.mrb[1].mxu1 }
 0x235   :  { %v163_v23 = vpop.f32.mrb[2].mxu1 }
 0x236   :  { %v218_v24 = vmul.f32 0.35355338, %v163_v23  ;;  %v1363_v25 = vpop.f32.mrb[3].mxu1  ;;  %v222_v26 = vsel %vm221_vm3, %v217_v21, -inf }
 0x237   :  { %223 = vmax.xlane.f32.xlu1 %v222_v26  ;;  %v210_v27 = vpop.f32.mrb[4].mxu0 }
 0x238   :  { %v219_v28 = vmul.f32 0.35355338, %v210_v27  ;;  %v1368_v29 = vpop.f32.mrb[5].mxu0  ;;  %v225_v33 = vsel %vm221_vm3, %v218_v24, -inf }
 0x239   :  { %v213_v30 = vpop.f32.mrb[6].mxu0 }
 0x23a   :  { %v220_v31 = vmul.f32 0.35355338, %v213_v30  ;;  %v1369_v32 = vpop.f32.mrb[7].mxu0  ;;  %v228_v34 = vsel %vm221_vm3, %v219_v28, -inf }
 0x23b   :  { %226 = vmax.xlane.f32.xlu1 %v225_v33  ;;  %229 = vmax.xlane.f32.xlu0 %v228_v34 }
 0x23c   :  { %v231_v35 = vsel %vm221_vm3, %v220_v31, -inf }
 0x23f   :  { %232 = vmax.xlane.f32.xlu1 %v231_v35 }
 0x250   :  { %268 = vrot.lane.b32.xlu1 %v1656_v15, %s1585_s2 }
 0x251   :  { %315 = vrot.lane.b32.xlu0 %v1654_v14, %s1585_s2 }
 0x254   :  { %364 = vrot.lane.b32.xlu1 %v1656_v15, %s1586_s28 }
 0x258   :  { %415 = vrot.lane.b32.xlu1 %v1654_v14, %s1586_s28 }
 0x2c4   :  { %v224_v36 = vpop.xlane.xlu1 %223 }
 0x2c5   :  { %v234_v37 = vsub.f32 %v217_v21, %v224_v36 }
 0x2c7   :  { %v238_v42 = vmul.f32 1.442695, %v234_v37 }
 0x2c8   :  { %v227_v38 = vpop.xlane.xlu1 %226  ;;  %v230_v39 = vpop.xlane.xlu0 %229 }
 0x2c9   :  { %v236_v40 = vsub.f32 %v219_v28, %v230_v39  ;;  %v235_v46 = vsub.f32 %v218_v24, %v227_v38 }
 0x2cb   :  { %v242_v41 = vmul.f32 1.442695, %v236_v40  ;;  %v240_v49 = vmul.f32 1.442695, %v235_v46 }
 0x2cc   :  { %v316_v43 = vpop.permute.xlu0 %315  ;;  %v233_v44 = vpop.xlane.xlu1 %232 }
 0x2cd   :  { %v237_v45 = vsub.f32 %v220_v31, %v233_v44  ;;  %1377 = vmatpush3.bf16.msra.mxu0 %v316_v43  ;;  %1516 = vpow2.f32 %v242_v41 }
 0x2ce   :  { %1388 = vmatprep.subr.bf16.mxu0 %v1582_v4  ;;  %1518 = vpow2.f32 %v238_v42 }
 0x2cf   :  { %v244_v47 = vmul.f32 1.442695, %v237_v45 }
 0x2d0   :  { %v269_v48 = vpop.permute.xlu1 %268 }
 0x2d1   :  { %1371 = vmatpush3.bf16.msra.mxu1 %v269_v48  ;;  %1520 = vpow2.f32 %v244_v47 }
 0x2d2   :  { %1382 = vmatprep.subr.bf16.mxu1 %v1582_v4  ;;  %1522 = vpow2.f32 %v240_v49 }
 0x2d4   :  { %v365_v58 = vpop.permute.xlu1 %364 }
 0x2d5   :  { %v370_v16 = vsel %vm119_vm2, %v365_v58, 0 }
 0x2d7   :  { %v1517_v50 = vpop.eup %1516 }
 0x2d8   :  { %v252_v51 = vsel %vm221_vm3, %v1517_v50, 0.0  ;;  %v1519_v52 = vpop.eup %1518  ;;  %v416_v59 = vpop.permute.xlu1 %415 }
 0x2d9   :  { %253 = vadd.xlane.f32.xlu1 %v252_v51  ;;  %v246_v53 = vsel %vm221_vm3, %v1519_v52, 0.0  ;;  %v421_v9 = vsel %vm119_vm2, %v416_v59, 0 }
 0x2db   :  { %v1521_v54 = vpop.eup %1520 }
 0x2dc   :  { %v255_v55 = vsel %vm221_vm3, %v1521_v54, 0.0  ;;  %v1523_v56 = vpop.eup %1522 }
 0x2dd   :  { %247 = vadd.xlane.f32.xlu1 %v246_v53  ;;  %v249_v57 = vsel %vm221_vm3, %v1523_v56, 0.0 }
 0x2e1   :  { %256 = vadd.xlane.f32.xlu1 %v255_v55 }
 0x2e5   :  { %250 = vadd.xlane.f32.xlu1 %v249_v57 }
 0x2f6   :  { %362 = vrot.lane.b32.xlu1 %v1656_v15, %s1587_s29 }
 0x2fa   :  { %413 = vrot.lane.b32.xlu1 %v1654_v14, %s1587_s29 }
 0x366   :  { %v254_v60 = vpop.xlane.xlu1 %253 }
 0x367   :  { %1524 = vrcp.f32 %v254_v60 }
 0x36a   :  { %v248_v61 = vpop.xlane.xlu1 %247 }
 0x36e   :  { %v257_v62 = vpop.xlane.xlu1 %256 }
 0x36f   :  { %1526 = vrcp.f32 %v257_v62 }
 0x370   :  { %1528 = vrcp.f32 %v248_v61 }
 0x371   :  { %v1525_v0 = vpop.eup %1524 }
 0x372   :  { %v251_v63 = vpop.xlane.xlu1 %250  ;;  %v264_v2 = vmul.f32 %v1525_v0, %v1517_v50 }
 0x373   :  { %1530 = vrcp.f32 %v251_v63 }
 0x376   :  { %v363_v12 = vpop.permute.xlu1 %362 }
 0x379   :  { %v1527_v1 = vpop.eup %1526 }
 0x37a   :  { %v265_v5 = vmul.f32 %v1527_v1, %v1521_v54  ;;  %v1529_v6 = vpop.eup %1528  ;;  %v414_v17 = vpop.permute.xlu1 %413 }
 0x37b   :  { %v262_v10 = vmul.f32 %v1529_v6, %v1519_v52 }
 0x37c   :  { %v267_v7 = vpack.c.bf16 %v265_v5, %v264_v2 }
 0x37d   :  { %v1531_v8 = vpop.eup %1530 }
 0x37e   :  { %v263_v11 = vmul.f32 %v1531_v8, %v1523_v56  ;;  %1379 = vmatmul.mubr.msk.bf16.vlgmr.msra.gmra.mrb[8].mxu0 %vm221_vm3, %v267_v7 }
 0x37f   :  { %1389 = vmatpush3.bf16.xpose.msra.mxu0 %v421_v9  ;;  %1390 = vmatprep.mubr.msk.bf16.mxu0 %vm1583_vm1, %v1582_v4 }
 0x380   :  { %v266_v13 = vpack.c.bf16 %v263_v11, %v262_v10  ;;  %1400 = vmatprep.subr.bf16.mxu0 %v1582_v4 }
 0x382   :  { %1373 = vmatmul.mubr.msk.bf16.vlgmr.msra.gmra.mrb[4].mxu1 %vm221_vm3, %v266_v13 }
 0x383   :  { %1383 = vmatpush3.bf16.xpose.msra.mxu1 %v370_v16  ;;  %1384 = vmatprep.mubr.msk.bf16.mxu1 %vm1583_vm1, %v1582_v4 }
 0x384   :  { %1394 = vmatprep.subr.bf16.mxu1 %v1582_v4 }
 0x386   :  { %1391 = vmatmul.mubr.msk.bf16.vlgmr.msra.gmra.mrb[12].mxu0 %vm119_vm2, %v414_v17 }
 0x387   :  { %1402 = vmatprep.mubr.msk.bf16.mxu0 %vm1583_vm1, %v1582_v4 }
 0x38a   :  { %1385 = vmatmul.mubr.msk.bf16.vlgmr.msra.gmra.mrb[8].mxu1 %vm119_vm2, %v363_v12 }
 0x38b   :  { %1396 = vmatprep.mubr.msk.bf16.mxu1 %vm1583_vm1, %v1582_v4 }
 0x451   :  { %v1704_v18 = vpop.f32.mrb[8].mxu0 }
 0x452   :  { %v1380_v19 = vpop.f32.mrb[9].mxu0 }
 0x453   :  { %v1706_v20 = vpop.f32.mrb[10].mxu0 }
 0x454   :  { %v1381_v21 = vpop.f32.mrb[11].mxu0 }
 0x455   :  { %v1708_v22 = vpop.f32.mrb[4].mxu1 }
 0x456   :  { %v1374_v23 = vpop.f32.mrb[5].mxu1 }
 0x457   :  { %v1710_v24 = vpop.f32.mrb[6].mxu1 }
 0x458   :  { %v1375_v25 = vpop.f32.mrb[7].mxu1 }
 0x459   :  { %v457_v26 = vpop.f32.mrb[12].mxu0 }
 0x45a   :  { %v1392_v27 = vpop.f32.mrb[13].mxu0  ;;  %v466_v34 = vmul.f32 0.35355338, %v457_v26 }
 0x45b   :  { %v460_v28 = vpop.f32.mrb[14].mxu0 }
 0x45c   :  { %v1393_v29 = vpop.f32.mrb[15].mxu0  ;;  %v467_v39 = vmul.f32 0.35355338, %v460_v28  ;;  %v474_v40 = vsel %vm221_vm3, %v466_v34, -inf }
 0x45d   :  { %v406_v30 = vpop.f32.mrb[8].mxu1 }
 0x45e   :  { %v464_v31 = vmul.f32 0.35355338, %v406_v30  ;;  %v1386_v32 = vpop.f32.mrb[9].mxu1  ;;  %v477_v41 = vsel %vm221_vm3, %v467_v39, -inf }
 0x45f   :  { %v409_v33 = vpop.f32.mrb[10].mxu1 }
 0x460   :  { %v465_v35 = vmul.f32 0.35355338, %v409_v33  ;;  %v1387_v36 = vpop.f32.mrb[11].mxu1  ;;  %v468_v37 = vsel %vm221_vm3, %v464_v31, -inf }
 0x461   :  { %469 = vmax.xlane.f32.xlu0 %v468_v37 }
 0x462   :  { %v471_v38 = vsel %vm221_vm3, %v465_v35, -inf }
 0x463   :  { %472 = vmax.xlane.f32.xlu1 %v471_v38 }
 0x465   :  { %475 = vmax.xlane.f32.xlu0 %v474_v40 }
 0x469   :  { %478 = vmax.xlane.f32.xlu0 %v477_v41 }
 0x474   :  { %514 = vrot.lane.b32.xlu1 %v1656_v15, %s1588_s30 }
 0x4ee   :  { %v470_v42 = vpop.xlane.xlu0 %469 }
 0x4ef   :  { %v480_v44 = vsub.f32 %v464_v31, %v470_v42 }
 0x4f0   :  { %v473_v43 = vpop.xlane.xlu1 %472 }
 0x4f1   :  { %v484_v48 = vmul.f32 1.442695, %v480_v44  ;;  %v481_v49 = vsub.f32 %v465_v35, %v473_v43 }
 0x4f2   :  { %v476_v45 = vpop.xlane.xlu0 %475 }
 0x4f3   :  { %v482_v46 = vsub.f32 %v466_v34, %v476_v45  ;;  %v486_v53 = vmul.f32 1.442695, %v481_v49 }
 0x4f4   :  { %v515_v47 = vpop.permute.xlu1 %514 }
 0x4f5   :  { %v488_v50 = vmul.f32 1.442695, %v482_v46  ;;  %1395 = vmatpush3.bf16.msra.mxu1 %v515_v47 }
 0x4f6   :  { %v479_v51 = vpop.xlane.xlu0 %478  ;;  %1406 = vmatprep.subr.bf16.mxu1 %v1582_v4 }
 0x4f7   :  { %1532 = vpow2.f32 %v488_v50  ;;  %v483_v52 = vsub.f32 %v467_v39, %v479_v51 }
 0x4f8   :  { %1534 = vpow2.f32 %v484_v48 }
 0x4f9   :  { %v490_v54 = vmul.f32 1.442695, %v483_v52 }
 0x4fb   :  { %1536 = vpow2.f32 %v490_v54 }
 0x4fc   :  { %1538 = vpow2.f32 %v486_v53 }
 0x501   :  { %v1533_v55 = vpop.eup %1532 }
 0x502   :  { %v498_v56 = vsel %vm221_vm3, %v1533_v55, 0.0  ;;  %v1535_v57 = vpop.eup %1534 }
 0x503   :  { %499 = vadd.xlane.f32.xlu1 %v498_v56  ;;  %v492_v59 = vsel %vm221_vm3, %v1535_v57, 0.0 }
 0x505   :  { %v1537_v58 = vpop.eup %1536 }
 0x506   :  { %v501_v60 = vsel %vm221_vm3, %v1537_v58, 0.0  ;;  %v1539_v61 = vpop.eup %1538 }
 0x507   :  { %493 = vadd.xlane.f32.xlu1 %v492_v59  ;;  %502 = vadd.xlane.f32.xlu0 %v501_v60  ;;  %v495_v62 = vsel %vm221_vm3, %v1539_v61, 0.0 }
 0x50b   :  { %496 = vadd.xlane.f32.xlu0 %v495_v62 }
 0x518   :  { %610 = vrot.lane.b32.xlu1 %v1656_v15, %s1589_s6 }
 0x51c   :  { %661 = vrot.lane.b32.xlu1 %v1654_v14, %s1589_s6 }
 0x520   :  { %659 = vrot.lane.b32.xlu1 %v1654_v14, %s1590_s7 }
 0x521   :  { %561 = vrot.lane.b32.xlu0 %v1654_v14, %s1588_s30 }
 0x525   :  { %608 = vrot.lane.b32.xlu0 %v1656_v15, %s1590_s7 }
 0x590   :  { %v500_v63 = vpop.xlane.xlu1 %499 }
 0x591   :  { %1540 = vrcp.f32 %v500_v63 }
 0x594   :  { %v494_v0 = vpop.xlane.xlu1 %493  ;;  %v503_v1 = vpop.xlane.xlu0 %502 }
 0x595   :  { %1542 = vrcp.f32 %v503_v1 }
 0x596   :  { %1544 = vrcp.f32 %v494_v0 }
 0x598   :  { %v497_v2 = vpop.xlane.xlu0 %496  ;;  %v611_v5 = vpop.permute.xlu1 %610 }
 0x599   :  { %1546 = vrcp.f32 %v497_v2  ;;  %v616_v25 = vsel %vm119_vm2, %v611_v5, 0 }
 0x59b   :  { %v1541_v7 = vpop.eup %1540 }
 0x59c   :  { %v562_v6 = vpop.permute.xlu0 %561  ;;  %v510_v10 = vmul.f32 %v1541_v7, %v1533_v55  ;;  %v662_v12 = vpop.permute.xlu1 %661 }
 0x59d   :  { %1401 = vmatpush3.bf16.msra.mxu0 %v562_v6  ;;  %v667_v21 = vsel %vm119_vm2, %v662_v12, 0 }
 0x59e   :  { %1412 = vmatprep.subr.bf16.mxu0 %v1582_v4 }
 0x59f   :  { %v1543_v8 = vpop.eup %1542 }
 0x5a0   :  { %v1545_v9 = vpop.eup %1544  ;;  %v511_v11 = vmul.f32 %v1543_v8, %v1537_v58  ;;  %v660_v26 = vpop.permute.xlu1 %659 }
 0x5a1   :  { %v508_v17 = vmul.f32 %v1545_v9, %v1535_v57  ;;  %v609_v27 = vpop.permute.xlu0 %608 }
 0x5a2   :  { %v513_v16 = vpack.c.bf16 %v511_v11, %v510_v10 }
 0x5a3   :  { %v1547_v13 = vpop.eup %1546 }
 0x5a4   :  { %v509_v19 = vmul.f32 %v1547_v13, %v1539_v61  ;;  %1403 = vmatmul.mubr.msk.bf16.vlgmr.msra.gmra.mrb[16].mxu0 %vm221_vm3, %v513_v16 }
 0x5a5   :  { %1414 = vmatprep.mubr.msk.bf16.mxu0 %vm1583_vm1, %v1582_v4 }
 0x5a6   :  { %1413 = vmatpush3.bf16.xpose.msra.mxu0 %v667_v21  ;;  %v512_v23 = vpack.c.bf16 %v509_v19, %v508_v17 }
 0x5a7   :  { %1424 = vmatprep.subr.bf16.mxu0 %v1582_v4 }
 0x5a8   :  { %1397 = vmatmul.mubr.msk.bf16.vlgmr.msra.gmra.mrb[12].mxu1 %vm221_vm3, %v512_v23 }
 0x5a9   :  { %1407 = vmatpush3.bf16.xpose.msra.mxu1 %v616_v25  ;;  %1408 = vmatprep.mubr.msk.bf16.mxu1 %vm1583_vm1, %v1582_v4 }
 0x5aa   :  { %1418 = vmatprep.subr.bf16.mxu1 %v1582_v4 }
 0x5ad   :  { %1415 = vmatmul.mubr.msk.bf16.vlgmr.msra.gmra.mrb[20].mxu0 %vm119_vm2, %v660_v26 }
 0x5ae   :  { %1426 = vmatprep.mubr.msk.bf16.mxu0 %vm1583_vm1, %v1582_v4 }
 0x5b0   :  { %1409 = vmatmul.mubr.msk.bf16.vlgmr.msra.gmra.mrb[16].mxu1 %vm119_vm2, %v609_v27 }
 0x5b1   :  { %1420 = vmatprep.mubr.msk.bf16.mxu1 %vm1583_vm1, %v1582_v4 }
 0x677   :  { %v1746_v28 = vpop.f32.mrb[16].mxu0 }
 0x678   :  { %v1404_v29 = vpop.f32.mrb[17].mxu0 }
 0x679   :  { %v1748_v30 = vpop.f32.mrb[18].mxu0 }
 0x67a   :  { %v1483_v31 = vpack.i.bf16 %v1748_v30, %v1746_v28  ;;  %v1405_v32 = vpop.f32.mrb[19].mxu0 }
 0x67b   :  { %v1752_v33 = vpop.f32.mrb[12].mxu1 }
 0x67c   :  { %v1398_v34 = vpop.f32.mrb[13].mxu1 }
 0x67d   :  { %v1754_v35 = vpop.f32.mrb[14].mxu1 }
 0x67e   :  { %v1478_v36 = vpack.i.bf16 %v1754_v35, %v1752_v33  ;;  %v1399_v37 = vpop.f32.mrb[15].mxu1 }
 0x680   :  { %v703_v38 = vpop.f32.mrb[20].mxu0 }
 0x681   :  { %v1416_v39 = vpop.f32.mrb[21].mxu0  ;;  %v712_v46 = vmul.f32 0.35355338, %v703_v38 }
 0x682   :  { %v706_v40 = vpop.f32.mrb[22].mxu0 }
 0x683   :  { %v652_v41 = vpop.f32.mrb[16].mxu1  ;;  %v1417_v42 = vpop.f32.mrb[23].mxu0  ;;  %v713_v51 = vmul.f32 0.35355338, %v706_v40  ;;  %v720_v52 = vsel %vm221_vm3, %v712_v46, -inf }
 0x684   :  { %v710_v43 = vmul.f32 0.35355338, %v652_v41  ;;  %v1410_v44 = vpop.f32.mrb[17].mxu1 }
 0x685   :  { %v655_v45 = vpop.f32.mrb[18].mxu1  ;;  %v723_v53 = vsel %vm221_vm3, %v713_v51, -inf }
 0x686   :  { %v711_v47 = vmul.f32 0.35355338, %v655_v45  ;;  %v1411_v48 = vpop.f32.mrb[19].mxu1  ;;  %v714_v49 = vsel %vm221_vm3, %v710_v43, -inf }
 0x687   :  { %715 = vmax.xlane.f32.xlu0 %v714_v49 }
 0x688   :  { %v717_v50 = vsel %vm221_vm3, %v711_v47, -inf }
 0x689   :  { %718 = vmax.xlane.f32.xlu1 %v717_v50 }
 0x68b   :  { %721 = vmax.xlane.f32.xlu0 %v720_v52 }
 0x68f   :  { %724 = vmax.xlane.f32.xlu0 %v723_v53 }
 0x69a   :  { %760 = vrot.lane.b32.xlu1 %v1656_v15, %s1591_s8 }
 0x714   :  { %v716_v54 = vpop.xlane.xlu0 %715 }
 0x715   :  { %v726_v56 = vsub.f32 %v710_v43, %v716_v54 }
 0x716   :  { %v719_v55 = vpop.xlane.xlu1 %718 }
 0x717   :  { %v730_v60 = vmul.f32 1.442695, %v726_v56  ;;  %v727_v61 = vsub.f32 %v711_v47, %v719_v55 }
 0x718   :  { %v722_v57 = vpop.xlane.xlu0 %721 }
 0x719   :  { %v728_v58 = vsub.f32 %v712_v46, %v722_v57  ;;  %v732_v1 = vmul.f32 1.442695, %v727_v61 }
 0x71a   :  { %v761_v59 = vpop.permute.xlu1 %760 }
 0x71b   :  { %v734_v62 = vmul.f32 1.442695, %v728_v58  ;;  %1419 = vmatpush3.bf16.msra.mxu1 %v761_v59 }
 0x71c   :  { %v725_v63 = vpop.xlane.xlu0 %724  ;;  %1430 = vmatprep.subr.bf16.mxu1 %v1582_v4 }
 0x71d   :  { %1548 = vpow2.f32 %v734_v62  ;;  %v729_v0 = vsub.f32 %v713_v51, %v725_v63 }
 0x71e   :  { %1550 = vpow2.f32 %v730_v60 }
 0x71f   :  { %v736_v2 = vmul.f32 1.442695, %v729_v0 }
 0x721   :  { %1552 = vpow2.f32 %v736_v2 }
 0x722   :  { %1554 = vpow2.f32 %v732_v1 }
 0x727   :  { %v1549_v5 = vpop.eup %1548 }
 0x728   :  { %v744_v6 = vsel %vm221_vm3, %v1549_v5, 0.0  ;;  %v1551_v7 = vpop.eup %1550 }
 0x729   :  { %745 = vadd.xlane.f32.xlu1 %v744_v6  ;;  %v738_v9 = vsel %vm221_vm3, %v1551_v7, 0.0 }
 0x72b   :  { %v1553_v8 = vpop.eup %1552 }
 0x72c   :  { %v747_v10 = vsel %vm221_vm3, %v1553_v8, 0.0  ;;  %v1555_v11 = vpop.eup %1554 }
 0x72d   :  { %739 = vadd.xlane.f32.xlu1 %v738_v9  ;;  %748 = vadd.xlane.f32.xlu0 %v747_v10  ;;  %v741_v12 = vsel %vm221_vm3, %v1555_v11, 0.0 }
 0x731   :  { %742 = vadd.xlane.f32.xlu0 %v741_v12 }
 0x73e   :  { %856 = vrot.lane.b32.xlu1 %v1656_v15, %s1592_s9 }
 0x742   :  { %907 = vrot.lane.b32.xlu1 %v1654_v14, %s1592_s9 }
 0x746   :  { %905 = vrot.lane.b32.xlu1 %v1654_v14, %s1593_s10 }
 0x747   :  { %807 = vrot.lane.b32.xlu0 %v1654_v14, %s1591_s8 }
 0x74b   :  { %854 = vrot.lane.b32.xlu0 %v1656_v15, %s1593_s10 }
 0x7b6   :  { %v746_v13 = vpop.xlane.xlu1 %745 }
 0x7b7   :  { %1556 = vrcp.f32 %v746_v13 }
 0x7ba   :  { %v740_v16 = vpop.xlane.xlu1 %739  ;;  %v749_v17 = vpop.xlane.xlu0 %748 }
 0x7bb   :  { %1558 = vrcp.f32 %v749_v17 }
 0x7bc   :  { %1560 = vrcp.f32 %v740_v16 }
 0x7be   :  { %v743_v19 = vpop.xlane.xlu0 %742  ;;  %v857_v21 = vpop.permute.xlu1 %856 }
 0x7bf   :  { %1562 = vrcp.f32 %v743_v19  ;;  %v862_v43 = vsel %vm119_vm2, %v857_v21, 0 }
 0x7c1   :  { %v1557_v25 = vpop.eup %1556 }
 0x7c2   :  { %v808_v23 = vpop.permute.xlu0 %807  ;;  %v756_v29 = vmul.f32 %v1557_v25, %v1549_v5  ;;  %v908_v34 = vpop.permute.xlu1 %907 }
 0x7c3   :  { %1425 = vmatpush3.bf16.msra.mxu0 %v808_v23  ;;  %v913_v41 = vsel %vm119_vm2, %v908_v34, 0 }
 0x7c4   :  { %1436 = vmatprep.subr.bf16.mxu0 %v1582_v4 }
 0x7c5   :  { %v1559_v26 = vpop.eup %1558 }
 0x7c6   :  { %v1561_v27 = vpop.eup %1560  ;;  %v757_v32 = vmul.f32 %v1559_v26, %v1553_v8  ;;  %v906_v44 = vpop.permute.xlu1 %905 }
 0x7c7   :  { %v754_v39 = vmul.f32 %v1561_v27, %v1551_v7  ;;  %v855_v45 = vpop.permute.xlu0 %854 }
 0x7c8   :  { %v759_v38 = vpack.c.bf16 %v757_v32, %v756_v29 }
 0x7c9   :  { %v1563_v37 = vpop.eup %1562 }
 0x7ca   :  { %v755_v40 = vmul.f32 %v1563_v37, %v1555_v11  ;;  %1427 = vmatmul.mubr.msk.bf16.vlgmr.msra.gmra.mrb[24].mxu0 %vm221_vm3, %v759_v38 }
 0x7cb   :  { %1438 = vmatprep.mubr.msk.bf16.mxu0 %vm1583_vm1, %v1582_v4 }
 0x7cc   :  { %1437 = vmatpush3.bf16.xpose.msra.mxu0 %v913_v41  ;;  %v758_v42 = vpack.c.bf16 %v755_v40, %v754_v39 }
 0x7cd   :  { %1448 = vmatprep.subr.bf16.mxu0 %v1582_v4 }
 0x7ce   :  { %1421 = vmatmul.mubr.msk.bf16.vlgmr.msra.gmra.mrb[20].mxu1 %vm221_vm3, %v758_v42 }
 0x7cf   :  { %1431 = vmatpush3.bf16.xpose.msra.mxu1 %v862_v43  ;;  %1432 = vmatprep.mubr.msk.bf16.mxu1 %vm1583_vm1, %v1582_v4 }
 0x7d0   :  { %1442 = vmatprep.subr.bf16.mxu1 %v1582_v4 }
 0x7d3   :  { %1439 = vmatmul.mubr.msk.bf16.vlgmr.msra.gmra.mrb[28].mxu0 %vm119_vm2, %v906_v44 }
 0x7d4   :  { %1450 = vmatprep.mubr.msk.bf16.mxu0 %vm1583_vm1, %v1582_v4 }
 0x7d6   :  { %1433 = vmatmul.mubr.msk.bf16.vlgmr.msra.gmra.mrb[24].mxu1 %vm119_vm2, %v855_v45 }
 0x7d7   :  { %1444 = vmatprep.mubr.msk.bf16.mxu1 %vm1583_vm1, %v1582_v4 }
 0x89d   :  { %v1792_v46 = vpop.f32.mrb[24].mxu0 }
 0x89e   :  { %v1428_v47 = vpop.f32.mrb[25].mxu0 }
 0x89f   :  { %v1794_v48 = vpop.f32.mrb[26].mxu0 }
 0x8a0   :  { %v1493_v49 = vpack.i.bf16 %v1794_v48, %v1792_v46  ;;  %v1429_v50 = vpop.f32.mrb[27].mxu0 }
 0x8a1   :  { %v800_v51 = vpop.f32.mrb[20].mxu1  ;;  %v1513_v50 = vld [vmem:[%s1865_s3 + $0x8] sm:$0xff]  }
 0x8a2   :  { %v1422_v52 = vpop.f32.mrb[21].mxu1 }
 0x8a3   :  { %v803_v53 = vpop.f32.mrb[22].mxu1 }
 0x8a4   :  { %v1488_v54 = vpack.i.bf16 %v803_v53, %v800_v51  ;;  %v1423_v55 = vpop.f32.mrb[23].mxu1 }
 0x8a6   :  { %v949_v56 = vpop.f32.mrb[28].mxu0 }
 0x8a7   :  { %v1440_v57 = vpop.f32.mrb[29].mxu0  ;;  %v958_v63 = vmul.f32 0.35355338, %v949_v56 }
 0x8a8   :  { %v952_v58 = vpop.f32.mrb[30].mxu0 }
 0x8a9   :  { %v898_v59 = vpop.f32.mrb[24].mxu1  ;;  %v1441_v60 = vpop.f32.mrb[31].mxu0  ;;  %v959_v6 = vmul.f32 0.35355338, %v952_v58  ;;  %v966_v7 = vsel %vm221_vm3, %v958_v63, -inf }
 0x8aa   :  { %v956_v4 = vmul.f32 0.35355338, %v898_v59  ;;  %v1434_v61 = vpop.f32.mrb[25].mxu1 }
 0x8ab   :  { %v901_v62 = vpop.f32.mrb[26].mxu1  ;;  %v969_v8 = vsel %vm221_vm3, %v959_v6, -inf }
 0x8ac   :  { %v957_v0 = vmul.f32 0.35355338, %v901_v62  ;;  %v1435_v1 = vpop.f32.mrb[27].mxu1  ;;  %v960_v2 = vsel %vm221_vm3, %v956_v4, -inf }
 0x8ad   :  { %961 = vmax.xlane.f32.xlu0 %v960_v2 }
 0x8ae   :  { %v963_v5 = vsel %vm221_vm3, %v957_v0, -inf }
 0x8af   :  { %964 = vmax.xlane.f32.xlu1 %v963_v5 }
 0x8b1   :  { %967 = vmax.xlane.f32.xlu0 %v966_v7 }
 0x8b5   :  { %970 = vmax.xlane.f32.xlu0 %v969_v8 }
 0x93a   :  { %v962_v9 = vpop.xlane.xlu0 %961 }
 0x93b   :  { %v972_v10 = vsub.f32 %v956_v4, %v962_v9 }
 0x93c   :  { %v965_v11 = vpop.xlane.xlu1 %964 }
 0x93d   :  { %v976_v16 = vmul.f32 1.442695, %v972_v10  ;;  %v973_v17 = vsub.f32 %v957_v0, %v965_v11 }
 0x93e   :  { %v968_v12 = vpop.xlane.xlu0 %967 }
 0x93f   :  { %v974_v13 = vsub.f32 %v958_v63, %v968_v12  ;;  %v978_v25 = vmul.f32 1.442695, %v973_v17 }
 0x941   :  { %v980_v19 = vmul.f32 1.442695, %v974_v13 }
 0x942   :  { %v971_v21 = vpop.xlane.xlu0 %970 }
 0x943   :  { %1564 = vpow2.f32 %v980_v19  ;;  %v975_v23 = vsub.f32 %v959_v6, %v971_v21 }
 0x944   :  { %1566 = vpow2.f32 %v976_v16 }
 0x945   :  { %v982_v26 = vmul.f32 1.442695, %v975_v23 }
 0x947   :  { %1568 = vpow2.f32 %v982_v26 }
 0x948   :  { %1570 = vpow2.f32 %v978_v25 }
 0x94d   :  { %v1565_v27 = vpop.eup %1564 }
 0x94e   :  { %v990_v29 = vsel %vm221_vm3, %v1565_v27, 0.0  ;;  %v1567_v32 = vpop.eup %1566 }
 0x94f   :  { %991 = vadd.xlane.f32.xlu1 %v990_v29  ;;  %v984_v37 = vsel %vm221_vm3, %v1567_v32, 0.0 }
 0x951   :  { %v1569_v34 = vpop.eup %1568 }
 0x952   :  { %v993_v38 = vsel %vm221_vm3, %v1569_v34, 0.0  ;;  %v1571_v39 = vpop.eup %1570 }
 0x953   :  { %985 = vadd.xlane.f32.xlu1 %v984_v37  ;;  %994 = vadd.xlane.f32.xlu0 %v993_v38  ;;  %v987_v40 = vsel %vm221_vm3, %v1571_v39, 0.0 }
 0x957   :  { %988 = vadd.xlane.f32.xlu0 %v987_v40  ;;  %v1580_v40 = vld [vmem:[%s1863_s0] sm:$0xff]  }
 0x964   :  { %1006 = vrot.lane.b32.xlu1 %v1656_v15, %s1594_s11 }
 0x968   :  { %1479 = vrot.lane.b32.xlu1 %v1478_v36, %s1595_s12 }
 0x96c   :  { %1484 = vrot.lane.b32.xlu1 %v1483_v31, %s1595_s12 }
 0x96d   :  { %1053 = vrot.lane.b32.xlu0 %v1654_v14, %s1594_s11 }
 0x970   :  { %1494 = vrot.lane.b32.xlu1 %v1493_v49, %s1596_s13  ;;  %v1512_v49 = vld [vmem:[%s1865_s3] sm:$0xff]  }
 0x971   :  { %1489 = vrot.lane.b32.xlu0 %v1488_v54, %s1596_s13 }
 0x9dc   :  { %v992_v41 = vpop.xlane.xlu1 %991 }
 0x9dd   :  { %1572 = vrcp.f32 %v992_v41  ;;  %v1241_v41 = vunpack.c.l.bf16 %v1580_v40 }
 0x9e0   :  { %v986_v42 = vpop.xlane.xlu1 %985  ;;  %v995_v43 = vpop.xlane.xlu0 %994 }
 0x9e1   :  { %1574 = vrcp.f32 %v995_v43 }
 0x9e2   :  { %1576 = vrcp.f32 %v986_v42 }
 0x9e4   :  { %v1007_v15 = vpop.permute.xlu1 %1006  ;;  %v989_v44 = vpop.xlane.xlu0 %988 }
 0x9e5   :  { %1578 = vrcp.f32 %v989_v44  ;;  %1443 = vmatpush3.bf16.msra.mxu1 %v1007_v15  ;;  %v1581_v44 = vld [vmem:[%s1863_s0 + $0x8] sm:$0xff]  }
 0x9e6   :  { %1454 = vmatprep.subr.bf16.mxu1 %v1512_v49 }
 0x9e7   :  { %v1573_v35 = vpop.eup %1572 }
 0x9e8   :  { %v1054_v33 = vpop.permute.xlu0 %1053  ;;  %v1002_v31 = vmul.f32 %v1573_v35, %v1565_v27  ;;  %v1480_v4 = vpop.permute.xlu1 %1479  ;;  %v1242_v35 = vunpack.c.h.bf16 %v1580_v40 }
 0x9e9   :  { %1449 = vmatpush3.bf16.msra.mxu0 %v1054_v33  ;;  %v1482_v6 = vunpack.i.h.bf16 %v1480_v4  ;;  %v1481_v7 = vunpack.i.l.bf16 %v1480_v4  ;;  %v1244_v33 = vunpack.c.h.bf16 %v1581_v44 }
 0x9eb   :  { %v1575_v28 = vpop.eup %1574  ;;  %v1149_v21 = vsel %vm119_vm2, %v1710_v24, %v1482_v6 }
 0x9ec   :  { %v1577_v30 = vpop.eup %1576  ;;  %v1003_v14 = vmul.f32 %v1575_v28, %v1569_v34  ;;  %v1485_v61 = vpop.permute.xlu1 %1484 }
 0x9ed   :  { %v1000_v46 = vmul.f32 %v1577_v30, %v1567_v32  ;;  %v1487_v63 = vunpack.i.h.bf16 %v1485_v61  ;;  %v1486_v0 = vunpack.i.l.bf16 %v1485_v61  ;;  %v1490_v1 = vpop.permute.xlu0 %1489 }
 0x9ee   :  { %v1005_v45 = vpack.c.bf16 %v1003_v14, %v1002_v31  ;;  %v1492_v8 = vunpack.i.h.bf16 %v1490_v1  ;;  %v1491_v9 = vunpack.i.l.bf16 %v1490_v1 }
 0x9ef   :  { %v1579_v36 = vpop.eup %1578  ;;  %v1151_v11 = vsel %vm119_vm2, %v1706_v20, %v1487_v63  ;;  %v1150_v12 = vsel %vm119_vm2, %v1704_v18, %v1486_v0  ;;  %v1148_v20 = vsel %vm119_vm2, %v1708_v22, %v1481_v7  ;;  %v1297_v22 = vld [vmem:[%s1866_s4] ss:$0 sm:$0xff] }
 0x9f0   :  { %v1001_v47 = vmul.f32 %v1579_v36, %v1571_v39  ;;  %1451 = vmatmul.mubr.msk.bf16.vlgmr.msra.gmra.mrb[32].mxu0 %vm221_vm3, %v1005_v45  ;;  %v1495_v62 = vpop.permute.xlu1 %1494  ;;  %v1153_v32 = vsel %vm221_vm3, %v1149_v21, %v1492_v8  ;;  %v1152_v34 = vsel %vm221_vm3, %v1148_v20, %v1491_v9  ;;  %v1243_v39 = vunpack.c.l.bf16 %v1640_v3 }
 0x9f1   :  { %v1497_v2 = vunpack.i.h.bf16 %v1495_v62  ;;  %v1496_v5 = vunpack.i.l.bf16 %v1495_v62 }
 0x9f2   :  { %v1004_v48 = vpack.c.bf16 %v1001_v47, %v1000_v46 }
 0x9f3   :  { %v1154_v17 = vsel %vm221_vm3, %v1150_v12, %v1496_v5  ;;  %v1155_v19 = vsel %vm221_vm3, %v1151_v11, %v1497_v2 }
 0x9f4   :  { %1445 = vmatmul.mubr.msk.bf16.vlgmr.msra.gmra.mrb[28].mxu1 %vm221_vm3, %v1004_v48 }
 0x9f5   :  { %1455 = vmatpush3.bf16.msra.mxu1 %v1512_v49 }
 0x9f6   :  { %1456 = vmatprep.subr.bf16.mxu1 %v1513_v50 }
 0x9f9   :  { %1457 = vmatpush3.bf16.msra.mxu1 %v1513_v50 }
 0xac3   :  { %v1093_v51 = vpop.f32.mrb[32].mxu0 }
 0xac4   :  { %v1452_v52 = vpop.f32.mrb[33].mxu0 }
 0xac5   :  { %v1096_v53 = vpop.f32.mrb[34].mxu0 }
 0xac6   :  { %v1503_v54 = vpack.i.bf16 %v1096_v53, %v1093_v51  ;;  %v1453_v55 = vpop.f32.mrb[35].mxu0 }
 0xac7   :  { %v1046_v56 = vpop.f32.mrb[28].mxu1 }
 0xac8   :  { %v1446_v57 = vpop.f32.mrb[29].mxu1  ;;  %1504 = vrot.lane.b32.xlu1 %v1503_v54, %s1597_s18 }
 0xac9   :  { %v1049_v58 = vpop.f32.mrb[30].mxu1 }
 0xaca   :  { %v1498_v59 = vpack.i.bf16 %v1049_v58, %v1046_v56  ;;  %v1447_v60 = vpop.f32.mrb[31].mxu1 }
 0xacc   :  { %1499 = vrot.lane.b32.xlu0 %v1498_v59, %s1597_s18 }
 0xb3a   :  { %v1505_v10 = vpop.permute.xlu1 %1504 }
 0xb3b   :  { %v1507_v13 = vunpack.i.h.bf16 %v1505_v10  ;;  %v1506_v16 = vunpack.i.l.bf16 %v1505_v10 }
 0xb3d   :  { %v1160_v23 = vsel %vm1156_vm4, %v1155_v19, %v1507_v13  ;;  %v1159_v25 = vsel %vm1156_vm4, %v1154_v17, %v1506_v16 }
 0xb3e   :  { %v1500_v26 = vpop.permute.xlu0 %1499  ;;  %v1162_v27 = vpack.c.bf16 %v1160_v23, %v1159_v25 }
 0xb3f   :  { %v1502_v29 = vunpack.i.h.bf16 %v1500_v26  ;;  %v1501_v18 = vunpack.i.l.bf16 %v1500_v26 }
 0xb41   :  { %v1157_v37 = vsel %vm1156_vm4, %v1152_v34, %v1501_v18  ;;  %v1158_v38 = vsel %vm1156_vm4, %v1153_v32, %v1502_v29 }
 0xb42   :  { %v1161_v24 = vpack.c.bf16 %v1158_v38, %v1157_v37 }
 0xb44   :  { %1458 = vmatprep.mubr.msk.bf16.mxu1 %vm58_vm0, %v1161_v24 }
 0xb45   :  { %1459 = vmatmul.mubr.msk.bf16.vlgmr.msra.gmra.mrb[32].mxu1 %vm58_vm0, %v1162_v27 }
 0xc18   :  { %v1460_v42 = vpop.f32.mrb[32].mxu1 }
 0xc19   :  { %v1235_v43 = vadd.f32 %v1460_v42, %v1297_v22  ;;  %v1226_v15 = vpop.f32.mrb[33].mxu1 }
 0xc1a   :  { %v1227_v28 = vadd.f32 %v1297_v22, %v1226_v15  ;;  %v1461_v30 = vpop.f32.mrb[34].mxu1 }
 0xc1b   :  { %v1247_v31 = vadd.f32 %v1243_v39, %v1235_v43  ;;  %v1238_v14 = vadd.f32 %v1461_v30, %v1297_v22  ;;  %v1229_v36 = vpop.f32.mrb[35].mxu1 }
 0xc1c   :  { %v1245_v3 = vadd.f32 %v1241_v41, %v1227_v28  ;;  %v1230_v45 = vadd.f32 %v1297_v22, %v1229_v36 }
 0xc1d   :  { %v1308_v46 = vpack.c.bf16 %v1247_v31, %v1247_v31  ;;  %v1248_v47 = vadd.f32 %v1244_v33, %v1238_v14 }
 0xc1e   :  { %v1306_v48 = vpack.c.bf16 %v1245_v3, %v1245_v3  ;;  %v1246_v49 = vadd.f32 %v1242_v35, %v1230_v45 }
 0xc1f   :  { %1268 = vst.msk [vmem:[%s1867_s5 + $0x8] sm:$0xf] %vm1265_vm5, %v1308_v46  ;;  %v1309_v50 = vpack.c.bf16 %v1248_v47, %v1248_v47 }
 0xc20   :  { %1266 = vst.msk [vmem:[%s1867_s5] sm:$0xf] %vm1265_vm5, %v1306_v48  ;;  %v1307_v51 = vpack.c.bf16 %v1246_v49, %v1246_v49 }
 0xc21   :  { %1269 = vst.msk [vmem:[%s1867_s5 + $0xc] sm:$0xf] %vm1265_vm5, %v1309_v50 }
 0xc22   :  { %1267 = vst.msk [vmem:[%s1867_s5 + $0x4] sm:$0xf] %vm1265_vm5, %v1307_v51 }

// kernel: vae_forward.12
= control target key start
LH: loop header
LB: loop body
LE: loop exit
PB: predicated region body
PF: predicated region fallthrough
CT: control target
= control target key end

     0   :  { %v226_v1 = vmov 0   ;;  %vm87_vm0 = vcmask 261120   ;;  %v27_v11 = vlaneseq  ;;  %s283_s1 = inlined_call_operand.vmem [shape: bf16[32,512], index: 1, kind: input, shape index: {}]   ;;  %s284_s0 = inlined_call_operand.vmem [shape: f32[8,32], index: 0, kind: input, shape index: {}]   ;;  %s285_s2 = inlined_call_operand.vmem [shape: f32[1,512], index: 2, kind: input, shape index: {}]   ;;  %s286_s3 = inlined_call_operand.vmem [shape: bf16[8,512], index: 3, kind: output, shape index: {}]  }
   0x1   :  { %v214_v0 = vld [vmem:[%s283_s1 + $0x4] ss:$16 sps:$4 sm:$0xff]   ;;  %123 = vmatprep.mubr.bf16.mxu0 %v226_v1  ;;  %164 = vmatprep.mubr.bf16.mxu1 %v226_v1  ;;  %v216_v2 = vld [vmem:[%s283_s1 + $0xc] ss:$16 sps:$4 sm:$0xff]   ;;  %v218_v3 = vld [vmem:[%s283_s1] ss:$16 sps:$4 sm:$0xff]  }
   0x2   :  { %91 = vmatprep.subr.bf16.mxu0 %v214_v0  ;;  %v219_v4 = vld [vmem:[%s283_s1 + $0x8] ss:$16 sps:$4 sm:$0xff]   ;;  %132 = vmatprep.subr.bf16.mxu1 %v216_v2  ;;  %v220_v5 = vld [vmem:[%s283_s1 + $0x24] ss:$16 sps:$4 sm:$0xff]   ;;  %v222_v6 = vld [vmem:[%s283_s1 + $0x2c] ss:$16 sps:$4 sm:$0xff]  }
   0x3   :  { %92 = vmatpush1.bf16.msra.mxu0 %v218_v3  ;;  %133 = vmatpush1.bf16.msra.mxu1 %v219_v4  ;;  %v224_v7 = vld [vmem:[%s283_s1 + $0x20] ss:$16 sps:$4 sm:$0xff]   ;;  %v225_v8 = vld [vmem:[%s283_s1 + $0x28] ss:$16 sps:$4 sm:$0xff]   ;;  %v28_v12 = vshrl.u32 %v27_v11, 7 }
   0x4   :  { %93 = vmatprep.subr.bf16.mxu0 %v220_v5  ;;  %v15_v9 = vld [vmem:[%s284_s0] sm:$0xff]  ;;  %134 = vmatprep.subr.bf16.mxu1 %v222_v6 }
   0x5   :  { %v16_v10 = vpack.c.bf16 %v15_v9, %v15_v9  ;;  %v29_v13 = vsub.s32 0, %v28_v12  ;;  %v37_v14 = vsub.s32 2, %v28_v12  ;;  %v25_v15 = vld [vmem:[%s285_s2] sm:$0xf]  ;;  %v33_v16 = vsub.s32 1, %v28_v12 }
   0x6   :  { %v41_v17 = vsub.s32 3, %v28_v12 }
   0x7   :  { %94 = vmatpush1.bf16.msra.mxu0 %v224_v7  ;;  %135 = vmatpush1.bf16.msra.mxu1 %v225_v8  ;;  %v30_v18 = vrot.slane %v25_v15, %v29_v13  ;;  %v38_v19 = vrot.slane %v25_v15, %v37_v14  ;;  %v34_v20 = vrot.slane %v25_v15, %v33_v16 }
   0x8   :  { %v42_v21 = vrot.slane %v25_v15, %v41_v17 }
   0xa   :  { %207 = vmatmul.mubr.msk.bf16.vlgmr.msra.gmra.mrb[0].mxu0 %vm87_vm0, %v16_v10  ;;  %208 = vmatmul.mubr.msk.bf16.vlgmr.msra.gmra.mrb[0].mxu1 %vm87_vm0, %v16_v10 }
  0xdd   :  { %v125_v22 = vpop.f32.mrb[0].mxu0  ;;  %v166_v23 = vpop.f32.mrb[0].mxu1 }
  0xde   :  { %v126_v24 = vadd.f32 %v125_v22, %v30_v18  ;;  %v167_v25 = vadd.f32 %v166_v23, %v38_v19  ;;  %v127_v26 = vpop.f32.mrb[1].mxu0  ;;  %v168_v27 = vpop.f32.mrb[1].mxu1 }
  0xdf   :  { %v128_v28 = vadd.f32 %v127_v26, %v34_v20  ;;  %v169_v29 = vadd.f32 %v168_v27, %v42_v21  ;;  %v129_v30 = vpop.f32.mrb[2].mxu0  ;;  %v170_v31 = vpop.f32.mrb[2].mxu1 }
  0xe0   :  { %v173_v32 = vmax.f32 %v126_v24, 0.0  ;;  %v175_v33 = vmax.f32 %v167_v25, 0.0  ;;  %v130_v34 = vpop.f32.mrb[3].mxu0  ;;  %v171_v35 = vpop.f32.mrb[3].mxu1 }
  0xe1   :  { %v174_v36 = vmax.f32 %v128_v28, 0.0  ;;  %v176_v37 = vmax.f32 %v169_v29, 0.0 }
  0xe3   :  { %v211_v38 = vpack.c.bf16 %v174_v36, %v173_v32  ;;  %v212_v39 = vpack.c.bf16 %v176_v37, %v175_v33 }
  0xe5   :  { %193 = vst [vmem:[%s286_s3] sm:$0xff] %v211_v38  ;;  %194 = vst [vmem:[%s286_s3 + $0x8] sm:$0xff] %v212_v39 }

// kernel: vae_forward.11
= control target key start
LH: loop header
LB: loop body
LE: loop exit
PB: predicated region body
PF: predicated region fallthrough
CT: control target
= control target key end

     0   :  { %v529_v22 = vmov 1966171168   ;;  %v102_v24 = vlaneseq  ;;  %vm405_vm0 = vcmask 523264   ;;  %vm407_vm1 = vcmask 785408   ;;  %s665_s1 = inlined_call_operand.vmem [shape: bf16[512,64], index: 1, kind: input, shape index: {}]   ;;  %s666_s0 = inlined_call_operand.vmem [shape: bf16[2,512], index: 0, kind: input, shape index: {}]   ;;  %s667_s2 = inlined_call_operand.vmem [shape: f32[1,64], index: 2, kind: input, shape index: {}]   ;;  %s668_s3 = inlined_call_operand.vmem [shape: f32[2,32], index: 3, kind: input, shape index: {}]   ;;  %s669_s4 = inlined_call_operand.vmem [shape: f32[2,128], index: 4, kind: output, shape index: {}]  }
   0x1   :  { %v495_v0 = vld [vmem:[%s665_s1 + $0x40] sm:$0xff]   ;;  %v499_v4 = vld [vmem:[%s665_s1 + $0x48] sm:$0xff]   ;;  %v503_v8 = vld [vmem:[%s665_s1 + $0x50] sm:$0xff]   ;;  %v100_v23 = vunpack.c.l.s4 %v529_v22 }
   0x2   :  { %v496_v1 = vld [vmem:[%s665_s1 + $0xc0] sm:$0xff]   ;;  %448 = vmatprep.subr.bf16.mxu0 %v495_v0  ;;  %v500_v5 = vld [vmem:[%s665_s1 + $0xc8] sm:$0xff]   ;;  %v504_v9 = vld [vmem:[%s665_s1 + $0xd0] sm:$0xff]   ;;  %v103_v30 = vshrl.u32 %v102_v24, 7 }
   0x3   :  { %v497_v2 = vld [vmem:[%s665_s1] sm:$0xff]   ;;  %470 = vmatprep.subr.bf16.mxu1 %v496_v1  ;;  %v501_v6 = vld [vmem:[%s665_s1 + $0x8] sm:$0xff]   ;;  %v505_v10 = vld [vmem:[%s665_s1 + $0x10] sm:$0xff]   ;;  %v101_v29 = vunpack.c.0.s8 %v100_v23 }
   0x4   :  { %v498_v3 = vld [vmem:[%s665_s1 + $0x80] sm:$0xff]   ;;  %449 = vmatpush3.bf16.msra.mxu0 %v497_v2  ;;  %v502_v7 = vld [vmem:[%s665_s1 + $0x88] sm:$0xff]   ;;  %v506_v11 = vld [vmem:[%s665_s1 + $0x90] sm:$0xff]  }
   0x5   :  { %471 = vmatpush3.bf16.msra.mxu1 %v498_v3  ;;  %450 = vmatprep.subr.bf16.mxu0 %v499_v4  ;;  %v507_v12 = vld [vmem:[%s665_s1 + $0x58] sm:$0xff]   ;;  %v511_v16 = vld [vmem:[%s665_s1 + $0x60] sm:$0xff]   ;;  %v515_v20 = vld [vmem:[%s665_s1 + $0x68] sm:$0xff]   ;;  %v104_v35 = vsub.s32 %v101_v29, %v103_v30 }
   0x6   :  { %472 = vmatprep.subr.bf16.mxu1 %v500_v5  ;;  %v508_v13 = vld [vmem:[%s665_s1 + $0xd8] sm:$0xff]   ;;  %v512_v17 = vld [vmem:[%s665_s1 + $0xe0] sm:$0xff]   ;;  %v516_v21 = vld [vmem:[%s665_s1 + $0xe8] sm:$0xff]  }
   0x7   :  { %v509_v14 = vld [vmem:[%s665_s1 + $0x18] sm:$0xff]   ;;  %v513_v18 = vld [vmem:[%s665_s1 + $0x20] sm:$0xff]   ;;  %v517_v25 = vld [vmem:[%s665_s1 + $0x28] sm:$0xff]  }
   0x8   :  { %451 = vmatpush3.bf16.msra.mxu0 %v501_v6  ;;  %v510_v15 = vld [vmem:[%s665_s1 + $0x98] sm:$0xff]   ;;  %v514_v19 = vld [vmem:[%s665_s1 + $0xa0] sm:$0xff]   ;;  %v518_v26 = vld [vmem:[%s665_s1 + $0xa8] sm:$0xff]  }
   0x9   :  { %473 = vmatpush3.bf16.msra.mxu1 %v502_v7  ;;  %452 = vmatprep.subr.bf16.mxu0 %v503_v8  ;;  %v519_v27 = vld [vmem:[%s665_s1 + $0x70] sm:$0xff]   ;;  %v523_v33 = vld [vmem:[%s665_s1 + $0x78] sm:$0xff]   ;;  %v415_v38 = vld.sshfl [vmem:[%s666_s0] sm:$0x33 pattern:$0x75316420] }
   0xa   :  { %474 = vmatprep.subr.bf16.mxu1 %v504_v9  ;;  %v520_v28 = vld [vmem:[%s665_s1 + $0xf0] sm:$0xff]   ;;  %v524_v34 = vld [vmem:[%s665_s1 + $0xf8] sm:$0xff]   ;;  %v98_v39 = vcombine.high %v415_v38, %v415_v38  ;;  %v105_v40 = vrot.slane %v415_v38, %v104_v35  ;;  %v414_v45 = vld [vmem:[%s667_s2] ss:$0 sm:$0xff]  ;;  %s530_s0 = smov 96   ;;  %s531_s2 = smov 64  }
   0xb   :  { %v521_v31 = vld [vmem:[%s665_s1 + $0x30] sm:$0xff]   ;;  %v525_v36 = vld [vmem:[%s665_s1 + $0x38] sm:$0xff]   ;;  %v391_v60 = vld [vmem:[%s668_s3] sm:$0x3] }
   0xc   :  { %453 = vmatpush3.bf16.msra.mxu0 %v505_v10  ;;  %v522_v32 = vld [vmem:[%s665_s1 + $0xb0] sm:$0xff]   ;;  %v526_v37 = vld [vmem:[%s665_s1 + $0xb8] sm:$0xff]   ;;  %v112_v41 = vrot.slane %v98_v39, %v104_v35  ;;  %v113_v42 = vcombine.high %v105_v40, %v105_v40 }
   0xd   :  { %475 = vmatpush3.bf16.msra.mxu1 %v506_v11  ;;  %454 = vmatprep.subr.bf16.mxu0 %v507_v12 }
   0xe   :  { %476 = vmatprep.subr.bf16.mxu1 %v508_v13  ;;  %343 = vmatprep.mubr.bf16.mxu0 %v112_v41  ;;  %v114_v43 = vcombine.high %v112_v41, %v112_v41 }
  0x10   :  { %455 = vmatpush3.bf16.msra.mxu0 %v509_v14  ;;  %383 = vmatprep.mubr.bf16.mxu1 %v114_v43 }
  0x11   :  { %477 = vmatpush3.bf16.msra.mxu1 %v510_v15  ;;  %456 = vmatprep.subr.bf16.mxu0 %v511_v16 }
  0x12   :  { %478 = vmatprep.subr.bf16.mxu1 %v512_v17 }
  0x14   :  { %457 = vmatpush3.bf16.msra.mxu0 %v513_v18 }
  0x15   :  { %479 = vmatpush3.bf16.msra.mxu1 %v514_v19  ;;  %458 = vmatprep.subr.bf16.mxu0 %v515_v20 }
  0x16   :  { %480 = vmatprep.subr.bf16.mxu1 %v516_v21 }
  0x18   :  { %459 = vmatpush3.bf16.msra.mxu0 %v517_v25 }
  0x19   :  { %481 = vmatpush3.bf16.msra.mxu1 %v518_v26  ;;  %460 = vmatprep.subr.bf16.mxu0 %v519_v27 }
  0x1a   :  { %482 = vmatprep.subr.bf16.mxu1 %v520_v28 }
  0x1c   :  { %461 = vmatpush3.bf16.msra.mxu0 %v521_v31 }
  0x1d   :  { %483 = vmatpush3.bf16.msra.mxu1 %v522_v32  ;;  %462 = vmatprep.subr.bf16.mxu0 %v523_v33 }
  0x1e   :  { %484 = vmatprep.subr.bf16.mxu1 %v524_v34 }
  0x20   :  { %463 = vmatpush3.bf16.msra.mxu0 %v525_v36 }
  0x21   :  { %485 = vmatpush3.bf16.msra.mxu1 %v526_v37 }
  0x23   :  { %344 = vmatmul.mubr.bf16.vlgmr.msra.gmra.mrb[0].mxu0 %v105_v40 }
  0x24   :  { %384 = vmatmul.mubr.bf16.vlgmr.msra.gmra.mrb[0].mxu1 %v113_v42 }
  0xf6   :  { %v464_v44 = vpop.f32.mrb[0].mxu0 }
  0xf7   :  { %v465_v46 = vpop.f32.mrb[1].mxu0  ;;  %v486_v47 = vpop.f32.mrb[0].mxu1 }
  0xf8   :  { %v466_v48 = vadd.f32 %v465_v46, %v464_v44  ;;  %v467_v49 = vpop.f32.mrb[2].mxu0  ;;  %v487_v50 = vpop.f32.mrb[1].mxu1 }
  0xf9   :  { %v468_v51 = vpop.f32.mrb[3].mxu0  ;;  %v488_v53 = vadd.f32 %v487_v50, %v486_v47  ;;  %v489_v54 = vpop.f32.mrb[2].mxu1 }
  0xfa   :  { %v346_v52 = vadd.f32 %v466_v48, %v414_v45  ;;  %v490_v55 = vpop.f32.mrb[3].mxu1 }
  0xfc   :  { %v386_v56 = vadd.f32 %v488_v53, %v346_v52 }
  0xfe   :  { %v392_v57 = vmul.f32 0.5, %v386_v56 }
 0x100   :  { %v393_v58 = vmul.f32 1.442695, %v392_v57 }
 0x102   :  { %527 = vpow2.f32 %v393_v58 }
 0x10c   :  { %v528_v59 = vpop.eup %527 }
 0x10d   :  { %396 = vrot.lane.b32.xlu0 %v528_v59, %s530_s0 }
 0x17f   :  { %v397_v61 = vpop.permute.xlu0 %396 }
 0x180   :  { %v399_v62 = vmul.f32 %v397_v61, %v391_v60 }
 0x182   :  { %v400_v63 = vadd.f32 %v399_v62, %v386_v56 }
 0x184   :  { %402 = vrot.lane.b32.xlu0 %v400_v63, %s531_s2 }
 0x1f6   :  { %v403_v0 = vpop.permute.xlu0 %402 }
 0x1f7   :  { %v406_v1 = vsel %vm405_vm0, %v386_v56, %v403_v0 }
 0x1f8   :  { %v408_v2 = vsel %vm407_vm1, %v406_v1, 0.0 }
 0x1f9   :  { %409 = vst [vmem:[%s669_s4] sm:$0x3] %v408_v2 }

// kernel: vae_forward.14
= control target key start
LH: loop header
LB: loop body
LE: loop exit
PB: predicated region body
PF: predicated region fallthrough
CT: control target
= control target key end

     0   :  { %s2396_s12 = smov 0   ;;  %s2923_s0 = inlined_call_operand.vmem [shape: bf16[2,10,10,32], index: 0, kind: input, shape index: {}]   ;;  %s2924_s1 = inlined_call_operand.vmem [shape: bf16[288,16], index: 1, kind: input, shape index: {}]   ;;  %s2925_s2 = inlined_call_operand.vmem [shape: f32[1,16], index: 2, kind: input, shape index: {}]   ;;  %s2926_s3 = inlined_call_operand.vmem [shape: bf16[2,64,16], index: 3, kind: output, shape index: {}]  }
   0x1 LB: > { %s1893_s13 = sadd.s32 4294967295, %s2374_s12   ;;  %p1897_p0 = scmp.ge.s32.totalorder %s2374_s12, 1  ;;  %s2374_s12 = sphi %s2396_s12, %s13_s12  }
   0x2   : > { %p137_p1 = scmp.lt.s32.totalorder %s2374_s12, 3 }
   0x4   : > { %p138_p2 = pnand %p1897_p0, %p137_p1 }
   0x5   : > { %v2338_v0 = vld [vmem:[%s2924_s1 + $0x10] sm:$0xff] (!%p138_p2)   ;;  %p161_p3 = scmp.lt.s32.totalorder (!%p138_p2), %s1893_s13, 1  ;;  %v2410_v1 = vld [vmem:[%s2924_s1 + $0x40] sm:$0xff] (!%p138_p2)   ;;  %v2340_v2 = vld [vmem:[%s2924_s1 + $0x18] sm:$0xff] (!%p138_p2)   ;;  %vm192_vm0 = vsmask.f32 (!%p138_p2), 3328 }
   0x6   : > { %141 = sbr.rel (%p138_p2) target bundleno = 338 (0x152), region = 32  ;;  %2153 = vmatprep.subr.bf16.mxu1 (!%p138_p2), %v2338_v0  ;;  %2201 = vmatprep.subr.bf16.mxu0 (!%p138_p2), %v2410_v1  ;;  %v2421_v3 = vld [vmem:[%s2924_s1 + $0x48] sm:$0xff] (!%p138_p2)   ;;  %v2428_v4 = vld [vmem:[%s2924_s1] sm:$0xff] (!%p138_p2)   ;;  %v2439_v5 = vld [vmem:[%s2924_s1 + $0x50] sm:$0xff] (!%p138_p2)   ;;  %vm193_vm1 = vsmask.f32 (!%p138_p2), 7440 }
   0x7   : > { %2154 = vmatpush3.bf16.msra.mxu1 (!%p138_p2), %v2338_v0  ;;  %2202 = vmatpush3.bf16.msra.mxu0 (!%p138_p2), %v2410_v1  ;;  %vm2473_vm2 = vmor (!%p138_p2), %vm192_vm0, %vm193_vm1  ;;  %vm335_vm3 = vcmask (!%p138_p2), 261120   ;;  %vm546_vm4 = vcmask (!%p138_p2), 1042432   ;;  %vm547_vm5 = vcmask (!%p138_p2), 1046532   ;;  %vm1829_vm7 = vcmask (!%p138_p2), 125952  }
   0x8   : > { %2155 = vmatprep.subr.bf16.mxu1 (!%p138_p2), %v2340_v2  ;;  %2203 = vmatprep.subr.bf16.mxu0 (!%p138_p2), %v2421_v3  ;;  %vm2580_vm6 = vmor (!%p138_p2), %vm546_vm4, %vm547_vm5 }
   0xb   : > { %2156 = vmatpush3.bf16.msra.mxu1 (!%p138_p2), %v2340_v2  ;;  %2204 = vmatpush3.bf16.msra.mxu0 (!%p138_p2), %v2421_v3 }
   0xc   : > { %2165 = vmatprep.subr.bf16.mxu1 (!%p138_p2), %v2428_v4  ;;  %2213 = vmatprep.subr.bf16.mxu0 (!%p138_p2), %v2439_v5 }
   0xd   : > { %s2932_s13 = smov (!%p161_p3, %s1893_s13), 1 }
   0xe   : > { %s2329_s22 = smul.u32 80, %s2932_s13  ;;  %s2090_s4 = sshll.u32 %s2932_s13, 5 }
   0xf   : > { %s2902_s7 = scalar_lea.vmem %s2926_s3, %s2090_s4 }
  0x10   : > { %s2434_s27 = scalar_lea.vmem %s2923_s0, %s2329_s22 }
  0x11   : > { %v2442_v6 = vld [vmem:[%s2434_s27] sm:$0xf]  ;;  %v2445_v7 = vld [vmem:[%s2434_s27 + $0x8] sm:$0xf]  ;;  %v2448_v8 = vld [vmem:[%s2434_s27 + $0x4] sm:$0x1] }
  0x12   : > { %v2452_v9 = vld [vmem:[%s2434_s27 + $0xc] sm:$0x1]  ;;  %v196_v10 = vshrl.u32 %v2442_v6, 16  ;;  %v199_v11 = vshll.u32 %v2442_v6, 16  ;;  %v205_v12 = vshll.u32 %v2448_v8, 16  ;;  %v210_v13 = vshrl.u32 %v2445_v7, 16 }
  0x13   : > { %v213_v14 = vshll.u32 %v2445_v7, 16  ;;  %v219_v15 = vshll.u32 %v2452_v9, 16  ;;  %v1957_v16 = vld [vmem:[%s2434_s27 + $0x8] sm:$0xf]  ;;  %v2464_v21 = vld [vmem:[%s2434_s27 + $0xc] sm:$0x1] }
  0x14   : > { %v198_v17 = vrot.slane %v196_v10, 4  ;;  %v201_v18 = vrot.slane %v199_v11, 5  ;;  %v207_v19 = vrot.slane %v205_v12, 5  ;;  %v212_v20 = vrot.slane %v210_v13, 4  ;;  %v1959_v24 = vld [vmem:[%s2434_s27 + $0x10] sm:$0xf] }
  0x15   : > { %v215_v22 = vrot.slane %v213_v14, 5  ;;  %v221_v23 = vrot.slane %v219_v15, 5  ;;  %v2468_v25 = vld [vmem:[%s2434_s27 + $0x14] sm:$0x1]  ;;  %v841_v27 = vshrl.u32 %v1957_v16, 16  ;;  %v844_v28 = vshll.u32 %v1957_v16, 16 }
  0x16   : > { %v202_v26 = vor.u32 %v201_v18, %v198_v17  ;;  %v850_v29 = vshll.u32 %v2464_v21, 16  ;;  %v855_v32 = vshrl.u32 %v1959_v24, 16  ;;  %v858_v33 = vshll.u32 %v1959_v24, 16  ;;  %v2479_v35 = vld [vmem:[%s2434_s27 + $0x10] sm:$0xf] }
  0x17   : > { %v216_v31 = vor.u32 %v215_v22, %v212_v20  ;;  %v864_v34 = vshll.u32 %v2468_v25, 16  ;;  %v843_v37 = vrot.slane %v841_v27, 4  ;;  %v846_v38 = vrot.slane %v844_v28, 5  ;;  %v2482_v39 = vld [vmem:[%s2434_s27 + $0x18] sm:$0xf] }
  0x18   : > { %v203_v36 = vrot.slane %v202_v26, 4  ;;  %v857_v41 = vrot.slane %v855_v32, 4  ;;  %v860_v42 = vrot.slane %v858_v33, 5  ;;  %v2485_v43 = vld [vmem:[%s2434_s27 + $0x14] sm:$0x1]  ;;  %v852_v46 = vrot.slane %v850_v29, 5 }
  0x19   : > { %v217_v40 = vrot.slane %v216_v31, 4  ;;  %v847_v45 = vor.u32 %v846_v38, %v843_v37  ;;  %v866_v47 = vrot.slane %v864_v34, 5  ;;  %v2492_v50 = vld [vmem:[%s2434_s27 + $0x1c] sm:$0x1]  ;;  %v224_v51 = vshrl.u32 %v2479_v35, 16 }
  0x1a   : > { %v208_v44 = vsel %vm2473_vm2, %v203_v36, %v207_v19  ;;  %v861_v49 = vor.u32 %v860_v42, %v857_v41  ;;  %v227_v52 = vshll.u32 %v2479_v35, 16  ;;  %v1961_v53 = vld [vmem:[%s2434_s27 + $0x18] sm:$0xf]  ;;  %v233_v56 = vshll.u32 %v2485_v43, 16  ;;  %v2506_v10 = vld [vmem:[%s2434_s27 + $0x1c] sm:$0x1] }
  0x1b   : > { %v222_v48 = vsel %vm2473_vm2, %v217_v40, %v221_v23  ;;  %v848_v55 = vrot.slane %v847_v45, 4  ;;  %v238_v57 = vshrl.u32 %v2482_v39, 16  ;;  %v226_v59 = vrot.slane %v224_v51, 4  ;;  %v1963_v15 = vld [vmem:[%s2434_s27 + $0x20] sm:$0xf] }
  0x1c   : > { %v1901_v54 = vcombine.low %v208_v44, %v222_v48  ;;  %v862_v58 = vrot.slane %v861_v49, 4  ;;  %v229_v60 = vrot.slane %v227_v52, 5  ;;  %v241_v61 = vshll.u32 %v2482_v39, 16  ;;  %v2512_v16 = vld [vmem:[%s2434_s27 + $0x24] sm:$0x1]  ;;  %v2345_v52 = vld [vmem:[%s2924_s1 + $0x8] sm:$0xff]  }
  0x1d   : > { %v853_v62 = vsel %vm2473_vm2, %v848_v55, %v852_v46  ;;  %v1091_v63 = vrot.slane %v2464_v21, 5  ;;  %v240_v0 = vrot.slane %v238_v57, 4  ;;  %v247_v2 = vshll.u32 %v2492_v50, 16  ;;  %v2516_v22 = vld [vmem:[%s2434_s27 + $0x20] sm:$0xf] }
  0x1e   : > { %2157 = vmatprep.mubr.msk.bf16.mxu1 %vm335_vm3, %v1901_v54  ;;  %v867_v11 = vsel %vm2473_vm2, %v862_v58, %v866_v47  ;;  %v230_v12 = vor.u32 %v229_v60, %v226_v59  ;;  %v235_v13 = vrot.slane %v233_v56, 5  ;;  %v243_v14 = vrot.slane %v241_v61, 5  ;;  %v2524_v38 = vld [vmem:[%s2434_s27 + $0x24] sm:$0x1]  ;;  %v2528_v45 = vld [vmem:[%s2434_s27 + $0x28] sm:$0xf] }
  0x1f   : > { %v1973_v17 = vcombine.low %v853_v62, %v867_v11  ;;  %v1095_v18 = vrot.slane %v2468_v25, 5  ;;  %v249_v19 = vrot.slane %v247_v2, 5  ;;  %v869_v20 = vshrl.u32 %v1961_v53, 16  ;;  %v2534_v49 = vld [vmem:[%s2434_s27 + $0x2c] sm:$0x1] }
  0x20   : > { %v231_v23 = vrot.slane %v230_v12, 4  ;;  %v244_v24 = vor.u32 %v243_v14, %v240_v0  ;;  %v872_v26 = vshll.u32 %v1961_v53, 16  ;;  %v878_v27 = vshll.u32 %v2506_v10, 16  ;;  %v2543_v57 = vld [vmem:[%s2434_s27 + $0x30] sm:$0xf] }
  0x21   : > { %2205 = vmatprep.mubr.msk.bf16.mxu0 %vm335_vm3, %v1973_v17  ;;  %v871_v28 = vrot.slane %v869_v20, 4  ;;  %v883_v29 = vshrl.u32 %v1963_v15, 16  ;;  %v886_v31 = vshll.u32 %v1963_v15, 16  ;;  %v892_v32 = vshll.u32 %v2512_v16, 16  ;;  %v2546_v58 = vld [vmem:[%s2434_s27 + $0x34] sm:$0x1] }
  0x22   : > { %v236_v33 = vsel %vm2473_vm2, %v231_v23, %v235_v13  ;;  %v245_v34 = vrot.slane %v244_v24, 4  ;;  %v874_v36 = vrot.slane %v872_v26, 5  ;;  %v880_v37 = vrot.slane %v878_v27, 5  ;;  %v2551_v0 = vld [vmem:[%s2434_s27 + $0x38] sm:$0xf]  ;;  %v2568_v24 = vld [vmem:[%s2924_s1 + $0x20] sm:$0xff]  }
  0x23   : > { %v885_v40 = vrot.slane %v883_v29, 4  ;;  %v888_v41 = vrot.slane %v886_v31, 5  ;;  %v894_v42 = vrot.slane %v892_v32, 5  ;;  %v1099_v44 = vrot.slane %v2506_v10, 5  ;;  %v2344_v15 = vld [vmem:[%s2924_s1 + $0x58] sm:$0xff]  }
  0x24   : > { %v250_v46 = vsel %vm2473_vm2, %v245_v34, %v249_v19  ;;  %v875_v47 = vor.u32 %v874_v36, %v871_v28  ;;  %v1103_v48 = vrot.slane %v2512_v16, 5  ;;  %v252_v51 = vshrl.u32 %v2516_v22, 16  ;;  %v2562_v20 = vld [vmem:[%s2434_s27 + $0x3c] sm:$0x1]  ;;  %v1983_v29 = vld [vmem:[%s2434_s27 + $0x8] sm:$0xe] }
  0x25   : > { %v1902_v53 = vcombine.low %v236_v33, %v250_v46  ;;  %v889_v54 = vor.u32 %v888_v41, %v885_v40  ;;  %v255_v55 = vshll.u32 %v2516_v22, 16  ;;  %v261_v56 = vshll.u32 %v2524_v38, 16  ;;  %v1984_v36 = vld [vmem:[%s2434_s27 + $0x10] sm:$0xe]  ;;  %v1990_v16 = vld [vmem:[%s2434_s27 + $0x40] sm:$0xe] }
  0x26   : > { %v876_v59 = vrot.slane %v875_v47, 4  ;;  %v254_v60 = vrot.slane %v252_v51, 4  ;;  %v266_v61 = vshrl.u32 %v2528_v45, 16  ;;  %v269_v62 = vshll.u32 %v2528_v45, 16  ;;  %v1985_v47 = vld [vmem:[%s2434_s27 + $0x18] sm:$0xe] }
  0x27   : > { %2158 = vmatmul.mubr.msk.bf16.vlgmr.msra.gmra.mrb[0].mxu1 %vm335_vm3, %v1902_v53  ;;  %v890_v2 = vrot.slane %v889_v54, 4  ;;  %v257_v11 = vrot.slane %v255_v55, 5  ;;  %v263_v12 = vrot.slane %v261_v56, 5  ;;  %v275_v13 = vshll.u32 %v2534_v49, 16  ;;  %v2346_v56 = vld [vmem:[%s2924_s1 + $0x60] sm:$0xff]  }
  0x28   : > { %2166 = vmatpush3.bf16.msra.mxu1 %v2428_v4  ;;  %v881_v14 = vsel %vm2473_vm2, %v876_v59, %v880_v37  ;;  %v268_v17 = vrot.slane %v266_v61, 4  ;;  %v271_v19 = vrot.slane %v269_v62, 5  ;;  %v280_v23 = vshrl.u32 %v2543_v57, 16  ;;  %v1986_v59 = vld [vmem:[%s2434_s27 + $0x20] sm:$0xe] }
  0x29   : > { %v895_v4 = vsel %vm2473_vm2, %v890_v2, %v894_v42  ;;  %v258_v26 = vor.u32 %v257_v11, %v254_v60  ;;  %v277_v27 = vrot.slane %v275_v13, 5  ;;  %2167 = vmatprep.subr.bf16.mxu1 %v2345_v52  ;;  %v283_v28 = vshll.u32 %v2543_v57, 16  ;;  %v2079_v46 = vld [vmem:[%s2925_s2] ss:$0 sm:$0xff] }
  0x2a   : > { %v1974_v31 = vcombine.low %v881_v14, %v895_v4  ;;  %v272_v32 = vor.u32 %v271_v19, %v268_v17  ;;  %v282_v33 = vrot.slane %v280_v23, 4  ;;  %v289_v34 = vshll.u32 %v2546_v58, 16  ;;  %v2603_v14 = vld [vmem:[%s2434_s27 + $0x2c] sm:$0x1] }
  0x2b   : > { %v259_v37 = vrot.slane %v258_v26, 4  ;;  %v285_v40 = vrot.slane %v283_v28, 5  ;;  %v294_v41 = vshrl.u32 %v2551_v0, 16  ;;  %v297_v42 = vshll.u32 %v2551_v0, 16  ;;  %v2606_v26 = vld [vmem:[%s2434_s27 + $0x34] sm:$0x1] }
  0x2c   : > { %2206 = vmatmul.mubr.msk.bf16.vlgmr.msra.gmra.mrb[0].mxu0 %vm335_vm3, %v1974_v31  ;;  %v273_v51 = vrot.slane %v272_v32, 4  ;;  %v291_v53 = vrot.slane %v289_v34, 5  ;;  %v303_v54 = vshll.u32 %v2562_v20, 16  ;;  %2168 = vmatpush3.bf16.msra.mxu1 %v2345_v52  ;;  %v1991_v55 = vrot.slane %v1983_v29, 9  ;;  %v1987_v52 = vld [vmem:[%s2434_s27 + $0x28] sm:$0xe] }
  0x2d   : > { %2214 = vmatpush3.bf16.msra.mxu0 %v2439_v5  ;;  %v264_v60 = vsel %vm2473_vm2, %v259_v37, %v263_v12  ;;  %v286_v61 = vor.u32 %v285_v40, %v282_v33  ;;  %v296_v62 = vrot.slane %v294_v41, 4  ;;  %v299_v2 = vrot.slane %v297_v42, 5  ;;  %2177 = vmatprep.subr.bf16.mxu1 %v2568_v24  ;;  %v1988_v28 = vld [vmem:[%s2434_s27 + $0x30] sm:$0xe]  ;;  %v2614_v31 = vld [vmem:[%s2434_s27 + $0x3c] sm:$0x1] }
  0x2e   : > { %2215 = vmatprep.subr.bf16.mxu0 %v2344_v15  ;;  %v278_v11 = vsel %vm2473_vm2, %v273_v51, %v277_v27  ;;  %v305_v13 = vrot.slane %v303_v54, 5  ;;  %v1092_v5 = vsel %vm2580_vm6, %v1991_v55, %v1091_v63  ;;  %v1992_v12 = vrot.slane %v1984_v36, 9  ;;  %v1989_v63 = vld [vmem:[%s2434_s27 + $0x38] sm:$0xe] }
  0x2f   : > { %v1903_v17 = vcombine.low %v264_v60, %v278_v11  ;;  %v287_v19 = vrot.slane %v286_v61, 4  ;;  %v300_v23 = vor.u32 %v299_v2, %v296_v62  ;;  %v1993_v4 = vrot.slane %v1985_v47, 9  ;;  %v523_v60 = vld [vmem:[%s2434_s27 + $0x8] sm:$0xe] }
  0x30   : > { %v1096_v27 = vsel %vm2580_vm6, %v1992_v12, %v1095_v18  ;;  %v1994_v29 = vrot.slane %v1986_v59, 9  ;;  %v1995_v21 = vrot.slane %v1987_v52, 9  ;;  %v1996_v36 = vrot.slane %v1988_v28, 9  ;;  %v522_v59 = vld [vmem:[%s2434_s27] sm:$0xe] }
  0x31   : > { %2216 = vmatpush3.bf16.msra.mxu0 %v2344_v15  ;;  %2161 = vmatprep.mubr.msk.bf16.mxu1 %vm335_vm3, %v1903_v17  ;;  %v292_v32 = vsel %vm2473_vm2, %v287_v19, %v291_v53  ;;  %v301_v33 = vrot.slane %v300_v23, 4  ;;  %v1999_v34 = vcombine.low %v1092_v5, %v1096_v27  ;;  %v1100_v25 = vsel %vm2580_vm6, %v1993_v4, %v1099_v44  ;;  %v2636_v44 = vld [vmem:[%s2434_s27 + $0x44] sm:$0x1]  ;;  %v524_v12 = vld [vmem:[%s2434_s27 + $0x10] sm:$0xe] }
  0x32   : > { %2225 = vmatprep.subr.bf16.mxu0 %v2346_v56  ;;  %v1104_v18 = vsel %vm2580_vm6, %v1994_v29, %v1103_v48  ;;  %v1107_v15 = vrot.slane %v2603_v14, 5  ;;  %v1111_v37 = vrot.slane %v2606_v26, 5  ;;  %v1911_v10 = vcombine.low %v2442_v6, %v2445_v7  ;;  %v2350_v6 = vld [vmem:[%s2924_s1 + $0x68] sm:$0xff]   ;;  %v525_v17 = vld [vmem:[%s2434_s27 + $0x18] sm:$0xe] }
  0x33   : > { %v306_v40 = vsel %vm2473_vm2, %v301_v33, %v305_v13  ;;  %2217 = vmatprep.mubr.msk.bf16.mxu0 %vm335_vm3, %v1999_v34  ;;  %v2000_v48 = vcombine.low %v1100_v25, %v1104_v18  ;;  %v1997_v53 = vrot.slane %v1989_v63, 9  ;;  %v1115_v54 = vrot.slane %v2614_v31, 5  ;;  %v2354_v28 = vld [vmem:[%s2434_s27 + $0x10] ss:$8 sps:$4 sm:$0xff]   ;;  %v526_v29 = vld [vmem:[%s2434_s27 + $0x20] sm:$0xe] }
  0x34   : > { %v1904_v41 = vcombine.low %v292_v32, %v306_v40  ;;  %v1108_v42 = vsel %vm2580_vm6, %v1995_v21, %v1107_v15  ;;  %v1112_v47 = vsel %vm2580_vm6, %v1996_v36, %v1111_v37  ;;  %v1998_v7 = vrot.slane %v1990_v16, 9  ;;  %v527_v33 = vld [vmem:[%s2434_s27 + $0x28] sm:$0xe]  ;;  %v2698_v34 = vld [vmem:[%s2434_s27 + $0x30] sm:$0xe] }
  0x35   : > { %v2001_v51 = vcombine.low %v1108_v42, %v1112_v47  ;;  %v1119_v55 = vrot.slane %v2636_v44, 5  ;;  %v551_v61 = vrot.slane %v2448_v8, 5  ;;  %v555_v62 = vrot.slane %v2452_v9, 5  ;;  %v2665_v8 = vld [vmem:[%s2924_s1 + $0x70] sm:$0xff]   ;;  %v2029_v37 = vld [vmem:[%s2434_s27 + $0x18] sm:$0xf] }
  0x36   : > { %2162 = vmatmul.mubr.msk.bf16.gmra.mrb[4].mxu1 %vm335_vm3, %v1904_v41  ;;  %v559_v2 = vrot.slane %v2485_v43, 5  ;;  %v563_v52 = vrot.slane %v2492_v50, 5  ;;  %v1116_v11 = vsel %vm2580_vm6, %v1997_v53, %v1115_v54  ;;  %v1921_v9 = vrot.slane %v522_v59, 9  ;;  %v2027_v25 = vld [vmem:[%s2434_s27 + $0x10] sm:$0xf]  ;;  %v2359_v50 = vld [vmem:[%s2924_s1 + $0x78] sm:$0xff]  }
  0x37   : > { %2169 = vmatprep.mubr.msk.bf16.mxu1 %vm335_vm3, %v1911_v10  ;;  %v1120_v13 = vsel %vm2580_vm6, %v1998_v7, %v1119_v55  ;;  %v1922_v43 = vrot.slane %v523_v60, 9  ;;  %v1912_v5 = vcombine.low %v2479_v35, %v2482_v39  ;;  %v1913_v19 = vcombine.low %v2516_v22, %v2528_v45  ;;  %v2705_v36 = vld [vmem:[%s2434_s27 + $0x14] sm:$0x1]  ;;  %v2714_v16 = vld [vmem:[%s2434_s27 + $0x1c] sm:$0x1] }
  0x38   : > { %2218 = vmatmul.mubr.msk.bf16.vlgmr.msra.gmra.mrb[0].mxu0 %vm335_vm3, %v2000_v48  ;;  %v934_v23 = vshll.u32 %v2614_v31, 16  ;;  %v2002_v4 = vcombine.low %v1116_v11, %v1120_v13  ;;  %v567_v27 = vrot.slane %v2524_v38, 5  ;;  %v552_v35 = vsel %vm2580_vm6, %v1921_v9, %v551_v61  ;;  %v2690_v38 = vld [vmem:[%s2924_s1 + $0x30] sm:$0xff]   ;;  %v2031_v59 = vld [vmem:[%s2434_s27 + $0x20] sm:$0xf] }
  0x39   : > { %2226 = vmatpush3.bf16.msra.mxu0 %v2346_v56  ;;  %2221 = vmatprep.mubr.msk.bf16.mxu0 %vm335_vm3, %v2001_v51  ;;  %v2352_v56 = vld [vmem:[%s2924_s1 + $0x28] sm:$0xff]   ;;  %v1923_v39 = vrot.slane %v524_v12, 9  ;;  %v571_v21 = vrot.slane %v2534_v49, 5  ;;  %v556_v22 = vsel %vm2580_vm6, %v1922_v43, %v555_v62  ;;  %v1924_v45 = vrot.slane %v525_v17, 9  ;;  %v2358_v53 = vld [vmem:[%s2434_s27 + $0x30] ss:$8 sps:$4 sm:$0xff]  }
  0x3a   : > { %2227 = vmatprep.subr.bf16.mxu0 %v2350_v6  ;;  %v575_v63 = vrot.slane %v2546_v58, 5  ;;  %v579_v32 = vrot.slane %v2562_v20, 5  ;;  %v1914_v18 = vcombine.low %v2543_v57, %v2551_v0  ;;  %v1925_v15 = vrot.slane %v526_v29, 9  ;;  %v2356_v57 = vld [vmem:[%s2434_s27 + $0x20] ss:$8 sps:$4 sm:$0xff]  }
  0x3b   : > { %v1381_v40 = vshrl.u32 %v2027_v25, 16  ;;  %v2711_v10 = vsel %vm2580_vm6, %v1923_v39, %v559_v2  ;;  %v1384_v41 = vshll.u32 %v2027_v25, 16  ;;  %v1390_v48 = vshll.u32 %v2705_v36, 16  ;;  %v529_v62 = vld [vmem:[%s2434_s27 + $0x38] sm:$0xe] }
  0x3c   : > { %v1926_v0 = vrot.slane %v527_v33, 9  ;;  %v1395_v47 = vshrl.u32 %v2029_v37, 16  ;;  %v1398_v51 = vshll.u32 %v2029_v37, 16  ;;  %v1927_v54 = vrot.slane %v2698_v34, 9  ;;  %v2733_v13 = vld [vmem:[%s2434_s27 + $0x24] sm:$0x1] }
  0x3d   : > { %2228 = vmatpush3.bf16.msra.mxu0 %v2350_v6  ;;  %v1383_v42 = vrot.slane %v1381_v40, 4  ;;  %v1386_v6 = vrot.slane %v1384_v41, 5  ;;  %v1392_v7 = vrot.slane %v1390_v48, 5  ;;  %v1404_v55 = vshll.u32 %v2714_v16, 16  ;;  %v2033_v9 = vld [vmem:[%s2434_s27 + $0x28] sm:$0xf] }
  0x3e   : > { %2170 = vmatmul.mubr.msk.bf16.vlgmr.msra.gmra.mrb[0].mxu1 %vm335_vm3, %v1912_v5  ;;  %2237 = vmatprep.subr.bf16.mxu0 %v2665_v8  ;;  %v564_v60 = vsel %vm2580_vm6, %v1924_v45, %v563_v52  ;;  %v2729_v61 = vsel %vm2580_vm6, %v1925_v15, %v567_v27  ;;  %v1397_v2 = vrot.slane %v1395_v47, 4  ;;  %v1400_v11 = vrot.slane %v1398_v51, 5  ;;  %v2360_v49 = vld [vmem:[%s2434_s27 + $0x40] ss:$8 sps:$4 sm:$0xff]   ;;  %v2035_v48 = vld [vmem:[%s2434_s27 + $0x30] sm:$0xf] }
  0x3f   : > { %2178 = vmatpush3.bf16.msra.mxu1 %v2568_v24  ;;  %2173 = vmatprep.mubr.msk.bf16.mxu1 %vm335_vm3, %v1913_v19  ;;  %v1929_v24 = vcombine.low %v552_v35, %v556_v22  ;;  %v1387_v43 = vor.u32 %v1386_v6, %v1383_v42  ;;  %v1406_v5 = vrot.slane %v1404_v55, 5  ;;  %v1409_v12 = vshrl.u32 %v2031_v59, 16  ;;  %v2037_v51 = vld [vmem:[%s2434_s27 + $0x38] sm:$0xf] }
  0x40   : > { %2222 = vmatmul.mubr.msk.bf16.gmra.mrb[4].mxu0 %vm335_vm3, %v2002_v4  ;;  %2179 = vmatprep.subr.bf16.mxu1 %v2352_v56  ;;  %v1412_v17 = vshll.u32 %v2031_v59, 16  ;;  %v1401_v52 = vor.u32 %v1400_v11, %v1397_v2  ;;  %v1418_v19 = vshll.u32 %v2733_v13, 16  ;;  %v1423_v4 = vshrl.u32 %v2033_v9, 16 }
  0x41   : > { %2229 = vmatprep.mubr.msk.bf16.mxu0 %vm335_vm3, %v2354_v28  ;;  %v1426_v28 = vshll.u32 %v2033_v9, 16  ;;  %v1388_v27 = vrot.slane %v1387_v43, 4  ;;  %v1411_v35 = vrot.slane %v1409_v12, 4  ;;  %v572_v22 = vsel %vm2580_vm6, %v1926_v0, %v571_v21  ;;  %v2361_v21 = vld [vmem:[%s2924_s1 + $0x38] sm:$0xff]   ;;  %v2039_v43 = vld [vmem:[%s2434_s27 + $0x40] sm:$0xf] }
  0x42   : > { %v1414_v39 = vrot.slane %v1412_v17, 5  ;;  %v1402_v45 = vrot.slane %v1401_v52, 4  ;;  %v1425_v33 = vrot.slane %v1423_v4, 4  ;;  %v1930_v25 = vcombine.low %v2711_v10, %v564_v60  ;;  %v2801_v17 = vld [vmem:[%s2434_s27 + $0x44] sm:$0x1] }
  0x43   : > { %2180 = vmatpush3.bf16.msra.mxu1 %v2352_v56  ;;  %v2737_v56 = vld [vmem:[%s2434_s27 + $0x2c] sm:$0x1]  ;;  %v1428_v34 = vrot.slane %v1426_v28, 5  ;;  %v2754_v37 = vrot.slane %v1418_v19, 5  ;;  %v1393_v40 = vsel %vm2473_vm2, %v1388_v27, %v1392_v7  ;;  %v1931_v0 = vcombine.low %v2729_v61, %v572_v22 }
  0x44   : > { %2189 = vmatprep.subr.bf16.mxu1 %v2690_v38  ;;  %v1432_v29 = vshll.u32 %v2737_v56, 16  ;;  %v1415_v15 = vor.u32 %v1414_v39, %v1411_v35  ;;  %v2778_v42 = vsel %vm2580_vm6, %v1927_v54, %v575_v63  ;;  %v1437_v6 = vshrl.u32 %v2035_v48, 16 }
  0x45   : > { %v1429_v10 = vor.u32 %v1428_v34, %v1425_v33  ;;  %v1440_v55 = vshll.u32 %v2035_v48, 16  ;;  %v1451_v60 = vshrl.u32 %v2037_v51, 16  ;;  %v1454_v58 = vshll.u32 %v2037_v51, 16 }
  0x46   : > { %2174 = vmatmul.mubr.msk.bf16.gmra.mrb[4].mxu1 %vm335_vm3, %v1914_v18  ;;  %v1928_v18 = vrot.slane %v529_v62, 9  ;;  %v1434_v41 = vrot.slane %v1432_v29, 5  ;;  %v1416_v47 = vrot.slane %v1415_v15, 4  ;;  %v1439_v61 = vrot.slane %v1437_v6, 4  ;;  %v2365_v6 = vld [vmem:[%s2924_s1 + $0x88] sm:$0xff]  }
  0x47   : > { %2181 = vmatprep.mubr.msk.bf16.mxu1 %vm335_vm3, %v1929_v24  ;;  %v2767_v24 = vld [vmem:[%s2924_s1 + $0x80] sm:$0xff]   ;;  %v1430_v7 = vrot.slane %v1429_v10, 4  ;;  %v1442_v2 = vrot.slane %v1440_v55, 5  ;;  %v1453_v9 = vrot.slane %v1451_v60, 4  ;;  %v1456_v12 = vrot.slane %v1454_v58, 5 }
  0x48   : > { %2230 = vmatmul.mubr.msk.bf16.vlgmr.msra.gmra.mrb[0].mxu0 %vm335_vm3, %v2356_v57  ;;  %v2771_v57 = vld [vmem:[%s2434_s27 + $0x34] sm:$0x1]  ;;  %v580_v54 = vsel %vm2580_vm6, %v1928_v18, %v579_v32  ;;  %v1465_v19 = vshrl.u32 %v2039_v43, 16  ;;  %v1468_v4 = vshll.u32 %v2039_v43, 16  ;;  %v1474_v28 = vshll.u32 %v2801_v17, 16 }
  0x49   : > { %2238 = vmatpush3.bf16.msra.mxu0 %v2665_v8  ;;  %2233 = vmatprep.mubr.msk.bf16.mxu0 %vm335_vm3, %v2358_v53  ;;  %v1407_v8 = vsel %vm2473_vm2, %v1402_v45, %v1406_v5  ;;  %v2782_v53 = vld [vmem:[%s2434_s27 + $0x3c] sm:$0x1]  ;;  %v1446_v59 = vshll.u32 %v2771_v57, 16  ;;  %v1421_v5 = vsel %vm2473_vm2, %v1416_v47, %v2754_v37  ;;  %v1435_v20 = vsel %vm2473_vm2, %v1430_v7, %v1434_v41  ;;  %v2054_v47 = vld [vmem:[%s2434_s27 + $0x18] sm:$0xe] }
  0x4a   : > { %2239 = vmatprep.subr.bf16.mxu0 %v2359_v50  ;;  %v2043_v62 = vcombine.low %v1393_v40, %v1407_v8  ;;  %v1460_v63 = vshll.u32 %v2782_v53, 16  ;;  %v1443_v52 = vor.u32 %v1442_v2, %v1439_v61  ;;  %v1457_v27 = vor.u32 %v1456_v12, %v1453_v9  ;;  %v2055_v60 = vld [vmem:[%s2434_s27 + $0x20] sm:$0xe]  ;;  %v2056_v61 = vld [vmem:[%s2434_s27 + $0x28] sm:$0xe] }
  0x4b   : > { %v1448_v11 = vrot.slane %v1446_v59, 5  ;;  %v1932_v22 = vcombine.low %v2778_v42, %v580_v54  ;;  %v1467_v33 = vrot.slane %v1465_v19, 4  ;;  %v1470_v34 = vrot.slane %v1468_v4, 5  ;;  %v2053_v42 = vld [vmem:[%s2434_s27 + $0x10] sm:$0xe] }
  0x4c   : > { %v1462_v32 = vrot.slane %v1460_v63, 5  ;;  %v1444_v45 = vrot.slane %v1443_v52, 4  ;;  %v1458_v18 = vrot.slane %v1457_v27, 4  ;;  %v2044_v40 = vcombine.low %v1421_v5, %v1435_v20  ;;  %v2364_v54 = vld [vmem:[%s2434_s27 + $0x18] ss:$8 sps:$4 sm:$0xff]  }
  0x4d   : > { %2240 = vmatpush3.bf16.msra.mxu0 %v2359_v50  ;;  %v2041_v50 = vld [vmem:[%s2434_s27 + $0x48] sm:$0xf]  ;;  %v1471_v10 = vor.u32 %v1470_v34, %v1467_v33  ;;  %v1476_v41 = vrot.slane %v1474_v28, 5  ;;  %v2061_v55 = vrot.slane %v2053_v42, 9  ;;  %v2062_v59 = vrot.slane %v2054_v47, 9 }
  0x4e   : > { %2182 = vmatmul.mubr.msk.bf16.vlgmr.msra.gmra.mrb[0].mxu1 %vm335_vm3, %v1930_v25  ;;  %2249 = vmatprep.subr.bf16.mxu0 %v2767_v24  ;;  %v1479_v35 = vshrl.u32 %v2041_v50, 16  ;;  %v1482_v39 = vshll.u32 %v2041_v50, 16  ;;  %v2363_v25 = vld [vmem:[%s2434_s27 + $0x8] ss:$8 sps:$4 sm:$0xff]   ;;  %v1449_v8 = vsel %vm2473_vm2, %v1444_v45, %v1448_v11  ;;  %v1463_v48 = vsel %vm2473_vm2, %v1458_v18, %v1462_v32  ;;  %v2058_v50 = vld [vmem:[%s2434_s27 + $0x38] sm:$0xe] }
  0x4f   : > { %2190 = vmatpush3.bf16.msra.mxu1 %v2690_v38  ;;  %2185 = vmatprep.mubr.msk.bf16.mxu1 %vm335_vm3, %v1931_v0  ;;  %v2806_v38 = vld [vmem:[%s2434_s27 + $0x4c] sm:$0x1]  ;;  %v2045_v51 = vcombine.low %v1449_v8, %v1463_v48  ;;  %v1472_v7 = vrot.slane %v1471_v10, 4  ;;  %v906_v58 = vshll.u32 %v2603_v14, 16  ;;  %v920_v63 = vshll.u32 %v2606_v26, 16 }
  0x50   : > { %2234 = vmatmul.mubr.msk.bf16.gmra.mrb[4].mxu0 %vm335_vm3, %v2360_v49  ;;  %2191 = vmatprep.subr.bf16.mxu1 %v2361_v21  ;;  %v1488_v29 = vshll.u32 %v2806_v38, 16  ;;  %v1481_v15 = vrot.slane %v1479_v35, 4  ;;  %v1484_v37 = vrot.slane %v1482_v39, 5  ;;  %v1631_v49 = vrot.slane %v2705_v36, 5  ;;  %v1967_v14 = vld [vmem:[%s2434_s27 + $0x30] sm:$0xf] }
  0x51   : > { %2241 = vmatprep.mubr.msk.bf16.mxu0 %vm335_vm3, %v2043_v62  ;;  %v1635_v36 = vrot.slane %v2714_v16, 5  ;;  %v1639_v16 = vrot.slane %v2733_v13, 5  ;;  %v1477_v2 = vsel %vm2473_vm2, %v1472_v7, %v1476_v41  ;;  %v2063_v43 = vrot.slane %v2055_v60, 9  ;;  %v1965_v13 = vld [vmem:[%s2434_s27 + $0x28] sm:$0xf] }
  0x52   : > { %v1490_v0 = vrot.slane %v1488_v29, 5  ;;  %v1632_v11 = vsel %vm2580_vm6, %v2061_v55, %v1631_v49  ;;  %v2366_v5 = vld [vmem:[%s2434_s27 + $0x28] ss:$8 sps:$4 sm:$0xff]   ;;  %v1643_v20 = vrot.slane %v2737_v56, 5  ;;  %v897_v12 = vshrl.u32 %v1965_v13, 16 }
  0x53   : > { %2192 = vmatpush3.bf16.msra.mxu1 %v2361_v21  ;;  %v1485_v21 = vor.u32 %v1484_v37, %v1481_v15  ;;  %v1636_v9 = vsel %vm2580_vm6, %v2062_v59, %v1635_v36  ;;  %v2057_v32 = vld [vmem:[%s2434_s27 + $0x30] sm:$0xe]  ;;  %v2064_v19 = vrot.slane %v2056_v61, 9  ;;  %v900_v4 = vshll.u32 %v1965_v13, 16  ;;  %v1969_v27 = vld [vmem:[%s2434_s27 + $0x38] sm:$0xf] }
  0x54   : > { %2261 = vmatprep.subr.bf16.mxu1 %v2410_v1  ;;  %v2069_v52 = vcombine.low %v1632_v11, %v1636_v9  ;;  %v911_v28 = vshrl.u32 %v1967_v14, 16  ;;  %v914_v39 = vshll.u32 %v1967_v14, 16  ;;  %v2065_v29 = vrot.slane %v2057_v32, 9  ;;  %v2367_v7 = vld [vmem:[%s2434_s27 + $0x38] ss:$8 sps:$4 sm:$0xff]  }
  0x55   : > { %v1486_v62 = vrot.slane %v1485_v21, 4  ;;  %v902_v45 = vrot.slane %v900_v4, 5  ;;  %v1647_v34 = vrot.slane %v2771_v57, 5  ;;  %v1651_v18 = vrot.slane %v2782_v53, 5  ;;  %v2059_v59 = vld [vmem:[%s2434_s27 + $0x40] sm:$0xe] }
  0x56   : > { %2186 = vmatmul.mubr.msk.bf16.gmra.mrb[4].mxu1 %vm335_vm3, %v1932_v22  ;;  %v1971_v22 = vld [vmem:[%s2434_s27 + $0x40] sm:$0xf]  ;;  %v913_v33 = vrot.slane %v911_v28, 4  ;;  %v916_v56 = vrot.slane %v914_v39, 5  ;;  %v925_v15 = vshrl.u32 %v1969_v27, 16  ;;  %v928_v37 = vshll.u32 %v1969_v27, 16 }
  0x57   : > { %2193 = vmatprep.mubr.msk.bf16.mxu1 %vm335_vm3, %v2363_v25  ;;  %v1491_v26 = vsel %vm2473_vm2, %v1486_v62, %v1490_v0  ;;  %v2066_v25 = vrot.slane %v2058_v50, 9  ;;  %v939_v8 = vshrl.u32 %v1971_v22, 16  ;;  %v942_v10 = vshll.u32 %v1971_v22, 16  ;;  %v2060_v60 = vld [vmem:[%s2434_s27 + $0x48] sm:$0xe] }
  0x58   : > { %2242 = vmatmul.mubr.msk.bf16.vlgmr.msra.gmra.mrb[0].mxu0 %vm335_vm3, %v2044_v40  ;;  %v2046_v35 = vcombine.low %v1477_v2, %v1491_v26  ;;  %v908_v40 = vrot.slane %v906_v58, 5  ;;  %v917_v41 = vor.u32 %v916_v56, %v913_v33  ;;  %v922_v57 = vrot.slane %v920_v63, 5 }
  0x59   : > { %2250 = vmatpush3.bf16.msra.mxu0 %v2767_v24  ;;  %2245 = vmatprep.mubr.msk.bf16.mxu0 %vm335_vm3, %v2045_v51  ;;  %v899_v24 = vrot.slane %v897_v12, 4  ;;  %v927_v48 = vrot.slane %v925_v15, 4  ;;  %v930_v21 = vrot.slane %v928_v37, 5  ;;  %v1640_v53 = vsel %vm2580_vm6, %v2063_v43, %v1639_v16 }
  0x5a   : > { %2251 = vmatprep.subr.bf16.mxu0 %v2365_v6  ;;  %v941_v42 = vrot.slane %v939_v8, 4  ;;  %v944_v47 = vrot.slane %v942_v10, 5  ;;  %v918_v36 = vrot.slane %v917_v41, 4  ;;  %v1648_v51 = vsel %vm2580_vm6, %v2065_v29, %v1647_v34 }
  0x5b   : > { %v903_v49 = vor.u32 %v902_v45, %v899_v24  ;;  %v948_v62 = vshll.u32 %v2636_v44, 16  ;;  %v931_v16 = vor.u32 %v930_v21, %v927_v48  ;;  %v2067_v11 = vrot.slane %v2059_v59, 9 }
  0x5c   : > { %v923_v61 = vsel %vm2473_vm2, %v918_v36, %v922_v57  ;;  %v945_v58 = vor.u32 %v944_v47, %v941_v42  ;;  %v1655_v9 = vrot.slane %v2801_v17, 5  ;;  %v2068_v43 = vrot.slane %v2060_v60, 9 }
  0x5d   : > { %2252 = vmatpush3.bf16.msra.mxu0 %v2365_v6  ;;  %v904_v0 = vrot.slane %v903_v49, 4  ;;  %v1652_v6 = vsel %vm2580_vm6, %v2066_v25, %v1651_v18  ;;  %v1659_v13 = vrot.slane %v2806_v38, 5  ;;  %v936_v44 = vrot.slane %v934_v23, 5 }
  0x5e   : > { %2194 = vmatmul.mubr.msk.bf16.vlgmr.msra.gmra.mrb[0].mxu1 %vm335_vm3, %v2364_v54  ;;  %v2071_v2 = vcombine.low %v1648_v51, %v1652_v6  ;;  %v932_v14 = vrot.slane %v931_v16, 4  ;;  %v946_v26 = vrot.slane %v945_v58, 4  ;;  %v1656_v17 = vsel %vm2580_vm6, %v2067_v11, %v1655_v9 }
  0x5f   : > { %2263 = vmatpush3.bf16.msra.mxu1 %v2410_v1  ;;  %2197 = vmatprep.mubr.msk.bf16.mxu1 %vm335_vm3, %v2366_v5  ;;  %v1644_v1 = vsel %vm2580_vm6, %v2064_v19, %v1643_v20  ;;  %v909_v55 = vsel %vm2473_vm2, %v904_v0, %v908_v40  ;;  %v1660_v38 = vsel %vm2580_vm6, %v2068_v43, %v1659_v13 }
  0x60   : > { %2246 = vmatmul.mubr.msk.bf16.gmra.mrb[4].mxu0 %vm335_vm3, %v2046_v35  ;;  %2262 = vmatprep.subr.bf16.mxu1 %v2421_v3  ;;  %v2070_v63 = vcombine.low %v1640_v53, %v1644_v1  ;;  %v1975_v54 = vcombine.low %v909_v55, %v923_v61  ;;  %v937_v5 = vsel %vm2473_vm2, %v932_v14, %v936_v44 }
  0x61   : > { %2253 = vmatprep.mubr.msk.bf16.mxu0 %vm335_vm3, %v2069_v52  ;;  %v2072_v23 = vcombine.low %v1656_v17, %v1660_v38 }
  0x63   : > { %2264 = vmatpush3.bf16.msra.mxu1 %v2421_v3  ;;  %v950_v3 = vrot.slane %v948_v62, 5 }
  0x65   : > { %v951_v31 = vsel %vm2473_vm2, %v946_v26, %v950_v3 }
  0x66   : > { %2198 = vmatmul.mubr.msk.bf16.gmra.mrb[4].mxu1 %vm335_vm3, %v2367_v7  ;;  %v1976_v20 = vcombine.low %v937_v5, %v951_v31 }
  0x67   : > { %2209 = vmatprep.mubr.msk.bf16.mxu1 %vm335_vm3, %v1975_v54 }
  0x68   : > { %2254 = vmatmul.mubr.msk.bf16.vlgmr.msra.gmra.mrb[0].mxu0 %vm335_vm3, %v2070_v63 }
  0x69   : > { %2257 = vmatprep.mubr.msk.bf16.mxu0 %vm335_vm3, %v2071_v2 }
  0x70   : > { %2258 = vmatmul.mubr.msk.bf16.gmra.mrb[4].mxu0 %vm335_vm3, %v2072_v23 }
  0x72   : > { %2210 = vmatmul.mubr.msk.bf16.vlgmr.msra.gmra.mrb[4].mxu1 %vm335_vm3, %v1976_v20 }
 0x131   : > { %v2195_v12 = vpop.f32.mrb[0].mxu1 }
 0x132   : > { %v785_v32 = vpop.f32.mrb[1].mxu1 }
 0x133   : > { %v2196_v50 = vpop.f32.mrb[2].mxu1 }
 0x134   : > { %v788_v52 = vpop.f32.mrb[3].mxu1 }
 0x13b   : > { %v2255_v19 = vpop.f32.mrb[0].mxu0 }
 0x13c   : > { %v2265_v4 = vadd.f32 %v2255_v19, %v2195_v12  ;;  %v1735_v28 = vpop.f32.mrb[1].mxu0 }
 0x13d   : > { %v2266_v30 = vadd.f32 %v1735_v28, %v785_v32  ;;  %v2256_v27 = vpop.f32.mrb[2].mxu0 }
 0x13e   : > { %v1783_v35 = vadd.f32 %v2265_v4, %v2079_v46  ;;  %v2267_v24 = vadd.f32 %v2256_v27, %v2196_v50  ;;  %v1738_v39 = vpop.f32.mrb[3].mxu0 }
 0x13f   : > { %v1781_v29 = vadd.f32 %v2266_v30, %v2079_v46  ;;  %v2268_v22 = vadd.f32 %v1738_v39, %v788_v52 }
 0x140   : > { %v1791_v45 = vmax.f32 %v1783_v35, 0.0  ;;  %v1784_v33 = vadd.f32 %v2267_v24, %v2079_v46 }
 0x141   : > { %v1789_v34 = vmax.f32 %v1781_v29, 0.0  ;;  %v1782_v25 = vadd.f32 %v2268_v22, %v2079_v46 }
 0x142   : > { %v2093_v56 = vpack.c.bf16 %v1791_v45, %v1791_v45  ;;  %v1792_v18 = vmax.f32 %v1784_v33, 0.0 }
 0x143   : > { %v2091_v15 = vpack.c.bf16 %v1789_v34, %v1789_v34  ;;  %v1790_v37 = vmax.f32 %v1782_v25, 0.0  ;;  %v2259_v49 = vpop.f32.mrb[4].mxu0 }
 0x144   : > { %1832 = vst.msk [vmem:[%s2902_s7 + $0x8] sm:$0xf] %vm1829_vm7, %v2093_v56  ;;  %v2094_v40 = vpack.c.bf16 %v1792_v18, %v1792_v18  ;;  %v1751_v8 = vpop.f32.mrb[5].mxu0 }
 0x145   : > { %1830 = vst.msk [vmem:[%s2902_s7] sm:$0xf] %vm1829_vm7, %v2091_v15  ;;  %v2092_v10 = vpack.c.bf16 %v1790_v37, %v1790_v37  ;;  %v2211_v41 = vpop.f32.mrb[4].mxu1  ;;  %v2260_v57 = vpop.f32.mrb[6].mxu0 }
 0x146   : > { %1833 = vst.msk [vmem:[%s2902_s7 + $0xc] sm:$0xf] %vm1829_vm7, %v2094_v40  ;;  %v2269_v48 = vadd.f32 %v2259_v49, %v2211_v41  ;;  %v1042_v21 = vpop.f32.mrb[5].mxu1  ;;  %v1754_v53 = vpop.f32.mrb[7].mxu0 }
 0x147   : > { %1831 = vst.msk [vmem:[%s2902_s7 + $0x4] sm:$0xf] %vm1829_vm7, %v2092_v10  ;;  %v2270_v0 = vadd.f32 %v1751_v8, %v1042_v21  ;;  %v2212_v42 = vpop.f32.mrb[6].mxu1 }
 0x148   : > { %v1787_v47 = vadd.f32 %v2269_v48, %v2079_v46  ;;  %v2271_v1 = vadd.f32 %v2260_v57, %v2212_v42  ;;  %v1045_v36 = vpop.f32.mrb[7].mxu1 }
 0x149   : > { %v1785_v51 = vadd.f32 %v2270_v0, %v2079_v46  ;;  %v2272_v6 = vadd.f32 %v1754_v53, %v1045_v36 }
 0x14a   : > { %v1795_v7 = vmax.f32 %v1787_v47, 0.0  ;;  %v1788_v55 = vadd.f32 %v2271_v1, %v2079_v46 }
 0x14b   : > { %v1793_v59 = vmax.f32 %v1785_v51, 0.0  ;;  %v1786_v60 = vadd.f32 %v2272_v6, %v2079_v46 }
 0x14c   : > { %v2097_v62 = vpack.c.bf16 %v1795_v7, %v1795_v7  ;;  %v1796_v61 = vmax.f32 %v1788_v55, 0.0 }
 0x14d   : > { %v2095_v16 = vpack.c.bf16 %v1793_v59, %v1793_v59  ;;  %v1794_v58 = vmax.f32 %v1786_v60, 0.0 }
 0x14e   : > { %1836 = vst.msk [vmem:[%s2902_s7 + $0x18] sm:$0xf] %vm1829_vm7, %v2097_v62  ;;  %v2098_v63 = vpack.c.bf16 %v1796_v61, %v1796_v61 }
 0x14f   : > { %1834 = vst.msk [vmem:[%s2902_s7 + $0x10] sm:$0xf] %vm1829_vm7, %v2095_v16  ;;  %v2096_v54 = vpack.c.bf16 %v1794_v58, %v1794_v58 }
 0x150   : > { %1837 = vst.msk [vmem:[%s2902_s7 + $0x1c] sm:$0xf] %vm1829_vm7, %v2098_v63 }
 0x151   : > { %1835 = vst.msk [vmem:[%s2902_s7 + $0x14] sm:$0xf] %vm1829_vm7, %v2096_v54 }
 0x152 PF: > { %s13_s12 = sadd.s32 1, %s2374_s12  }
 0x153   : > { %p10_p4 = scmp.ge.s32.totalorder %s13_s12, 4  }
 0x155   :  { %12 = sbr.rel (!%p10_p4) target bundleno = 1 (0x1), region = 64 }

// kernel: vae_forward.15
= control target key start
LH: loop header
LB: loop body
LE: loop exit
PB: predicated region body
PF: predicated region fallthrough
CT: control target
= control target key end

     0   :  { %s6304_s12 = smov 0   ;;  %s8104_s0 = inlined_call_operand.vmem [shape: bf16[2,18,18,16], index: 0, kind: input, shape index: {}]   ;;  %s8105_s1 = inlined_call_operand.vmem [shape: bf16[144,3], index: 1, kind: input, shape index: {}]   ;;  %s8106_s2 = inlined_call_operand.vmem [shape: f32[1,3], index: 2, kind: input, shape index: {}]   ;;  %s8107_s3 = inlined_call_operand.vmem [shape: f32[2,256,3], index: 3, kind: output, shape index: {}]  }
   0x1 LB: > { %s4885_s13 = sadd.s32 4294967295, %s6282_s12   ;;  %p4889_p0 = scmp.ge.s32.totalorder %s6282_s12, 1  ;;  %s6282_s12 = sphi %s6304_s12, %s13_s12  }
   0x2   : > { %p137_p1 = scmp.lt.s32.totalorder %s6282_s12, 3 }
   0x4   : > { %p138_p2 = pnand %p4889_p0, %p137_p1 }
   0x6   : > { %141 = sbr.rel (%p138_p2) target bundleno = 585 (0x249), region = 32 }
   0xd   : > { %v6160_v0 = vld [vmem:[%s8105_s1 + $0x8] sm:$0xff]   ;;  %p161_p3 = scmp.lt.s32.totalorder %s4885_s13, 1  ;;  %v6161_v1 = vld [vmem:[%s8105_s1 + $0x20] sm:$0xff]   ;;  %vm222_vm0 = vsmask.f32 3328  ;;  %vm665_vm3 = vcmask 130048  }
   0xe   : > { %5587 = vmatprep.subr.bf16.mxu1 %v6160_v0  ;;  %v6323_v2 = vld [vmem:[%s8105_s1] sm:$0xff]   ;;  %5723 = vmatprep.subr.bf16.mxu0 %v6161_v1  ;;  %v6330_v3 = vld [vmem:[%s8105_s1 + $0x28] sm:$0xff]   ;;  %vm223_vm1 = vsmask.f32 7440  ;;  %vm1218_vm4 = vcmask 1042432   ;;  %vm1219_vm5 = vcmask 1046532  }
   0xf   : > { %s8173_s13 = smov (!%p161_p3, %s4885_s13), 1  ;;  %5588 = vmatpush3.bf16.msra.mxu1 %v6160_v0  ;;  %5724 = vmatpush3.bf16.msra.mxu0 %v6161_v1  ;;  %vm6354_vm2 = vmor %vm222_vm0, %vm223_vm1  ;;  %vm4797_vm7 = vcmask 23552  }
  0x10   : > { %s6151_s20 = smul.u32 216, %s8173_s13  ;;  %5621 = vmatprep.subr.bf16.mxu1 %v6323_v2  ;;  %5757 = vmatprep.subr.bf16.mxu0 %v6330_v3  ;;  %vm6576_vm6 = vmor %vm1218_vm4, %vm1219_vm5  ;;  %s5433_s15 = sshll.u32 %s8173_s13, 8 }
  0x12   : > { %s6335_s25 = scalar_lea.vmem %s8104_s0, %s6151_s20  ;;  %s8003_s20 = scalar_lea.vmem %s8107_s3, %s5433_s15 }
  0x13   : > { %v172_v4 = vld [vmem:[%s6335_s25] sm:$0xf]  ;;  %v173_v5 = vld [vmem:[%s6335_s25 + $0x4] sm:$0xf]  ;;  %v206_v6 = vld [vmem:[%s6335_s25 + $0x8] sm:$0x1] }
  0x14   : > { %v226_v7 = vshrl.u32 %v172_v4, 16  ;;  %v229_v8 = vshll.u32 %v172_v4, 16  ;;  %v235_v9 = vshll.u32 %v173_v5, 16  ;;  %v239_v10 = vshrl.u32 %v173_v5, 16  ;;  %v5073_v11 = vld [vmem:[%s6335_s25 + $0xc] sm:$0xf] }
  0x15   : > { %v245_v12 = vshll.u32 %v206_v6, 16  ;;  %v6343_v13 = vld [vmem:[%s6335_s25 + $0x10] sm:$0xf]  ;;  %v6346_v14 = vld [vmem:[%s6335_s25 + $0x14] sm:$0x1]  ;;  %v2041_v20 = vshrl.u32 %v5073_v11, 16 }
  0x16   : > { %v228_v15 = vrot.slane %v226_v7, 4  ;;  %v231_v16 = vrot.slane %v229_v8, 5  ;;  %v237_v17 = vrot.slane %v235_v9, 5  ;;  %v241_v18 = vrot.slane %v239_v10, 4  ;;  %v174_v27 = vld [vmem:[%s6335_s25 + $0xc] sm:$0xf] }
  0x17   : > { %v247_v19 = vrot.slane %v245_v12, 5  ;;  %v2044_v21 = vshll.u32 %v5073_v11, 16  ;;  %v2050_v22 = vshll.u32 %v6343_v13, 16  ;;  %v2054_v25 = vshrl.u32 %v6343_v13, 16  ;;  %v175_v32 = vld [vmem:[%s6335_s25 + $0x10] sm:$0xf] }
  0x18   : > { %v232_v23 = vor.u32 %v231_v16, %v228_v15  ;;  %v242_v24 = vor.u32 %v241_v18, %v237_v17  ;;  %v2060_v26 = vshll.u32 %v6346_v14, 16  ;;  %v2043_v29 = vrot.slane %v2041_v20, 4  ;;  %v207_v38 = vld [vmem:[%s6335_s25 + $0x14] sm:$0x1]  ;;  %v5076_v49 = vld [vmem:[%s6335_s25 + $0x18] sm:$0xf] }
  0x19   : > { %v2046_v30 = vrot.slane %v2044_v21, 5  ;;  %v2052_v31 = vrot.slane %v2050_v22, 5  ;;  %v2056_v35 = vrot.slane %v2054_v25, 4  ;;  %v250_v39 = vshrl.u32 %v174_v27, 16  ;;  %v6366_v54 = vld [vmem:[%s6335_s25 + $0x1c] sm:$0xf] }
  0x1a   : > { %v233_v33 = vrot.slane %v232_v23, 4  ;;  %v243_v34 = vrot.slane %v242_v24, 4  ;;  %v2062_v37 = vrot.slane %v2060_v26, 5  ;;  %v253_v40 = vshll.u32 %v174_v27, 16  ;;  %v6374_v59 = vld [vmem:[%s6335_s25 + $0x20] sm:$0x1] }
  0x1b   : > { %v2047_v36 = vor.u32 %v2046_v30, %v2043_v29  ;;  %v2057_v43 = vor.u32 %v2056_v35, %v2052_v31  ;;  %v259_v44 = vshll.u32 %v175_v32, 16  ;;  %v252_v47 = vrot.slane %v250_v39, 4  ;;  %v176_v10 = vld [vmem:[%s6335_s25 + $0x18] sm:$0xf]  ;;  %v208_v24 = vld [vmem:[%s6335_s25 + $0x20] sm:$0x1] }
  0x1c   : > { %v238_v41 = vsel %vm6354_vm2, %v233_v33, %v237_v17  ;;  %v248_v42 = vsel %vm6354_vm2, %v243_v34, %v247_v19  ;;  %v255_v48 = vrot.slane %v253_v40, 5  ;;  %v263_v52 = vshrl.u32 %v175_v32, 16  ;;  %v177_v17 = vld [vmem:[%s6335_s25 + $0x1c] sm:$0xf]  ;;  %v5079_v32 = vld [vmem:[%s6335_s25 + $0x24] sm:$0xf] }
  0x1d   : > { %v4893_v45 = vcombine.low %v238_v41, %v248_v42  ;;  %v2048_v46 = vrot.slane %v2047_v36, 4  ;;  %v2058_v50 = vrot.slane %v2057_v43, 4  ;;  %v261_v51 = vrot.slane %v259_v44, 5 }
  0x1e   : > { %v269_v53 = vshll.u32 %v207_v38, 16  ;;  %v2787_v56 = vrot.slane %v6343_v13, 5  ;;  %v2790_v57 = vrot.slane %v6346_v14, 5  ;;  %v256_v58 = vor.u32 %v255_v48, %v252_v47  ;;  %v6166_v38 = vld [vmem:[%s8105_s1 + $0x10] sm:$0xff]   ;;  %v6609_v14 = vld [vmem:[%s6335_s25 + $0x7c] sm:$0xf] }
  0x1f   : > { %5589 = vmatprep.mubr.msk.bf16.mxu1 %vm665_vm3, %v4893_v45  ;;  %v2053_v55 = vsel %vm6354_vm2, %v2048_v46, %v2052_v31  ;;  %v2063_v60 = vsel %vm6354_vm2, %v2058_v50, %v2062_v37  ;;  %v265_v61 = vrot.slane %v263_v52, 4  ;;  %v2065_v63 = vshrl.u32 %v5076_v49, 16  ;;  %v6397_v37 = vld [vmem:[%s6335_s25 + $0x28] sm:$0xf]  ;;  %v6406_v45 = vld [vmem:[%s6335_s25 + $0x2c] sm:$0x1] }
  0x20   : > { %v271_v62 = vrot.slane %v269_v53, 5  ;;  %v5121_v0 = vcombine.low %v2053_v55, %v2063_v60  ;;  %v257_v1 = vrot.slane %v256_v58, 4  ;;  %v2068_v4 = vshll.u32 %v5076_v49, 16  ;;  %v178_v52 = vld [vmem:[%s6335_s25 + $0x24] sm:$0xf] }
  0x21   : > { %v2074_v5 = vshll.u32 %v6366_v54, 16  ;;  %v266_v6 = vor.u32 %v265_v61, %v261_v51  ;;  %v2067_v7 = vrot.slane %v2065_v63, 4  ;;  %v2078_v8 = vshrl.u32 %v6366_v54, 16  ;;  %v179_v61 = vld [vmem:[%s6335_s25 + $0x28] sm:$0xf] }
  0x22   : > { %v2084_v9 = vshll.u32 %v6374_v59, 16  ;;  %5725 = vmatprep.mubr.msk.bf16.mxu0 %vm665_vm3, %v5121_v0  ;;  %v262_v11 = vsel %vm6354_vm2, %v257_v1, %v261_v51  ;;  %v2070_v12 = vrot.slane %v2068_v4, 5  ;;  %v2794_v16 = vrot.slane %v6366_v54, 5 }
  0x23   : > { %v2076_v15 = vrot.slane %v2074_v5, 5  ;;  %v267_v18 = vrot.slane %v266_v6, 4  ;;  %v2080_v19 = vrot.slane %v2078_v8, 4  ;;  %v2797_v21 = vrot.slane %v6374_v59, 5  ;;  %v209_v6 = vld [vmem:[%s6335_s25 + $0x2c] sm:$0x1] }
  0x24   : > { %v2086_v20 = vrot.slane %v2084_v9, 5  ;;  %v2071_v22 = vor.u32 %v2070_v12, %v2067_v7  ;;  %v6390_v23 = vrot.slane %v2794_v16, 4  ;;  %v274_v25 = vshrl.u32 %v176_v10, 16 }
  0x25   : > { %v277_v26 = vshll.u32 %v176_v10, 16  ;;  %v272_v27 = vsel %vm6354_vm2, %v267_v18, %v271_v62  ;;  %v2081_v29 = vor.u32 %v2080_v19, %v2076_v15  ;;  %v283_v30 = vshll.u32 %v177_v17, 16  ;;  %v6417_v62 = vld [vmem:[%s8105_s1 + $0x30] sm:$0xff]  }
  0x26   : > { %v287_v31 = vshrl.u32 %v177_v17, 16  ;;  %v4894_v33 = vcombine.low %v262_v11, %v272_v27  ;;  %v2072_v34 = vrot.slane %v2071_v22, 4  ;;  %v276_v35 = vrot.slane %v274_v25, 4  ;;  %v6430_v22 = vld [vmem:[%s6335_s25 + $0x34] sm:$0xf] }
  0x27   : > { %v279_v36 = vrot.slane %v277_v26, 5  ;;  %v2082_v39 = vrot.slane %v2081_v29, 4  ;;  %v285_v40 = vrot.slane %v283_v30, 5  ;;  %v293_v42 = vshll.u32 %v208_v24, 16  ;;  %v6437_v30 = vld [vmem:[%s6335_s25 + $0x38] sm:$0x1] }
  0x28   : > { %v289_v41 = vrot.slane %v287_v31, 4  ;;  %5590 = vmatmul.mubr.msk.bf16.vlgmr.msra.gmra.mrb[0].mxu1 %vm665_vm3, %v4894_v33  ;;  %v2077_v43 = vsel %vm6354_vm2, %v2072_v34, %v2076_v15  ;;  %v2089_v46 = vshrl.u32 %v5079_v32, 16  ;;  %v2092_v47 = vshll.u32 %v5079_v32, 16  ;;  %v5082_v15 = vld [vmem:[%s6335_s25 + $0x30] sm:$0xf] }
  0x29   : > { %v280_v44 = vor.u32 %v279_v36, %v276_v35  ;;  %5622 = vmatpush3.bf16.msra.mxu1 %v6323_v2  ;;  %v2087_v48 = vsel %vm6354_vm2, %v2082_v39, %v2086_v20  ;;  %v295_v50 = vrot.slane %v293_v42, 5  ;;  %v2098_v51 = vshll.u32 %v6397_v37, 16  ;;  %v180_v42 = vld [vmem:[%s6335_s25 + $0x30] sm:$0xf] }
  0x2a   : > { %v290_v49 = vor.u32 %v289_v41, %v285_v40  ;;  %v5122_v53 = vcombine.low %v2077_v43, %v2087_v48  ;;  %v2091_v58 = vrot.slane %v2089_v46, 4  ;;  %v2094_v60 = vrot.slane %v2092_v47, 5  ;;  %5655 = vmatprep.subr.bf16.mxu1 %v6166_v38  ;;  %v181_v48 = vld [vmem:[%s6335_s25 + $0x34] sm:$0xf] }
  0x2b   : > { %v281_v55 = vrot.slane %v280_v44, 4  ;;  %v2100_v63 = vrot.slane %v2098_v51, 5  ;;  %v2102_v0 = vshrl.u32 %v6397_v37, 16  ;;  %v2108_v1 = vshll.u32 %v6406_v45, 16 }
  0x2c   : > { %v291_v2 = vrot.slane %v290_v49, 4  ;;  %5726 = vmatmul.mubr.msk.bf16.vlgmr.msra.gmra.mrb[0].mxu0 %vm665_vm3, %v5122_v53  ;;  %v2095_v5 = vor.u32 %v2094_v60, %v2091_v58  ;;  %v298_v7 = vshrl.u32 %v178_v52, 16  ;;  %v301_v8 = vshll.u32 %v178_v52, 16  ;;  %v210_v53 = vld [vmem:[%s6335_s25 + $0x38] sm:$0x1] }
  0x2d   : > { %v286_v4 = vsel %vm6354_vm2, %v281_v55, %v285_v40  ;;  %5758 = vmatpush3.bf16.msra.mxu0 %v6330_v3  ;;  %v2104_v10 = vrot.slane %v2102_v0, 4  ;;  %v2110_v11 = vrot.slane %v2108_v1, 5  ;;  %v307_v12 = vshll.u32 %v179_v61, 16 }
  0x2e   : > { %v296_v9 = vsel %vm6354_vm2, %v291_v2, %v295_v50  ;;  %v2096_v18 = vrot.slane %v2095_v5, 4  ;;  %v300_v19 = vrot.slane %v298_v7, 4  ;;  %v303_v20 = vrot.slane %v301_v8, 5  ;;  %5791 = vmatprep.subr.bf16.mxu0 %v6417_v62 }
  0x2f   : > { %v4895_v17 = vcombine.low %v286_v4, %v296_v9  ;;  %v2105_v24 = vor.u32 %v2104_v10, %v2100_v63  ;;  %v309_v25 = vrot.slane %v307_v12, 5  ;;  %v311_v26 = vshrl.u32 %v179_v61, 16  ;;  %v5085_v4 = vld [vmem:[%s6335_s25 + $0x3c] sm:$0xf]  ;;  %v6454_v9 = vld [vmem:[%s6335_s25 + $0x40] sm:$0xf] }
  0x30   : > { %v317_v3 = vshll.u32 %v209_v6, 16  ;;  %v2101_v27 = vsel %vm6354_vm2, %v2096_v18, %v2100_v63  ;;  %v304_v29 = vor.u32 %v303_v20, %v300_v19  ;;  %v2113_v31 = vshrl.u32 %v5082_v15, 16  ;;  %v6459_v20 = vld [vmem:[%s6335_s25 + $0x44] sm:$0x1] }
  0x31   : > { %5593 = vmatprep.mubr.msk.bf16.mxu1 %vm665_vm3, %v4895_v17  ;;  %v2116_v32 = vshll.u32 %v5082_v15, 16  ;;  %v2106_v33 = vrot.slane %v2105_v24, 4  ;;  %v313_v34 = vrot.slane %v311_v26, 4  ;;  %v2122_v36 = vshll.u32 %v6430_v22, 16 }
  0x32   : > { %v319_v35 = vrot.slane %v317_v3, 5  ;;  %v305_v38 = vrot.slane %v304_v29, 4  ;;  %v2115_v39 = vrot.slane %v2113_v31, 4  ;;  %v2126_v41 = vshrl.u32 %v6430_v22, 16  ;;  %v182_v29 = vld [vmem:[%s6335_s25 + $0x3c] sm:$0xf] }
  0x33   : > { %v2118_v40 = vrot.slane %v2116_v32, 5  ;;  %v2111_v43 = vsel %vm6354_vm2, %v2106_v33, %v2110_v11  ;;  %v314_v44 = vor.u32 %v313_v34, %v309_v25  ;;  %v2124_v46 = vrot.slane %v2122_v36, 5 }
  0x34   : > { %v2132_v47 = vshll.u32 %v6437_v30, 16  ;;  %v5123_v49 = vcombine.low %v2101_v27, %v2111_v43  ;;  %v310_v50 = vsel %vm6354_vm2, %v305_v38, %v309_v25  ;;  %v2128_v52 = vrot.slane %v2126_v41, 4 }
  0x35   : > { %v2119_v51 = vor.u32 %v2118_v40, %v2115_v39  ;;  %v315_v55 = vrot.slane %v314_v44, 4  ;;  %v322_v60 = vshrl.u32 %v180_v42, 16  ;;  %v325_v61 = vshll.u32 %v180_v42, 16 }
  0x36   : > { %v2134_v58 = vrot.slane %v2132_v47, 5  ;;  %5729 = vmatprep.mubr.msk.bf16.mxu0 %vm665_vm3, %v5123_v49  ;;  %v2129_v63 = vor.u32 %v2128_v52, %v2124_v46  ;;  %v331_v0 = vshll.u32 %v181_v48, 16  ;;  %v335_v1 = vshrl.u32 %v181_v48, 16  ;;  %v211_v49 = vld [vmem:[%s6335_s25 + $0x44] sm:$0x1] }
  0x37   : > { %v2120_v2 = vrot.slane %v2119_v51, 4  ;;  %v320_v5 = vsel %vm6354_vm2, %v315_v55, %v319_v35  ;;  %v324_v6 = vrot.slane %v322_v60, 4  ;;  %v327_v7 = vrot.slane %v325_v61, 5  ;;  %v183_v35 = vld [vmem:[%s6335_s25 + $0x40] sm:$0xf] }
  0x38   : > { %v341_v8 = vshll.u32 %v210_v53, 16  ;;  %v4896_v10 = vcombine.low %v310_v50, %v320_v5  ;;  %v2130_v12 = vrot.slane %v2129_v63, 4  ;;  %v333_v15 = vrot.slane %v331_v0, 5  ;;  %v5088_v51 = vld [vmem:[%s6335_s25 + $0x48] sm:$0xf] }
  0x39   : > { %v2125_v11 = vsel %vm6354_vm2, %v2120_v2, %v2124_v46  ;;  %v328_v17 = vor.u32 %v327_v7, %v324_v6  ;;  %v337_v18 = vrot.slane %v335_v1, 4  ;;  %v2137_v24 = vshrl.u32 %v5085_v4, 16  ;;  %v6477_v60 = vld [vmem:[%s6335_s25 + $0x4c] sm:$0xf] }
  0x3a   : > { %v343_v19 = vrot.slane %v341_v8, 5  ;;  %5594 = vmatmul.mubr.msk.bf16.gmra.mrb[4].mxu1 %vm665_vm3, %v4896_v10  ;;  %v2135_v25 = vsel %vm6354_vm2, %v2130_v12, %v2134_v58  ;;  %v2140_v26 = vshll.u32 %v5085_v4, 16  ;;  %v2146_v3 = vshll.u32 %v6454_v9, 16  ;;  %v6485_v10 = vld [vmem:[%s6335_s25 + $0x50] sm:$0x1] }
  0x3b   : > { %v2150_v27 = vshrl.u32 %v6454_v9, 16  ;;  %v5124_v31 = vcombine.low %v2125_v11, %v2135_v25  ;;  %v329_v32 = vrot.slane %v328_v17, 4  ;;  %v338_v33 = vor.u32 %v337_v18, %v333_v15  ;;  %v6492_v25 = vld [vmem:[%s6335_s25 + $0x4c] sm:$0xf] }
  0x3c   : > { %v2139_v34 = vrot.slane %v2137_v24, 4  ;;  %v2142_v36 = vrot.slane %v2140_v26, 5  ;;  %v2148_v38 = vrot.slane %v2146_v3, 5  ;;  %v2156_v40 = vshll.u32 %v6459_v20, 16 }
  0x3d   : > { %v2152_v39 = vrot.slane %v2150_v27, 4  ;;  %5730 = vmatmul.mubr.msk.bf16.gmra.mrb[4].mxu0 %vm665_vm3, %v5124_v31  ;;  %v334_v41 = vsel %vm6354_vm2, %v329_v32, %v333_v15  ;;  %v339_v42 = vrot.slane %v338_v33, 4  ;;  %v346_v43 = vshrl.u32 %v182_v29, 16  ;;  %v6489_v15 = vld [vmem:[%s6335_s25 + $0x48] sm:$0xf] }
  0x3e   : > { %v349_v44 = vshll.u32 %v182_v29, 16  ;;  %v2143_v46 = vor.u32 %v2142_v36, %v2139_v34  ;;  %v2158_v48 = vrot.slane %v2156_v40, 5  ;;  %v355_v50 = vshll.u32 %v183_v35, 16  ;;  %v212_v34 = vld [vmem:[%s6335_s25 + $0x50] sm:$0x1] }
  0x3f   : > { %v2153_v47 = vor.u32 %v2152_v39, %v2148_v38  ;;  %v344_v52 = vsel %vm6354_vm2, %v339_v42, %v343_v19  ;;  %v348_v53 = vrot.slane %v346_v43, 4  ;;  %v359_v58 = vshrl.u32 %v183_v35, 16 }
  0x40   : > { %v351_v55 = vrot.slane %v349_v44, 5  ;;  %v4897_v61 = vcombine.low %v334_v41, %v344_v52  ;;  %v2144_v2 = vrot.slane %v2143_v46, 4  ;;  %v357_v0 = vrot.slane %v355_v50, 5  ;;  %v5091_v41 = vld [vmem:[%s6335_s25 + $0x54] sm:$0xf] }
  0x41   : > { %v2154_v63 = vrot.slane %v2153_v47, 4  ;;  %v361_v4 = vrot.slane %v359_v58, 4  ;;  %v365_v5 = vshll.u32 %v211_v49, 16  ;;  %v2161_v6 = vshrl.u32 %v5088_v51, 16 }
  0x42   : > { %v352_v1 = vor.u32 %v351_v55, %v348_v53  ;;  %5597 = vmatprep.mubr.msk.bf16.mxu1 %vm665_vm3, %v4897_v61  ;;  %v2149_v7 = vsel %vm6354_vm2, %v2144_v2, %v2148_v38  ;;  %v2164_v11 = vshll.u32 %v5088_v51, 16  ;;  %v2170_v12 = vshll.u32 %v6477_v60, 16  ;;  %v6508_v51 = vld [vmem:[%s6335_s25 + $0x58] sm:$0xf] }
  0x43   : > { %v2159_v8 = vsel %vm6354_vm2, %v2154_v63, %v2158_v48  ;;  %v362_v19 = vor.u32 %v361_v4, %v357_v0  ;;  %v367_v24 = vrot.slane %v365_v5, 5  ;;  %v2163_v26 = vrot.slane %v2161_v6, 4 }
  0x44   : > { %v5125_v17 = vcombine.low %v2149_v7, %v2159_v8  ;;  %v353_v18 = vrot.slane %v352_v1, 4  ;;  %v2166_v3 = vrot.slane %v2164_v11, 5  ;;  %v2172_v27 = vrot.slane %v2170_v12, 5  ;;  %v6518_v8 = vld [vmem:[%s6335_s25 + $0x54] sm:$0xf] }
  0x45   : > { %v2174_v29 = vshrl.u32 %v6477_v60, 16  ;;  %v363_v32 = vrot.slane %v362_v19, 4  ;;  %v2180_v33 = vshll.u32 %v6485_v10, 16  ;;  %v370_v35 = vshrl.u32 %v6489_v15, 16  ;;  %v6524_v19 = vld [vmem:[%s6335_s25 + $0x58] sm:$0xf] }
  0x46   : > { %5733 = vmatprep.mubr.msk.bf16.mxu0 %vm665_vm3, %v5125_v17  ;;  %v358_v31 = vsel %vm6354_vm2, %v353_v18, %v357_v0  ;;  %v2167_v36 = vor.u32 %v2166_v3, %v2163_v26  ;;  %v373_v39 = vshll.u32 %v6489_v15, 16  ;;  %v379_v40 = vshll.u32 %v6492_v25, 16  ;;  %v6514_v0 = vld [vmem:[%s6335_s25 + $0x5c] sm:$0x1] }
  0x47   : > { %v2176_v38 = vrot.slane %v2174_v29, 4  ;;  %v368_v42 = vsel %vm6354_vm2, %v363_v32, %v367_v24  ;;  %v2182_v43 = vrot.slane %v2180_v33, 5  ;;  %v372_v44 = vrot.slane %v370_v35, 4  ;;  %v213_v33 = vld [vmem:[%s6335_s25 + $0x5c] sm:$0x1] }
  0x48   : > { %v383_v46 = vshrl.u32 %v6492_v25, 16  ;;  %v4898_v47 = vcombine.low %v358_v31, %v368_v42  ;;  %v2168_v48 = vrot.slane %v2167_v36, 4  ;;  %v375_v50 = vrot.slane %v373_v39, 5 }
  0x49   : > { %v2177_v49 = vor.u32 %v2176_v38, %v2172_v27  ;;  %v381_v52 = vrot.slane %v379_v40, 5  ;;  %v389_v55 = vshll.u32 %v212_v34, 16  ;;  %v2185_v58 = vshrl.u32 %v5091_v41, 16  ;;  %v5094_v40 = vld [vmem:[%s6335_s25 + $0x60] sm:$0xf] }
  0x4a   : > { %v385_v53 = vrot.slane %v383_v46, 4  ;;  %5598 = vmatmul.mubr.msk.bf16.gmra.mrb[8].mxu1 %vm665_vm3, %v4898_v47  ;;  %v2173_v61 = vsel %vm6354_vm2, %v2168_v48, %v2172_v27  ;;  %v376_v63 = vor.u32 %v375_v50, %v372_v44  ;;  %v2188_v1 = vshll.u32 %v5091_v41, 16  ;;  %v6538_v46 = vld [vmem:[%s6335_s25 + $0x64] sm:$0xf] }
  0x4b   : > { %v2178_v2 = vrot.slane %v2177_v49, 4  ;;  %v391_v5 = vrot.slane %v389_v55, 5  ;;  %v2187_v6 = vrot.slane %v2185_v58, 4  ;;  %v2194_v7 = vshll.u32 %v6508_v51, 16  ;;  %v6545_v55 = vld [vmem:[%s6335_s25 + $0x68] sm:$0x1] }
  0x4c   : > { %v386_v4 = vor.u32 %v385_v53, %v381_v52  ;;  %v377_v12 = vrot.slane %v376_v63, 4  ;;  %v2190_v17 = vrot.slane %v2188_v1, 5  ;;  %v2198_v18 = vshrl.u32 %v6508_v51, 16 }
  0x4d   : > { %v2183_v11 = vsel %vm6354_vm2, %v2178_v2, %v2182_v43  ;;  %v2196_v3 = vrot.slane %v2194_v7, 5  ;;  %v2204_v27 = vshll.u32 %v6514_v0, 16  ;;  %v394_v34 = vshrl.u32 %v6518_v8, 16 }
  0x4e   : > { %v5126_v24 = vcombine.low %v2173_v61, %v2183_v11  ;;  %v387_v26 = vrot.slane %v386_v4, 4  ;;  %v382_v29 = vsel %vm6354_vm2, %v377_v12, %v381_v52  ;;  %v2191_v31 = vor.u32 %v2190_v17, %v2187_v6  ;;  %v6555_v17 = vld [vmem:[%s6335_s25 + $0x64] sm:$0xf] }
  0x4f   : > { %v2200_v32 = vrot.slane %v2198_v18, 4  ;;  %v2206_v36 = vrot.slane %v2204_v27, 5  ;;  %v397_v38 = vshll.u32 %v6518_v8, 16  ;;  %v403_v39 = vshll.u32 %v6524_v19, 16 }
  0x50   : > { %5734 = vmatmul.mubr.msk.bf16.gmra.mrb[8].mxu0 %vm665_vm3, %v5126_v24  ;;  %v392_v35 = vsel %vm6354_vm2, %v387_v26, %v391_v5  ;;  %v2192_v42 = vrot.slane %v2191_v31, 4  ;;  %v396_v44 = vrot.slane %v394_v34, 4  ;;  %v407_v49 = vshrl.u32 %v6524_v19, 16  ;;  %v6549_v5 = vld [vmem:[%s6335_s25 + $0x60] sm:$0xf] }
  0x51   : > { %v4899_v41 = vcombine.low %v382_v29, %v392_v35  ;;  %v2201_v43 = vor.u32 %v2200_v32, %v2196_v3  ;;  %v399_v47 = vrot.slane %v397_v38, 5  ;;  %v405_v48 = vrot.slane %v403_v39, 5  ;;  %v214_v35 = vld [vmem:[%s6335_s25 + $0x68] sm:$0x1] }
  0x52   : > { %v413_v50 = vshll.u32 %v213_v33, 16  ;;  %v2197_v52 = vsel %vm6354_vm2, %v2192_v42, %v2196_v3  ;;  %v2209_v58 = vshrl.u32 %v5094_v40, 16  ;;  %v2212_v61 = vshll.u32 %v5094_v40, 16 }
  0x53   : > { %5601 = vmatprep.mubr.msk.bf16.mxu1 %vm665_vm3, %v4899_v41  ;;  %v2202_v53 = vrot.slane %v2201_v43, 4  ;;  %v400_v2 = vor.u32 %v399_v47, %v396_v44  ;;  %v409_v63 = vrot.slane %v407_v49, 4  ;;  %v2218_v4 = vshll.u32 %v6538_v46, 16  ;;  %v5154_v43 = vld [vmem:[%s6335_s25 + $0xc] sm:$0xe] }
  0x54   : > { %v415_v1 = vrot.slane %v413_v50, 5  ;;  %v2211_v7 = vrot.slane %v2209_v58, 4  ;;  %v2214_v11 = vrot.slane %v2212_v61, 5  ;;  %v2222_v12 = vshrl.u32 %v6538_v46, 16 }
  0x55   : > { %v2207_v6 = vsel %vm6354_vm2, %v2202_v53, %v2206_v36  ;;  %v401_v24 = vrot.slane %v400_v2, 4  ;;  %v410_v26 = vor.u32 %v409_v63, %v405_v48  ;;  %v2220_v3 = vrot.slane %v2218_v4, 5 }
  0x56   : > { %v5127_v18 = vcombine.low %v2197_v52, %v2207_v6  ;;  %v2215_v27 = vor.u32 %v2214_v11, %v2211_v7  ;;  %v2224_v29 = vrot.slane %v2222_v12, 4  ;;  %v2228_v31 = vshll.u32 %v6545_v55, 16  ;;  %v6583_v7 = vld [vmem:[%s6335_s25 + $0x70] sm:$0xf] }
  0x57   : > { %v418_v32 = vshrl.u32 %v6549_v5, 16  ;;  %v406_v33 = vsel %vm6354_vm2, %v401_v24, %v405_v48  ;;  %v411_v34 = vrot.slane %v410_v26, 4  ;;  %v421_v36 = vshll.u32 %v6549_v5, 16  ;;  %v6570_v48 = vld [vmem:[%s6335_s25 + $0x6c] sm:$0xf] }
  0x58   : > { %5737 = vmatprep.mubr.msk.bf16.mxu0 %vm665_vm3, %v5127_v18  ;;  %v427_v38 = vshll.u32 %v6555_v17, 16  ;;  %v2216_v39 = vrot.slane %v2215_v27, 4  ;;  %v2225_v40 = vor.u32 %v2224_v29, %v2220_v3  ;;  %v2230_v41 = vrot.slane %v2228_v31, 5  ;;  %v215_v31 = vld [vmem:[%s6335_s25 + $0x74] sm:$0x1] }
  0x59   : > { %v420_v42 = vrot.slane %v418_v32, 4  ;;  %v416_v44 = vsel %vm6354_vm2, %v411_v34, %v415_v1  ;;  %v423_v47 = vrot.slane %v421_v36, 5  ;;  %v431_v50 = vshrl.u32 %v6555_v17, 16  ;;  %v5155_v32 = vld [vmem:[%s6335_s25 + $0x18] sm:$0xe] }
  0x5a   : > { %v429_v49 = vrot.slane %v427_v38, 5  ;;  %v4900_v52 = vcombine.low %v406_v33, %v416_v44  ;;  %v2221_v53 = vsel %vm6354_vm2, %v2216_v39, %v2220_v3  ;;  %v2226_v58 = vrot.slane %v2225_v40, 4  ;;  %v6602_v38 = vld [vmem:[%s6335_s25 + $0x78] sm:$0xf] }
  0x5b   : > { %v437_v61 = vshll.u32 %v214_v35, 16  ;;  %v424_v63 = vor.u32 %v423_v47, %v420_v42  ;;  %v433_v1 = vrot.slane %v431_v50, 4  ;;  %v5170_v4 = vrot.slane %v5154_v43, 9  ;;  %v5156_v47 = vld [vmem:[%s6335_s25 + $0x24] sm:$0xe] }
  0x5c   : > { %v2789_v6 = vrot.slane %v2787_v56, 4  ;;  %5602 = vmatmul.mubr.msk.bf16.gmra.mrb[12].mxu1 %vm665_vm3, %v4900_v52  ;;  %v2231_v11 = vsel %vm6354_vm2, %v2226_v58, %v2230_v41  ;;  %v442_v18 = vshrl.u32 %v6570_v48, 16  ;;  %v445_v24 = vshll.u32 %v6570_v48, 16  ;;  %v216_v41 = vld [vmem:[%s6335_s25 + $0x80] sm:$0x1] }
  0x5d   : > { %v439_v12 = vrot.slane %v437_v61, 5  ;;  %v5128_v26 = vcombine.low %v2221_v53, %v2231_v11  ;;  %v425_v3 = vrot.slane %v424_v63, 4  ;;  %v434_v27 = vor.u32 %v433_v1, %v429_v49 }
  0x5e   : > { %v2788_v29 = vsel %vm6576_vm6, %v5170_v4, %v2787_v56  ;;  %v2791_v33 = vsel %vm6576_vm6, %v2789_v6, %v2790_v57  ;;  %v444_v34 = vrot.slane %v442_v18, 4  ;;  %v447_v35 = vrot.slane %v445_v24, 5  ;;  %v6636_v24 = vld [vmem:[%s6335_s25 + $0x88] sm:$0xf] }
  0x5f   : > { %v451_v36 = vshll.u32 %v6583_v7, 16  ;;  %5738 = vmatmul.mubr.msk.bf16.gmra.mrb[12].mxu0 %vm665_vm3, %v5128_v26  ;;  %v430_v13 = vsel %vm6354_vm2, %v425_v3, %v429_v49  ;;  %v435_v56 = vrot.slane %v434_v27, 4  ;;  %v5186_v39 = vcombine.low %v2788_v29, %v2791_v33 }
  0x60   : > { %v455_v40 = vshrl.u32 %v6583_v7, 16  ;;  %v448_v57 = vor.u32 %v447_v35, %v444_v34  ;;  %v461_v43 = vshll.u32 %v215_v31, 16  ;;  %v5171_v44 = vrot.slane %v5155_v32, 9  ;;  %v217_v35 = vld [vmem:[%s6335_s25 + $0x8c] sm:$0x1] }
  0x61   : > { %v453_v42 = vrot.slane %v451_v36, 5  ;;  %v440_v50 = vsel %vm6354_vm2, %v435_v56, %v439_v12  ;;  %5759 = vmatprep.mubr.msk.bf16.mxu0 %vm665_vm3, %v5186_v39  ;;  %v2798_v49 = vsel %vm6576_vm6, %v6390_v23, %v2797_v21  ;;  %v466_v53 = vshrl.u32 %v6602_v38, 16  ;;  %v6628_v12 = vld [vmem:[%s6335_s25 + $0x84] sm:$0xf] }
  0x62   : > { %v457_v52 = vrot.slane %v455_v40, 4  ;;  %v4901_v58 = vcombine.low %v430_v13, %v440_v50  ;;  %v449_v61 = vrot.slane %v448_v57, 4  ;;  %v463_v63 = vrot.slane %v461_v43, 5  ;;  %v5157_v40 = vld [vmem:[%s6335_s25 + $0x30] sm:$0xe] }
  0x63   : > { %v2795_v1 = vsel %vm6576_vm6, %v5171_v44, %v2794_v16  ;;  %v468_v11 = vrot.slane %v466_v53, 4  ;;  %v469_v59 = vshll.u32 %v6602_v38, 16  ;;  %v475_v23 = vshll.u32 %v6609_v14, 16  ;;  %v6641_v16 = vld [vmem:[%s8105_s1 + $0x38] sm:$0xff]   ;;  %v6660_v50 = vld [vmem:[%s6335_s25 + $0x90] sm:$0xf] }
  0x64   : > { %v458_v4 = vor.u32 %v457_v52, %v453_v42  ;;  %v5187_v6 = vcombine.low %v2795_v1, %v2798_v49  ;;  %5605 = vmatprep.mubr.msk.bf16.mxu1 %vm665_vm3, %v4901_v58  ;;  %v454_v21 = vsel %vm6354_vm2, %v449_v61, %v453_v42  ;;  %v479_v54 = vshrl.u32 %v6609_v14, 16  ;;  %v6665_v58 = vld [vmem:[%s6335_s25 + $0x94] sm:$0xf] }
  0x65   : > { %v485_v18 = vshll.u32 %v216_v41, 16  ;;  %v471_v3 = vrot.slane %v469_v59, 5  ;;  %v5172_v27 = vrot.slane %v5156_v47, 9  ;;  %v2801_v29 = vrot.slane %v6397_v37, 5 }
  0x66   : > { %v459_v26 = vrot.slane %v458_v4, 4  ;;  %v477_v31 = vrot.slane %v475_v23, 5  ;;  %v481_v32 = vrot.slane %v479_v54, 4  ;;  %v2804_v34 = vrot.slane %v6406_v45, 5  ;;  %v218_v23 = vld [vmem:[%s6335_s25 + $0x98] sm:$0x1] }
  0x67   : > { %v487_v33 = vrot.slane %v485_v18, 5  ;;  %5760 = vmatmul.mubr.msk.bf16.vlgmr.msra.gmra.mrb[0].mxu0 %vm665_vm3, %v5187_v6  ;;  %v472_v13 = vor.u32 %v471_v3, %v468_v11  ;;  %v2802_v56 = vsel %vm6576_vm6, %v5172_v27, %v2801_v29  ;;  %v2803_v39 = vrot.slane %v2801_v29, 4  ;;  %v5158_v27 = vld [vmem:[%s6335_s25 + $0x3c] sm:$0xe] }
  0x68   : > { %v464_v36 = vsel %vm6354_vm2, %v459_v26, %v463_v63  ;;  %5792 = vmatpush3.bf16.msra.mxu0 %v6417_v62  ;;  %v482_v37 = vor.u32 %v481_v32, %v477_v31  ;;  %v490_v45 = vshrl.u32 %v6628_v12, 16  ;;  %v493_v57 = vshll.u32 %v6628_v12, 16 }
  0x69   : > { %v4902_v41 = vcombine.low %v454_v21, %v464_v36  ;;  %v473_v42 = vrot.slane %v472_v13, 4  ;;  %v2805_v43 = vsel %vm6576_vm6, %v2803_v39, %v2804_v34  ;;  %v499_v44 = vshll.u32 %v6636_v24, 16  ;;  %5825 = vmatprep.subr.bf16.mxu0 %v6641_v16 }
  0x6a   : > { %v503_v47 = vshrl.u32 %v6636_v24, 16  ;;  %v483_v62 = vrot.slane %v482_v37, 4  ;;  %v5188_v52 = vcombine.low %v2802_v56, %v2805_v43  ;;  %v492_v49 = vrot.slane %v490_v45, 4 }
  0x6b   : > { %5606 = vmatmul.mubr.msk.bf16.gmra.mrb[16].mxu1 %vm665_vm3, %v4902_v41  ;;  %v495_v53 = vrot.slane %v493_v57, 5  ;;  %v478_v61 = vsel %vm6354_vm2, %v473_v42, %v477_v31  ;;  %v501_v63 = vrot.slane %v499_v44, 5  ;;  %v509_v4 = vshll.u32 %v217_v35, 16  ;;  %v6693_v42 = vld [vmem:[%s6335_s25 + $0xa0] sm:$0xf] }
  0x6c   : > { %v505_v1 = vrot.slane %v503_v47, 4  ;;  %v488_v6 = vsel %vm6354_vm2, %v483_v62, %v487_v33  ;;  %5763 = vmatprep.mubr.msk.bf16.mxu0 %vm665_vm3, %v5188_v52  ;;  %v5173_v59 = vrot.slane %v5157_v40, 9  ;;  %v2808_v21 = vrot.slane %v6430_v22, 5  ;;  %v6688_v40 = vld [vmem:[%s6335_s25 + $0x9c] sm:$0xf] }
  0x6d   : > { %v496_v11 = vor.u32 %v495_v53, %v492_v49  ;;  %v4903_v54 = vcombine.low %v478_v61, %v488_v6  ;;  %v511_v26 = vrot.slane %v509_v4, 5  ;;  %v2811_v3 = vrot.slane %v6437_v30, 5  ;;  %v219_v52 = vld [vmem:[%s6335_s25 + $0xa4] sm:$0x1] }
  0x6e   : > { %v506_v18 = vor.u32 %v505_v1, %v501_v63  ;;  %v2809_v31 = vsel %vm6576_vm6, %v5173_v59, %v2808_v21  ;;  %v2810_v32 = vrot.slane %v2808_v21, 4  ;;  %v514_v33 = vshrl.u32 %v6660_v50, 16  ;;  %v5159_v59 = vld [vmem:[%s6335_s25 + $0x48] sm:$0xe] }
  0x6f   : > { %v497_v29 = vrot.slane %v496_v11, 4  ;;  %5609 = vmatprep.mubr.msk.bf16.mxu1 %vm665_vm3, %v4903_v54  ;;  %v517_v22 = vshll.u32 %v6660_v50, 16  ;;  %v523_v35 = vshll.u32 %v6665_v58, 16  ;;  %v527_v36 = vshrl.u32 %v6665_v58, 16 }
  0x70   : > { %v507_v34 = vrot.slane %v506_v18, 4  ;;  %v2812_v13 = vsel %vm6576_vm6, %v2810_v32, %v2811_v3  ;;  %v516_v56 = vrot.slane %v514_v33, 4  ;;  %v533_v39 = vshll.u32 %v218_v23, 16  ;;  %v6712_v33 = vld [vmem:[%s6335_s25 + $0xa8] sm:$0xf] }
  0x71   : > { %v502_v30 = vsel %vm6354_vm2, %v497_v29, %v501_v63  ;;  %v5189_v37 = vcombine.low %v2809_v31, %v2812_v13  ;;  %v519_v45 = vrot.slane %v517_v22, 5  ;;  %v525_v57 = vrot.slane %v523_v35, 5 }
  0x72   : > { %v512_v41 = vsel %vm6354_vm2, %v507_v34, %v511_v26  ;;  %v529_v44 = vrot.slane %v527_v36, 4  ;;  %v535_v47 = vrot.slane %v533_v39, 5  ;;  %v5174_v62 = vrot.slane %v5158_v27, 9 }
  0x73   : > { %v4904_v43 = vcombine.low %v502_v30, %v512_v41  ;;  %5764 = vmatmul.mubr.msk.bf16.gmra.mrb[4].mxu0 %vm665_vm3, %v5189_v37  ;;  %v520_v49 = vor.u32 %v519_v45, %v516_v56  ;;  %v2815_v53 = vrot.slane %v6454_v9, 5  ;;  %v2818_v61 = vrot.slane %v6459_v20, 5  ;;  %v6717_v30 = vld [vmem:[%s6335_s25 + $0xac] sm:$0xf]  ;;  %v220_v37 = vld [vmem:[%s6335_s25 + $0xb0] sm:$0x1] }
  0x74   : > { %v538_v63 = vshrl.u32 %v6688_v40, 16  ;;  %v530_v1 = vor.u32 %v529_v44, %v525_v57  ;;  %v541_v4 = vshll.u32 %v6688_v40, 16  ;;  %v547_v6 = vshll.u32 %v6693_v42, 16  ;;  %v5160_v45 = vld [vmem:[%s6335_s25 + $0x54] sm:$0xe] }
  0x75   : > { %5610 = vmatmul.mubr.msk.bf16.gmra.mrb[20].mxu1 %vm665_vm3, %v4904_v43  ;;  %v551_v11 = vshrl.u32 %v6693_v42, 16  ;;  %v521_v21 = vrot.slane %v520_v49, 4  ;;  %v2816_v23 = vsel %vm6576_vm6, %v5174_v62, %v2815_v53  ;;  %v2817_v9 = vrot.slane %v2815_v53, 4  ;;  %v6727_v62 = vld [vmem:[%s6335_s25 + $0xb4] sm:$0xf] }
  0x76   : > { %v540_v20 = vrot.slane %v538_v63, 4  ;;  %v531_v54 = vrot.slane %v530_v1, 4  ;;  %v543_v18 = vrot.slane %v541_v4, 5  ;;  %v549_v26 = vrot.slane %v547_v6, 5  ;;  %v6739_v4 = vld [vmem:[%s6335_s25 + $0xb8] sm:$0xf] }
  0x77   : > { %v553_v3 = vrot.slane %v551_v11, 4  ;;  %v526_v27 = vsel %vm6354_vm2, %v521_v21, %v525_v57  ;;  %v2819_v29 = vsel %vm6576_vm6, %v2817_v9, %v2818_v61  ;;  %v557_v31 = vshll.u32 %v219_v52, 16 }
  0x78   : > { %v5175_v32 = vrot.slane %v5159_v59, 9  ;;  %v536_v34 = vsel %vm6354_vm2, %v531_v54, %v535_v47  ;;  %v5190_v22 = vcombine.low %v2816_v23, %v2819_v29  ;;  %v544_v35 = vor.u32 %v543_v18, %v540_v20  ;;  %v221_v18 = vld [vmem:[%s6335_s25 + $0xbc] sm:$0x1] }
  0x79   : > { %v554_v36 = vor.u32 %v553_v3, %v549_v26  ;;  %v4905_v13 = vcombine.low %v526_v27, %v536_v34  ;;  %v559_v56 = vrot.slane %v557_v31, 5  ;;  %v2822_v39 = vrot.slane %v6477_v60, 5  ;;  %v5161_v31 = vld [vmem:[%s6335_s25 + $0x60] sm:$0xe] }
  0x7a   : > { %v2825_v41 = vrot.slane %v6485_v10, 5  ;;  %5767 = vmatprep.mubr.msk.bf16.mxu0 %vm665_vm3, %v5190_v22  ;;  %v545_v57 = vrot.slane %v544_v35, 4  ;;  %v562_v44 = vshrl.u32 %v6712_v33, 16  ;;  %v565_v47 = vshll.u32 %v6712_v33, 16 }
  0x7b   : > { %v555_v43 = vrot.slane %v554_v36, 4  ;;  %5613 = vmatprep.mubr.msk.bf16.mxu1 %vm665_vm3, %v4905_v13  ;;  %v2823_v60 = vsel %vm6576_vm6, %v5175_v32, %v2822_v39  ;;  %v2824_v52 = vrot.slane %v2822_v39, 4  ;;  %v571_v10 = vshll.u32 %v6717_v30, 16  ;;  %v5162_v36 = vld [vmem:[%s6335_s25 + $0x6c] sm:$0xe] }
  0x7c   : > { %v575_v49 = vshrl.u32 %v6717_v30, 16  ;;  %v550_v53 = vsel %vm6354_vm2, %v545_v57, %v549_v26  ;;  %v564_v63 = vrot.slane %v562_v44, 4  ;;  %v567_v1 = vrot.slane %v565_v47, 5 }
  0x7d   : > { %v560_v61 = vsel %vm6354_vm2, %v555_v43, %v559_v56  ;;  %v2826_v11 = vsel %vm6576_vm6, %v2824_v52, %v2825_v41  ;;  %v573_v59 = vrot.slane %v571_v10, 5  ;;  %v581_v20 = vshll.u32 %v220_v37, 16  ;;  %v5099_v52 = vld [vmem:[%s6335_s25 + $0x74] sm:$0x1] }
  0x7e   : > { %v4906_v6 = vcombine.low %v550_v53, %v560_v61  ;;  %v577_v21 = vrot.slane %v575_v49, 4  ;;  %v5191_v23 = vcombine.low %v2823_v60, %v2826_v11  ;;  %v568_v9 = vor.u32 %v567_v1, %v564_v63  ;;  %v5098_v60 = vld [vmem:[%s6335_s25 + $0x70] sm:$0xf] }
  0x7f   : > { %v5176_v54 = vrot.slane %v5160_v45, 9  ;;  %v2829_v3 = vrot.slane %v6508_v51, 5  ;;  %v2832_v27 = vrot.slane %v6514_v0, 5  ;;  %v586_v29 = vshrl.u32 %v6727_v62, 16 }
  0x80   : > { %5614 = vmatmul.mubr.msk.bf16.gmra.mrb[24].mxu1 %vm665_vm3, %v4906_v6  ;;  %v578_v26 = vor.u32 %v577_v21, %v573_v59  ;;  %5768 = vmatmul.mubr.msk.bf16.gmra.mrb[8].mxu0 %vm665_vm3, %v5191_v23  ;;  %v569_v32 = vrot.slane %v568_v9, 4  ;;  %v583_v34 = vrot.slane %v581_v20, 5  ;;  %v589_v22 = vshll.u32 %v6727_v62, 16 }
  0x81   : > { %v595_v35 = vshll.u32 %v6739_v4, 16  ;;  %v2830_v51 = vsel %vm6576_vm6, %v5176_v54, %v2829_v3  ;;  %v2831_v56 = vrot.slane %v2829_v3, 4  ;;  %v588_v0 = vrot.slane %v586_v29, 4  ;;  %v5163_v54 = vld [vmem:[%s6335_s25 + $0x78] sm:$0xe] }
  0x82   : > { %v579_v13 = vrot.slane %v578_v26, 4  ;;  %v574_v39 = vsel %vm6354_vm2, %v569_v32, %v573_v59  ;;  %v591_v41 = vrot.slane %v589_v22, 5  ;;  %v599_v45 = vshrl.u32 %v6739_v4, 16  ;;  %v6217_v29 = vld [vmem:[%s6335_s25] sm:$0xf] }
  0x83   : > { %v597_v37 = vrot.slane %v595_v35, 5  ;;  %v2833_v43 = vsel %vm6576_vm6, %v2831_v56, %v2832_v27  ;;  %v605_v44 = vshll.u32 %v221_v18, 16  ;;  %v5177_v47 = vrot.slane %v5161_v31, 9  ;;  %v6779_v31 = vld [vmem:[%s6335_s25 + $0x4] sm:$0xf] }
  0x84   : > { %v584_v57 = vsel %vm6354_vm2, %v579_v13, %v583_v34  ;;  %v5192_v49 = vcombine.low %v2830_v51, %v2833_v43  ;;  %v592_v53 = vor.u32 %v591_v41, %v588_v0  ;;  %v601_v61 = vrot.slane %v599_v45, 4  ;;  %v6783_v34 = vld [vmem:[%s6335_s25 + $0x7c] sm:$0xf]  ;;  %v6786_v22 = vld [vmem:[%s6335_s25 + $0x80] sm:$0x1] }
  0x85   : > { %v4907_v10 = vcombine.low %v574_v39, %v584_v57  ;;  %v607_v63 = vrot.slane %v605_v44, 5  ;;  %v2836_v1 = vrot.slane %v6538_v46, 5  ;;  %v2839_v6 = vrot.slane %v6545_v55, 5  ;;  %v5164_v35 = vld [vmem:[%s6335_s25 + $0x84] sm:$0xe] }
  0x86   : > { %v5178_v11 = vrot.slane %v5162_v36, 9  ;;  %5771 = vmatprep.mubr.msk.bf16.mxu0 %vm665_vm3, %v5192_v49  ;;  %v593_v59 = vrot.slane %v592_v53, 4  ;;  %v602_v21 = vor.u32 %v601_v61, %v597_v37  ;;  %v2843_v23 = vrot.slane %v5098_v60, 5  ;;  %v5104_v0 = vld [vmem:[%s6335_s25 + $0x88] sm:$0xf] }
  0x87   : > { %5617 = vmatprep.mubr.msk.bf16.mxu1 %vm665_vm3, %v4907_v10  ;;  %v2846_v9 = vrot.slane %v5099_v52, 5  ;;  %v2837_v20 = vsel %vm6576_vm6, %v5177_v47, %v2836_v1  ;;  %v2838_v46 = vrot.slane %v2836_v1, 4  ;;  %v4926_v32 = vcombine.low %v6217_v29, %v6779_v31  ;;  %v5105_v39 = vld [vmem:[%s6335_s25 + $0x8c] sm:$0x1]  ;;  %v5107_v45 = vld [vmem:[%s6335_s25 + $0x94] sm:$0xf] }
  0x88   : > { %v598_v55 = vsel %vm6354_vm2, %v593_v59, %v597_v37  ;;  %v603_v18 = vrot.slane %v602_v21, 4  ;;  %v2844_v26 = vsel %vm6576_vm6, %v5178_v11, %v2843_v23  ;;  %v2845_v3 = vrot.slane %v2843_v23, 4  ;;  %v5108_v52 = vld [vmem:[%s6335_s25 + $0x98] sm:$0x1]  ;;  %v5165_v10 = vld [vmem:[%s6335_s25 + $0x90] sm:$0xe] }
  0x89   : > { %v2840_v27 = vsel %vm6576_vm6, %v2838_v46, %v2839_v6  ;;  %v5179_v56 = vrot.slane %v5163_v54, 9  ;;  %v2850_v57 = vrot.slane %v6783_v34, 5  ;;  %v2853_v43 = vrot.slane %v6786_v22, 5  ;;  %v5111_v11 = vld [vmem:[%s6335_s25 + $0xa4] sm:$0x1] }
  0x8a   : > { %v608_v36 = vsel %vm6354_vm2, %v603_v18, %v607_v63  ;;  %v5193_v13 = vcombine.low %v2837_v20, %v2840_v27  ;;  %v2847_v51 = vsel %vm6576_vm6, %v2845_v3, %v2846_v9  ;;  %v5180_v44 = vrot.slane %v5164_v35, 9  ;;  %v5110_v63 = vld [vmem:[%s6335_s25 + $0xa0] sm:$0xf]  ;;  %v5166_v59 = vld [vmem:[%s6335_s25 + $0x9c] sm:$0xe] }
  0x8b   : > { %v4908_v41 = vcombine.low %v598_v55, %v608_v36  ;;  %v5194_v37 = vcombine.low %v2844_v26, %v2847_v51  ;;  %v2857_v47 = vrot.slane %v5104_v0, 5  ;;  %v2860_v60 = vrot.slane %v5105_v39, 5  ;;  %v6219_v21 = vld [vmem:[%s6335_s25 + $0xc] sm:$0xf]  ;;  %v6813_v23 = vld [vmem:[%s6335_s25 + $0x10] sm:$0xf] }
  0x8c   : > { %5772 = vmatmul.mubr.msk.bf16.gmra.mrb[12].mxu0 %vm665_vm3, %v5193_v13  ;;  %v2851_v49 = vsel %vm6576_vm6, %v5179_v56, %v2850_v57  ;;  %v2852_v53 = vrot.slane %v2850_v57, 4  ;;  %v2864_v61 = vrot.slane %v5107_v45, 5  ;;  %v4927_v9 = vcombine.low %v6219_v21, %v6813_v23  ;;  %v6221_v27 = vld [vmem:[%s6335_s25 + $0x18] sm:$0xf]  ;;  %v6822_v29 = vld [vmem:[%s6335_s25 + $0x1c] sm:$0xf] }
  0x8d   : > { %5618 = vmatmul.mubr.msk.bf16.gmra.mrb[28].mxu1 %vm665_vm3, %v4908_v41  ;;  %5775 = vmatprep.mubr.msk.bf16.mxu0 %vm665_vm3, %v5194_v37  ;;  %v2858_v1 = vsel %vm6576_vm6, %v5180_v44, %v2857_v47  ;;  %v2859_v6 = vrot.slane %v2857_v47, 4  ;;  %v5181_v46 = vrot.slane %v5165_v10, 9  ;;  %v2867_v54 = vrot.slane %v5108_v52, 5  ;;  %v5113_v51 = vld [vmem:[%s6335_s25 + $0xac] sm:$0xf]  ;;  %v6830_v39 = vld [vmem:[%s8105_s1 + $0x18] sm:$0xff]  }
  0x8e   : > { %5623 = vmatprep.mubr.msk.bf16.mxu1 %vm665_vm3, %v4926_v32  ;;  %v2854_v20 = vsel %vm6576_vm6, %v2852_v53, %v2853_v43  ;;  %v2866_v26 = vrot.slane %v2864_v61, 4  ;;  %v2871_v3 = vrot.slane %v5110_v63, 5  ;;  %v4928_v32 = vcombine.low %v6221_v27, %v6822_v29  ;;  %v5116_v0 = vld [vmem:[%s6335_s25 + $0xb8] sm:$0xf]  ;;  %v6223_v57 = vld [vmem:[%s8105_s1 + $0x10] sm:$0xff]  }
  0x8f   : > { %v5195_v55 = vcombine.low %v2851_v49, %v2854_v20  ;;  %v2861_v18 = vsel %vm6576_vm6, %v2859_v6, %v2860_v60  ;;  %v5182_v36 = vrot.slane %v5166_v59, 9  ;;  %v2874_v13 = vrot.slane %v5111_v11, 5  ;;  %v5114_v47 = vld [vmem:[%s6335_s25 + $0xb0] sm:$0x1]  ;;  %v5167_v60 = vld [vmem:[%s6335_s25 + $0xa8] sm:$0xe] }
  0x90   : > { %v5196_v35 = vcombine.low %v2858_v1, %v2861_v18  ;;  %v2873_v56 = vrot.slane %v2871_v3, 4  ;;  %v2865_v41 = vsel %vm6576_vm6, %v5181_v46, %v2864_v61  ;;  %v2868_v37 = vsel %vm6576_vm6, %v2866_v26, %v2867_v54  ;;  %v5117_v10 = vld [vmem:[%s6335_s25 + $0xbc] sm:$0x1]  ;;  %v5168_v49 = vld [vmem:[%s6335_s25 + $0xb4] sm:$0xe] }
  0x91   : > { %v2878_v45 = vrot.slane %v5113_v51, 5  ;;  %v2872_v43 = vsel %vm6576_vm6, %v5182_v36, %v2871_v3  ;;  %v2885_v52 = vrot.slane %v5116_v0, 5  ;;  %v6224_v53 = vld [vmem:[%s6335_s25 + $0x24] sm:$0xf]  ;;  %v6854_v61 = vld [vmem:[%s6335_s25 + $0x28] sm:$0xf]  ;;  %v5197_v1 = vcombine.low %v2865_v41, %v2868_v37 }
  0x92   : > { %v2875_v44 = vsel %vm6576_vm6, %v2873_v56, %v2874_v13  ;;  %v4929_v63 = vcombine.low %v6224_v53, %v6854_v61  ;;  %v5119_v6 = vld [vmem:[%s6335_s25 + $0xc4] sm:$0xf]  ;;  %v5183_v59 = vrot.slane %v5167_v60, 9  ;;  %v6226_v20 = vld [vmem:[%s6335_s25 + $0x30] sm:$0xf]  ;;  %v2888_v26 = vrot.slane %v5117_v10, 5 }
  0x93   : > { %v5198_v11 = vcombine.low %v2872_v43, %v2875_v44  ;;  %v2880_v21 = vrot.slane %v2878_v45, 4  ;;  %v6860_v46 = vld [vmem:[%s6335_s25 + $0x34] sm:$0xf]  ;;  %v2887_v18 = vrot.slane %v2885_v52, 4  ;;  %v5120_v13 = vld [vmem:[%s6335_s25 + $0xc8] sm:$0x1] }
  0x94   : > { %5776 = vmatmul.mubr.msk.bf16.gmra.mrb[16].mxu0 %vm665_vm3, %v5195_v55  ;;  %v4930_v54 = vcombine.low %v6226_v20, %v6860_v46  ;;  %v5184_v55 = vrot.slane %v5168_v49, 9  ;;  %v2879_v3 = vsel %vm6576_vm6, %v5183_v59, %v2878_v45  ;;  %v5169_v51 = vld [vmem:[%s6335_s25 + $0xc0] sm:$0xe]  ;;  %v6228_v56 = vld [vmem:[%s6335_s25 + $0x3c] sm:$0xf]  ;;  %v2895_v44 = vrot.slane %v5120_v13, 5 }
  0x95   : > { %5624 = vmatmul.mubr.msk.bf16.vlgmr.msra.gmra.mrb[0].mxu1 %vm665_vm3, %v4927_v9  ;;  %5779 = vmatprep.mubr.msk.bf16.mxu0 %vm665_vm3, %v5196_v35  ;;  %v2881_v9 = vrot.slane %v5114_v47, 5  ;;  %v2889_v36 = vsel %vm6576_vm6, %v2887_v18, %v2888_v26  ;;  %v6879_v0 = vld [vmem:[%s6335_s25 + $0x40] sm:$0xf]  ;;  %v4932_v47 = vcombine.low %v6489_v15, %v6492_v25  ;;  %v2266_v10 = vshll.u32 %v6783_v34, 16  ;;  %v6175_v53 = vld [vmem:[%s6335_s25 + $0x18] sm:$0xff]  }
  0x96   : > { %5656 = vmatpush3.bf16.msra.mxu1 %v6223_v57  ;;  %5627 = vmatprep.mubr.msk.bf16.mxu1 %vm665_vm3, %v4928_v32  ;;  %v2892_v32 = vrot.slane %v5119_v6, 5  ;;  %v2886_v35 = vsel %vm6576_vm6, %v5184_v55, %v2885_v52  ;;  %v4931_v41 = vcombine.low %v6228_v56, %v6879_v0  ;;  %v5185_v57 = vrot.slane %v5169_v51, 9 }
  0x97   : > { %5689 = vmatprep.subr.bf16.mxu1 %v6830_v39  ;;  %v2882_v27 = vsel %vm6576_vm6, %v2880_v21, %v2881_v9  ;;  %v5200_v45 = vcombine.low %v2886_v35, %v2889_v36  ;;  %v2270_v15 = vshrl.u32 %v6783_v34, 16  ;;  %v4933_v49 = vcombine.low %v6518_v8, %v6524_v19  ;;  %v1170_v8 = vld [vmem:[%s6335_s25] sm:$0xe]  ;;  %v1171_v19 = vld [vmem:[%s6335_s25 + $0xc] sm:$0xe] }
  0x98   : > { %v5199_v37 = vcombine.low %v2879_v3, %v2882_v27  ;;  %v2894_v43 = vrot.slane %v2892_v32, 4  ;;  %v2893_v60 = vsel %vm6576_vm6, %v5185_v57, %v2892_v32  ;;  %v1230_v21 = vrot.slane %v6813_v23, 5  ;;  %v1172_v34 = vld [vmem:[%s6335_s25 + $0x18] sm:$0xe]  ;;  %v6178_v27 = vld [vmem:[%s6335_s25 + $0x24] sm:$0xff]   ;;  %v6180_v32 = vld [vmem:[%s6335_s25 + $0x30] sm:$0xff]  }
  0x99   : > { %v2272_v6 = vrot.slane %v2270_v15, 4  ;;  %v2276_v9 = vshll.u32 %v6786_v22, 16  ;;  %v1223_v23 = vrot.slane %v6779_v31, 5  ;;  %v1237_v20 = vrot.slane %v6822_v29, 5  ;;  %v1174_v36 = vld [vmem:[%s6335_s25 + $0x30] sm:$0xe] }
  0x9a   : > { %v2896_v52 = vsel %vm6576_vm6, %v2894_v43, %v2895_v44  ;;  %v4935_v18 = vcombine.low %v6570_v48, %v6583_v7  ;;  %v1244_v26 = vrot.slane %v6854_v61, 5  ;;  %v1251_v3 = vrot.slane %v6860_v46, 5  ;;  %v6232_v48 = vld [vmem:[%s6335_s25 + $0x20] sm:$0x1]  ;;  %v6233_v57 = vld [vmem:[%s6335_s25 + $0x2c] sm:$0x1] }
  0x9b   : > { %v5201_v25 = vcombine.low %v2893_v60, %v2896_v52  ;;  %v4936_v22 = vcombine.low %v6602_v38, %v6609_v14  ;;  %v4937_v31 = vcombine.low %v6628_v12, %v6636_v24  ;;  %v4959_v29 = vrot.slane %v1170_v8, 9  ;;  %v6931_v46 = vld [vmem:[%s8105_s1 + $0x40] sm:$0xff]  }
  0x9c   : > { %5780 = vmatmul.mubr.msk.bf16.gmra.mrb[20].mxu0 %vm665_vm3, %v5197_v1  ;;  %v6899_v1 = vrot.slane %v2266_v10, 5  ;;  %v4960_v35 = vrot.slane %v1171_v19, 9  ;;  %v1232_v13 = vrot.slane %v1230_v21, 4  ;;  %v4961_v51 = vrot.slane %v1172_v34, 9  ;;  %v6234_v10 = vld [vmem:[%s6335_s25 + $0x38] sm:$0x1] }
  0x9d   : > { %5628 = vmatmul.mubr.msk.bf16.gmra.mrb[4].mxu1 %vm665_vm3, %v4929_v63  ;;  %5783 = vmatprep.mubr.msk.bf16.mxu0 %vm665_vm3, %v5198_v11  ;;  %v4934_v63 = vcombine.low %v6549_v5, %v6555_v17  ;;  %v6230_v11 = vld [vmem:[%s6335_s25 + $0x8] sm:$0x1]  ;;  %v6231_v5 = vld [vmem:[%s6335_s25 + $0x14] sm:$0x1]  ;;  %v1240_v7 = vrot.slane %v6232_v48, 5  ;;  %v4938_v38 = vcombine.low %v6660_v50, %v6665_v58  ;;  %v4939_v14 = vcombine.low %v6688_v40, %v6693_v42 }
  0x9e   : > { %5631 = vmatprep.mubr.msk.bf16.mxu1 %vm665_vm3, %v4930_v54  ;;  %8124 = vst [vmem:[#allocation2_spill] sm:$0xff] %v6899_v1  ;;  %v1226_v59 = vrot.slane %v6230_v11, 5  ;;  %v1233_v17 = vrot.slane %v6231_v5, 5  ;;  %v1173_v54 = vld [vmem:[%s6335_s25 + $0x24] sm:$0xe]  ;;  %v2273_v55 = vor.u32 %v2272_v6, %v6899_v1  ;;  %v1225_v56 = vrot.slane %v1223_v23, 4 }
  0x9f   : > { %v4962_v61 = vrot.slane %v1173_v54, 9  ;;  %v1247_v43 = vrot.slane %v6233_v57, 5  ;;  %v4963_v44 = vrot.slane %v1174_v36, 9  ;;  %v4940_v60 = vcombine.low %v6712_v33, %v6717_v30  ;;  %v1176_v6 = vld [vmem:[%s6335_s25 + $0x48] sm:$0xe]  ;;  %v6186_v58 = vld [vmem:[%s6335_s25 + $0x54] sm:$0xff]  }
  0xa0   : > { %v6944_v52 = vsel %vm6576_vm6, %v4959_v29, %v1223_v23  ;;  %v1254_v15 = vrot.slane %v6234_v10, 5  ;;  %v6965_v11 = vrot.slane %v2273_v55, 4  ;;  %v5284_v34 = vld [vmem:[%s6335_s25 + $0x18] sm:$0xf]  ;;  %v6184_v5 = vld [vmem:[%s6335_s25 + $0x48] sm:$0xff]  }
  0xa1   : > { %v6980_v19 = vsel %vm6576_vm6, %v4962_v61, %v1244_v26  ;;  %v6235_v23 = vld [vmem:[%s6335_s25 + $0x44] sm:$0x1]  ;;  %v1177_v55 = vld [vmem:[%s6335_s25 + $0x54] sm:$0xe]  ;;  %v3608_v48 = vshll.u32 %v5284_v34, 16 }
  0xa2   : > { %8126 = vst [vmem:[#allocation4_spill] sm:$0xff] %v6965_v11  ;;  %v4966_v10 = vrot.slane %v1177_v55, 9  ;;  %v5290_v55 = vld [vmem:[%s6335_s25 + $0x30] sm:$0xf]  ;;  %v5291_v50 = vld [vmem:[%s6335_s25 + $0x34] sm:$0xf] }
  0xa3   : > { %v3610_v24 = vrot.slane %v3608_v48, 5 }
  0xa4   : > { %5784 = vmatmul.mubr.msk.bf16.gmra.mrb[24].mxu0 %vm665_vm3, %v5199_v37  ;;  %v1175_v37 = vld [vmem:[%s6335_s25 + $0x3c] sm:$0xe] }
  0xa5   : > { %5632 = vmatmul.mubr.msk.bf16.gmra.mrb[8].mxu1 %vm665_vm3, %v4931_v41  ;;  %5787 = vmatprep.mubr.msk.bf16.mxu0 %vm665_vm3, %v5200_v45  ;;  %v1239_v41 = vrot.slane %v1237_v20, 4  ;;  %v1246_v45 = vrot.slane %v1244_v26, 4 }
  0xa6   : > { %5635 = vmatprep.mubr.msk.bf16.mxu1 %vm665_vm3, %v4932_v47  ;;  %v1253_v47 = vrot.slane %v1251_v3, 4 }
  0xa7   : > { %v6976_v8 = vsel %vm6576_vm6, %v1239_v41, %v1240_v7  ;;  %v6995_v26 = vsel %vm6576_vm6, %v1246_v45, %v1247_v43  ;;  %v6237_v45 = vld [vmem:[%s6335_s25 + $0x50] sm:$0x1]  ;;  %v3662_v41 = vshll.u32 %v5291_v50, 16 }
  0xa8   : > { %v1268_v57 = vrot.slane %v6237_v45, 5  ;;  %v8134_v11 = vcombine.low %v6980_v19, %v6995_v26 }
  0xac   : > { %5788 = vmatmul.mubr.msk.bf16.gmra.mrb[28].mxu0 %vm665_vm3, %v5201_v25  ;;  %v1258_v25 = vrot.slane %v6879_v0, 5  ;;  %v6962_v0 = vsel %vm6576_vm6, %v4961_v51, %v1237_v20  ;;  %v1261_v20 = vrot.slane %v6235_v23, 5  ;;  %v3605_v51 = vshrl.u32 %v5284_v34, 16  ;;  %v7039_v34 = vld [vmem:[%s6335_s25 + $0x5c] sm:$0x1] }
  0xad   : > { %5636 = vmatmul.mubr.msk.bf16.gmra.mrb[12].mxu1 %vm665_vm3, %v4933_v49  ;;  %5793 = vmatprep.mubr.msk.bf16.mxu0 %vm665_vm3, %v6175_v53  ;;  %v6948_v49 = vrot.slane %v2276_v9, 5  ;;  %v6954_v53 = vsel %vm6576_vm6, %v4960_v35, %v1230_v21  ;;  %v6972_v21 = vsel %vm6576_vm6, %v1225_v56, %v1226_v59  ;;  %v4964_v9 = vrot.slane %v1175_v37, 9  ;;  %v6236_v59 = vld [vmem:[%s6335_s25 + $0x4c] sm:$0xf] }
  0xae   : > { %5639 = vmatprep.mubr.msk.bf16.mxu1 %vm665_vm3, %v4934_v63  ;;  %v6958_v63 = vsel %vm6576_vm6, %v1232_v13, %v1233_v17  ;;  %v6986_v17 = vsel %vm6576_vm6, %v4963_v44, %v1251_v3  ;;  %v1265_v54 = vrot.slane %v6236_v59, 5  ;;  %v1260_v3 = vrot.slane %v1258_v25, 4  ;;  %v7010_v13 = vld [vmem:[%s6335_s25 + $0x60] sm:$0xe] }
  0xaf   : > { %8125 = vst [vmem:[#allocation3_spill] sm:$0xff] %v6948_v49  ;;  %v7020_v43 = vsel %vm6576_vm6, %v4964_v9, %v1258_v25  ;;  %v6238_v25 = vld [vmem:[%s6335_s25 + $0x58] sm:$0xf]  ;;  %v1275_v9 = vrot.slane %v7039_v34, 5  ;;  %v4967_v23 = vrot.slane %v7010_v13, 9  ;;  %v3607_v12 = vrot.slane %v3605_v51, 4 }
  0xb0   : > { %v1267_v37 = vrot.slane %v1265_v54, 4  ;;  %v7024_v44 = vsel %vm6576_vm6, %v1260_v3, %v1261_v20  ;;  %v6240_v20 = vld [vmem:[%s6335_s25 + $0x64] sm:$0xf]  ;;  %v6241_v34 = vld [vmem:[%s6335_s25 + $0x70] sm:$0xf]  ;;  %v3666_v56 = vshrl.u32 %v5291_v50, 16 }
  0xb1   : > { %v1279_v59 = vrot.slane %v6240_v20, 5  ;;  %v1286_v20 = vrot.slane %v6241_v34, 5  ;;  %v5289_v34 = vld [vmem:[%s6335_s25 + $0x2c] sm:$0x1] }
  0xb2   : > { %v7056_v3 = vsel %vm6576_vm6, %v1267_v37, %v1268_v57  ;;  %v3653_v37 = vshrl.u32 %v5290_v55, 16  ;;  %v3656_v57 = vshll.u32 %v5290_v55, 16 }
  0xb3   : > { %v1281_v36 = vrot.slane %v1279_v59, 4 }
  0xb4   : > { %5794 = vmatmul.mubr.msk.bf16.vlgmr.msra.gmra.mrb[0].mxu0 %vm665_vm3, %v6178_v27  ;;  %v6999_v27 = vsel %vm6576_vm6, %v1253_v47, %v1254_v15  ;;  %v5286_v15 = vld [vmem:[%s6335_s25 + $0x20] sm:$0x1]  ;;  %v3658_v50 = vrot.slane %v3656_v57, 5  ;;  %v6192_v57 = vld [vmem:[%s6335_s25 + $0x78] sm:$0xff]  }
  0xb5   : > { %5640 = vmatmul.mubr.msk.bf16.gmra.mrb[16].mxu1 %vm665_vm3, %v4935_v18  ;;  %5826 = vmatpush3.bf16.msra.mxu0 %v6641_v16  ;;  %v6182_v16 = vld [vmem:[%s6335_s25 + $0x3c] sm:$0xff]   ;;  %v3624_v48 = vshll.u32 %v5286_v15, 16 }
  0xb6   : > { %5643 = vmatprep.mubr.msk.bf16.mxu1 %vm665_vm3, %v4936_v22  ;;  %5797 = vmatprep.mubr.msk.bf16.mxu0 %vm665_vm3, %v6180_v32  ;;  %v5285_v18 = vld [vmem:[%s6335_s25 + $0x1c] sm:$0xf]  ;;  %v4965_v22 = vrot.slane %v1176_v6, 9  ;;  %v5287_v6 = vld [vmem:[%s6335_s25 + $0x24] sm:$0xf] }
  0xb7   : > { %5859 = vmatprep.subr.bf16.mxu0 %v6931_v46  ;;  %v3614_v7 = vshll.u32 %v5285_v18, 16  ;;  %v3618_v61 = vshrl.u32 %v5285_v18, 16  ;;  %v3632_v13 = vshll.u32 %v5287_v6, 16  ;;  %v3611_v18 = vor.u32 %v3610_v24, %v3607_v12 }
  0xb8   : > { %v7028_v47 = vsel %vm6576_vm6, %v4965_v22, %v1265_v54  ;;  %v5288_v54 = vld [vmem:[%s6335_s25 + $0x28] sm:$0xf]  ;;  %v3629_v22 = vshrl.u32 %v5287_v6, 16  ;;  %v1288_v24 = vrot.slane %v1286_v20, 4 }
  0xb9   : > { %v3634_v29 = vrot.slane %v3632_v13, 5  ;;  %v3655_v13 = vrot.slane %v3653_v37, 4  ;;  %v3612_v40 = vrot.slane %v3611_v18, 4 }
  0xba   : > { %v3631_v15 = vrot.slane %v3629_v22, 4  ;;  %v5292_v22 = vld [vmem:[%s6335_s25 + $0x38] sm:$0x1] }
  0xbb   : > { %v3672_v37 = vshll.u32 %v5292_v22, 16 }
  0xbc   : > { %5798 = vmatmul.mubr.msk.bf16.gmra.mrb[4].mxu0 %vm665_vm3, %v6182_v16  ;;  %v1272_v16 = vrot.slane %v6238_v25, 5  ;;  %v1179_v25 = vld [vmem:[%s6335_s25 + $0x6c] sm:$0xe] }
  0xbd   : > { %5644 = vmatmul.mubr.msk.bf16.gmra.mrb[20].mxu1 %vm665_vm3, %v4937_v31  ;;  %5801 = vmatprep.mubr.msk.bf16.mxu0 %vm665_vm3, %v6184_v5  ;;  %v7049_v31 = vrot.slane %v3614_v7, 5  ;;  %v3620_v5 = vrot.slane %v3618_v61, 4  ;;  %v3638_v7 = vshll.u32 %v5288_v54, 16  ;;  %v3642_v61 = vshrl.u32 %v5288_v54, 16 }
  0xbe   : > { %5647 = vmatprep.mubr.msk.bf16.mxu1 %vm665_vm3, %v4938_v38  ;;  %v6188_v38 = vld [vmem:[%s6335_s25 + $0x60] sm:$0xff]   ;;  %v7063_v51 = vsel %vm6576_vm6, %v4966_v10, %v1272_v16  ;;  %v1274_v45 = vrot.slane %v1272_v16, 4  ;;  %v6242_v10 = vld [vmem:[%s6335_s25 + $0x68] sm:$0x1]  ;;  %v7070_v16 = vrot.slane %v3624_v48, 5  ;;  %v4968_v54 = vrot.slane %v1179_v25, 9 }
  0xbf   : > { %v3621_v6 = vor.u32 %v3620_v5, %v7049_v31  ;;  %v1282_v35 = vrot.slane %v6242_v10, 5  ;;  %v7073_v32 = vrot.slane %v3638_v7, 5  ;;  %v3644_v12 = vrot.slane %v3642_v61, 4  ;;  %v6243_v5 = vld [vmem:[%s6335_s25 + $0x74] sm:$0x1]  ;;  %v6190_v25 = vld [vmem:[%s6335_s25 + $0x6c] sm:$0xff]  }
  0xc0   : > { %v1289_v55 = vrot.slane %v6243_v5, 5  ;;  %v7092_v48 = vsel %vm6576_vm6, %v4967_v23, %v1279_v59  ;;  %v3635_v7 = vor.u32 %v3634_v29, %v3631_v15  ;;  %v3648_v61 = vshll.u32 %v5289_v34, 16  ;;  %v6245_v10 = vld [vmem:[%s6335_s25 + $0x88] sm:$0xf] }
  0xc1   : > { %v3622_v42 = vrot.slane %v3621_v6, 4  ;;  %v7097_v33 = vsel %vm6576_vm6, %v1274_v45, %v1275_v9  ;;  %v7105_v23 = vsel %vm6576_vm6, %v1281_v36, %v1282_v35  ;;  %v7109_v29 = vsel %vm6576_vm6, %v4968_v54, %v1286_v20  ;;  %v1181_v45 = vld [vmem:[%s6335_s25 + $0x84] sm:$0xe]  ;;  %v5293_v20 = vld [vmem:[%s6335_s25 + $0x3c] sm:$0xf] }
  0xc2   : > { %v7113_v9 = vsel %vm6576_vm6, %v1288_v24, %v1289_v55  ;;  %v3659_v59 = vor.u32 %v3658_v50, %v3655_v13  ;;  %v3617_v6 = vsel %vm6354_vm2, %v3612_v40, %v7049_v31  ;;  %v1300_v15 = vrot.slane %v6245_v10, 5  ;;  %v6246_v24 = vld [vmem:[%s6335_s25 + $0x80] sm:$0x1] }
  0xc3   : > { %v3627_v35 = vsel %vm6354_vm2, %v3622_v42, %v7070_v16  ;;  %v3636_v54 = vrot.slane %v3635_v7, 4  ;;  %v3650_v34 = vrot.slane %v3648_v61, 5  ;;  %v1296_v5 = vrot.slane %v6246_v24, 5  ;;  %v7127_v55 = vld [vmem:[%s6335_s25 + $0x40] sm:$0xf] }
  0xc4   : > { %5802 = vmatmul.mubr.msk.bf16.gmra.mrb[8].mxu0 %vm665_vm3, %v6186_v58  ;;  %v3668_v58 = vrot.slane %v3666_v56, 4  ;;  %v1180_v56 = vld [vmem:[%s6335_s25 + $0x78] sm:$0xe]  ;;  %8127 = vst [vmem:[#allocation5_spill] sm:$0xff] %v7127_v55  ;;  %v3674_v13 = vrot.slane %v3672_v37, 5  ;;  %v4970_v16 = vrot.slane %v1181_v45, 9  ;;  %v8128_v50 = vcombine.low %v6727_v62, %v6739_v4 }
  0xc5   : > { %5648 = vmatmul.mubr.msk.bf16.gmra.mrb[24].mxu1 %vm665_vm3, %v4939_v14  ;;  %5805 = vmatprep.mubr.msk.bf16.mxu0 %vm665_vm3, %v6188_v38  ;;  %v7086_v14 = vrot.slane %v3662_v41, 5  ;;  %v6244_v41 = vld [vmem:[%s6335_s25 + $0x7c] sm:$0xf]  ;;  %v3660_v40 = vrot.slane %v3659_v59, 4  ;;  %v6247_v42 = vld [vmem:[%s6335_s25 + $0x8c] sm:$0x1]  ;;  %v3641_v45 = vsel %vm6354_vm2, %v3636_v54, %v7073_v32 }
  0xc6   : > { %5651 = vmatprep.mubr.msk.bf16.mxu1 %vm665_vm3, %v4940_v60  ;;  %v3645_v60 = vor.u32 %v3644_v12, %v7073_v32  ;;  %v1293_v18 = vrot.slane %v6244_v41, 5  ;;  %v4969_v12 = vrot.slane %v1180_v56, 9  ;;  %v3677_v7 = vshrl.u32 %v5293_v20, 16  ;;  %v6193_v41 = vld [vmem:[%s6335_s25 + $0x84] sm:$0xff]   ;;  %v6194_v59 = vld [vmem:[%s6335_s25 + $0x90] sm:$0xff]  }
  0xc7   : > { %v3669_v36 = vor.u32 %v3668_v58, %v7086_v14  ;;  %v1303_v58 = vrot.slane %v6247_v42, 5  ;;  %v3680_v61 = vshll.u32 %v5293_v20, 16  ;;  %v1302_v56 = vrot.slane %v1300_v15, 4  ;;  %v7167_v20 = vld [vmem:[%s6335_s25 + $0x4c] sm:$0xf] }
  0xc8   : > { %v3646_v31 = vrot.slane %v3645_v60, 4  ;;  %v1295_v22 = vrot.slane %v1293_v18, 4  ;;  %v3686_v62 = vshll.u32 %v7127_v55, 16  ;;  %v3690_v4 = vshrl.u32 %v7127_v55, 16  ;;  %v7245_v37 = vld [vmem:[%s6335_s25 + $0x5c] sm:$0x1] }
  0xc9   : > { %v3670_v60 = vrot.slane %v3669_v36, 4  ;;  %v7159_v10 = vsel %vm6576_vm6, %v4969_v12, %v1293_v18  ;;  %v3665_v24 = vsel %vm6354_vm2, %v3660_v40, %v7086_v14  ;;  %v7174_v32 = vsel %vm6576_vm6, %v4970_v16, %v1300_v15  ;;  %v7178_v18 = vld [vmem:[%s6335_s25 + $0x58] sm:$0xf]  ;;  %v7192_v40 = vld [vmem:[%s6335_s25 + $0x90] sm:$0xe] }
  0xca   : > { %v3651_v36 = vsel %vm6354_vm2, %v3646_v31, %v3650_v34  ;;  %v3679_v54 = vrot.slane %v3677_v7, 4  ;;  %v3682_v34 = vrot.slane %v3680_v61, 5  ;;  %v5299_v31 = vld [vmem:[%s6335_s25 + $0x54] sm:$0xf]  ;;  %v3692_v14 = vrot.slane %v3690_v4, 4 }
  0xcb   : > { %v3675_v12 = vsel %vm6354_vm2, %v3670_v60, %v3674_v13  ;;  %v3710_v42 = vshll.u32 %v7167_v20, 16  ;;  %v3714_v7 = vshrl.u32 %v7167_v20, 16  ;;  %v3725_v13 = vshrl.u32 %v5299_v31, 16  ;;  %v1183_v38 = vld [vmem:[%s6335_s25 + $0x9c] sm:$0xe] }
  0xcc   : > { %5806 = vmatmul.mubr.msk.bf16.gmra.mrb[12].mxu0 %vm665_vm3, %v6190_v25  ;;  %v8129_v25 = vcombine.low %v6944_v52, %v6972_v21  ;;  %v7147_v52 = vcombine.low %v3617_v6, %v3627_v35  ;;  %v7163_v6 = vsel %vm6576_vm6, %v1295_v22, %v1296_v5  ;;  %v5296_v35 = vld [vmem:[%s6335_s25 + $0x48] sm:$0xf]  ;;  %v7184_v5 = vsel %vm6576_vm6, %v1302_v56, %v1303_v58  ;;  %v7187_v22 = vld [vmem:[%s6335_s25 + $0x44] sm:$0x1] }
  0xcd   : > { %5652 = vmatmul.mubr.msk.bf16.gmra.mrb[28].mxu1 %vm665_vm3, %v8128_v50  ;;  %5809 = vmatprep.mubr.msk.bf16.mxu0 %vm665_vm3, %v6192_v57  ;;  %8130 = vst [vmem:[#allocation6_spill] sm:$0xff] %v7187_v22  ;;  %v7189_v50 = vrot.slane %v3686_v62, 5  ;;  %v3701_v15 = vshrl.u32 %v5296_v35, 16  ;;  %v3704_v16 = vshll.u32 %v5296_v35, 16  ;;  %v3728_v61 = vshll.u32 %v5299_v31, 16 }
  0xce   : > { %5657 = vmatprep.mubr.msk.bf16.mxu1 %vm665_vm3, %v8129_v25  ;;  %v3734_v58 = vshll.u32 %v7178_v18, 16  ;;  %v3738_v25 = vshrl.u32 %v7178_v18, 16  ;;  %v8131_v60 = vcombine.low %v6954_v53, %v6958_v63  ;;  %v7204_v56 = vcombine.low %v3641_v45, %v3651_v36  ;;  %v7221_v35 = vld [vmem:[%s6335_s25 + $0x50] sm:$0x1]  ;;  %v6250_v62 = vld [vmem:[%s6335_s25 + $0x98] sm:$0x1] }
  0xcf   : > { %v7208_v4 = vcombine.low %v3665_v24, %v3675_v12  ;;  %v8132_v53 = vcombine.low %v6962_v0, %v6976_v8  ;;  %v3693_v45 = vor.u32 %v3692_v14, %v7189_v50  ;;  %v5302_v24 = vld [vmem:[%s6335_s25 + $0x60] sm:$0xf]  ;;  %v3703_v31 = vrot.slane %v3701_v15, 4  ;;  %v7227_v8 = vld [vmem:[%s6335_s25 + $0x64] sm:$0xf]  ;;  %v6196_v14 = vld [vmem:[%s6335_s25 + $0xa8] sm:$0xff]  }
  0xd0   : > { %v7224_v12 = vrot.slane %v3710_v42, 5  ;;  %v3716_v0 = vrot.slane %v3714_v7, 4  ;;  %v3730_v15 = vrot.slane %v3728_v61, 5  ;;  %v6249_v7 = vld [vmem:[%s6335_s25 + $0x94] sm:$0xf]  ;;  %v1310_v21 = vrot.slane %v6250_v62, 5 }
  0xd1   : > { %v1307_v63 = vrot.slane %v6249_v7, 5  ;;  %v3720_v57 = vshll.u32 %v7221_v35, 16  ;;  %v3749_v36 = vshrl.u32 %v5302_v24, 16  ;;  %v3762_v61 = vshrl.u32 %v7227_v8, 16  ;;  %v6251_v7 = vld [vmem:[%s6335_s25 + $0xa0] sm:$0xf] }
  0xd2   : > { %v1314_v55 = vrot.slane %v6251_v7, 5  ;;  %v3694_v62 = vrot.slane %v3693_v45, 4  ;;  %v1321_v45 = vrot.slane %v6717_v30, 5  ;;  %v7272_v7 = vld [vmem:[%s6335_s25 + $0x68] sm:$0x1]  ;;  %v6197_v30 = vld [vmem:[%s6335_s25 + $0xb4] sm:$0xff]  }
  0xd3   : > { %v3751_v19 = vrot.slane %v3749_v36, 4  ;;  %8136 = vst [vmem:[#allocation8_spill] sm:$0xff] %v7272_v7  ;;  %v6198_v36 = vld [vmem:[%s6335_s25 + $0xc0] sm:$0xff]  }
  0xd4   : > { %5810 = vmatmul.mubr.msk.bf16.gmra.mrb[16].mxu0 %vm665_vm3, %v6193_v41  ;;  %v3696_v41 = vshll.u32 %v7187_v22, 16  ;;  %v3752_v22 = vshll.u32 %v5302_v24, 16  ;;  %v3744_v24 = vshll.u32 %v7245_v37, 16 }
  0xd5   : > { %5658 = vmatmul.mubr.msk.bf16.vlgmr.msra.gmra.mrb[0].mxu1 %vm665_vm3, %v8131_v60  ;;  %5813 = vmatprep.mubr.msk.bf16.mxu0 %vm665_vm3, %v6194_v59  ;;  %v3683_v59 = vor.u32 %v3682_v34, %v3679_v54  ;;  %v7232_v54 = vld [vmem:[%s8105_s1 + $0x20] sm:$0xff]   ;;  %v3727_v60 = vrot.slane %v3725_v13, 4  ;;  %v3758_v13 = vshll.u32 %v7227_v8, 16 }
  0xd6   : > { %5690 = vmatpush3.bf16.msra.mxu1 %v6830_v39  ;;  %5661 = vmatprep.mubr.msk.bf16.mxu1 %vm665_vm3, %v8132_v53  ;;  %v3706_v39 = vrot.slane %v3704_v16, 5  ;;  %8133 = vst [vmem:[#allocation7_spill] sm:$0xff] %v7232_v54  ;;  %v6195_v34 = vld [vmem:[%s6335_s25 + $0x9c] sm:$0xff]   ;;  %v7237_v53 = vrot.slane %v3734_v58, 5  ;;  %v3740_v16 = vrot.slane %v3738_v25, 4  ;;  %v7239_v42 = vrot.slane %v3696_v41, 5 }
  0xd7   : > { %5893 = vmatprep.subr.bf16.mxu1 %v7232_v54  ;;  %v7250_v58 = vrot.slane %v3683_v59, 4  ;;  %v3717_v41 = vor.u32 %v3716_v0, %v7224_v12  ;;  %v3731_v54 = vor.u32 %v3730_v15, %v3727_v60  ;;  %v1309_v59 = vrot.slane %v1307_v63, 4  ;;  %v1184_v0 = vld [vmem:[%s6335_s25 + $0xa8] sm:$0xe] }
  0xd8   : > { %v3707_v25 = vor.u32 %v3706_v39, %v3703_v31  ;;  %v3741_v1 = vor.u32 %v3740_v16, %v7237_v53  ;;  %v3722_v31 = vrot.slane %v3720_v57, 5  ;;  %v4972_v39 = vrot.slane %v1183_v38, 9  ;;  %v6252_v57 = vld [vmem:[%s6335_s25 + $0xa4] sm:$0x1] }
  0xd9   : > { %v3754_v26 = vrot.slane %v3752_v22, 5  ;;  %v7268_v60 = vrot.slane %v3758_v13, 5  ;;  %v3718_v15 = vrot.slane %v3717_v41, 4  ;;  %v1316_v16 = vrot.slane %v1314_v55, 4  ;;  %v6253_v41 = vld [vmem:[%s6335_s25 + $0xb0] sm:$0x1] }
  0xda   : > { %v1317_v38 = vrot.slane %v6252_v57, 5  ;;  %v4973_v49 = vrot.slane %v1184_v0, 9  ;;  %v3689_v22 = vsel %vm6354_vm2, %v7250_v58, %v7189_v50  ;;  %v8137_v13 = vrot.slane %v7192_v40, 9  ;;  %v1185_v50 = vld [vmem:[%s6335_s25 + $0xb4] sm:$0xe] }
  0xdb   : > { %v1324_v57 = vrot.slane %v6253_v41, 5  ;;  %v3768_v0 = vshll.u32 %v7272_v7, 16  ;;  %v5305_v58 = vld [vmem:[%s6335_s25 + $0x6c] sm:$0xf]  ;;  %v7296_v40 = vsel %vm6576_vm6, %v1309_v59, %v1310_v21  ;;  %v8139_v59 = vcombine.low %v7020_v43, %v7024_v44 }
  0xdc   : > { %5814 = vmatmul.mubr.msk.bf16.gmra.mrb[20].mxu0 %vm665_vm3, %v6195_v34  ;;  %v8135_v34 = vcombine.low %v6986_v17, %v6999_v27  ;;  %v3732_v17 = vrot.slane %v3731_v54, 4  ;;  %v3742_v27 = vrot.slane %v3741_v1, 4  ;;  %v3699_v1 = vsel %vm6354_vm2, %v3694_v62, %v7239_v42 }
  0xdd   : > { %5662 = vmatmul.mubr.msk.bf16.gmra.mrb[4].mxu1 %vm665_vm3, %v8134_v11  ;;  %5817 = vmatprep.mubr.msk.bf16.mxu0 %vm665_vm3, %v6196_v14  ;;  %v3764_v11 = vrot.slane %v3762_v61, 4  ;;  %v3708_v14 = vrot.slane %v3707_v25, 4  ;;  %v7284_v61 = vsel %vm6576_vm6, %v8137_v13, %v1307_v63  ;;  %v1323_v25 = vrot.slane %v1321_v45, 4 }
  0xde   : > { %5665 = vmatprep.mubr.msk.bf16.mxu1 %vm665_vm3, %v8135_v34  ;;  %v3746_v34 = vrot.slane %v3744_v24, 5  ;;  %v3755_v54 = vor.u32 %v3754_v26, %v3751_v19  ;;  %v7303_v42 = vsel %vm6576_vm6, %v4972_v39, %v1314_v55  ;;  %v7307_v62 = vsel %vm6576_vm6, %v1316_v16, %v1317_v38  ;;  %v6254_v39 = vld [vmem:[%s6335_s25 + $0xb8] sm:$0xf] }
  0xdf   : > { %v3765_v24 = vor.u32 %v3764_v11, %v7268_v60  ;;  %v3713_v63 = vsel %vm6354_vm2, %v3708_v14, %v7224_v12  ;;  %v3723_v19 = vsel %vm6354_vm2, %v3718_v15, %v3722_v31  ;;  %v3737_v21 = vsel %vm6354_vm2, %v3732_v17, %v7237_v53  ;;  %v7356_v17 = vld [vmem:[%s6335_s25 + $0x7c] sm:$0xf] }
  0xe0   : > { %v3747_v12 = vsel %vm6354_vm2, %v3742_v27, %v3746_v34  ;;  %v7319_v55 = vsel %vm6576_vm6, %v4973_v49, %v1321_v45  ;;  %v7328_v31 = vsel %vm6576_vm6, %v1323_v25, %v1324_v57  ;;  %v4974_v53 = vrot.slane %v1185_v50, 9  ;;  %v7332_v49 = vld [vmem:[%s6335_s25 + $0x70] sm:$0xf]  ;;  %8143 = vst [vmem:[#allocation12_spill] sm:$0xff] %v7356_v17  ;;  %v5311_v27 = vld [vmem:[%s6335_s25 + $0x84] sm:$0xf] }
  0xe1   : > { %8138 = vst [vmem:[#allocation9_spill] sm:$0xff] %v7319_v55  ;;  %8140 = vst [vmem:[#allocation10_spill] sm:$0xff] %v7328_v31  ;;  %v1328_v26 = vrot.slane %v6254_v39, 5  ;;  %v3773_v45 = vshrl.u32 %v5305_v58, 16  ;;  %v8142_v43 = vcombine.low %v7028_v47, %v7056_v3  ;;  %v7338_v44 = vcombine.low %v3689_v22, %v3699_v1  ;;  %v5308_v3 = vld [vmem:[%s6335_s25 + $0x78] sm:$0xf] }
  0xe2   : > { %8141 = vst [vmem:[#allocation11_spill] sm:$0xff] %v7332_v49  ;;  %v7340_v11 = vrot.slane %v3755_v54, 4  ;;  %v7342_v14 = vrot.slane %v3765_v24, 4  ;;  %v7344_v15 = vrot.slane %v3768_v0, 5  ;;  %v7348_v38 = vcombine.low %v3713_v63, %v3723_v19  ;;  %v6199_v34 = vld [vmem:[%s6335_s25 + $0xcc] sm:$0xff]  }
  0xe3   : > { %v7352_v47 = vcombine.low %v3737_v21, %v3747_v12  ;;  %v7363_v22 = vld [vmem:[%s6335_s25 + $0xbc] sm:$0x1]  ;;  %v3776_v25 = vshll.u32 %v5305_v58, 16  ;;  %v3782_v41 = vshll.u32 %v7332_v49, 16  ;;  %v7368_v57 = vld [vmem:[%s6335_s25 + $0x88] sm:$0xf]  ;;  %v7372_v1 = vsel %vm6576_vm6, %v4974_v53, %v1328_v26 }
  0xe4   : > { %5818 = vmatmul.mubr.msk.bf16.gmra.mrb[24].mxu0 %vm665_vm3, %v6197_v30  ;;  %8144 = vst [vmem:[#allocation13_spill] sm:$0xff] %v7368_v57  ;;  %v7374_v54 = vrot.slane %v1328_v26, 4  ;;  %v7376_v24 = vrot.slane %v3773_v45, 4  ;;  %v3786_v0 = vshrl.u32 %v7332_v49, 16  ;;  %v5314_v50 = vld [vmem:[%s6335_s25 + $0x90] sm:$0xf]  ;;  %v8147_v58 = vcombine.low %v7063_v51, %v7097_v33 }
  0xe5   : > { %5666 = vmatmul.mubr.msk.bf16.gmra.mrb[8].mxu1 %vm665_vm3, %v8139_v59  ;;  %5821 = vmatprep.mubr.msk.bf16.mxu0 %vm665_vm3, %v6198_v36  ;;  %v3797_v19 = vshrl.u32 %v5308_v3, 16  ;;  %v3800_v21 = vshll.u32 %v5308_v3, 16  ;;  %v7389_v12 = vld [vmem:[%s6335_s25 + $0x94] sm:$0xf]  ;;  %v3806_v53 = vshll.u32 %v7356_v17, 16  ;;  %v3810_v39 = vshrl.u32 %v7356_v17, 16 }
  0xe6   : > { %5669 = vmatprep.mubr.msk.bf16.mxu1 %vm665_vm3, %v8142_v43  ;;  %8145 = vst [vmem:[#allocation14_spill] sm:$0xff] %v7389_v12  ;;  %v7392_v59 = vld [vmem:[%s6335_s25 + $0x74] sm:$0x1]  ;;  %v3821_v26 = vshrl.u32 %v5311_v27, 16  ;;  %v3824_v45 = vshll.u32 %v5311_v27, 16  ;;  %v3830_v43 = vshll.u32 %v7368_v57, 16 }
  0xe7   : > { %8146 = vst [vmem:[#allocation15_spill] sm:$0xff] %v7392_v59  ;;  %v3834_v36 = vshrl.u32 %v7368_v57, 16  ;;  %v3845_v30 = vshrl.u32 %v5314_v50, 16  ;;  %v3848_v3 = vshll.u32 %v5314_v50, 16  ;;  %v3778_v63 = vrot.slane %v3776_v25, 5 }
  0xe8   : > { %v7405_v27 = vrot.slane %v3782_v41, 5  ;;  %v3854_v16 = vshll.u32 %v7389_v12, 16  ;;  %v3858_v13 = vshrl.u32 %v7389_v12, 16  ;;  %v8148_v50 = vcombine.low %v7092_v48, %v7105_v23  ;;  %v5317_v41 = vld [vmem:[%s6335_s25 + $0x9c] sm:$0xf] }
  0xe9   : > { %v3788_v51 = vrot.slane %v3786_v0, 4  ;;  %v3792_v33 = vshll.u32 %v7392_v59, 16  ;;  %v3802_v25 = vrot.slane %v3800_v21, 5  ;;  %v3812_v57 = vrot.slane %v3810_v39, 4  ;;  %v7421_v17 = vld [vmem:[%s6335_s25 + $0x8c] sm:$0x1] }
  0xea   : > { %v3823_v49 = vrot.slane %v3821_v26, 4  ;;  %v3826_v12 = vrot.slane %v3824_v45, 5  ;;  %v7423_v31 = vrot.slane %v3830_v43, 5  ;;  %v3836_v48 = vrot.slane %v3834_v36, 4  ;;  %v7429_v0 = vld [vmem:[%s6335_s25 + $0x98] sm:$0x1] }
  0xeb   : > { %v3847_v23 = vrot.slane %v3845_v30, 4  ;;  %v3850_v55 = vrot.slane %v3848_v3, 5  ;;  %v7431_v59 = vrot.slane %v3854_v16, 5  ;;  %v3869_v21 = vshrl.u32 %v5317_v41, 16 }
  0xec   : > { %5822 = vmatmul.mubr.msk.bf16.gmra.mrb[28].mxu0 %vm665_vm3, %v6199_v34  ;;  %v7408_v34 = vld [vmem:[%s6335_s25 + $0x80] sm:$0x1]  ;;  %v3779_v39 = vor.u32 %v3778_v63, %v7376_v24  ;;  %v3789_v7 = vor.u32 %v3788_v51, %v7405_v27  ;;  %v3827_v30 = vor.u32 %v3826_v12, %v3823_v49  ;;  %v3837_v16 = vor.u32 %v3836_v48, %v7423_v31 }
  0xed   : > { %5670 = vmatmul.mubr.msk.bf16.gmra.mrb[12].mxu1 %vm665_vm3, %v8147_v58  ;;  %5827 = vmatprep.mubr.msk.bf16.mxu0 %vm665_vm3, %v7147_v52  ;;  %v3799_v52 = vrot.slane %v3797_v19, 4  ;;  %v7418_v58 = vrot.slane %v3806_v53, 5  ;;  %v3860_v19 = vrot.slane %v3858_v13, 4  ;;  %v3872_v53 = vshll.u32 %v5317_v41, 16 }
  0xee   : > { %5673 = vmatprep.mubr.msk.bf16.mxu1 %vm665_vm3, %v8148_v50  ;;  %v7426_v50 = vld [vmem:[%s6335_s25 + $0xa0] sm:$0xf]  ;;  %v3816_v45 = vshll.u32 %v7408_v34, 16  ;;  %v3840_v13 = vshll.u32 %v7421_v17, 16  ;;  %v3851_v24 = vor.u32 %v3850_v55, %v3847_v23  ;;  %v3864_v63 = vshll.u32 %v7429_v0, 16 }
  0xef   : > { %v3803_v26 = vor.u32 %v3802_v25, %v3799_v52  ;;  %v3813_v36 = vor.u32 %v3812_v57, %v7418_v58  ;;  %v3878_v43 = vshll.u32 %v7426_v50, 16  ;;  %v3882_v3 = vshrl.u32 %v7426_v50, 16 }
  0xf0   : > { %v8149_v51 = vcombine.low %v7109_v29, %v7113_v9  ;;  %v3794_v49 = vrot.slane %v3792_v33, 5  ;;  %v3861_v57 = vor.u32 %v3860_v19, %v7431_v59  ;;  %v3871_v12 = vrot.slane %v3869_v21, 4 }
  0xf1   : > { %v8150_v52 = vcombine.low %v7159_v10, %v7163_v6  ;;  %v3780_v55 = vrot.slane %v3779_v39, 4  ;;  %v3790_v29 = vrot.slane %v3789_v7, 4  ;;  %v3804_v9 = vrot.slane %v3803_v26, 4 }
  0xf2   : > { %v3818_v25 = vrot.slane %v3816_v45, 5  ;;  %v3814_v33 = vrot.slane %v3813_v36, 4  ;;  %v3828_v41 = vrot.slane %v3827_v30, 4  ;;  %v7457_v48 = vrot.slane %v3878_v43, 5 }
  0xf3   : > { %v3884_v23 = vrot.slane %v3882_v3, 4  ;;  %v3838_v19 = vrot.slane %v3837_v16, 4  ;;  %v3842_v21 = vrot.slane %v3840_v13, 5  ;;  %v3852_v10 = vrot.slane %v3851_v24, 4 }
  0xf4   : > { %5828 = vmatmul.mubr.msk.bf16.vlgmr.msra.gmra.mrb[0].mxu0 %vm665_vm3, %v7204_v56  ;;  %v3874_v56 = vrot.slane %v3872_v53, 5  ;;  %v3866_v6 = vrot.slane %v3864_v63, 5  ;;  %v7460_v53 = vld [vmem:[%s6335_s25 + $0xa4] sm:$0x1]  ;;  %v8151_v26 = vrot.slane %v7363_v22, 5  ;;  %v3785_v36 = vsel %vm6354_vm2, %v3780_v55, %v7405_v27 }
  0xf5   : > { %5674 = vmatmul.mubr.msk.bf16.gmra.mrb[16].mxu1 %vm665_vm3, %v8149_v51  ;;  %5860 = vmatpush3.bf16.msra.mxu0 %v6931_v46  ;;  %v5320_v46 = vld [vmem:[%s6335_s25 + $0xa8] sm:$0xf]  ;;  %v3862_v51 = vrot.slane %v3861_v57, 4  ;;  %v3795_v30 = vsel %vm6354_vm2, %v3790_v29, %v3794_v49  ;;  %v3809_v43 = vsel %vm6354_vm2, %v3804_v9, %v7418_v58  ;;  %v3819_v22 = vsel %vm6354_vm2, %v3814_v33, %v3818_v25 }
  0xf6   : > { %5677 = vmatprep.mubr.msk.bf16.mxu1 %vm665_vm3, %v8150_v52  ;;  %5831 = vmatprep.mubr.msk.bf16.mxu0 %vm665_vm3, %v7208_v4  ;;  %v3875_v52 = vor.u32 %v3874_v56, %v3871_v12  ;;  %v7463_v4 = vld [vmem:[%s6335_s25 + $0xac] sm:$0xf]  ;;  %v3893_v7 = vshrl.u32 %v5320_v46, 16  ;;  %v3896_v39 = vshll.u32 %v5320_v46, 16  ;;  %v7470_v45 = vsel %vm6576_vm6, %v7374_v54, %v8151_v26 }
  0xf7   : > { %v3833_v54 = vsel %vm6354_vm2, %v3828_v41, %v7423_v31  ;;  %v3885_v3 = vor.u32 %v3884_v23, %v7457_v48  ;;  %v3888_v16 = vshll.u32 %v7460_v53, 16  ;;  %v3843_v27 = vsel %vm6354_vm2, %v3838_v19, %v3842_v21  ;;  %v5369_v31 = vld [vmem:[%s6335_s25 + $0x48] sm:$0xe]  ;;  %v5372_v26 = vld [vmem:[%s6335_s25 + $0x6c] sm:$0xe] }
  0xf8   : > { %v3857_v58 = vsel %vm6354_vm2, %v3852_v10, %v7431_v59  ;;  %v3902_v13 = vshll.u32 %v7463_v4, 16  ;;  %v3906_v24 = vshrl.u32 %v7463_v4, 16  ;;  %v8152_v63 = vcombine.low %v7174_v32, %v7184_v5  ;;  %v7506_v59 = vld [vmem:[%s6335_s25 + $0xb0] sm:$0x1] }
  0xf9   : > { %v3876_v49 = vrot.slane %v3875_v52, 4  ;;  %v3895_v57 = vrot.slane %v3893_v7, 4  ;;  %v3898_v12 = vrot.slane %v3896_v39, 5  ;;  %v8153_v56 = vcombine.low %v7284_v61, %v7296_v40  ;;  %v5323_v40 = vld [vmem:[%s6335_s25 + $0xb4] sm:$0xf] }
  0xfa   : > { %v8154_v32 = vsel %vm6354_vm2, %v7342_v14, %v7344_v15  ;;  %v8155_v5 = vsel %vm6354_vm2, %v7340_v11, %v7268_v60  ;;  %v4990_v55 = vcombine.low %v7372_v1, %v7470_v45  ;;  %v7524_v29 = vcombine.low %v3785_v36, %v3795_v30  ;;  %v5370_v15 = vld [vmem:[%s6335_s25 + $0x54] sm:$0xe] }
  0xfb   : > { %v7526_v61 = vcombine.low %v3809_v43, %v3819_v22  ;;  %v7529_v9 = vcombine.low %v3833_v54, %v3843_v27  ;;  %v3886_v25 = vrot.slane %v3885_v3, 4  ;;  %v3890_v46 = vrot.slane %v3888_v16, 5  ;;  %v8157_v16 = vld [vmem:[#allocation8_spill] sm:$0xff] }
  0xfc   : > { %5832 = vmatmul.mubr.msk.bf16.gmra.mrb[4].mxu0 %vm665_vm3, %v7338_v44  ;;  %v3867_v44 = vsel %vm6354_vm2, %v3862_v51, %v3866_v6  ;;  %v5385_v14 = vrot.slane %v5369_v31, 9  ;;  %v7534_v60 = vrot.slane %v3902_v13, 5  ;;  %v3908_v11 = vrot.slane %v3906_v24, 4  ;;  %v5371_v6 = vld [vmem:[%s6335_s25 + $0x60] sm:$0xe]  ;;  %v8158_v13 = vld [vmem:[#allocation9_spill] sm:$0xff] }
  0xfd   : > { %5678 = vmatmul.mubr.msk.bf16.gmra.mrb[20].mxu1 %vm665_vm3, %v8152_v63  ;;  %5835 = vmatprep.mubr.msk.bf16.mxu0 %vm665_vm3, %v7348_v38  ;;  %v5338_v38 = vcombine.low %v8155_v5, %v8154_v32  ;;  %v7532_v33 = vcombine.low %v3857_v58, %v3867_v44  ;;  %v3912_v41 = vshll.u32 %v7506_v59, 16  ;;  %v3881_v23 = vsel %vm6354_vm2, %v3876_v49, %v7457_v48  ;;  %v8159_v24 = vld [vmem:[#allocation10_spill] sm:$0xff]  ;;  %v8161_v63 = vld [vmem:[#allocation11_spill] sm:$0xff] }
  0xfe   : > { %5681 = vmatprep.mubr.msk.bf16.mxu1 %vm665_vm3, %v8153_v56  ;;  %v3899_v19 = vor.u32 %v3898_v12, %v3895_v57  ;;  %v4379_v21 = vrot.slane %v7167_v20, 5  ;;  %v4382_v10 = vrot.slane %v7221_v35, 5  ;;  %v3917_v51 = vshrl.u32 %v5323_v40, 16  ;;  %v7556_v35 = vld [vmem:[%s6335_s25 + $0xb8] sm:$0xf]  ;;  %v8162_v49 = vld [vmem:[#allocation15_spill] sm:$0xff] }
  0xff   : > { %v5386_v52 = vrot.slane %v5370_v15, 9  ;;  %v4386_v7 = vrot.slane %v7178_v18, 5  ;;  %v4389_v39 = vrot.slane %v7245_v37, 5  ;;  %v3891_v36 = vsel %vm6354_vm2, %v3886_v25, %v3890_v46  ;;  %v5326_v12 = vld [vmem:[%s6335_s25 + $0xc0] sm:$0xf] }
 0x100   : > { %v3920_v30 = vshll.u32 %v5323_v40, 16  ;;  %v7550_v48 = vsel %vm6576_vm6, %v5385_v14, %v4379_v21  ;;  %v4381_v43 = vrot.slane %v4379_v21, 4  ;;  %v3909_v20 = vor.u32 %v3908_v11, %v7534_v60  ;;  %v5373_v14 = vld [vmem:[%s6335_s25 + $0x78] sm:$0xe] }
 0x101   : > { %v7560_v37 = vsel %vm6576_vm6, %v5386_v52, %v4386_v7  ;;  %v4388_v18 = vrot.slane %v4386_v7, 4  ;;  %v5387_v22 = vrot.slane %v5371_v6, 9  ;;  %v8156_v54 = vcombine.low %v7303_v42, %v7307_v62  ;;  %v6201_v6 = vld [vmem:[%s6335_s25 + $0xc] sm:$0xff]  }
 0x102   : > { %v4393_v3 = vrot.slane %v7227_v8, 5  ;;  %v4396_v27 = vrot.slane %v8157_v16, 5  ;;  %v5388_v58 = vrot.slane %v5372_v26, 9  ;;  %v8160_v31 = vcombine.low %v8158_v13, %v8159_v24  ;;  %v8164_v13 = vld [vmem:[#allocation3_spill] sm:$0xff]  ;;  %v8165_v24 = vld [vmem:[#allocation4_spill] sm:$0xff] }
 0x103   : > { %v7581_v62 = vsel %vm6576_vm6, %v4388_v18, %v4389_v39  ;;  %v4400_v44 = vrot.slane %v8161_v63, 5  ;;  %v4403_v8 = vrot.slane %v8162_v49, 5  ;;  %v3926_v57 = vshll.u32 %v7556_v35, 16  ;;  %v7618_v39 = vld [vmem:[%s6335_s25 + $0xc4] sm:$0xf]  ;;  %v8166_v49 = vld [vmem:[#allocation13_spill] sm:$0xff] }
 0x104   : > { %5836 = vmatmul.mubr.msk.bf16.gmra.mrb[8].mxu0 %vm665_vm3, %v7352_v47  ;;  %v7569_v47 = vsel %vm6576_vm6, %v4381_v43, %v4382_v10  ;;  %v5402_v56 = vcombine.low %v7560_v37, %v7581_v62  ;;  %v7591_v32 = vsel %vm6576_vm6, %v5387_v22, %v4393_v3  ;;  %v4395_v5 = vrot.slane %v4393_v3, 4  ;;  %v5100_v10 = vld [vmem:[%s6335_s25 + $0x78] sm:$0xf]  ;;  %v8163_v22 = vld [vmem:[#allocation12_spill] sm:$0xff]  ;;  %v6266_v62 = vld [vmem:[%s6335_s25 + $0xa0] sm:$0xf] }
 0x105   : > { %5682 = vmatmul.mubr.msk.bf16.gmra.mrb[24].mxu1 %vm665_vm3, %v8156_v54  ;;  %5839 = vmatprep.mubr.msk.bf16.mxu0 %vm665_vm3, %v5338_v38  ;;  %v5401_v42 = vcombine.low %v7550_v48, %v7569_v47  ;;  %v7593_v38 = vrot.slane %v3912_v41, 5  ;;  %v3930_v40 = vshrl.u32 %v7556_v35, 16  ;;  %v7598_v25 = vsel %vm6576_vm6, %v5388_v58, %v4400_v44 }
 0x106   : > { %5685 = vmatprep.mubr.msk.bf16.mxu1 %vm665_vm3, %v8160_v31  ;;  %v4402_v46 = vrot.slane %v4400_v44, 4  ;;  %v7601_v15 = vcombine.low %v3881_v23, %v3891_v36  ;;  %v7603_v11 = vrot.slane %v3899_v19, 4  ;;  %v7605_v21 = vrot.slane %v3917_v51, 4 }
 0x107   : > { %v7609_v41 = vsel %vm6576_vm6, %v4395_v5, %v4396_v27  ;;  %v7613_v52 = vrot.slane %v3909_v20, 4  ;;  %v7615_v7 = vrot.slane %v3920_v30, 5  ;;  %v7626_v51 = vrot.slane %v3926_v57, 5  ;;  %v5374_v20 = vld [vmem:[%s6335_s25 + $0x84] sm:$0xe] }
 0x108   : > { %v5403_v23 = vcombine.low %v7591_v32, %v7609_v41  ;;  %v7624_v19 = vsel %vm6576_vm6, %v4402_v46, %v4403_v8  ;;  %v3941_v26 = vshrl.u32 %v5326_v12, 16  ;;  %v5389_v43 = vrot.slane %v5373_v14, 9  ;;  %v7634_v30 = vld [vmem:[%s6335_s25 + $0xbc] sm:$0x1]  ;;  %v5329_v5 = vld [vmem:[%s6335_s25 + $0xcc] sm:$0xf] }
 0x109   : > { %v5404_v36 = vcombine.low %v7598_v25, %v7624_v19  ;;  %v3944_v18 = vshll.u32 %v5326_v12, 16  ;;  %v4407_v54 = vrot.slane %v8163_v22, 5  ;;  %v4410_v3 = vrot.slane %v7408_v34, 5  ;;  %v6202_v14 = vld [vmem:[%s6335_s25 + $0x18] sm:$0xff]   ;;  %v5375_v22 = vld [vmem:[%s6335_s25 + $0x90] sm:$0xe] }
 0x10a   : > { %v2257_v16 = vshrl.u32 %v5100_v10, 16  ;;  %v3950_v27 = vshll.u32 %v7618_v39, 16  ;;  %v2260_v58 = vshll.u32 %v5100_v10, 16  ;;  %v2279_v34 = vsel %vm6354_vm2, %v8165_v24, %v8164_v13  ;;  %v8167_v24 = vld [vmem:[#allocation14_spill] sm:$0xff]  ;;  %v6270_v19 = vld [vmem:[%s6335_s25 + $0xac] sm:$0xf] }
 0x10b   : > { %v7653_v1 = vsel %vm6576_vm6, %v5389_v43, %v4407_v54  ;;  %v4409_v45 = vrot.slane %v4407_v54, 4  ;;  %v3932_v31 = vrot.slane %v3930_v40, 4  ;;  %v3936_v63 = vshll.u32 %v7634_v30, 16 }
 0x10c   : > { %5840 = vmatmul.mubr.msk.bf16.gmra.mrb[12].mxu0 %vm665_vm3, %v7524_v29  ;;  %v3954_v29 = vshrl.u32 %v7618_v39, 16  ;;  %v2262_v44 = vrot.slane %v2260_v58, 5  ;;  %v4414_v8 = vrot.slane %v8166_v49, 5  ;;  %v3905_v57 = vsel %vm6354_vm2, %v7603_v11, %v7534_v60  ;;  %v6203_v60 = vld [vmem:[%s6335_s25 + $0x24] sm:$0xff]  }
 0x10d   : > { %5686 = vmatmul.mubr.msk.bf16.gmra.mrb[28].mxu1 %vm665_vm3, %v4990_v55  ;;  %5843 = vmatprep.mubr.msk.bf16.mxu0 %vm665_vm3, %v7526_v61  ;;  %v2259_v55 = vrot.slane %v2257_v16, 4  ;;  %v5390_v61 = vrot.slane %v5374_v20, 9  ;;  %v3923_v12 = vor.u32 %v7615_v7, %v7605_v21  ;;  %v7666_v46 = vsel %vm6576_vm6, %v4409_v45, %v4410_v3  ;;  %v7677_v7 = vld [vmem:[%s6335_s25 + $0xd0] sm:$0xf] }
 0x10e   : > { %5691 = vmatprep.mubr.msk.bf16.mxu1 %vm665_vm3, %v6201_v6  ;;  %v4417_v40 = vrot.slane %v7421_v17, 5  ;;  %v3943_v10 = vrot.slane %v3941_v26, 4  ;;  %v3946_v6 = vrot.slane %v3944_v18, 5  ;;  %v5405_v43 = vcombine.low %v7653_v1, %v7666_v46  ;;  %v7689_v18 = vld [vmem:[%s6335_s25 + $0xc8] sm:$0x1] }
 0x10f   : > { %v2263_v20 = vor.u32 %v2262_v44, %v2259_v55  ;;  %v7674_v11 = vrot.slane %v3950_v27, 5  ;;  %v3956_v21 = vrot.slane %v3954_v29, 4  ;;  %v7681_v54 = vsel %vm6576_vm6, %v5390_v61, %v4414_v8  ;;  %v8168_v55 = vld [vmem:[#allocation2_spill] sm:$0xff] }
 0x110   : > { %v4416_v3 = vrot.slane %v4414_v8, 4  ;;  %v3915_v17 = vsel %vm6354_vm2, %v7613_v52, %v7593_v38  ;;  %v3933_v26 = vor.u32 %v3932_v31, %v7626_v51  ;;  %v3965_v16 = vshrl.u32 %v5329_v5, 16  ;;  %v8169_v31 = vld [vmem:[#allocation7_spill] sm:$0xff] }
 0x111   : > { %v2264_v27 = vrot.slane %v2263_v20, 4  ;;  %v3968_v29 = vshll.u32 %v5329_v5, 16  ;;  %v5391_v13 = vrot.slane %v5375_v22, 9  ;;  %v4421_v45 = vrot.slane %v8167_v24, 5 }
 0x112   : > { %v7695_v58 = vsel %vm6576_vm6, %v4416_v3, %v4417_v40  ;;  %v3974_v38 = vshll.u32 %v7677_v7, 16  ;;  %v3978_v52 = vshrl.u32 %v7677_v7, 16  ;;  %v3947_v44 = vor.u32 %v3946_v6, %v3943_v10  ;;  %v5376_v10 = vld [vmem:[%s6335_s25 + $0x9c] sm:$0xe]  ;;  %v6204_v6 = vld [vmem:[%s6335_s25 + $0x30] sm:$0xff]  }
 0x113   : > { %v5406_v61 = vcombine.low %v7681_v54, %v7695_v58  ;;  %v3960_v49 = vshll.u32 %v7689_v18, 16  ;;  %v3938_v5 = vrot.slane %v3936_v63, 5  ;;  %v7716_v40 = vsel %vm6576_vm6, %v5391_v13, %v4421_v45  ;;  %v6205_v13 = vld [vmem:[%s6335_s25 + $0x3c] sm:$0xff]  }
 0x114   : > { %5844 = vmatmul.mubr.msk.bf16.gmra.mrb[16].mxu0 %vm665_vm3, %v7529_v9  ;;  %v2269_v9 = vsel %vm6354_vm2, %v2264_v27, %v8168_v55  ;;  %v4424_v20 = vrot.slane %v7429_v0, 5  ;;  %v5344_v22 = vcombine.low %v3905_v57, %v3915_v17  ;;  %v3924_v3 = vrot.slane %v3923_v12, 4 }
 0x115   : > { %5692 = vmatmul.mubr.msk.bf16.vlgmr.msra.gmra.mrb[0].mxu1 %vm665_vm3, %v6202_v14  ;;  %5847 = vmatprep.mubr.msk.bf16.mxu0 %vm665_vm3, %v7532_v33  ;;  %v3957_v33 = vor.u32 %v3956_v21, %v7674_v11  ;;  %v7712_v8 = vcombine.low %v2269_v9, %v2279_v34  ;;  %v4423_v14 = vrot.slane %v4421_v45, 4  ;;  %v3934_v27 = vrot.slane %v3933_v26, 4  ;;  %v7722_v21 = vld [vmem:[%s6335_s25 + $0xd4] sm:$0x1]  ;;  %v5365_v9 = vld [vmem:[%s6335_s25 + $0x18] sm:$0xe] }
 0x116   : > { %5894 = vmatpush3.bf16.msra.mxu1 %v8169_v31  ;;  %5695 = vmatprep.mubr.msk.bf16.mxu1 %vm665_vm3, %v6203_v60  ;;  %v3967_v60 = vrot.slane %v3965_v16, 4  ;;  %v3970_v24 = vrot.slane %v3968_v29, 5  ;;  %v7724_v34 = vrot.slane %v3974_v38, 5  ;;  %v3980_v55 = vrot.slane %v3978_v52, 4 }
 0x117   : > { %v7728_v63 = vsel %vm6576_vm6, %v4423_v14, %v4424_v20  ;;  %v3948_v45 = vrot.slane %v3947_v44, 4  ;;  %v3958_v0 = vrot.slane %v3957_v33, 4  ;;  %v3962_v57 = vrot.slane %v3960_v49, 5  ;;  %v6256_v33 = vld [vmem:[%s6335_s25 + $0x1c] sm:$0xf] }
 0x118   : > { %v5407_v12 = vcombine.low %v7716_v40, %v7728_v63  ;;  %v5392_v17 = vrot.slane %v5376_v10, 9  ;;  %v4428_v26 = vrot.slane %v7426_v50, 5  ;;  %v3929_v16 = vsel %vm6354_vm2, %v3924_v3, %v7626_v51  ;;  %v5377_v14 = vld [vmem:[%s6335_s25 + $0xa8] sm:$0xe] }
 0x119   : > { %v3939_v29 = vsel %vm6354_vm2, %v3934_v27, %v3938_v5  ;;  %v3984_v38 = vshll.u32 %v7722_v21, 16  ;;  %v4431_v52 = vrot.slane %v7460_v53, 5  ;;  %v3971_v50 = vor.u32 %v3970_v24, %v3967_v60  ;;  %v6206_v60 = vld [vmem:[%s6335_s25 + $0x48] sm:$0xff]   ;;  %v6257_v24 = vld [vmem:[%s6335_s25 + $0x20] sm:$0x1] }
 0x11a   : > { %v7749_v51 = vsel %vm6576_vm6, %v5392_v17, %v4428_v26  ;;  %v4430_v31 = vrot.slane %v4428_v26, 4  ;;  %v3953_v53 = vsel %vm6354_vm2, %v3948_v45, %v7674_v11  ;;  %v3963_v44 = vsel %vm6354_vm2, %v3958_v0, %v3962_v57  ;;  %v5378_v26 = vld [vmem:[%s6335_s25 + $0xb4] sm:$0xe] }
 0x11b   : > { %v4351_v49 = vrot.slane %v6256_v33, 5  ;;  %v5345_v20 = vcombine.low %v3929_v16, %v3939_v29  ;;  %v5381_v3 = vrot.slane %v5365_v9, 9  ;;  %v5346_v11 = vcombine.low %v3953_v53, %v3963_v44  ;;  %v5367_v33 = vld [vmem:[%s6335_s25 + $0x30] sm:$0xe] }
 0x11c   : > { %5848 = vmatmul.mubr.msk.bf16.gmra.mrb[20].mxu0 %vm665_vm3, %v7601_v15  ;;  %v3981_v15 = vor.u32 %v3980_v55, %v7724_v34  ;;  %v7760_v5 = vsel %vm6576_vm6, %v4430_v31, %v4431_v52  ;;  %v3972_v10 = vrot.slane %v3971_v50, 4  ;;  %v4354_v55 = vrot.slane %v6257_v24, 5  ;;  %v5366_v52 = vld [vmem:[%s6335_s25 + $0x24] sm:$0xe]  ;;  %v6258_v50 = vld [vmem:[%s6335_s25 + $0x28] sm:$0xf] }
 0x11d   : > { %5696 = vmatmul.mubr.msk.bf16.gmra.mrb[4].mxu1 %vm665_vm3, %v6204_v6  ;;  %5851 = vmatprep.mubr.msk.bf16.mxu0 %vm665_vm3, %v5344_v22  ;;  %v3986_v22 = vrot.slane %v3984_v38, 5  ;;  %v5408_v27 = vcombine.low %v7749_v51, %v7760_v5  ;;  %v4353_v45 = vrot.slane %v4351_v49, 4  ;;  %v5393_v0 = vrot.slane %v5377_v14, 9  ;;  %v6259_v31 = vld [vmem:[%s6335_s25 + $0x34] sm:$0xf] }
 0x11e   : > { %5699 = vmatprep.mubr.msk.bf16.mxu1 %vm665_vm3, %v6205_v13  ;;  %v3982_v6 = vrot.slane %v3981_v15, 4  ;;  %v6207_v13 = vld [vmem:[%s6335_s25 + $0x54] sm:$0xff]   ;;  %v4435_v57 = vrot.slane %v7463_v4, 5  ;;  %v4438_v17 = vrot.slane %v7506_v59, 5  ;;  %v3977_v4 = vsel %vm6354_vm2, %v3972_v10, %v7724_v34  ;;  %v6208_v10 = vld [vmem:[%s6335_s25 + $0x60] sm:$0xff]  }
 0x11f   : > { %v4352_v38 = vsel %vm6576_vm6, %v5381_v3, %v4351_v49  ;;  %v4358_v15 = vrot.slane %v6258_v50, 5  ;;  %v4355_v9 = vsel %vm6576_vm6, %v4353_v45, %v4354_v55  ;;  %v4365_v53 = vrot.slane %v6259_v31, 5  ;;  %v6260_v3 = vld [vmem:[%s6335_s25 + $0x2c] sm:$0x1]  ;;  %v6275_v51 = vld [vmem:[%s6335_s25 + $0xc8] sm:$0x1] }
 0x120   : > { %v7774_v16 = vsel %vm6576_vm6, %v5393_v0, %v4435_v57  ;;  %v4437_v29 = vrot.slane %v4435_v57, 4  ;;  %v3987_v59 = vsel %vm6354_vm2, %v3982_v6, %v3986_v22  ;;  %v5394_v44 = vrot.slane %v5378_v26, 9  ;;  %v6209_v45 = vld [vmem:[%s6335_s25 + $0x6c] sm:$0xff]   ;;  %v5379_v26 = vld [vmem:[%s6335_s25 + $0xc0] sm:$0xe] }
 0x121   : > { %v4442_v14 = vrot.slane %v7556_v35, 5  ;;  %v5382_v22 = vrot.slane %v5366_v52, 9  ;;  %v5397_v6 = vcombine.low %v4352_v38, %v4355_v9  ;;  %v4360_v24 = vrot.slane %v4358_v15, 4  ;;  %v6261_v35 = vld [vmem:[%s6335_s25 + $0x38] sm:$0x1] }
 0x122   : > { %v7793_v34 = vsel %vm6576_vm6, %v4437_v29, %v4438_v17  ;;  %v5383_v0 = vrot.slane %v5367_v33, 9  ;;  %v4367_v57 = vrot.slane %v4365_v53, 4  ;;  %v4368_v17 = vrot.slane %v6261_v35, 5  ;;  %v8170_v38 = vld [vmem:[#allocation5_spill] sm:$0xff] }
 0x123   : > { %v5409_v49 = vcombine.low %v7774_v16, %v7793_v34  ;;  %v7804_v55 = vsel %vm6576_vm6, %v5394_v44, %v4442_v14  ;;  %v4372_v52 = vrot.slane %v8170_v38, 5  ;;  %v5395_v50 = vrot.slane %v5379_v26, 9  ;;  %v5368_v44 = vld [vmem:[%s6335_s25 + $0x3c] sm:$0xe]  ;;  %v6262_v38 = vld [vmem:[%s6335_s25 + $0x70] sm:$0xf] }
 0x124   : > { %5852 = vmatmul.mubr.msk.bf16.gmra.mrb[24].mxu0 %vm665_vm3, %v5345_v20  ;;  %v5347_v20 = vcombine.low %v3977_v4, %v3987_v59  ;;  %v4359_v4 = vsel %vm6576_vm6, %v5382_v22, %v4358_v15  ;;  %v4366_v9 = vsel %vm6576_vm6, %v5383_v0, %v4365_v53  ;;  %v4369_v31 = vsel %vm6576_vm6, %v4367_v57, %v4368_v17  ;;  %v5097_v22 = vld [vmem:[%s6335_s25 + $0x6c] sm:$0xf] }
 0x125   : > { %5700 = vmatmul.mubr.msk.bf16.gmra.mrb[8].mxu1 %vm665_vm3, %v6206_v60  ;;  %5855 = vmatprep.mubr.msk.bf16.mxu0 %vm665_vm3, %v5346_v11  ;;  %v4361_v60 = vrot.slane %v6260_v3, 5  ;;  %v4445_v11 = vrot.slane %v7634_v30, 5  ;;  %v4449_v33 = vrot.slane %v7618_v39, 5  ;;  %v4452_v15 = vrot.slane %v7689_v18, 5 }
 0x126   : > { %5703 = vmatprep.mubr.msk.bf16.mxu1 %vm665_vm3, %v6207_v13  ;;  %v4444_v13 = vrot.slane %v4442_v14, 4  ;;  %v5380_v14 = vld [vmem:[%s6335_s25 + $0xcc] sm:$0xe]  ;;  %v4374_v53 = vrot.slane %v4372_v52, 4  ;;  %v2233_v0 = vshrl.u32 %v5097_v22, 16  ;;  %v2236_v57 = vshll.u32 %v5097_v22, 16 }
 0x127   : > { %v4362_v59 = vsel %vm6576_vm6, %v4360_v24, %v4361_v60  ;;  %v7835_v3 = vsel %vm6576_vm6, %v5395_v50, %v4449_v33  ;;  %v4451_v60 = vrot.slane %v4449_v33, 4  ;;  %v8171_v24 = vld [vmem:[#allocation6_spill] sm:$0xff]  ;;  %v5396_v18 = vrot.slane %v5380_v14, 9 }
 0x128   : > { %v7811_v29 = vsel %vm6576_vm6, %v4444_v13, %v4445_v11  ;;  %v6210_v11 = vld [vmem:[%s6335_s25 + $0x78] sm:$0xff]   ;;  %v4375_v13 = vrot.slane %v8171_v24, 5  ;;  %v4456_v17 = vrot.slane %v7677_v7, 5  ;;  %v4459_v26 = vrot.slane %v7722_v21, 5 }
 0x129   : > { %v5410_v30 = vcombine.low %v7804_v55, %v7811_v29  ;;  %v7842_v39 = vsel %vm6576_vm6, %v4451_v60, %v4452_v15  ;;  %v2242_v50 = vshll.u32 %v6262_v38, 16  ;;  %v6212_v15 = vld [vmem:[%s6335_s25 + $0x90] sm:$0xff]   ;;  %v6213_v60 = vld [vmem:[%s6335_s25 + $0x9c] sm:$0xff]   ;;  %v2420_v5 = vshll.u32 %v6275_v51, 16 }
 0x12a   : > { %v5411_v35 = vcombine.low %v7835_v3, %v7842_v39  ;;  %v7859_v7 = vsel %vm6576_vm6, %v5396_v18, %v4456_v17  ;;  %v4458_v21 = vrot.slane %v4456_v17, 4  ;;  %v5106_v17 = vld [vmem:[%s6335_s25 + $0x90] sm:$0xf] }
 0x12b   : > { %v2244_v14 = vrot.slane %v2242_v50, 5 }
 0x12c   : > { %5856 = vmatmul.mubr.msk.bf16.gmra.mrb[28].mxu0 %vm665_vm3, %v5347_v20  ;;  %v5398_v20 = vcombine.low %v4359_v4, %v4362_v59  ;;  %v4376_v59 = vsel %vm6576_vm6, %v4374_v53, %v4375_v13 }
 0x12d   : > { %5704 = vmatmul.mubr.msk.bf16.gmra.mrb[12].mxu1 %vm665_vm3, %v6208_v10  ;;  %5861 = vmatprep.mubr.msk.bf16.mxu0 %vm665_vm3, %v5397_v6  ;;  %v5399_v10 = vcombine.low %v4366_v9, %v4369_v31  ;;  %v5384_v6 = vrot.slane %v5368_v44, 9  ;;  %v2246_v9 = vshrl.u32 %v6262_v38, 16  ;;  %v2235_v31 = vrot.slane %v2233_v0, 4  ;;  %v6215_v38 = vld [vmem:[%s6335_s25 + $0xb4] sm:$0xff]  }
 0x12e   : > { %5707 = vmatprep.mubr.msk.bf16.mxu1 %vm665_vm3, %v6209_v45  ;;  %v6211_v45 = vld [vmem:[%s6335_s25 + $0x84] sm:$0xff]   ;;  %v2238_v44 = vrot.slane %v2236_v57, 5 }
 0x12f   : > { %v4373_v4 = vsel %vm6576_vm6, %v5384_v6, %v4372_v52  ;;  %v7863_v52 = vsel %vm6576_vm6, %v4458_v21, %v4459_v26  ;;  %v6263_v6 = vld [vmem:[%s6335_s25 + $0x74] sm:$0x1]  ;;  %v6214_v26 = vld [vmem:[%s6335_s25 + $0xa8] sm:$0xff]   ;;  %v2305_v21 = vshrl.u32 %v5106_v17, 16 }
 0x130   : > { %v5400_v33 = vcombine.low %v4373_v4, %v4376_v59  ;;  %v5412_v22 = vcombine.low %v7859_v7, %v7863_v52  ;;  %v2252_v53 = vshll.u32 %v6263_v6, 16  ;;  %v5109_v59 = vld [vmem:[%s6335_s25 + $0x9c] sm:$0xf]  ;;  %v6267_v6 = vld [vmem:[%s6335_s25 + $0x8c] sm:$0x1] }
 0x132   : > { %v2254_v48 = vrot.slane %v2252_v53, 5  ;;  %v2300_v53 = vshll.u32 %v6267_v6, 16 }
 0x134   : > { %5862 = vmatmul.mubr.msk.bf16.vlgmr.msra.gmra.mrb[0].mxu0 %vm665_vm3, %v5398_v20  ;;  %v2248_v20 = vrot.slane %v2246_v9, 4 }
 0x135   : > { %5708 = vmatmul.mubr.msk.bf16.gmra.mrb[16].mxu1 %vm665_vm3, %v6210_v11  ;;  %5865 = vmatprep.mubr.msk.bf16.mxu0 %vm665_vm3, %v5399_v10  ;;  %v5103_v11 = vld [vmem:[%s6335_s25 + $0x84] sm:$0xf]  ;;  %v2239_v10 = vor.u32 %v2238_v44, %v2235_v31  ;;  %v2308_v31 = vshll.u32 %v5106_v17, 16 }
 0x136   : > { %5711 = vmatprep.mubr.msk.bf16.mxu1 %vm665_vm3, %v6211_v45  ;;  %v2249_v2 = vor.u32 %v2248_v20, %v2244_v14  ;;  %v2281_v24 = vshrl.u32 %v5103_v11, 16  ;;  %v2284_v13 = vshll.u32 %v5103_v11, 16  ;;  %v6264_v45 = vld [vmem:[%s6335_s25 + $0x88] sm:$0xf]  ;;  %v2332_v11 = vshll.u32 %v5109_v59, 16 }
 0x137   : > { %v2290_v18 = vshll.u32 %v6264_v45, 16  ;;  %v2294_v0 = vshrl.u32 %v6264_v45, 16  ;;  %v2240_v57 = vrot.slane %v2239_v10, 4  ;;  %v2338_v10 = vshll.u32 %v6266_v62, 16 }
 0x138   : > { %v2250_v4 = vrot.slane %v2249_v2, 4  ;;  %v2283_v47 = vrot.slane %v2281_v24, 4  ;;  %v2307_v24 = vrot.slane %v2305_v21, 4  ;;  %v2310_v32 = vrot.slane %v2308_v31, 5  ;;  %v6269_v31 = vld [vmem:[%s6335_s25 + $0xa4] sm:$0x1] }
 0x139   : > { %v7883_v50 = vrot.slane %v2290_v18, 5  ;;  %v2296_v9 = vrot.slane %v2294_v0, 4  ;;  %v2245_v44 = vsel %vm6354_vm2, %v2240_v57, %v2244_v14  ;;  %v2334_v45 = vrot.slane %v2332_v11, 5  ;;  %v6216_v18 = vld [vmem:[%s6335_s25 + $0xc0] sm:$0xff]  }
 0x13a   : > { %v2255_v14 = vsel %vm6354_vm2, %v2250_v4, %v2254_v48  ;;  %v7906_v17 = vrot.slane %v2338_v10, 5  ;;  %v5112_v4 = vld [vmem:[%s6335_s25 + $0xa8] sm:$0xf] }
 0x13b   : > { %v2297_v2 = vor.u32 %v2296_v9, %v7883_v50  ;;  %v5129_v0 = vcombine.low %v2245_v44, %v2255_v14  ;;  %v2348_v44 = vshll.u32 %v6269_v31, 16  ;;  %v2356_v25 = vshll.u32 %v5112_v4, 16 }
 0x13c   : > { %5866 = vmatmul.mubr.msk.bf16.gmra.mrb[4].mxu0 %vm665_vm3, %v5400_v33  ;;  %v6265_v33 = vld [vmem:[%s6335_s25 + $0x94] sm:$0xf] }
 0x13d   : > { %5712 = vmatmul.mubr.msk.bf16.gmra.mrb[20].mxu1 %vm665_vm3, %v6212_v15  ;;  %5869 = vmatprep.mubr.msk.bf16.mxu0 %vm665_vm3, %v5401_v42  ;;  %v2286_v42 = vrot.slane %v2284_v13, 5  ;;  %v2314_v15 = vshll.u32 %v6265_v33, 16  ;;  %v2318_v20 = vshrl.u32 %v6265_v33, 16  ;;  %v2298_v48 = vrot.slane %v2297_v2, 4 }
 0x13e   : > { %5715 = vmatprep.mubr.msk.bf16.mxu1 %vm665_vm3, %v6213_v60  ;;  %v2329_v60 = vshrl.u32 %v5109_v59, 16  ;;  %v6268_v59 = vld [vmem:[%s6335_s25 + $0x98] sm:$0x1]  ;;  %v2353_v33 = vshrl.u32 %v5112_v4, 16  ;;  %v5118_v4 = vld [vmem:[%s6335_s25 + $0xc0] sm:$0xf] }
 0x13f   : > { %v2287_v37 = vor.u32 %v2286_v42, %v2283_v47  ;;  %v7903_v41 = vrot.slane %v2314_v15, 5  ;;  %v2302_v47 = vrot.slane %v2300_v53, 5  ;;  %v2311_v42 = vor.u32 %v2310_v32, %v2307_v24  ;;  %v5115_v15 = vld [vmem:[%s6335_s25 + $0xb4] sm:$0xf] }
 0x140   : > { %v2331_v13 = vrot.slane %v2329_v60, 4  ;;  %v2366_v60 = vshrl.u32 %v6270_v19, 16  ;;  %v2377_v1 = vshrl.u32 %v5115_v15, 16  ;;  %v2380_v46 = vshll.u32 %v5115_v15, 16 }
 0x141   : > { %v2288_v57 = vrot.slane %v2287_v37, 4  ;;  %v2303_v14 = vsel %vm6354_vm2, %v2298_v48, %v2302_v47  ;;  %v2312_v37 = vrot.slane %v2311_v42, 4  ;;  %v2350_v53 = vrot.slane %v2348_v44, 5 }
 0x142   : > { %v2335_v21 = vor.u32 %v2334_v45, %v2331_v13  ;;  %v2355_v24 = vrot.slane %v2353_v33, 4  ;;  %v2368_v45 = vrot.slane %v2366_v60, 4  ;;  %v6274_v33 = vld [vmem:[%s6335_s25 + $0xbc] sm:$0x1] }
 0x143   : > { %v2293_v11 = vsel %vm6354_vm2, %v2288_v57, %v7883_v50  ;;  %v2317_v48 = vsel %vm6354_vm2, %v2312_v37, %v7903_v41  ;;  %v2396_v40 = vshll.u32 %v6274_v33, 16 }
 0x144   : > { %5870 = vmatmul.mubr.msk.bf16.gmra.mrb[8].mxu0 %vm665_vm3, %v5402_v56  ;;  %v2342_v56 = vshrl.u32 %v6266_v62, 16  ;;  %v2336_v6 = vrot.slane %v2335_v21, 4  ;;  %v5131_v50 = vcombine.low %v2293_v11, %v2303_v14 }
 0x145   : > { %5716 = vmatmul.mubr.msk.bf16.gmra.mrb[24].mxu1 %vm665_vm3, %v6214_v26  ;;  %5873 = vmatprep.mubr.msk.bf16.mxu0 %vm665_vm3, %v5403_v23  ;;  %v2320_v23 = vrot.slane %v2318_v20, 4 }
 0x146   : > { %5719 = vmatprep.mubr.msk.bf16.mxu1 %vm665_vm3, %v6215_v38  ;;  %v2344_v26 = vrot.slane %v2342_v56, 4  ;;  %v2324_v38 = vshll.u32 %v6268_v59, 16  ;;  %v2341_v42 = vsel %vm6354_vm2, %v2336_v6, %v7906_v17  ;;  %v2422_v6 = vrot.slane %v2420_v5, 5 }
 0x147   : > { %v2321_v9 = vor.u32 %v2320_v23, %v7903_v41  ;;  %v2358_v23 = vrot.slane %v2356_v25, 5  ;;  %v6272_v41 = vld [vmem:[%s6335_s25 + $0xb0] sm:$0x1] }
 0x148   : > { %v2345_v20 = vor.u32 %v2344_v26, %v7906_v17  ;;  %v2326_v62 = vrot.slane %v2324_v38, 5  ;;  %v2372_v59 = vshll.u32 %v6272_v41, 16  ;;  %v2401_v38 = vshrl.u32 %v5118_v4, 16 }
 0x149   : > { %v2322_v2 = vrot.slane %v2321_v9, 4  ;;  %v2359_v58 = vor.u32 %v2358_v23, %v2355_v24  ;;  %v2404_v17 = vshll.u32 %v5118_v4, 16  ;;  %v6273_v9 = vld [vmem:[%s6335_s25 + $0xc4] sm:$0xf] }
 0x14a   : > { %v2346_v32 = vrot.slane %v2345_v20, 4  ;;  %v2410_v21 = vshll.u32 %v6273_v9, 16  ;;  %v2414_v31 = vshrl.u32 %v6273_v9, 16  ;;  %v2374_v25 = vrot.slane %v2372_v59, 5 }
 0x14b   : > { %v2327_v47 = vsel %vm6354_vm2, %v2322_v2, %v2326_v62  ;;  %v2360_v15 = vrot.slane %v2359_v58, 4  ;;  %v2398_v62 = vrot.slane %v2396_v40, 5 }
 0x14c   : > { %5874 = vmatmul.mubr.msk.bf16.gmra.mrb[12].mxu0 %vm665_vm3, %v5404_v36  ;;  %v2362_v36 = vshll.u32 %v6270_v19, 16  ;;  %v2351_v54 = vsel %vm6354_vm2, %v2346_v32, %v2350_v53  ;;  %v5132_v63 = vcombine.low %v2317_v48, %v2327_v47  ;;  %v2403_v19 = vrot.slane %v2401_v38, 4 }
 0x14d   : > { %5720 = vmatmul.mubr.msk.bf16.gmra.mrb[28].mxu1 %vm665_vm3, %v6216_v18  ;;  %5877 = vmatprep.mubr.msk.bf16.mxu0 %vm665_vm3, %v5405_v43  ;;  %v6271_v43 = vld [vmem:[%s6335_s25 + $0xb8] sm:$0xf]  ;;  %v2379_v18 = vrot.slane %v2377_v1, 4  ;;  %v2412_v60 = vrot.slane %v2410_v21, 5  ;;  %v2416_v11 = vrot.slane %v2414_v31, 4 }
 0x14e   : > { %5741 = vmatprep.mubr.msk.bf16.mxu1 %vm665_vm3, %v5129_v0  ;;  %v2386_v10 = vshll.u32 %v6271_v43, 16  ;;  %v2390_v56 = vshrl.u32 %v6271_v43, 16  ;;  %v2364_v13 = vrot.slane %v2362_v36, 5  ;;  %v2382_v0 = vrot.slane %v2380_v46, 5 }
 0x14f   : > { %v2406_v36 = vrot.slane %v2404_v17, 5 }
 0x150   : > { %v2388_v57 = vrot.slane %v2386_v10, 5  ;;  %v2392_v26 = vrot.slane %v2390_v56, 4  ;;  %v2365_v1 = vsel %vm6354_vm2, %v2360_v15, %v2364_v13  ;;  %v2417_v10 = vor.u32 %v2416_v11, %v2412_v60 }
 0x151   : > { %v2407_v43 = vor.u32 %v2406_v36, %v2403_v19 }
 0x152   : > { %v2393_v44 = vor.u32 %v2392_v26, %v2388_v57  ;;  %v2418_v2 = vrot.slane %v2417_v10, 4  ;;  %v7998_v26 = vld [vmem:[%s8106_s2] ss:$0 sm:$0xff] }
 0x153   : > { %v2408_v56 = vrot.slane %v2407_v43, 4 }
 0x154   : > { %5878 = vmatmul.mubr.msk.bf16.gmra.mrb[16].mxu0 %vm665_vm3, %v5406_v61  ;;  %v2369_v61 = vor.u32 %v2368_v45, %v2364_v13  ;;  %v2394_v37 = vrot.slane %v2393_v44, 4  ;;  %v2423_v24 = vsel %vm6354_vm2, %v2418_v2, %v2422_v6 }
 0x155   : > { %5742 = vmatmul.mubr.msk.bf16.vlgmr.msra.gmra.mrb[16].mxu1 %vm665_vm3, %v7712_v8  ;;  %5881 = vmatprep.mubr.msk.bf16.mxu0 %vm665_vm3, %v5407_v12  ;;  %v2383_v8 = vor.u32 %v2382_v0, %v2379_v18  ;;  %v5133_v12 = vcombine.low %v2341_v42, %v2351_v54  ;;  %v2413_v53 = vsel %vm6354_vm2, %v2408_v56, %v2412_v60 }
 0x156   : > { %5745 = vmatprep.mubr.msk.bf16.mxu1 %vm665_vm3, %v5131_v50  ;;  %v2370_v20 = vrot.slane %v2369_v61, 4  ;;  %v2399_v16 = vsel %vm6354_vm2, %v2394_v37, %v2398_v62  ;;  %v5136_v32 = vcombine.low %v2413_v53, %v2423_v24 }
 0x157   : > { %v2384_v14 = vrot.slane %v2383_v8, 4 }
 0x158   : > { %v2375_v46 = vsel %vm6354_vm2, %v2370_v20, %v2374_v25 }
 0x159   : > { %v5134_v34 = vcombine.low %v2365_v1, %v2375_v46 }
 0x15c   : > { %5882 = vmatmul.mubr.msk.bf16.gmra.mrb[20].mxu0 %vm665_vm3, %v5408_v27  ;;  %v2389_v27 = vsel %vm6354_vm2, %v2384_v14, %v2388_v57 }
 0x15d   : > { %5746 = vmatmul.mubr.msk.bf16.gmra.mrb[20].mxu1 %vm665_vm3, %v5132_v63  ;;  %5885 = vmatprep.mubr.msk.bf16.mxu0 %vm665_vm3, %v5409_v49  ;;  %v5135_v49 = vcombine.low %v2389_v27, %v2399_v16 }
 0x15e   : > { %5749 = vmatprep.mubr.msk.bf16.mxu1 %vm665_vm3, %v5133_v12 }
 0x164   : > { %5886 = vmatmul.mubr.msk.bf16.gmra.mrb[24].mxu0 %vm665_vm3, %v5410_v30 }
 0x165   : > { %5750 = vmatmul.mubr.msk.bf16.gmra.mrb[24].mxu1 %vm665_vm3, %v5134_v34  ;;  %5889 = vmatprep.mubr.msk.bf16.mxu0 %vm665_vm3, %v5411_v35 }
 0x166   : > { %5753 = vmatprep.mubr.msk.bf16.mxu1 %vm665_vm3, %v5135_v49 }
 0x16c   : > { %5890 = vmatmul.mubr.msk.bf16.gmra.mrb[28].mxu0 %vm665_vm3, %v5412_v22 }
 0x16d   : > { %5754 = vmatmul.mubr.msk.bf16.gmra.mrb[28].mxu1 %vm665_vm3, %v5136_v32 }
 0x1e8   : > { %v5693_v55 = vpop.f32.mrb[0].mxu1 }
 0x1e9   : > { %v1833_v29 = vpop.f32.mrb[1].mxu1 }
 0x1ea   : > { %v5694_v30 = vpop.f32.mrb[2].mxu1 }
 0x1eb   : > { %v1836_v3 = vpop.f32.mrb[3].mxu1 }
 0x1f0   : > { %v5697_v39 = vpop.f32.mrb[4].mxu1 }
 0x1f1   : > { %v1849_v35 = vpop.f32.mrb[5].mxu1 }
 0x1f2   : > { %v5698_v23 = vpop.f32.mrb[6].mxu1 }
 0x1f3   : > { %v1852_v13 = vpop.f32.mrb[7].mxu1 }
 0x1f8   : > { %v5701_v45 = vpop.f32.mrb[8].mxu1 }
 0x1f9   : > { %v1865_v28 = vpop.f32.mrb[9].mxu1 }
 0x1fa   : > { %v5702_v50 = vpop.f32.mrb[10].mxu1 }
 0x1fb   : > { %v1868_v18 = vpop.f32.mrb[11].mxu1 }
 0x200   : > { %v5705_v0 = vpop.f32.mrb[12].mxu1 }
 0x201   : > { %v1881_v57 = vpop.f32.mrb[13].mxu1 }
 0x202   : > { %v5706_v7 = vpop.f32.mrb[14].mxu1 }
 0x203   : > { %v1884_v52 = vpop.f32.mrb[15].mxu1 }
 0x207   : > { %v5863_v22 = vpop.f32.mrb[0].mxu0 }
 0x208   : > { %v5895_v4 = vadd.f32 %v5863_v22, %v5693_v55  ;;  %v4599_v48 = vpop.f32.mrb[1].mxu0 }
 0x209   : > { %v5896_v47 = vadd.f32 %v4599_v48, %v1833_v29  ;;  %v5864_v42 = vpop.f32.mrb[2].mxu0 }
 0x20a   : > { %v4767_v54 = vadd.f32 %v5895_v4, %v7998_v26  ;;  %v5897_v58 = vadd.f32 %v5864_v42, %v5694_v30  ;;  %v4602_v61 = vpop.f32.mrb[3].mxu0 }
 0x20b   : > { %v4765_v41 = vadd.f32 %v5896_v47, %v7998_v26  ;;  %v5898_v59 = vadd.f32 %v4602_v61, %v1836_v3 }
 0x20c   : > { %4800 = vst.msk [vmem:[%s8003_s20 + $0x10] sm:$0xff] %vm4797_vm7, %v4767_v54  ;;  %v4768_v38 = vadd.f32 %v5897_v58, %v7998_v26 }
 0x20d   : > { %4798 = vst.msk [vmem:[%s8003_s20] sm:$0xff] %vm4797_vm7, %v4765_v41  ;;  %v4766_v17 = vadd.f32 %v5898_v59, %v7998_v26 }
 0x20e   : > { %4801 = vst.msk [vmem:[%s8003_s20 + $0x18] sm:$0xff] %vm4797_vm7, %v4768_v38 }
 0x20f   : > { %4799 = vst.msk [vmem:[%s8003_s20 + $0x8] sm:$0xff] %vm4797_vm7, %v4766_v17  ;;  %v5867_v9 = vpop.f32.mrb[4].mxu0 }
 0x210   : > { %v5899_v21 = vadd.f32 %v5867_v9, %v5697_v39  ;;  %v4615_v31 = vpop.f32.mrb[5].mxu0 }
 0x211   : > { %v5900_v8 = vadd.f32 %v4615_v31, %v1849_v35  ;;  %v5868_v44 = vpop.f32.mrb[6].mxu0 }
 0x212   : > { %v4771_v33 = vadd.f32 %v5899_v21, %v7998_v26  ;;  %v5901_v40 = vadd.f32 %v5868_v44, %v5698_v23  ;;  %v4618_v63 = vpop.f32.mrb[7].mxu0 }
 0x213   : > { %v4769_v12 = vadd.f32 %v5900_v8, %v7998_v26  ;;  %v5902_v15 = vadd.f32 %v4618_v63, %v1852_v13 }
 0x214   : > { %4804 = vst.msk [vmem:[%s8003_s20 + $0x30] sm:$0xff] %vm4797_vm7, %v4771_v33  ;;  %v4772_v20 = vadd.f32 %v5901_v40, %v7998_v26 }
 0x215   : > { %4802 = vst.msk [vmem:[%s8003_s20 + $0x20] sm:$0xff] %vm4797_vm7, %v4769_v12  ;;  %v4770_v25 = vadd.f32 %v5902_v15, %v7998_v26 }
 0x216   : > { %4805 = vst.msk [vmem:[%s8003_s20 + $0x38] sm:$0xff] %vm4797_vm7, %v4772_v20 }
 0x217   : > { %4803 = vst.msk [vmem:[%s8003_s20 + $0x28] sm:$0xff] %vm4797_vm7, %v4770_v25  ;;  %v5871_v19 = vpop.f32.mrb[8].mxu0 }
 0x218   : > { %v5903_v36 = vadd.f32 %v5871_v19, %v5701_v45  ;;  %v4631_v60 = vpop.f32.mrb[9].mxu0 }
 0x219   : > { %v5904_v11 = vadd.f32 %v4631_v60, %v1865_v28  ;;  %v5872_v14 = vpop.f32.mrb[10].mxu0 }
 0x21a   : > { %v4775_v37 = vadd.f32 %v5903_v36, %v7998_v26  ;;  %v5905_v62 = vadd.f32 %v5872_v14, %v5702_v50  ;;  %v4634_v1 = vpop.f32.mrb[11].mxu0 }
 0x21b   : > { %v4773_v46 = vadd.f32 %v5904_v11, %v7998_v26  ;;  %v5906_v43 = vadd.f32 %v4634_v1, %v1868_v18 }
 0x21c   : > { %4808 = vst.msk [vmem:[%s8003_s20 + $0x50] sm:$0xff] %vm4797_vm7, %v4775_v37  ;;  %v4776_v10 = vadd.f32 %v5905_v62, %v7998_v26 }
 0x21d   : > { %4806 = vst.msk [vmem:[%s8003_s20 + $0x40] sm:$0xff] %vm4797_vm7, %v4773_v46  ;;  %v4774_v51 = vadd.f32 %v5906_v43, %v7998_v26 }
 0x21e   : > { %4809 = vst.msk [vmem:[%s8003_s20 + $0x58] sm:$0xff] %vm4797_vm7, %v4776_v10 }
 0x21f   : > { %4807 = vst.msk [vmem:[%s8003_s20 + $0x48] sm:$0xff] %vm4797_vm7, %v4774_v51  ;;  %v5875_v5 = vpop.f32.mrb[12].mxu0 }
 0x220   : > { %v5907_v27 = vadd.f32 %v5875_v5, %v5705_v0  ;;  %v4647_v16 = vpop.f32.mrb[13].mxu0 }
 0x221   : > { %v5908_v34 = vadd.f32 %v4647_v16, %v1881_v57  ;;  %v5876_v49 = vpop.f32.mrb[14].mxu0 }
 0x222   : > { %v4779_v56 = vadd.f32 %v5907_v27, %v7998_v26  ;;  %v5909_v2 = vadd.f32 %v5876_v49, %v5706_v7  ;;  %v4650_v6 = vpop.f32.mrb[15].mxu0 }
 0x223   : > { %v4777_v53 = vadd.f32 %v5908_v34, %v7998_v26  ;;  %v5910_v24 = vadd.f32 %v4650_v6, %v1884_v52 }
 0x224   : > { %4812 = vst.msk [vmem:[%s8003_s20 + $0x70] sm:$0xff] %vm4797_vm7, %v4779_v56  ;;  %v4780_v32 = vadd.f32 %v5909_v2, %v7998_v26 }
 0x225   : > { %4810 = vst.msk [vmem:[%s8003_s20 + $0x60] sm:$0xff] %vm4797_vm7, %v4777_v53  ;;  %v4778_v55 = vadd.f32 %v5910_v24, %v7998_v26 }
 0x226   : > { %4813 = vst.msk [vmem:[%s8003_s20 + $0x78] sm:$0xff] %vm4797_vm7, %v4780_v32 }
 0x227   : > { %4811 = vst.msk [vmem:[%s8003_s20 + $0x68] sm:$0xff] %vm4797_vm7, %v4778_v55  ;;  %v5879_v29 = vpop.f32.mrb[16].mxu0 }
 0x228   : > { %v5743_v30 = vpop.f32.mrb[16].mxu1  ;;  %v4663_v3 = vpop.f32.mrb[17].mxu0 }
 0x229   : > { %v5911_v39 = vadd.f32 %v5879_v29, %v5743_v30  ;;  %v2626_v35 = vpop.f32.mrb[17].mxu1  ;;  %v5880_v23 = vpop.f32.mrb[18].mxu0 }
 0x22a   : > { %v5912_v13 = vadd.f32 %v4663_v3, %v2626_v35  ;;  %v5744_v45 = vpop.f32.mrb[18].mxu1  ;;  %v4666_v28 = vpop.f32.mrb[19].mxu0 }
 0x22b   : > { %v4783_v50 = vadd.f32 %v5911_v39, %v7998_v26  ;;  %v5913_v18 = vadd.f32 %v5880_v23, %v5744_v45  ;;  %v2629_v0 = vpop.f32.mrb[19].mxu1 }
 0x22c   : > { %v4781_v57 = vadd.f32 %v5912_v13, %v7998_v26  ;;  %v5914_v7 = vadd.f32 %v4666_v28, %v2629_v0 }
 0x22d   : > { %4816 = vst.msk [vmem:[%s8003_s20 + $0x90] sm:$0xff] %vm4797_vm7, %v4783_v50  ;;  %v4784_v52 = vadd.f32 %v5913_v18, %v7998_v26 }
 0x22e   : > { %4814 = vst.msk [vmem:[%s8003_s20 + $0x80] sm:$0xff] %vm4797_vm7, %v4781_v57  ;;  %v4782_v22 = vadd.f32 %v5914_v7, %v7998_v26 }
 0x22f   : > { %4817 = vst.msk [vmem:[%s8003_s20 + $0x98] sm:$0xff] %vm4797_vm7, %v4784_v52  ;;  %v5883_v4 = vpop.f32.mrb[20].mxu0 }
 0x230   : > { %4815 = vst.msk [vmem:[%s8003_s20 + $0x88] sm:$0xff] %vm4797_vm7, %v4782_v22  ;;  %v5747_v48 = vpop.f32.mrb[20].mxu1  ;;  %v4679_v47 = vpop.f32.mrb[21].mxu0 }
 0x231   : > { %v5915_v42 = vadd.f32 %v5883_v4, %v5747_v48  ;;  %v2642_v54 = vpop.f32.mrb[21].mxu1  ;;  %v5884_v58 = vpop.f32.mrb[22].mxu0 }
 0x232   : > { %v5916_v61 = vadd.f32 %v4679_v47, %v2642_v54  ;;  %v5748_v41 = vpop.f32.mrb[22].mxu1  ;;  %v4682_v59 = vpop.f32.mrb[23].mxu0 }
 0x233   : > { %v4787_v38 = vadd.f32 %v5915_v42, %v7998_v26  ;;  %v5917_v17 = vadd.f32 %v5884_v58, %v5748_v41  ;;  %v2645_v9 = vpop.f32.mrb[23].mxu1 }
 0x234   : > { %v4785_v21 = vadd.f32 %v5916_v61, %v7998_v26  ;;  %v5918_v31 = vadd.f32 %v4682_v59, %v2645_v9 }
 0x235   : > { %4820 = vst.msk [vmem:[%s8003_s20 + $0xb0] sm:$0xff] %vm4797_vm7, %v4787_v38  ;;  %v4788_v8 = vadd.f32 %v5917_v17, %v7998_v26 }
 0x236   : > { %4818 = vst.msk [vmem:[%s8003_s20 + $0xa0] sm:$0xff] %vm4797_vm7, %v4785_v21  ;;  %v4786_v44 = vadd.f32 %v5918_v31, %v7998_v26 }
 0x237   : > { %4821 = vst.msk [vmem:[%s8003_s20 + $0xb8] sm:$0xff] %vm4797_vm7, %v4788_v8  ;;  %v5887_v33 = vpop.f32.mrb[24].mxu0 }
 0x238   : > { %4819 = vst.msk [vmem:[%s8003_s20 + $0xa8] sm:$0xff] %vm4797_vm7, %v4786_v44  ;;  %v5751_v40 = vpop.f32.mrb[24].mxu1  ;;  %v4695_v63 = vpop.f32.mrb[25].mxu0 }
 0x239   : > { %v5919_v12 = vadd.f32 %v5887_v33, %v5751_v40  ;;  %v2658_v15 = vpop.f32.mrb[25].mxu1  ;;  %v5888_v20 = vpop.f32.mrb[26].mxu0 }
 0x23a   : > { %v5920_v25 = vadd.f32 %v4695_v63, %v2658_v15  ;;  %v5752_v19 = vpop.f32.mrb[26].mxu1  ;;  %v4698_v36 = vpop.f32.mrb[27].mxu0 }
 0x23b   : > { %v4791_v60 = vadd.f32 %v5919_v12, %v7998_v26  ;;  %v5921_v11 = vadd.f32 %v5888_v20, %v5752_v19  ;;  %v2661_v14 = vpop.f32.mrb[27].mxu1 }
 0x23c   : > { %v4789_v37 = vadd.f32 %v5920_v25, %v7998_v26  ;;  %v5922_v62 = vadd.f32 %v4698_v36, %v2661_v14 }
 0x23d   : > { %4824 = vst.msk [vmem:[%s8003_s20 + $0xd0] sm:$0xff] %vm4797_vm7, %v4791_v60  ;;  %v4792_v1 = vadd.f32 %v5921_v11, %v7998_v26 }
 0x23e   : > { %4822 = vst.msk [vmem:[%s8003_s20 + $0xc0] sm:$0xff] %vm4797_vm7, %v4789_v37  ;;  %v4790_v46 = vadd.f32 %v5922_v62, %v7998_v26 }
 0x23f   : > { %4825 = vst.msk [vmem:[%s8003_s20 + $0xd8] sm:$0xff] %vm4797_vm7, %v4792_v1  ;;  %v5891_v43 = vpop.f32.mrb[28].mxu0 }
 0x240   : > { %4823 = vst.msk [vmem:[%s8003_s20 + $0xc8] sm:$0xff] %vm4797_vm7, %v4790_v46  ;;  %v5755_v10 = vpop.f32.mrb[28].mxu1  ;;  %v4711_v51 = vpop.f32.mrb[29].mxu0 }
 0x241   : > { %v5923_v5 = vadd.f32 %v5891_v43, %v5755_v10  ;;  %v2674_v27 = vpop.f32.mrb[29].mxu1  ;;  %v5892_v16 = vpop.f32.mrb[30].mxu0 }
 0x242   : > { %v5924_v34 = vadd.f32 %v4711_v51, %v2674_v27  ;;  %v5756_v49 = vpop.f32.mrb[30].mxu1  ;;  %v4714_v56 = vpop.f32.mrb[31].mxu0 }
 0x243   : > { %v4795_v2 = vadd.f32 %v5923_v5, %v7998_v26  ;;  %v5925_v6 = vadd.f32 %v5892_v16, %v5756_v49  ;;  %v2677_v53 = vpop.f32.mrb[31].mxu1 }
 0x244   : > { %v4793_v24 = vadd.f32 %v5924_v34, %v7998_v26  ;;  %v5926_v32 = vadd.f32 %v4714_v56, %v2677_v53 }
 0x245   : > { %4828 = vst.msk [vmem:[%s8003_s20 + $0xf0] sm:$0xff] %vm4797_vm7, %v4795_v2  ;;  %v4796_v55 = vadd.f32 %v5925_v6, %v7998_v26 }
 0x246   : > { %4826 = vst.msk [vmem:[%s8003_s20 + $0xe0] sm:$0xff] %vm4797_vm7, %v4793_v24  ;;  %v4794_v29 = vadd.f32 %v5926_v32, %v7998_v26 }
 0x247   : > { %4829 = vst.msk [vmem:[%s8003_s20 + $0xf8] sm:$0xff] %vm4797_vm7, %v4796_v55 }
 0x248   : > { %4827 = vst.msk [vmem:[%s8003_s20 + $0xe8] sm:$0xff] %vm4797_vm7, %v4794_v29 }
 0x249 PF: > { %s13_s12 = sadd.s32 1, %s6282_s12  }
 0x24a   : > { %p10_p4 = scmp.ge.s32.totalorder %s13_s12, 4  }
 0x24c   :  { %12 = sbr.rel (!%p10_p4) target bundleno = 1 (0x1), region = 64 }

</bundles_post_ra>
